<compile_context>
chip_gen: v5e
topology: v5e:2x2
jax: 0.10.0
libtpu: 0.0.40
codegen_flags: <defaults>
</compile_context>

<pallas_src>
import functools
import math

import jax
import jax.numpy as jnp
from jax import lax
from jax.experimental import pallas as pl
from jax.experimental.pallas import tpu as pltpu


# ----------------------------- small helpers -------------------------------
def _round_up(x, m):
    return ((x + m - 1) // m) * m


def _sigmoid(x):
    return 1.0 / (1.0 + jnp.exp(-x))


def _softplus(x):
    # numerically-stable softplus from elementwise primitives (EUP/VPU)
    return jnp.maximum(x, 0.0) + jnp.log(1.0 + jnp.exp(-jnp.abs(x)))


# ----------------------------- linear kernels -------------------------------
def _linear_kernel(x_ref, w_ref, o_ref):
    o_ref[...] = jnp.dot(x_ref[...], w_ref[...],
                         preferred_element_type=jnp.float32).astype(o_ref.dtype)


def _linear_bias_kernel(x_ref, w_ref, b_ref, o_ref):
    acc = jnp.dot(x_ref[...], w_ref[...], preferred_element_type=jnp.float32)
    o_ref[...] = (acc + b_ref[...]).astype(o_ref.dtype)


def linear(x, w, b=None, *, block_m=256):
    """x: (M, K) -> (M, N).  bf16 MXU operands, f32 accumulate / output.

    M is tiled into `block_m`-row blocks on a "parallel" grid axis so the
    HBM<->VMEM DMAs double-buffer against the MXU.  K/N are small in this
    model, so K stays a single block (no reduction axis / accumulator needed;
    add one with a VMEM f32 accumulator + pl.when init/finalize if K grows).
    """
    M, K = x.shape
    N = w.shape[1]
    bm = min(block_m, _round_up(M, 8))
    Mp = _round_up(M, bm)
    xp = x if Mp == M else jnp.pad(x, ((0, Mp - M), (0, 0)))
    xp = xp.astype(jnp.bfloat16)
    wb = w.astype(jnp.bfloat16)
    grid = (Mp // bm,)

    if b is None:
        out = pl.pallas_call(
            _linear_kernel,
            out_shape=jax.ShapeDtypeStruct((Mp, N), jnp.float32),
            grid=grid,
            in_specs=[pl.BlockSpec((bm, K), lambda i: (i, 0)),
                      pl.BlockSpec((K, N), lambda i: (0, 0))],
            out_specs=pl.BlockSpec((bm, N), lambda i: (i, 0)),
            compiler_params=pltpu.CompilerParams(
                dimension_semantics=("parallel",)),
        )(xp, wb)
    else:
        b2 = b.reshape(1, N).astype(jnp.float32)
        out = pl.pallas_call(
            _linear_bias_kernel,
            out_shape=jax.ShapeDtypeStruct((Mp, N), jnp.float32),
            grid=grid,
            in_specs=[pl.BlockSpec((bm, K), lambda i: (i, 0)),
                      pl.BlockSpec((K, N), lambda i: (0, 0)),
                      pl.BlockSpec((1, N), lambda i: (0, 0))],
            out_specs=pl.BlockSpec((bm, N), lambda i: (i, 0)),
            compiler_params=pltpu.CompilerParams(
                dimension_semantics=("parallel",)),
        )(xp, wb, b2)
    return out[:M] if Mp != M else out


# ---------------------------- layernorm kernel ------------------------------
def _layernorm_kernel(x_ref, g_ref, b_ref, o_ref, *, eps):
    x = x_ref[...].astype(jnp.float32)
    mean = jnp.mean(x, axis=-1, keepdims=True)
    xc = x - mean
    var = jnp.mean(xc * xc, axis=-1, keepdims=True)
    inv = lax.rsqrt(var + eps)
    o_ref[...] = (xc * inv * g_ref[...] + b_ref[...]).astype(o_ref.dtype)


def layernorm(x, g, b, eps, *, block_m=256):
    """Tiled LayerNorm over the flattened token axis (parallel grid)."""
    shp = x.shape
    D = shp[-1]
    x2 = x.reshape(-1, D).astype(jnp.float32)
    M = x2.shape[0]
    bm = min(block_m, _round_up(M, 8))
    Mp = _round_up(M, bm)
    if Mp != M:
        x2 = jnp.pad(x2, ((0, Mp - M), (0, 0)))
    out = pl.pallas_call(
        functools.partial(_layernorm_kernel, eps=eps),
        out_shape=jax.ShapeDtypeStruct((Mp, D), jnp.float32),
        grid=(Mp // bm,),
        in_specs=[pl.BlockSpec((bm, D), lambda i: (i, 0)),
                  pl.BlockSpec((1, D), lambda i: (0, 0)),
                  pl.BlockSpec((1, D), lambda i: (0, 0))],
        out_specs=pl.BlockSpec((bm, D), lambda i: (i, 0)),
        compiler_params=pltpu.CompilerParams(
            dimension_semantics=("parallel",)),
    )(x2, g.reshape(1, D).astype(jnp.float32),
      b.reshape(1, D).astype(jnp.float32))
    if Mp != M:
        out = out[:M]
    return out.reshape(shp)


# ------------------- causal depthwise conv1d + SiLU kernel ------------------
def _conv_silu_kernel(x_ref, w_ref, b_ref, o_ref, *, Kc):
    # Taps are realized with pltpu.roll (XLU slot) instead of misaligned
    # sublane-offset slices; wrapped rows are masked to zero (causal pad).
    x = x_ref[...].astype(jnp.float32)                       # (L, d_inner)
    row = lax.broadcasted_iota(jnp.int32, x.shape, 0)
    acc = x * w_ref[Kc - 1:Kc, :]                            # shift-0 tap
    for s in range(1, Kc):                                   # Kc = 4, static
        xs = pltpu.roll(x, s, axis=0)                        # row t <- x[t-s]
        xs = jnp.where(row >= s, xs, 0.0)
        acc = acc + xs * w_ref[Kc - 1 - s:Kc - s, :]
    acc = acc + b_ref[...]
    o_ref[...] = (acc * _sigmoid(acc)).astype(o_ref.dtype)


def conv1d_silu(x, w, b):
    """x: (B, L, d_inner); w: (Kc, d_inner) depthwise taps; b: (d_inner,)."""
    Bsz, L, di = x.shape
    Kc = w.shape[0]
    # TODO(synk): for long L, tile L with a (Kc-1)-row halo instead of one
    # full-L block per batch element.
    return pl.pallas_call(
        functools.partial(_conv_silu_kernel, Kc=Kc),
        out_shape=jax.ShapeDtypeStruct((Bsz, L, di), jnp.float32),
        grid=(Bsz,),
        in_specs=[pl.BlockSpec((None, L, di), lambda bb: (bb, 0, 0)),
                  pl.BlockSpec((Kc, di), lambda bb: (0, 0)),
                  pl.BlockSpec((1, di), lambda bb: (0, 0))],
        out_specs=pl.BlockSpec((None, L, di), lambda bb: (bb, 0, 0)),
        compiler_params=pltpu.CompilerParams(
            dimension_semantics=("parallel",)),
    )(x.astype(jnp.float32), w.astype(jnp.float32),
      b.reshape(1, di).astype(jnp.float32))


# ----------- fused x_proj + dt_proj + selective scan + gate + out_proj ------
def _mamba_scan_kernel(u_ref, z_ref, wdt_ref, wbt_ref, wct_ref, dtw_ref,
                       dtb_ref, A_ref, D_ref, ow_ref, o_ref,
                       h_ref, y_ref, *, T):
    # grid = (batch, time-chunk); h_ref carries the SSM state across chunks.
    @pl.when(pl.program_id(1) == 0)
    def _():
        h_ref[...] = jnp.zeros_like(h_ref)

    u = u_ref[...]                              # (T, d_inner) f32 (conv output)
    z = z_ref[...]                              # (T, d_inner) f32 (gate branch)
    u16 = u.astype(jnp.bfloat16)

    # ---- non-recurrent math, vectorized over the whole chunk (MXU/EUP) ----
    dt_low = jnp.dot(u16, wdt_ref[...], preferred_element_type=jnp.float32)
    dr = jnp.dot(dt_low.astype(jnp.bfloat16), dtw_ref[...],
                 preferred_element_type=jnp.float32) + dtb_ref[...]
    delta = _softplus(dr)                       # (T, d_inner)
    du = delta * u                              # (T, d_inner)
    # B(t), C(t) produced directly in state-major (d_state, T) layout so the
    # per-step column is a cheap static lane slice (no per-step MXU op).
    dn = (((1,), (1,)), ((), ()))               # contract both on d_inner
    BmT = lax.dot_general(wbt_ref[...], u16, dn,
                          preferred_element_type=jnp.float32)   # (d_state, T)
    CmT = lax.dot_general(wct_ref[...], u16, dn,
                          preferred_element_type=jnp.float32)   # (d_state, T)
    A = A_ref[...]                              # (d_state, d_inner), negative

    # ---- serial recurrence: critical path = one multiply-add per step -----
    # The exp / outer product / C-reduction have no dependence on h, so the
    # fully unrolled loop lets the scheduler overlap them (EUP/XLU slots).
    h = h_ref[...]                              # (d_state, d_inner)
    for t in range(T):                          # static unroll
        dA_t = jnp.exp(delta[t:t + 1, :] * A)                  # (ds, di)
        dBu_t = BmT[:, t:t + 1] * du[t:t + 1, :]               # VPU outer prod
        h = dA_t * h + dBu_t
        y_ref[t:t + 1, :] = jnp.sum(CmT[:, t:t + 1] * h, axis=0, keepdims=True)
    h_ref[...] = h

    # ---- vectorized epilogue: D-skip, SiLU(z) gate, fused out_proj ---------
    y = y_ref[...] + D_ref[...] * u
    y = y * (z * _sigmoid(z))
    o_ref[...] = jnp.dot(y.astype(jnp.bfloat16), ow_ref[...],
                         preferred_element_type=jnp.float32).astype(o_ref.dtype)


def mamba_scan(x_conv, z, p, d_model, *, chunk=16):
    """Fused Mamba tail.  x_conv, z: (B, L, d_inner) -> (B, L, d_model)."""
    Bsz, L, di = x_conv.shape
    ds_ = p["A_T"].shape[0]
    dt_rank = p["dt_w"].shape[0]
    T = min(chunk, _round_up(L, 8))
    Lp = _round_up(L, T)
    if Lp != L:                                 # pad tail tokens (discarded)
        pad = ((0, 0), (0, Lp - L), (0, 0))
        x_conv = jnp.pad(x_conv, pad)
        z = jnp.pad(z, pad)
    n_chunks = Lp // T

    # Split x_proj weight once (parameter-side, no activation round trips);
    # B/C pieces pre-transposed so the kernel can contract on d_inner (A@B^T).
    xproj_w = p["xproj_w"]
    wdt = xproj_w[:, :dt_rank].astype(jnp.bfloat16)                    # (di, dtr)
    wbt = xproj_w[:, dt_rank:dt_rank + ds_].T.astype(jnp.bfloat16)     # (ds, di)
    wct = xproj_w[:, dt_rank + ds_:].T.astype(jnp.bfloat16)            # (ds, di)

    out = pl.pallas_call(
        functools.partial(_mamba_scan_kernel, T=T),
        out_shape=jax.ShapeDtypeStruct((Bsz, Lp, d_model), jnp.float32),
        grid=(Bsz, n_chunks),
        in_specs=[
            pl.BlockSpec((None, T, di), lambda b, c: (b, c, 0)),   # u = conv(x)
            pl.BlockSpec((None, T, di), lambda b, c: (b, c, 0)),   # z gate
            pl.BlockSpec((di, dt_rank), lambda b, c: (0, 0)),      # x_proj -> dt
            pl.BlockSpec((ds_, di), lambda b, c: (0, 0)),          # x_proj -> B^T
            pl.BlockSpec((ds_, di), lambda b, c: (0, 0)),          # x_proj -> C^T
            pl.BlockSpec((dt_rank, di), lambda b, c: (0, 0)),      # dt_proj w
            pl.BlockSpec((1, di), lambda b, c: (0, 0)),            # dt_proj b
            pl.BlockSpec((ds_, di), lambda b, c: (0, 0)),          # A^T
            pl.BlockSpec((1, di), lambda b, c: (0, 0)),            # D
            pl.BlockSpec((di, d_model), lambda b, c: (0, 0)),      # out_proj w
        ],
        out_specs=pl.BlockSpec((None, T, d_model), lambda b, c: (b, c, 0)),
        scratch_shapes=[pltpu.VMEM((ds_, di), jnp.float32),        # h carry
                        pltpu.VMEM((T, di), jnp.float32)],         # y chunk buf
        compiler_params=pltpu.CompilerParams(
            dimension_semantics=("parallel", "arbitrary")),
    )(x_conv.astype(jnp.float32), z.astype(jnp.float32),
      wdt, wbt, wct,
      p["dt_w"].astype(jnp.bfloat16),
      p["dt_b"].reshape(1, di).astype(jnp.float32),
      p["A_T"].astype(jnp.float32),
      p["D"].reshape(1, di).astype(jnp.float32),
      p["out_w"].astype(jnp.bfloat16))
    return out[:, :L] if Lp != L else out


# ------------------------------ Mamba module ---------------------------------
def mamba_apply(x, p):
    """x: (B, L, d_model) -> (B, L, d_model).  Mamba (expand=2, d_conv=4)."""
    B, L, dm = x.shape
    d_inner = p["conv_w"].shape[1]

    xz = linear(x.reshape(B * L, dm), p["in_w"])            # no bias
    xs = xz[:, :d_inner].reshape(B, L, d_inner)
    z = xz[:, d_inner:].reshape(B, L, d_inner)

    x_conv = conv1d_silu(xs, p["conv_w"], p["conv_b"])      # (B, L, d_inner)
    return mamba_scan(x_conv, z, p, dm)                     # (B, L, d_model)


# ------------------------------ block_1D --------------------------------------
def block1d_apply(inp, p, bi=True, cls=True):
    """Pallas equivalent of block_1D.forward (DropPath p=0 -> identity)."""
    xn = layernorm(inp, p["ln_g"], p["ln_b"], eps=1e-6)
    x1 = mamba_apply(xn, p["mamba"])
    if bi:
        if cls:
            x2 = jnp.concatenate(
                [jnp.flip(xn[:, :-1, :], axis=1), xn[:, -1:, :]], axis=1)
            x3f = mamba_apply(x2, p["mamba"])
            x3 = jnp.concatenate(
                [jnp.flip(x3f[:, :-1, :], axis=1), x3f[:, -1:, :]], axis=1)
        else:
            x3 = jnp.flip(mamba_apply(jnp.flip(xn, axis=1), p["mamba"]), axis=1)
        return (x1 + x3) / 2.0 + inp
    return x1 + inp


# ------------------------- parameter initialization --------------------------
def init_block1d_params(key, d_model, d_state=16, d_conv=4):
    d_inner = 2 * d_model
    dt_rank = math.ceil(d_model / 16)
    keys = iter(jax.random.split(key, 64))

    def nrm(shape, scale=0.1):
        return scale * jax.random.normal(next(keys), shape, jnp.float32)

    # A = -exp(A_log) with standard Mamba init, stored transposed (d_state, d_inner)
    A_T = -jnp.tile(jnp.arange(1, d_state + 1, dtype=jnp.float32)[:, None],
                    (1, d_inner))
    mamba = dict(
        in_w=nrm((d_model, 2 * d_inner)),
        conv_w=nrm((d_conv, d_inner)),
        conv_b=nrm((d_inner,)),
        xproj_w=nrm((d_inner, dt_rank + 2 * d_state)),
        dt_w=nrm((dt_rank, d_inner)),
        dt_b=nrm((d_inner,)) - 3.0,                     # softplus(dt_b) ~ 0.05
        A_T=A_T,
        D=jnp.ones((d_inner,), jnp.float32),
        out_w=nrm((d_inner, d_model)),
    )
    return dict(ln_g=jnp.ones((d_model,), jnp.float32),
                ln_b=jnp.zeros((d_model,), jnp.float32),
                mamba=mamba)


# ---------------------------------- main -------------------------------------
if __name__ == "__main__":
    key = jax.random.PRNGKey(0)
    kx, kp = jax.random.split(key)

    B, L, d_model = 2, 256, 128        # 255 spatial tokens + 1 cls token
    x = jax.random.normal(kx, (B, L, d_model), jnp.float32)
    params = init_block1d_params(kp, d_model, d_state=16, d_conv=4)

    fwd = jax.jit(functools.partial(block1d_apply, bi=True, cls=True))
    out = fwd(x, params)
    out = jax.block_until_ready(out)

    assert out.shape == (B, L, d_model), out.shape
    assert bool(jnp.all(jnp.isfinite(out)))
    print("KERNEL_OK")
</pallas_src>

<mosaic_0001>
module attributes {stable_mosaic.version = 11 : i64} {
  func.func @_layernorm_kernel(%arg0: i32, %arg1: memref<256x128xf32, #tpu.memory_space<vmem>>, %arg2: memref<1x128xf32, #tpu.memory_space<vmem>>, %arg3: memref<1x128xf32, #tpu.memory_space<vmem>>, %arg4: memref<256x128xf32, #tpu.memory_space<vmem>>) attributes {dimension_semantics = [#tpu.dimension_semantics<parallel>], iteration_bounds = array<i64: 2>, scalar_prefetch = 0 : i64, scratch_operands = 0 : i64, tpu.core_type = #tpu.core_type<tc>, window_params = [{transform_indices = @transform_0, window_bounds = array<i64: 256, 128>}, {pipeline_mode = #tpu.pipeline_mode<synchronous>, transform_indices = @transform_1, window_bounds = array<i64: 1, 128>}, {pipeline_mode = #tpu.pipeline_mode<synchronous>, transform_indices = @transform_2, window_bounds = array<i64: 1, 128>}, {transform_indices = @transform_3, window_bounds = array<i64: 256, 128>}]} {
    %c0 = arith.constant 0 : index
    %c0_0 = arith.constant 0 : index
    %0 = vector.load %arg1[%c0, %c0_0] : memref<256x128xf32, #tpu.memory_space<vmem>>, vector<256x128xf32>
    %cst = arith.constant dense<0.000000e+00> : vector<256xf32>
    %1 = vector.multi_reduction <add>, %0, %cst [1] : vector<256x128xf32> to vector<256xf32>
    %2 = vector.shape_cast %1 : vector<256xf32> to vector<256x1xf32>
    %cst_1 = arith.constant 1.280000e+02 : f32
    %3 = vector.broadcast %cst_1 : f32 to vector<256x1xf32>
    %4 = arith.divf %2, %3 : vector<256x1xf32>
    %5 = vector.broadcast %4 : vector<256x1xf32> to vector<256x128xf32>
    %6 = arith.subf %0, %5 : vector<256x128xf32>
    %7 = arith.mulf %6, %6 : vector<256x128xf32>
    %cst_2 = arith.constant dense<0.000000e+00> : vector<256xf32>
    %8 = vector.multi_reduction <add>, %7, %cst_2 [1] : vector<256x128xf32> to vector<256xf32>
    %9 = vector.shape_cast %8 : vector<256xf32> to vector<256x1xf32>
    %cst_3 = arith.constant 1.280000e+02 : f32
    %10 = vector.broadcast %cst_3 : f32 to vector<256x1xf32>
    %11 = arith.divf %9, %10 : vector<256x1xf32>
    %cst_4 = arith.constant 9.99999997E-7 : f32
    %12 = vector.broadcast %cst_4 : f32 to vector<256x1xf32>
    %13 = arith.addf %11, %12 : vector<256x1xf32>
    %14 = math.rsqrt %13 : vector<256x1xf32>
    %15 = vector.broadcast %14 : vector<256x1xf32> to vector<256x128xf32>
    %16 = arith.mulf %6, %15 : vector<256x128xf32>
    %c0_5 = arith.constant 0 : index
    %c0_6 = arith.constant 0 : index
    %17 = vector.load %arg2[%c0_5, %c0_6] : memref<1x128xf32, #tpu.memory_space<vmem>>, vector<1x128xf32>
    %18 = vector.broadcast %17 : vector<1x128xf32> to vector<256x128xf32>
    %19 = arith.mulf %16, %18 : vector<256x128xf32>
    %c0_7 = arith.constant 0 : index
    %c0_8 = arith.constant 0 : index
    %20 = vector.load %arg3[%c0_7, %c0_8] : memref<1x128xf32, #tpu.memory_space<vmem>>, vector<1x128xf32>
    %21 = vector.broadcast %20 : vector<1x128xf32> to vector<256x128xf32>
    %22 = arith.addf %19, %21 : vector<256x128xf32>
    %c0_9 = arith.constant 0 : index
    %c0_10 = arith.constant 0 : index
    %23 = vector.load %arg4[%c0_9, %c0_10] : memref<256x128xf32, #tpu.memory_space<vmem>>, vector<256x128xf32>
    tpu.vector_store %arg4[%c0_9, %c0_10], %22 {strides = array<i32>} : memref<256x128xf32, #tpu.memory_space<vmem>>, vector<256x128xf32>,
    return
  }
  func.func @transform_0(%arg0: i32) -> (i32, i32) {
    %c0_i32 = arith.constant 0 : i32
    %c0_i32_0 = arith.constant 0 : i32
    return %arg0, %c0_i32 : i32, i32
  }
  func.func @transform_1(%arg0: i32) -> (i32, i32) {
    %c0_i32 = arith.constant 0 : i32
    %c0_i32_0 = arith.constant 0 : i32
    %c0_i32_1 = arith.constant 0 : i32
    return %c0_i32, %c0_i32_0 : i32, i32
  }
  func.func @transform_2(%arg0: i32) -> (i32, i32) {
    %c0_i32 = arith.constant 0 : i32
    %c0_i32_0 = arith.constant 0 : i32
    %c0_i32_1 = arith.constant 0 : i32
    return %c0_i32, %c0_i32_0 : i32, i32
  }
  func.func @transform_3(%arg0: i32) -> (i32, i32) {
    %c0_i32 = arith.constant 0 : i32
    %c0_i32_0 = arith.constant 0 : i32
    return %arg0, %c0_i32 : i32, i32
  }
}

module attributes {stable_mosaic.version = 11 : i64} {
  func.func @_linear_kernel(%arg0: i32, %arg1: memref<256x128xbf16, #tpu.memory_space<vmem>>, %arg2: memref<128x512xbf16, #tpu.memory_space<vmem>>, %arg3: memref<256x512xf32, #tpu.memory_space<vmem>>) attributes {dimension_semantics = [#tpu.dimension_semantics<parallel>], iteration_bounds = array<i64: 2>, scalar_prefetch = 0 : i64, scratch_operands = 0 : i64, tpu.core_type = #tpu.core_type<tc>, window_params = [{transform_indices = @transform_0, window_bounds = array<i64: 256, 128>}, {pipeline_mode = #tpu.pipeline_mode<synchronous>, transform_indices = @transform_1, window_bounds = array<i64: 128, 512>}, {transform_indices = @transform_2, window_bounds = array<i64: 256, 512>}]} {
    %c0 = arith.constant 0 : index
    %c0_0 = arith.constant 0 : index
    %0 = vector.load %arg1[%c0, %c0_0] : memref<256x128xbf16, #tpu.memory_space<vmem>>, vector<256x128xbf16>
    %c0_1 = arith.constant 0 : index
    %c0_2 = arith.constant 0 : index
    %1 = vector.load %arg2[%c0_1, %c0_2] : memref<128x512xbf16, #tpu.memory_space<vmem>>, vector<128x512xbf16>
    %cst = arith.constant dense<0.000000e+00> : vector<256x512xf32>
    %2 = tpu.matmul %0, %1, %cst {dimension_numbers = #tpu.dot_dimension_numbers<[1], [0], [0], [1], [0, 0, 1, 1], [], []>} : vector<256x128xbf16>, vector<128x512xbf16>, vector<256x512xf32> -> vector<256x512xf32>
    %c0_3 = arith.constant 0 : index
    %c0_4 = arith.constant 0 : index
    %3 = vector.load %arg3[%c0_3, %c0_4] : memref<256x512xf32, #tpu.memory_space<vmem>>, vector<256x512xf32>
    tpu.vector_store %arg3[%c0_3, %c0_4], %2 {strides = array<i32>} : memref<256x512xf32, #tpu.memory_space<vmem>>, vector<256x512xf32>,
    return
  }
  func.func @transform_0(%arg0: i32) -> (i32, i32) {
    %c0_i32 = arith.constant 0 : i32
    %c0_i32_0 = arith.constant 0 : i32
    return %arg0, %c0_i32 : i32, i32
  }
  func.func @transform_1(%arg0: i32) -> (i32, i32) {
    %c0_i32 = arith.constant 0 : i32
    %c0_i32_0 = arith.constant 0 : i32
    %c0_i32_1 = arith.constant 0 : i32
    return %c0_i32, %c0_i32_0 : i32, i32
  }
  func.func @transform_2(%arg0: i32) -> (i32, i32) {
    %c0_i32 = arith.constant 0 : i32
    %c0_i32_0 = arith.constant 0 : i32
    return %arg0, %c0_i32 : i32, i32
  }
}

module attributes {stable_mosaic.version = 11 : i64} {
  func.func @_conv_silu_kernel(%arg0: i32, %arg1: memref<1x256x256xf32, #tpu.memory_space<vmem>>, %arg2: memref<4x256xf32, #tpu.memory_space<vmem>>, %arg3: memref<1x256xf32, #tpu.memory_space<vmem>>, %arg4: memref<1x256x256xf32, #tpu.memory_space<vmem>>) attributes {dimension_semantics = [#tpu.dimension_semantics<parallel>], iteration_bounds = array<i64: 2>, scalar_prefetch = 0 : i64, scratch_operands = 0 : i64, tpu.core_type = #tpu.core_type<tc>, window_params = [{transform_indices = @transform_0, window_bounds = array<i64: 1, 256, 256>}, {pipeline_mode = #tpu.pipeline_mode<synchronous>, transform_indices = @transform_1, window_bounds = array<i64: 4, 256>}, {pipeline_mode = #tpu.pipeline_mode<synchronous>, transform_indices = @transform_2, window_bounds = array<i64: 1, 256>}, {transform_indices = @transform_3, window_bounds = array<i64: 1, 256, 256>}]} {
    %c0 = arith.constant 0 : index
    %c0_0 = arith.constant 0 : index
    %c0_1 = arith.constant 0 : index
    %0 = vector.load %arg1[%c0, %c0_0, %c0_1] : memref<1x256x256xf32, #tpu.memory_space<vmem>>, vector<1x256x256xf32>
    %1 = vector.shape_cast %0 : vector<1x256x256xf32> to vector<256x256xf32>
    %2 = tpu.iota {dimensions = array<i32: 0>} : vector<256x256xi32>
    %c3 = arith.constant 3 : index
    %c0_2 = arith.constant 0 : index
    %3 = vector.load %arg2[%c3, %c0_2] : memref<4x256xf32, #tpu.memory_space<vmem>>, vector<1x256xf32>
    %4 = vector.broadcast %3 : vector<1x256xf32> to vector<256x256xf32>
    %5 = arith.mulf %1, %4 : vector<256x256xf32>
    %c1_i32 = arith.constant 1 : i32
    %6 = tpu.dynamic_rotate %1 by %c1_i32 dim 0 : vector<256x256xf32>, i32 -> vector<256x256xf32>
    %c1_i32_3 = arith.constant 1 : i32
    %7 = vector.broadcast %c1_i32_3 : i32 to vector<256x256xi32>
    %8 = arith.cmpi sge, %2, %7 : vector<256x256xi32>
    %cst = arith.constant 0.000000e+00 : f32
    %9 = vector.broadcast %cst : f32 to vector<256x256xf32>
    %10 = arith.select %8, %6, %9 : vector<256x256xi1>, vector<256x256xf32>
    %c2 = arith.constant 2 : index
    %c0_4 = arith.constant 0 : index
    %11 = vector.load %arg2[%c2, %c0_4] : memref<4x256xf32, #tpu.memory_space<vmem>>, vector<1x256xf32>
    %12 = vector.broadcast %11 : vector<1x256xf32> to vector<256x256xf32>
    %13 = arith.mulf %10, %12 : vector<256x256xf32>
    %14 = arith.addf %5, %13 : vector<256x256xf32>
    %c2_i32 = arith.constant 2 : i32
    %15 = tpu.dynamic_rotate %1 by %c2_i32 dim 0 : vector<256x256xf32>, i32 -> vector<256x256xf32>
    %c2_i32_5 = arith.constant 2 : i32
    %16 = vector.broadcast %c2_i32_5 : i32 to vector<256x256xi32>
    %17 = arith.cmpi sge, %2, %16 : vector<256x256xi32>
    %cst_6 = arith.constant 0.000000e+00 : f32
    %18 = vector.broadcast %cst_6 : f32 to vector<256x256xf32>
    %19 = arith.select %17, %15, %18 : vector<256x256xi1>, vector<256x256xf32>
    %c1 = arith.constant 1 : index
    %c0_7 = arith.constant 0 : index
    %20 = vector.load %arg2[%c1, %c0_7] : memref<4x256xf32, #tpu.memory_space<vmem>>, vector<1x256xf32>
    %21 = vector.broadcast %20 : vector<1x256xf32> to vector<256x256xf32>
    %22 = arith.mulf %19, %21 : vector<256x256xf32>
    %23 = arith.addf %14, %22 : vector<256x256xf32>
    %c3_i32 = arith.constant 3 : i32
    %24 = tpu.dynamic_rotate %1 by %c3_i32 dim 0 : vector<256x256xf32>, i32 -> vector<256x256xf32>
    %c3_i32_8 = arith.constant 3 : i32
    %25 = vector.broadcast %c3_i32_8 : i32 to vector<256x256xi32>
    %26 = arith.cmpi sge, %2, %25 : vector<256x256xi32>
    %cst_9 = arith.constant 0.000000e+00 : f32
    %27 = vector.broadcast %cst_9 : f32 to vector<256x256xf32>
    %28 = arith.select %26, %24, %27 : vector<256x256xi1>, vector<256x256xf32>
    %c0_10 = arith.constant 0 : index
    %c0_11 = arith.constant 0 : index
    %29 = vector.load %arg2[%c0_10, %c0_11] : memref<4x256xf32, #tpu.memory_space<vmem>>, vector<1x256xf32>
    %30 = vector.broadcast %29 : vector<1x256xf32> to vector<256x256xf32>
    %31 = arith.mulf %28, %30 : vector<256x256xf32>
    %32 = arith.addf %23, %31 : vector<256x256xf32>
    %c0_12 = arith.constant 0 : index
    %c0_13 = arith.constant 0 : index
    %33 = vector.load %arg3[%c0_12, %c0_13] : memref<1x256xf32, #tpu.memory_space<vmem>>, vector<1x256xf32>
    %34 = vector.broadcast %33 : vector<1x256xf32> to vector<256x256xf32>
    %35 = arith.addf %32, %34 : vector<256x256xf32>
    %cst_14 = arith.constant 0.000000e+00 : f32
    %36 = vector.broadcast %cst_14 : f32 to vector<256x256xf32>
    %37 = arith.subf %36, %35 : vector<256x256xf32>
    %38 = math.exp %37 : vector<256x256xf32>
    %cst_15 = arith.constant 1.000000e+00 : f32
    %39 = vector.broadcast %cst_15 : f32 to vector<256x256xf32>
    %40 = arith.addf %39, %38 : vector<256x256xf32>
    %cst_16 = arith.constant 1.000000e+00 : f32
    %41 = vector.broadcast %cst_16 : f32 to vector<256x256xf32>
    %42 = arith.divf %41, %40 : vector<256x256xf32>
    %43 = arith.mulf %35, %42 : vector<256x256xf32>
    %c0_17 = arith.constant 0 : index
    %c0_18 = arith.constant 0 : index
    %c0_19 = arith.constant 0 : index
    %44 = vector.load %arg4[%c0_17, %c0_18, %c0_19] : memref<1x256x256xf32, #tpu.memory_space<vmem>>, vector<1x256x256xf32>
    %45 = vector.shape_cast %44 : vector<1x256x256xf32> to vector<256x256xf32>
    %46 = vector.shape_cast %43 : vector<256x256xf32> to vector<1x256x256xf32>
    tpu.vector_store %arg4[%c0_17, %c0_18, %c0_19], %46 {strides = array<i32>} : memref<1x256x256xf32, #tpu.memory_space<vmem>>, vector<1x256x256xf32>,
    return
  }
  func.func @transform_0(%arg0: i32) -> (i32, i32, i32) {
    %c0_i32 = arith.constant 0 : i32
    %c0_i32_0 = arith.constant 0 : i32
    %c0_i32_1 = arith.constant 0 : i32
    return %arg0, %c0_i32, %c0_i32_0 : i32, i32, i32
  }
  func.func @transform_1(%arg0: i32) -> (i32, i32) {
    %c0_i32 = arith.constant 0 : i32
    %c0_i32_0 = arith.constant 0 : i32
    %c0_i32_1 = arith.constant 0 : i32
    return %c0_i32, %c0_i32_0 : i32, i32
  }
  func.func @transform_2(%arg0: i32) -> (i32, i32) {
    %c0_i32 = arith.constant 0 : i32
    %c0_i32_0 = arith.constant 0 : i32
    %c0_i32_1 = arith.constant 0 : i32
    return %c0_i32, %c0_i32_0 : i32, i32
  }
  func.func @transform_3(%arg0: i32) -> (i32, i32, i32) {
    %c0_i32 = arith.constant 0 : i32
    %c0_i32_0 = arith.constant 0 : i32
    %c0_i32_1 = arith.constant 0 : i32
    return %arg0, %c0_i32, %c0_i32_0 : i32, i32, i32
  }
}

module attributes {stable_mosaic.version = 11 : i64} {
  func.func @_mamba_scan_kernel(%arg0: i32, %arg1: i32, %arg2: memref<1x16x256xf32, #tpu.memory_space<vmem>>, %arg3: memref<1x16x256xf32, #tpu.memory_space<vmem>>, %arg4: memref<256x8xbf16, #tpu.memory_space<vmem>>, %arg5: memref<16x256xbf16, #tpu.memory_space<vmem>>, %arg6: memref<16x256xbf16, #tpu.memory_space<vmem>>, %arg7: memref<8x256xbf16, #tpu.memory_space<vmem>>, %arg8: memref<1x256xf32, #tpu.memory_space<vmem>>, %arg9: memref<16x256xf32, #tpu.memory_space<vmem>>, %arg10: memref<1x256xf32, #tpu.memory_space<vmem>>, %arg11: memref<256x128xbf16, #tpu.memory_space<vmem>>, %arg12: memref<1x16x128xf32, #tpu.memory_space<vmem>>, %arg13: memref<16x256xf32, #tpu.memory_space<vmem>>, %arg14: memref<16x256xf32, #tpu.memory_space<vmem>>) attributes {dimension_semantics = [#tpu.dimension_semantics<parallel>, #tpu.dimension_semantics<arbitrary>], iteration_bounds = array<i64: 2, 16>, scalar_prefetch = 0 : i64, scratch_operands = 2 : i64, tpu.core_type = #tpu.core_type<tc>, window_params = [{transform_indices = @transform_0, window_bounds = array<i64: 1, 16, 256>}, {transform_indices = @transform_1, window_bounds = array<i64: 1, 16, 256>}, {pipeline_mode = #tpu.pipeline_mode<synchronous>, transform_indices = @transform_2, window_bounds = array<i64: 256, 8>}, {pipeline_mode = #tpu.pipeline_mode<synchronous>, transform_indices = @transform_3, window_bounds = array<i64: 16, 256>}, {pipeline_mode = #tpu.pipeline_mode<synchronous>, transform_indices = @transform_4, window_bounds = array<i64: 16, 256>}, {pipeline_mode = #tpu.pipeline_mode<synchronous>, transform_indices = @transform_5, window_bounds = array<i64: 8, 256>}, {pipeline_mode = #tpu.pipeline_mode<synchronous>, transform_indices = @transform_6, window_bounds = array<i64: 1, 256>}, {pipeline_mode = #tpu.pipeline_mode<synchronous>, transform_indices = @transform_7, window_bounds = array<i64: 16, 256>}, {pipeline_mode = #tpu.pipeline_mode<synchronous>, transform_indices = @transform_8, window_bounds = array<i64: 1, 256>}, {pipeline_mode = #tpu.pipeline_mode<synchronous>, transform_indices = @transform_9, window_bounds = array<i64: 256, 128>}, {transform_indices = @transform_10, window_bounds = array<i64: 1, 16, 128>}]} {
    %c0_i32 = arith.constant 0 : i32
    %0 = arith.cmpi eq, %arg1, %c0_i32 : i32
    %1 = arith.extui %0 : i1 to i32
    %c0_i32_0 = arith.constant 0 : i32
    %2 = arith.cmpi ne, %1, %c0_i32_0 : i32
    scf.if %2 {
      %cst_74 = arith.constant 0.000000e+00 : f32
      %326 = vector.broadcast %cst_74 : f32 to vector<16x256xf32>
      %c0_75 = arith.constant 0 : index
      %c0_76 = arith.constant 0 : index
      %327 = vector.load %arg13[%c0_75, %c0_76] : memref<16x256xf32, #tpu.memory_space<vmem>>, vector<16x256xf32>
      tpu.vector_store %arg13[%c0_75, %c0_76], %326 {strides = array<i32>} : memref<16x256xf32, #tpu.memory_space<vmem>>, vector<16x256xf32>,
    } else {
    }
    %c0 = arith.constant 0 : index
    %c0_1 = arith.constant 0 : index
    %c0_2 = arith.constant 0 : index
    %3 = vector.load %arg2[%c0, %c0_1, %c0_2] : memref<1x16x256xf32, #tpu.memory_space<vmem>>, vector<1x16x256xf32>
    %4 = vector.shape_cast %3 : vector<1x16x256xf32> to vector<16x256xf32>
    %c0_3 = arith.constant 0 : index
    %c0_4 = arith.constant 0 : index
    %c0_5 = arith.constant 0 : index
    %5 = vector.load %arg3[%c0_3, %c0_4, %c0_5] : memref<1x16x256xf32, #tpu.memory_space<vmem>>, vector<1x16x256xf32>
    %6 = vector.shape_cast %5 : vector<1x16x256xf32> to vector<16x256xf32>
    %7 = arith.truncf %4 : vector<16x256xf32> to vector<16x256xbf16>
    %c0_6 = arith.constant 0 : index
    %c0_7 = arith.constant 0 : index
    %8 = vector.load %arg4[%c0_6, %c0_7] : memref<256x8xbf16, #tpu.memory_space<vmem>>, vector<256x8xbf16>
    %cst = arith.constant dense<0.000000e+00> : vector<16x8xf32>
    %9 = tpu.matmul %7, %8, %cst {dimension_numbers = #tpu.dot_dimension_numbers<[1], [0], [0], [1], [0, 0, 1, 1], [], []>} : vector<16x256xbf16>, vector<256x8xbf16>, vector<16x8xf32> -> vector<16x8xf32>
    %10 = arith.truncf %9 : vector<16x8xf32> to vector<16x8xbf16>
    %c0_8 = arith.constant 0 : index
    %c0_9 = arith.constant 0 : index
    %11 = vector.load %arg7[%c0_8, %c0_9] : memref<8x256xbf16, #tpu.memory_space<vmem>>, vector<8x256xbf16>
    %cst_10 = arith.constant dense<0.000000e+00> : vector<16x256xf32>
    %12 = tpu.matmul %10, %11, %cst_10 {dimension_numbers = #tpu.dot_dimension_numbers<[1], [0], [0], [1], [0, 0, 1, 1], [], []>} : vector<16x8xbf16>, vector<8x256xbf16>, vector<16x256xf32> -> vector<16x256xf32>
    %c0_11 = arith.constant 0 : index
    %c0_12 = arith.constant 0 : index
    %13 = vector.load %arg8[%c0_11, %c0_12] : memref<1x256xf32, #tpu.memory_space<vmem>>, vector<1x256xf32>
    %14 = vector.broadcast %13 : vector<1x256xf32> to vector<16x256xf32>
    %15 = arith.addf %12, %14 : vector<16x256xf32>
    %cst_13 = arith.constant 0.000000e+00 : f32
    %16 = vector.broadcast %cst_13 : f32 to vector<16x256xf32>
    %17 = arith.maximumf %15, %16 : vector<16x256xf32>
    %18 = math.absf %15 : vector<16x256xf32>
    %cst_14 = arith.constant 0.000000e+00 : f32
    %19 = vector.broadcast %cst_14 : f32 to vector<16x256xf32>
    %20 = arith.subf %19, %18 : vector<16x256xf32>
    %21 = math.exp %20 : vector<16x256xf32>
    %cst_15 = arith.constant 1.000000e+00 : f32
    %22 = vector.broadcast %cst_15 : f32 to vector<16x256xf32>
    %23 = arith.addf %22, %21 : vector<16x256xf32>
    %24 = math.log %23 : vector<16x256xf32>
    %25 = arith.addf %17, %24 : vector<16x256xf32>
    %26 = arith.mulf %25, %4 : vector<16x256xf32>
    %c0_16 = arith.constant 0 : index
    %c0_17 = arith.constant 0 : index
    %27 = vector.load %arg5[%c0_16, %c0_17] : memref<16x256xbf16, #tpu.memory_space<vmem>>, vector<16x256xbf16>
    %cst_18 = arith.constant dense<0.000000e+00> : vector<16x16xf32>
    %28 = tpu.matmul %27, %7, %cst_18 {dimension_numbers = #tpu.dot_dimension_numbers<[1], [1], [0], [0], [0, 0, 1, 0], [], []>} : vector<16x256xbf16>, vector<16x256xbf16>, vector<16x16xf32> -> vector<16x16xf32>
    %c0_19 = arith.constant 0 : index
    %c0_20 = arith.constant 0 : index
    %29 = vector.load %arg6[%c0_19, %c0_20] : memref<16x256xbf16, #tpu.memory_space<vmem>>, vector<16x256xbf16>
    %cst_21 = arith.constant dense<0.000000e+00> : vector<16x16xf32>
    %30 = tpu.matmul %29, %7, %cst_21 {dimension_numbers = #tpu.dot_dimension_numbers<[1], [1], [0], [0], [0, 0, 1, 0], [], []>} : vector<16x256xbf16>, vector<16x256xbf16>, vector<16x16xf32> -> vector<16x16xf32>
    %c0_22 = arith.constant 0 : index
    %c0_23 = arith.constant 0 : index
    %31 = vector.load %arg9[%c0_22, %c0_23] : memref<16x256xf32, #tpu.memory_space<vmem>>, vector<16x256xf32>
    %c0_24 = arith.constant 0 : index
    %c0_25 = arith.constant 0 : index
    %32 = vector.load %arg13[%c0_24, %c0_25] : memref<16x256xf32, #tpu.memory_space<vmem>>, vector<16x256xf32>
    %33 = vector.extract_strided_slice %25 {offsets = [0, 0], sizes = [1, 256], strides = [1, 1]} : vector<16x256xf32> to vector<1x256xf32>
    %34 = vector.broadcast %33 : vector<1x256xf32> to vector<16x256xf32>
    %35 = arith.mulf %34, %31 : vector<16x256xf32>
    %36 = math.exp %35 : vector<16x256xf32>
    %37 = vector.extract_strided_slice %28 {offsets = [0, 0], sizes = [16, 1], strides = [1, 1]} : vector<16x16xf32> to vector<16x1xf32>
    %38 = vector.extract_strided_slice %26 {offsets = [0, 0], sizes = [1, 256], strides = [1, 1]} : vector<16x256xf32> to vector<1x256xf32>
    %39 = vector.broadcast %37 : vector<16x1xf32> to vector<16x256xf32>
    %40 = vector.broadcast %38 : vector<1x256xf32> to vector<16x256xf32>
    %41 = arith.mulf %39, %40 : vector<16x256xf32>
    %42 = arith.mulf %36, %32 : vector<16x256xf32>
    %43 = arith.addf %42, %41 : vector<16x256xf32>
    %44 = vector.extract_strided_slice %30 {offsets = [0, 0], sizes = [16, 1], strides = [1, 1]} : vector<16x16xf32> to vector<16x1xf32>
    %45 = vector.broadcast %44 : vector<16x1xf32> to vector<16x256xf32>
    %46 = arith.mulf %45, %43 : vector<16x256xf32>
    %cst_26 = arith.constant dense<0.000000e+00> : vector<256xf32>
    %47 = vector.multi_reduction <add>, %46, %cst_26 [0] : vector<16x256xf32> to vector<256xf32>
    %48 = vector.shape_cast %47 : vector<256xf32> to vector<1x256xf32>
    %c0_27 = arith.constant 0 : index
    %c0_28 = arith.constant 0 : index
    %49 = vector.load %arg14[%c0_27, %c0_28] : memref<16x256xf32, #tpu.memory_space<vmem>>, vector<1x256xf32>
    tpu.vector_store %arg14[%c0_27, %c0_28], %48 {strides = array<i32>} : memref<16x256xf32, #tpu.memory_space<vmem>>, vector<1x256xf32>,
    %50 = vector.extract_strided_slice %25 {offsets = [1, 0], sizes = [1, 256], strides = [1, 1]} : vector<16x256xf32> to vector<1x256xf32>
    %51 = vector.broadcast %50 : vector<1x256xf32> to vector<16x256xf32>
    %52 = arith.mulf %51, %31 : vector<16x256xf32>
    %53 = math.exp %52 : vector<16x256xf32>
    %54 = vector.extract_strided_slice %28 {offsets = [0, 1], sizes = [16, 1], strides = [1, 1]} : vector<16x16xf32> to vector<16x1xf32>
    %55 = vector.extract_strided_slice %26 {offsets = [1, 0], sizes = [1, 256], strides = [1, 1]} : vector<16x256xf32> to vector<1x256xf32>
    %56 = vector.broadcast %54 : vector<16x1xf32> to vector<16x256xf32>
    %57 = vector.broadcast %55 : vector<1x256xf32> to vector<16x256xf32>
    %58 = arith.mulf %56, %57 : vector<16x256xf32>
    %59 = arith.mulf %53, %43 : vector<16x256xf32>
    %60 = arith.addf %59, %58 : vector<16x256xf32>
    %61 = vector.extract_strided_slice %30 {offsets = [0, 1], sizes = [16, 1], strides = [1, 1]} : vector<16x16xf32> to vector<16x1xf32>
    %62 = vector.broadcast %61 : vector<16x1xf32> to vector<16x256xf32>
    %63 = arith.mulf %62, %60 : vector<16x256xf32>
    %cst_29 = arith.constant dense<0.000000e+00> : vector<256xf32>
    %64 = vector.multi_reduction <add>, %63, %cst_29 [0] : vector<16x256xf32> to vector<256xf32>
    %65 = vector.shape_cast %64 : vector<256xf32> to vector<1x256xf32>
    %c1 = arith.constant 1 : index
    %c0_30 = arith.constant 0 : index
    %66 = vector.load %arg14[%c1, %c0_30] : memref<16x256xf32, #tpu.memory_space<vmem>>, vector<1x256xf32>
    tpu.vector_store %arg14[%c1, %c0_30], %65 {strides = array<i32>} : memref<16x256xf32, #tpu.memory_space<vmem>>, vector<1x256xf32>,
    %67 = vector.extract_strided_slice %25 {offsets = [2, 0], sizes = [1, 256], strides = [1, 1]} : vector<16x256xf32> to vector<1x256xf32>
    %68 = vector.broadcast %67 : vector<1x256xf32> to vector<16x256xf32>
    %69 = arith.mulf %68, %31 : vector<16x256xf32>
    %70 = math.exp %69 : vector<16x256xf32>
    %71 = vector.extract_strided_slice %28 {offsets = [0, 2], sizes = [16, 1], strides = [1, 1]} : vector<16x16xf32> to vector<16x1xf32>
    %72 = vector.extract_strided_slice %26 {offsets = [2, 0], sizes = [1, 256], strides = [1, 1]} : vector<16x256xf32> to vector<1x256xf32>
    %73 = vector.broadcast %71 : vector<16x1xf32> to vector<16x256xf32>
    %74 = vector.broadcast %72 : vector<1x256xf32> to vector<16x256xf32>
    %75 = arith.mulf %73, %74 : vector<16x256xf32>
    %76 = arith.mulf %70, %60 : vector<16x256xf32>
    %77 = arith.addf %76, %75 : vector<16x256xf32>
    %78 = vector.extract_strided_slice %30 {offsets = [0, 2], sizes = [16, 1], strides = [1, 1]} : vector<16x16xf32> to vector<16x1xf32>
    %79 = vector.broadcast %78 : vector<16x1xf32> to vector<16x256xf32>
    %80 = arith.mulf %79, %77 : vector<16x256xf32>
    %cst_31 = arith.constant dense<0.000000e+00> : vector<256xf32>
    %81 = vector.multi_reduction <add>, %80, %cst_31 [0] : vector<16x256xf32> to vector<256xf32>
    %82 = vector.shape_cast %81 : vector<256xf32> to vector<1x256xf32>
    %c2 = arith.constant 2 : index
    %c0_32 = arith.constant 0 : index
    %83 = vector.load %arg14[%c2, %c0_32] : memref<16x256xf32, #tpu.memory_space<vmem>>, vector<1x256xf32>
    tpu.vector_store %arg14[%c2, %c0_32], %82 {strides = array<i32>} : memref<16x256xf32, #tpu.memory_space<vmem>>, vector<1x256xf32>,
    %84 = vector.extract_strided_slice %25 {offsets = [3, 0], sizes = [1, 256], strides = [1, 1]} : vector<16x256xf32> to vector<1x256xf32>
    %85 = vector.broadcast %84 : vector<1x256xf32> to vector<16x256xf32>
    %86 = arith.mulf %85, %31 : vector<16x256xf32>
    %87 = math.exp %86 : vector<16x256xf32>
    %88 = vector.extract_strided_slice %28 {offsets = [0, 3], sizes = [16, 1], strides = [1, 1]} : vector<16x16xf32> to vector<16x1xf32>
    %89 = vector.extract_strided_slice %26 {offsets = [3, 0], sizes = [1, 256], strides = [1, 1]} : vector<16x256xf32> to vector<1x256xf32>
    %90 = vector.broadcast %88 : vector<16x1xf32> to vector<16x256xf32>
    %91 = vector.broadcast %89 : vector<1x256xf32> to vector<16x256xf32>
    %92 = arith.mulf %90, %91 : vector<16x256xf32>
    %93 = arith.mulf %87, %77 : vector<16x256xf32>
    %94 = arith.addf %93, %92 : vector<16x256xf32>
    %95 = vector.extract_strided_slice %30 {offsets = [0, 3], sizes = [16, 1], strides = [1, 1]} : vector<16x16xf32> to vector<16x1xf32>
    %96 = vector.broadcast %95 : vector<16x1xf32> to vector<16x256xf32>
    %97 = arith.mulf %96, %94 : vector<16x256xf32>
    %cst_33 = arith.constant dense<0.000000e+00> : vector<256xf32>
    %98 = vector.multi_reduction <add>, %97, %cst_33 [0] : vector<16x256xf32> to vector<256xf32>
    %99 = vector.shape_cast %98 : vector<256xf32> to vector<1x256xf32>
    %c3 = arith.constant 3 : index
    %c0_34 = arith.constant 0 : index
    %100 = vector.load %arg14[%c3, %c0_34] : memref<16x256xf32, #tpu.memory_space<vmem>>, vector<1x256xf32>
    tpu.vector_store %arg14[%c3, %c0_34], %99 {strides = array<i32>} : memref<16x256xf32, #tpu.memory_space<vmem>>, vector<1x256xf32>,
    %101 = vector.extract_strided_slice %25 {offsets = [4, 0], sizes = [1, 256], strides = [1, 1]} : vector<16x256xf32> to vector<1x256xf32>
    %102 = vector.broadcast %101 : vector<1x256xf32> to vector<16x256xf32>
    %103 = arith.mulf %102, %31 : vector<16x256xf32>
    %104 = math.exp %103 : vector<16x256xf32>
    %105 = vector.extract_strided_slice %28 {offsets = [0, 4], sizes = [16, 1], strides = [1, 1]} : vector<16x16xf32> to vector<16x1xf32>
    %106 = vector.extract_strided_slice %26 {offsets = [4, 0], sizes = [1, 256], strides = [1, 1]} : vector<16x256xf32> to vector<1x256xf32>
    %107 = vector.broadcast %105 : vector<16x1xf32> to vector<16x256xf32>
    %108 = vector.broadcast %106 : vector<1x256xf32> to vector<16x256xf32>
    %109 = arith.mulf %107, %108 : vector<16x256xf32>
    %110 = arith.mulf %104, %94 : vector<16x256xf32>
    %111 = arith.addf %110, %109 : vector<16x256xf32>
    %112 = vector.extract_strided_slice %30 {offsets = [0, 4], sizes = [16, 1], strides = [1, 1]} : vector<16x16xf32> to vector<16x1xf32>
    %113 = vector.broadcast %112 : vector<16x1xf32> to vector<16x256xf32>
    %114 = arith.mulf %113, %111 : vector<16x256xf32>
    %cst_35 = arith.constant dense<0.000000e+00> : vector<256xf32>
    %115 = vector.multi_reduction <add>, %114, %cst_35 [0] : vector<16x256xf32> to vector<256xf32>
    %116 = vector.shape_cast %115 : vector<256xf32> to vector<1x256xf32>
    %c4 = arith.constant 4 : index
    %c0_36 = arith.constant 0 : index
    %117 = vector.load %arg14[%c4, %c0_36] : memref<16x256xf32, #tpu.memory_space<vmem>>, vector<1x256xf32>
    tpu.vector_store %arg14[%c4, %c0_36], %116 {strides = array<i32>} : memref<16x256xf32, #tpu.memory_space<vmem>>, vector<1x256xf32>,
    %118 = vector.extract_strided_slice %25 {offsets = [5, 0], sizes = [1, 256], strides = [1, 1]} : vector<16x256xf32> to vector<1x256xf32>
    %119 = vector.broadcast %118 : vector<1x256xf32> to vector<16x256xf32>
    %120 = arith.mulf %119, %31 : vector<16x256xf32>
    %121 = math.exp %120 : vector<16x256xf32>
    %122 = vector.extract_strided_slice %28 {offsets = [0, 5], sizes = [16, 1], strides = [1, 1]} : vector<16x16xf32> to vector<16x1xf32>
    %123 = vector.extract_strided_slice %26 {offsets = [5, 0], sizes = [1, 256], strides = [1, 1]} : vector<16x256xf32> to vector<1x256xf32>
    %124 = vector.broadcast %122 : vector<16x1xf32> to vector<16x256xf32>
    %125 = vector.broadcast %123 : vector<1x256xf32> to vector<16x256xf32>
    %126 = arith.mulf %124, %125 : vector<16x256xf32>
    %127 = arith.mulf %121, %111 : vector<16x256xf32>
    %128 = arith.addf %127, %126 : vector<16x256xf32>
    %129 = vector.extract_strided_slice %30 {offsets = [0, 5], sizes = [16, 1], strides = [1, 1]} : vector<16x16xf32> to vector<16x1xf32>
    %130 = vector.broadcast %129 : vector<16x1xf32> to vector<16x256xf32>
    %131 = arith.mulf %130, %128 : vector<16x256xf32>
    %cst_37 = arith.constant dense<0.000000e+00> : vector<256xf32>
    %132 = vector.multi_reduction <add>, %131, %cst_37 [0] : vector<16x256xf32> to vector<256xf32>
    %133 = vector.shape_cast %132 : vector<256xf32> to vector<1x256xf32>
    %c5 = arith.constant 5 : index
    %c0_38 = arith.constant 0 : index
    %134 = vector.load %arg14[%c5, %c0_38] : memref<16x256xf32, #tpu.memory_space<vmem>>, vector<1x256xf32>
    tpu.vector_store %arg14[%c5, %c0_38], %133 {strides = array<i32>} : memref<16x256xf32, #tpu.memory_space<vmem>>, vector<1x256xf32>,
    %135 = vector.extract_strided_slice %25 {offsets = [6, 0], sizes = [1, 256], strides = [1, 1]} : vector<16x256xf32> to vector<1x256xf32>
    %136 = vector.broadcast %135 : vector<1x256xf32> to vector<16x256xf32>
    %137 = arith.mulf %136, %31 : vector<16x256xf32>
    %138 = math.exp %137 : vector<16x256xf32>
    %139 = vector.extract_strided_slice %28 {offsets = [0, 6], sizes = [16, 1], strides = [1, 1]} : vector<16x16xf32> to vector<16x1xf32>
    %140 = vector.extract_strided_slice %26 {offsets = [6, 0], sizes = [1, 256], strides = [1, 1]} : vector<16x256xf32> to vector<1x256xf32>
    %141 = vector.broadcast %139 : vector<16x1xf32> to vector<16x256xf32>
    %142 = vector.broadcast %140 : vector<1x256xf32> to vector<16x256xf32>
    %143 = arith.mulf %141, %142 : vector<16x256xf32>
    %144 = arith.mulf %138, %128 : vector<16x256xf32>
    %145 = arith.addf %144, %143 : vector<16x256xf32>
    %146 = vector.extract_strided_slice %30 {offsets = [0, 6], sizes = [16, 1], strides = [1, 1]} : vector<16x16xf32> to vector<16x1xf32>
    %147 = vector.broadcast %146 : vector<16x1xf32> to vector<16x256xf32>
    %148 = arith.mulf %147, %145 : vector<16x256xf32>
    %cst_39 = arith.constant dense<0.000000e+00> : vector<256xf32>
    %149 = vector.multi_reduction <add>, %148, %cst_39 [0] : vector<16x256xf32> to vector<256xf32>
    %150 = vector.shape_cast %149 : vector<256xf32> to vector<1x256xf32>
    %c6 = arith.constant 6 : index
    %c0_40 = arith.constant 0 : index
    %151 = vector.load %arg14[%c6, %c0_40] : memref<16x256xf32, #tpu.memory_space<vmem>>, vector<1x256xf32>
    tpu.vector_store %arg14[%c6, %c0_40], %150 {strides = array<i32>} : memref<16x256xf32, #tpu.memory_space<vmem>>, vector<1x256xf32>,
    %152 = vector.extract_strided_slice %25 {offsets = [7, 0], sizes = [1, 256], strides = [1, 1]} : vector<16x256xf32> to vector<1x256xf32>
    %153 = vector.broadcast %152 : vector<1x256xf32> to vector<16x256xf32>
    %154 = arith.mulf %153, %31 : vector<16x256xf32>
    %155 = math.exp %154 : vector<16x256xf32>
    %156 = vector.extract_strided_slice %28 {offsets = [0, 7], sizes = [16, 1], strides = [1, 1]} : vector<16x16xf32> to vector<16x1xf32>
    %157 = vector.extract_strided_slice %26 {offsets = [7, 0], sizes = [1, 256], strides = [1, 1]} : vector<16x256xf32> to vector<1x256xf32>
    %158 = vector.broadcast %156 : vector<16x1xf32> to vector<16x256xf32>
    %159 = vector.broadcast %157 : vector<1x256xf32> to vector<16x256xf32>
    %160 = arith.mulf %158, %159 : vector<16x256xf32>
    %161 = arith.mulf %155, %145 : vector<16x256xf32>
    %162 = arith.addf %161, %160 : vector<16x256xf32>
    %163 = vector.extract_strided_slice %30 {offsets = [0, 7], sizes = [16, 1], strides = [1, 1]} : vector<16x16xf32> to vector<16x1xf32>
    %164 = vector.broadcast %163 : vector<16x1xf32> to vector<16x256xf32>
    %165 = arith.mulf %164, %162 : vector<16x256xf32>
    %cst_41 = arith.constant dense<0.000000e+00> : vector<256xf32>
    %166 = vector.multi_reduction <add>, %165, %cst_41 [0] : vector<16x256xf32> to vector<256xf32>
    %167 = vector.shape_cast %166 : vector<256xf32> to vector<1x256xf32>
    %c7 = arith.constant 7 : index
    %c0_42 = arith.constant 0 : index
    %168 = vector.load %arg14[%c7, %c0_42] : memref<16x256xf32, #tpu.memory_space<vmem>>, vector<1x256xf32>
    tpu.vector_store %arg14[%c7, %c0_42], %167 {strides = array<i32>} : memref<16x256xf32, #tpu.memory_space<vmem>>, vector<1x256xf32>,
    %169 = vector.extract_strided_slice %25 {offsets = [8, 0], sizes = [1, 256], strides = [1, 1]} : vector<16x256xf32> to vector<1x256xf32>
    %170 = vector.broadcast %169 : vector<1x256xf32> to vector<16x256xf32>
    %171 = arith.mulf %170, %31 : vector<16x256xf32>
    %172 = math.exp %171 : vector<16x256xf32>
    %173 = vector.extract_strided_slice %28 {offsets = [0, 8], sizes = [16, 1], strides = [1, 1]} : vector<16x16xf32> to vector<16x1xf32>
    %174 = vector.extract_strided_slice %26 {offsets = [8, 0], sizes = [1, 256], strides = [1, 1]} : vector<16x256xf32> to vector<1x256xf32>
    %175 = vector.broadcast %173 : vector<16x1xf32> to vector<16x256xf32>
    %176 = vector.broadcast %174 : vector<1x256xf32> to vector<16x256xf32>
    %177 = arith.mulf %175, %176 : vector<16x256xf32>
    %178 = arith.mulf %172, %162 : vector<16x256xf32>
    %179 = arith.addf %178, %177 : vector<16x256xf32>
    %180 = vector.extract_strided_slice %30 {offsets = [0, 8], sizes = [16, 1], strides = [1, 1]} : vector<16x16xf32> to vector<16x1xf32>
    %181 = vector.broadcast %180 : vector<16x1xf32> to vector<16x256xf32>
    %182 = arith.mulf %181, %179 : vector<16x256xf32>
    %cst_43 = arith.constant dense<0.000000e+00> : vector<256xf32>
    %183 = vector.multi_reduction <add>, %182, %cst_43 [0] : vector<16x256xf32> to vector<256xf32>
    %184 = vector.shape_cast %183 : vector<256xf32> to vector<1x256xf32>
    %c8 = arith.constant 8 : index
    %c0_44 = arith.constant 0 : index
    %185 = vector.load %arg14[%c8, %c0_44] : memref<16x256xf32, #tpu.memory_space<vmem>>, vector<1x256xf32>
    tpu.vector_store %arg14[%c8, %c0_44], %184 {strides = array<i32>} : memref<16x256xf32, #tpu.memory_space<vmem>>, vector<1x256xf32>,
    %186 = vector.extract_strided_slice %25 {offsets = [9, 0], sizes = [1, 256], strides = [1, 1]} : vector<16x256xf32> to vector<1x256xf32>
    %187 = vector.broadcast %186 : vector<1x256xf32> to vector<16x256xf32>
    %188 = arith.mulf %187, %31 : vector<16x256xf32>
    %189 = math.exp %188 : vector<16x256xf32>
    %190 = vector.extract_strided_slice %28 {offsets = [0, 9], sizes = [16, 1], strides = [1, 1]} : vector<16x16xf32> to vector<16x1xf32>
    %191 = vector.extract_strided_slice %26 {offsets = [9, 0], sizes = [1, 256], strides = [1, 1]} : vector<16x256xf32> to vector<1x256xf32>
    %192 = vector.broadcast %190 : vector<16x1xf32> to vector<16x256xf32>
    %193 = vector.broadcast %191 : vector<1x256xf32> to vector<16x256xf32>
    %194 = arith.mulf %192, %193 : vector<16x256xf32>
    %195 = arith.mulf %189, %179 : vector<16x256xf32>
    %196 = arith.addf %195, %194 : vector<16x256xf32>
    %197 = vector.extract_strided_slice %30 {offsets = [0, 9], sizes = [16, 1], strides = [1, 1]} : vector<16x16xf32> to vector<16x1xf32>
    %198 = vector.broadcast %197 : vector<16x1xf32> to vector<16x256xf32>
    %199 = arith.mulf %198, %196 : vector<16x256xf32>
    %cst_45 = arith.constant dense<0.000000e+00> : vector<256xf32>
    %200 = vector.multi_reduction <add>, %199, %cst_45 [0] : vector<16x256xf32> to vector<256xf32>
    %201 = vector.shape_cast %200 : vector<256xf32> to vector<1x256xf32>
    %c9 = arith.constant 9 : index
    %c0_46 = arith.constant 0 : index
    %202 = vector.load %arg14[%c9, %c0_46] : memref<16x256xf32, #tpu.memory_space<vmem>>, vector<1x256xf32>
    tpu.vector_store %arg14[%c9, %c0_46], %201 {strides = array<i32>} : memref<16x256xf32, #tpu.memory_space<vmem>>, vector<1x256xf32>,
    %203 = vector.extract_strided_slice %25 {offsets = [10, 0], sizes = [1, 256], strides = [1, 1]} : vector<16x256xf32> to vector<1x256xf32>
    %204 = vector.broadcast %203 : vector<1x256xf32> to vector<16x256xf32>
    %205 = arith.mulf %204, %31 : vector<16x256xf32>
    %206 = math.exp %205 : vector<16x256xf32>
    %207 = vector.extract_strided_slice %28 {offsets = [0, 10], sizes = [16, 1], strides = [1, 1]} : vector<16x16xf32> to vector<16x1xf32>
    %208 = vector.extract_strided_slice %26 {offsets = [10, 0], sizes = [1, 256], strides = [1, 1]} : vector<16x256xf32> to vector<1x256xf32>
    %209 = vector.broadcast %207 : vector<16x1xf32> to vector<16x256xf32>
    %210 = vector.broadcast %208 : vector<1x256xf32> to vector<16x256xf32>
    %211 = arith.mulf %209, %210 : vector<16x256xf32>
    %212 = arith.mulf %206, %196 : vector<16x256xf32>
    %213 = arith.addf %212, %211 : vector<16x256xf32>
    %214 = vector.extract_strided_slice %30 {offsets = [0, 10], sizes = [16, 1], strides = [1, 1]} : vector<16x16xf32> to vector<16x1xf32>
    %215 = vector.broadcast %214 : vector<16x1xf32> to vector<16x256xf32>
    %216 = arith.mulf %215, %213 : vector<16x256xf32>
    %cst_47 = arith.constant dense<0.000000e+00> : vector<256xf32>
    %217 = vector.multi_reduction <add>, %216, %cst_47 [0] : vector<16x256xf32> to vector<256xf32>
    %218 = vector.shape_cast %217 : vector<256xf32> to vector<1x256xf32>
    %c10 = arith.constant 10 : index
    %c0_48 = arith.constant 0 : index
    %219 = vector.load %arg14[%c10, %c0_48] : memref<16x256xf32, #tpu.memory_space<vmem>>, vector<1x256xf32>
    tpu.vector_store %arg14[%c10, %c0_48], %218 {strides = array<i32>} : memref<16x256xf32, #tpu.memory_space<vmem>>, vector<1x256xf32>,
    %220 = vector.extract_strided_slice %25 {offsets = [11, 0], sizes = [1, 256], strides = [1, 1]} : vector<16x256xf32> to vector<1x256xf32>
    %221 = vector.broadcast %220 : vector<1x256xf32> to vector<16x256xf32>
    %222 = arith.mulf %221, %31 : vector<16x256xf32>
    %223 = math.exp %222 : vector<16x256xf32>
    %224 = vector.extract_strided_slice %28 {offsets = [0, 11], sizes = [16, 1], strides = [1, 1]} : vector<16x16xf32> to vector<16x1xf32>
    %225 = vector.extract_strided_slice %26 {offsets = [11, 0], sizes = [1, 256], strides = [1, 1]} : vector<16x256xf32> to vector<1x256xf32>
    %226 = vector.broadcast %224 : vector<16x1xf32> to vector<16x256xf32>
    %227 = vector.broadcast %225 : vector<1x256xf32> to vector<16x256xf32>
    %228 = arith.mulf %226, %227 : vector<16x256xf32>
    %229 = arith.mulf %223, %213 : vector<16x256xf32>
    %230 = arith.addf %229, %228 : vector<16x256xf32>
    %231 = vector.extract_strided_slice %30 {offsets = [0, 11], sizes = [16, 1], strides = [1, 1]} : vector<16x16xf32> to vector<16x1xf32>
    %232 = vector.broadcast %231 : vector<16x1xf32> to vector<16x256xf32>
    %233 = arith.mulf %232, %230 : vector<16x256xf32>
    %cst_49 = arith.constant dense<0.000000e+00> : vector<256xf32>
    %234 = vector.multi_reduction <add>, %233, %cst_49 [0] : vector<16x256xf32> to vector<256xf32>
    %235 = vector.shape_cast %234 : vector<256xf32> to vector<1x256xf32>
    %c11 = arith.constant 11 : index
    %c0_50 = arith.constant 0 : index
    %236 = vector.load %arg14[%c11, %c0_50] : memref<16x256xf32, #tpu.memory_space<vmem>>, vector<1x256xf32>
    tpu.vector_store %arg14[%c11, %c0_50], %235 {strides = array<i32>} : memref<16x256xf32, #tpu.memory_space<vmem>>, vector<1x256xf32>,
    %237 = vector.extract_strided_slice %25 {offsets = [12, 0], sizes = [1, 256], strides = [1, 1]} : vector<16x256xf32> to vector<1x256xf32>
    %238 = vector.broadcast %237 : vector<1x256xf32> to vector<16x256xf32>
    %239 = arith.mulf %238, %31 : vector<16x256xf32>
    %240 = math.exp %239 : vector<16x256xf32>
    %241 = vector.extract_strided_slice %28 {offsets = [0, 12], sizes = [16, 1], strides = [1, 1]} : vector<16x16xf32> to vector<16x1xf32>
    %242 = vector.extract_strided_slice %26 {offsets = [12, 0], sizes = [1, 256], strides = [1, 1]} : vector<16x256xf32> to vector<1x256xf32>
    %243 = vector.broadcast %241 : vector<16x1xf32> to vector<16x256xf32>
    %244 = vector.broadcast %242 : vector<1x256xf32> to vector<16x256xf32>
    %245 = arith.mulf %243, %244 : vector<16x256xf32>
    %246 = arith.mulf %240, %230 : vector<16x256xf32>
    %247 = arith.addf %246, %245 : vector<16x256xf32>
    %248 = vector.extract_strided_slice %30 {offsets = [0, 12], sizes = [16, 1], strides = [1, 1]} : vector<16x16xf32> to vector<16x1xf32>
    %249 = vector.broadcast %248 : vector<16x1xf32> to vector<16x256xf32>
    %250 = arith.mulf %249, %247 : vector<16x256xf32>
    %cst_51 = arith.constant dense<0.000000e+00> : vector<256xf32>
    %251 = vector.multi_reduction <add>, %250, %cst_51 [0] : vector<16x256xf32> to vector<256xf32>
    %252 = vector.shape_cast %251 : vector<256xf32> to vector<1x256xf32>
    %c12 = arith.constant 12 : index
    %c0_52 = arith.constant 0 : index
    %253 = vector.load %arg14[%c12, %c0_52] : memref<16x256xf32, #tpu.memory_space<vmem>>, vector<1x256xf32>
    tpu.vector_store %arg14[%c12, %c0_52], %252 {strides = array<i32>} : memref<16x256xf32, #tpu.memory_space<vmem>>, vector<1x256xf32>,
    %254 = vector.extract_strided_slice %25 {offsets = [13, 0], sizes = [1, 256], strides = [1, 1]} : vector<16x256xf32> to vector<1x256xf32>
    %255 = vector.broadcast %254 : vector<1x256xf32> to vector<16x256xf32>
    %256 = arith.mulf %255, %31 : vector<16x256xf32>
    %257 = math.exp %256 : vector<16x256xf32>
    %258 = vector.extract_strided_slice %28 {offsets = [0, 13], sizes = [16, 1], strides = [1, 1]} : vector<16x16xf32> to vector<16x1xf32>
    %259 = vector.extract_strided_slice %26 {offsets = [13, 0], sizes = [1, 256], strides = [1, 1]} : vector<16x256xf32> to vector<1x256xf32>
    %260 = vector.broadcast %258 : vector<16x1xf32> to vector<16x256xf32>
    %261 = vector.broadcast %259 : vector<1x256xf32> to vector<16x256xf32>
    %262 = arith.mulf %260, %261 : vector<16x256xf32>
    %263 = arith.mulf %257, %247 : vector<16x256xf32>
    %264 = arith.addf %263, %262 : vector<16x256xf32>
    %265 = vector.extract_strided_slice %30 {offsets = [0, 13], sizes = [16, 1], strides = [1, 1]} : vector<16x16xf32> to vector<16x1xf32>
    %266 = vector.broadcast %265 : vector<16x1xf32> to vector<16x256xf32>
    %267 = arith.mulf %266, %264 : vector<16x256xf32>
    %cst_53 = arith.constant dense<0.000000e+00> : vector<256xf32>
    %268 = vector.multi_reduction <add>, %267, %cst_53 [0] : vector<16x256xf32> to vector<256xf32>
    %269 = vector.shape_cast %268 : vector<256xf32> to vector<1x256xf32>
    %c13 = arith.constant 13 : index
    %c0_54 = arith.constant 0 : index
    %270 = vector.load %arg14[%c13, %c0_54] : memref<16x256xf32, #tpu.memory_space<vmem>>, vector<1x256xf32>
    tpu.vector_store %arg14[%c13, %c0_54], %269 {strides = array<i32>} : memref<16x256xf32, #tpu.memory_space<vmem>>, vector<1x256xf32>,
    %271 = vector.extract_strided_slice %25 {offsets = [14, 0], sizes = [1, 256], strides = [1, 1]} : vector<16x256xf32> to vector<1x256xf32>
    %272 = vector.broadcast %271 : vector<1x256xf32> to vector<16x256xf32>
    %273 = arith.mulf %272, %31 : vector<16x256xf32>
    %274 = math.exp %273 : vector<16x256xf32>
    %275 = vector.extract_strided_slice %28 {offsets = [0, 14], sizes = [16, 1], strides = [1, 1]} : vector<16x16xf32> to vector<16x1xf32>
    %276 = vector.extract_strided_slice %26 {offsets = [14, 0], sizes = [1, 256], strides = [1, 1]} : vector<16x256xf32> to vector<1x256xf32>
    %277 = vector.broadcast %275 : vector<16x1xf32> to vector<16x256xf32>
    %278 = vector.broadcast %276 : vector<1x256xf32> to vector<16x256xf32>
    %279 = arith.mulf %277, %278 : vector<16x256xf32>
    %280 = arith.mulf %274, %264 : vector<16x256xf32>
    %281 = arith.addf %280, %279 : vector<16x256xf32>
    %282 = vector.extract_strided_slice %30 {offsets = [0, 14], sizes = [16, 1], strides = [1, 1]} : vector<16x16xf32> to vector<16x1xf32>
    %283 = vector.broadcast %282 : vector<16x1xf32> to vector<16x256xf32>
    %284 = arith.mulf %283, %281 : vector<16x256xf32>
    %cst_55 = arith.constant dense<0.000000e+00> : vector<256xf32>
    %285 = vector.multi_reduction <add>, %284, %cst_55 [0] : vector<16x256xf32> to vector<256xf32>
    %286 = vector.shape_cast %285 : vector<256xf32> to vector<1x256xf32>
    %c14 = arith.constant 14 : index
    %c0_56 = arith.constant 0 : index
    %287 = vector.load %arg14[%c14, %c0_56] : memref<16x256xf32, #tpu.memory_space<vmem>>, vector<1x256xf32>
    tpu.vector_store %arg14[%c14, %c0_56], %286 {strides = array<i32>} : memref<16x256xf32, #tpu.memory_space<vmem>>, vector<1x256xf32>,
    %288 = vector.extract_strided_slice %25 {offsets = [15, 0], sizes = [1, 256], strides = [1, 1]} : vector<16x256xf32> to vector<1x256xf32>
    %289 = vector.broadcast %288 : vector<1x256xf32> to vector<16x256xf32>
    %290 = arith.mulf %289, %31 : vector<16x256xf32>
    %291 = math.exp %290 : vector<16x256xf32>
    %292 = vector.extract_strided_slice %28 {offsets = [0, 15], sizes = [16, 1], strides = [1, 1]} : vector<16x16xf32> to vector<16x1xf32>
    %293 = vector.extract_strided_slice %26 {offsets = [15, 0], sizes = [1, 256], strides = [1, 1]} : vector<16x256xf32> to vector<1x256xf32>
    %294 = vector.broadcast %292 : vector<16x1xf32> to vector<16x256xf32>
    %295 = vector.broadcast %293 : vector<1x256xf32> to vector<16x256xf32>
    %296 = arith.mulf %294, %295 : vector<16x256xf32>
    %297 = arith.mulf %291, %281 : vector<16x256xf32>
    %298 = arith.addf %297, %296 : vector<16x256xf32>
    %299 = vector.extract_strided_slice %30 {offsets = [0, 15], sizes = [16, 1], strides = [1, 1]} : vector<16x16xf32> to vector<16x1xf32>
    %300 = vector.broadcast %299 : vector<16x1xf32> to vector<16x256xf32>
    %301 = arith.mulf %300, %298 : vector<16x256xf32>
    %cst_57 = arith.constant dense<0.000000e+00> : vector<256xf32>
    %302 = vector.multi_reduction <add>, %301, %cst_57 [0] : vector<16x256xf32> to vector<256xf32>
    %303 = vector.shape_cast %302 : vector<256xf32> to vector<1x256xf32>
    %c15 = arith.constant 15 : index
    %c0_58 = arith.constant 0 : index
    %304 = vector.load %arg14[%c15, %c0_58] : memref<16x256xf32, #tpu.memory_space<vmem>>, vector<1x256xf32>
    tpu.vector_store %arg14[%c15, %c0_58], %303 {strides = array<i32>} : memref<16x256xf32, #tpu.memory_space<vmem>>, vector<1x256xf32>,
    %c0_59 = arith.constant 0 : index
    %c0_60 = arith.constant 0 : index
    %305 = vector.load %arg13[%c0_59, %c0_60] : memref<16x256xf32, #tpu.memory_space<vmem>>, vector<16x256xf32>
    tpu.vector_store %arg13[%c0_59, %c0_60], %298 {strides = array<i32>} : memref<16x256xf32, #tpu.memory_space<vmem>>, vector<16x256xf32>,
    %c0_61 = arith.constant 0 : index
    %c0_62 = arith.constant 0 : index
    %306 = vector.load %arg14[%c0_61, %c0_62] : memref<16x256xf32, #tpu.memory_space<vmem>>, vector<16x256xf32>
    %c0_63 = arith.constant 0 : index
    %c0_64 = arith.constant 0 : index
    %307 = vector.load %arg10[%c0_63, %c0_64] : memref<1x256xf32, #tpu.memory_space<vmem>>, vector<1x256xf32>
    %308 = vector.broadcast %307 : vector<1x256xf32> to vector<16x256xf32>
    %309 = arith.mulf %308, %4 : vector<16x256xf32>
    %310 = arith.addf %306, %309 : vector<16x256xf32>
    %cst_65 = arith.constant 0.000000e+00 : f32
    %311 = vector.broadcast %cst_65 : f32 to vector<16x256xf32>
    %312 = arith.subf %311, %6 : vector<16x256xf32>
    %313 = math.exp %312 : vector<16x256xf32>
    %cst_66 = arith.constant 1.000000e+00 : f32
    %314 = vector.broadcast %cst_66 : f32 to vector<16x256xf32>
    %315 = arith.addf %314, %313 : vector<16x256xf32>
    %cst_67 = arith.constant 1.000000e+00 : f32
    %316 = vector.broadcast %cst_67 : f32 to vector<16x256xf32>
    %317 = arith.divf %316, %315 : vector<16x256xf32>
    %318 = arith.mulf %6, %317 : vector<16x256xf32>
    %319 = arith.mulf %310, %318 : vector<16x256xf32>
    %320 = arith.truncf %319 : vector<16x256xf32> to vector<16x256xbf16>
    %c0_68 = arith.constant 0 : index
    %c0_69 = arith.constant 0 : index
    %321 = vector.load %arg11[%c0_68, %c0_69] : memref<256x128xbf16, #tpu.memory_space<vmem>>, vector<256x128xbf16>
    %cst_70 = arith.constant dense<0.000000e+00> : vector<16x128xf32>
    %322 = tpu.matmul %320, %321, %cst_70 {dimension_numbers = #tpu.dot_dimension_numbers<[1], [0], [0], [1], [0, 0, 1, 1], [], []>} : vector<16x256xbf16>, vector<256x128xbf16>, vector<16x128xf32> -> vector<16x128xf32>
    %c0_71 = arith.constant 0 : index
    %c0_72 = arith.constant 0 : index
    %c0_73 = arith.constant 0 : index
    %323 = vector.load %arg12[%c0_71, %c0_72, %c0_73] : memref<1x16x128xf32, #tpu.memory_space<vmem>>, vector<1x16x128xf32>
    %324 = vector.shape_cast %323 : vector<1x16x128xf32> to vector<16x128xf32>
    %325 = vector.shape_cast %322 : vector<16x128xf32> to vector<1x16x128xf32>
    tpu.vector_store %arg12[%c0_71, %c0_72, %c0_73], %325 {strides = array<i32>} : memref<1x16x128xf32, #tpu.memory_space<vmem>>, vector<1x16x128xf32>,
    return
  }
  func.func @transform_0(%arg0: i32, %arg1: i32) -> (i32, i32, i32) {
    %c0_i32 = arith.constant 0 : i32
    %c0_i32_0 = arith.constant 0 : i32
    return %arg0, %arg1, %c0_i32 : i32, i32, i32
  }
  func.func @transform_1(%arg0: i32, %arg1: i32) -> (i32, i32, i32) {
    %c0_i32 = arith.constant 0 : i32
    %c0_i32_0 = arith.constant 0 : i32
    return %arg0, %arg1, %c0_i32 : i32, i32, i32
  }
  func.func @transform_2(%arg0: i32, %arg1: i32) -> (i32, i32) {
    %c0_i32 = arith.constant 0 : i32
    %c0_i32_0 = arith.constant 0 : i32
    %c0_i32_1 = arith.constant 0 : i32
    return %c0_i32, %c0_i32_0 : i32, i32
  }
  func.func @transform_3(%arg0: i32, %arg1: i32) -> (i32, i32) {
    %c0_i32 = arith.constant 0 : i32
    %c0_i32_0 = arith.constant 0 : i32
    %c0_i32_1 = arith.constant 0 : i32
    return %c0_i32, %c0_i32_0 : i32, i32
  }
  func.func @transform_4(%arg0: i32, %arg1: i32) -> (i32, i32) {
    %c0_i32 = arith.constant 0 : i32
    %c0_i32_0 = arith.constant 0 : i32
    %c0_i32_1 = arith.constant 0 : i32
    return %c0_i32, %c0_i32_0 : i32, i32
  }
  func.func @transform_5(%arg0: i32, %arg1: i32) -> (i32, i32) {
    %c0_i32 = arith.constant 0 : i32
    %c0_i32_0 = arith.constant 0 : i32
    %c0_i32_1 = arith.constant 0 : i32
    return %c0_i32, %c0_i32_0 : i32, i32
  }
  func.func @transform_6(%arg0: i32, %arg1: i32) -> (i32, i32) {
    %c0_i32 = arith.constant 0 : i32
    %c0_i32_0 = arith.constant 0 : i32
    %c0_i32_1 = arith.constant 0 : i32
    return %c0_i32, %c0_i32_0 : i32, i32
  }
  func.func @transform_7(%arg0: i32, %arg1: i32) -> (i32, i32) {
    %c0_i32 = arith.constant 0 : i32
    %c0_i32_0 = arith.constant 0 : i32
    %c0_i32_1 = arith.constant 0 : i32
    return %c0_i32, %c0_i32_0 : i32, i32
  }
  func.func @transform_8(%arg0: i32, %arg1: i32) -> (i32, i32) {
    %c0_i32 = arith.constant 0 : i32
    %c0_i32_0 = arith.constant 0 : i32
    %c0_i32_1 = arith.constant 0 : i32
    return %c0_i32, %c0_i32_0 : i32, i32
  }
  func.func @transform_9(%arg0: i32, %arg1: i32) -> (i32, i32) {
    %c0_i32 = arith.constant 0 : i32
    %c0_i32_0 = arith.constant 0 : i32
    %c0_i32_1 = arith.constant 0 : i32
    return %c0_i32, %c0_i32_0 : i32, i32
  }
  func.func @transform_10(%arg0: i32, %arg1: i32) -> (i32, i32, i32) {
    %c0_i32 = arith.constant 0 : i32
    %c0_i32_0 = arith.constant 0 : i32
    return %arg0, %arg1, %c0_i32 : i32, i32, i32
  }
}

</mosaic_0001>

<bundles_post_ra>
// kernel: block1d_apply.7
= control target key start
LH: loop header
LB: loop body
LE: loop exit
PB: predicated region body
PF: predicated region fallthrough
CT: control target
= control target key end

     0   :  { %s1132_s12 = smov 0   ;;  %s2115_s0 = inlined_call_operand.vmem [shape: f32[512,128], index: 0, kind: input, shape index: {}]   ;;  %s2116_s1 = inlined_call_operand.vmem [shape: f32[1,128], index: 1, kind: input, shape index: {}]   ;;  %s2117_s2 = inlined_call_operand.vmem [shape: f32[1,128], index: 2, kind: input, shape index: {}]   ;;  %s2118_s3 = inlined_call_operand.vmem [shape: f32[512,128], index: 3, kind: output, shape index: {}]  }
   0x1 LB: > { %s1013_s13 = sadd.s32 4294967295, %s1109_s12   ;;  %p1017_p0 = scmp.ge.s32.totalorder %s1109_s12, 1  ;;  %s1109_s12 = sphi %s1132_s12, %s13_s12  }
   0x2   : > { %p138_p1 = scmp.lt.s32.totalorder %s1109_s12, 3 }
   0x4   : > { %p139_p2 = pnand %p1017_p0, %p138_p1 }
   0x5   : > { %s1018_s14 = sshll.u32 (!%p139_p2), %s1013_s13, 5 }
   0x6   : > { %142 = sbr.rel (%p139_p2) target bundleno = 386 (0x182), region = 32  ;;  %p163_p3 = scmp.lt.s32.totalorder (!%p139_p2), %s1018_s14, 63 }
   0xb   : > { %s2140_s14 = smov (!%p163_p3, %s1018_s14), 63  ;;  %v1111_v32 = vmov 128.0  }
   0xc   : > { %s1019_s15 = sshll.u32 %s2140_s14, 3  ;;  %1035 = vrcp.f32 %v1111_v32 }
   0xd   : > { %s1148_s18 = scalar_lea.vmem %s2115_s0, %s1019_s15  ;;  %s1539_s25 = scalar_lea.vmem %s2118_s3, %s1019_s15 }
   0xe   : > { %v1151_v0 = vld [vmem:[%s1148_s18 + $0x20] sm:$0xff]  ;;  %v1154_v1 = vld [vmem:[%s1148_s18 + $0x10] sm:$0xff]  ;;  %v1163_v3 = vld [vmem:[%s1148_s18 + $0x28] sm:$0xff] }
   0xf   : > { %v1157_v2 = vld [vmem:[%s1148_s18] sm:$0xff]  ;;  %214 = vadd.xlane.f32.xlu2 %v1151_v0  ;;  %210 = vadd.xlane.f32.xlu1 %v1154_v1  ;;  %v1166_v4 = vld [vmem:[%s1148_s18 + $0x18] sm:$0xff]  ;;  %v1169_v5 = vld [vmem:[%s1148_s18 + $0x8] sm:$0xff] }
  0x10   : > { %206 = vadd.xlane.f32.xlu0 %v1157_v2  ;;  %v1175_v6 = vld [vmem:[%s1148_s18 + $0x40] sm:$0xff]  ;;  %v1178_v7 = vld [vmem:[%s1148_s18 + $0x38] sm:$0xff]  ;;  %v1181_v8 = vld [vmem:[%s1148_s18 + $0x30] sm:$0xff] }
  0x11   : > { %v1187_v9 = vld [vmem:[%s1148_s18 + $0x58] sm:$0xff]  ;;  %v1190_v10 = vld [vmem:[%s1148_s18 + $0x50] sm:$0xff]  ;;  %v1193_v11 = vld [vmem:[%s1148_s18 + $0x48] sm:$0xff] }
  0x12   : > { %v1199_v12 = vld [vmem:[%s1148_s18 + $0x70] sm:$0xff]  ;;  %v1202_v13 = vld [vmem:[%s1148_s18 + $0x68] sm:$0xff]  ;;  %v1205_v14 = vld [vmem:[%s1148_s18 + $0x60] sm:$0xff]  ;;  %v1036_v33 = vpop.eup %1035 }
  0x13   : > { %v1211_v15 = vld [vmem:[%s1148_s18 + $0x88] sm:$0xff]  ;;  %v1214_v16 = vld [vmem:[%s1148_s18 + $0x80] sm:$0xff]  ;;  %v1217_v17 = vld [vmem:[%s1148_s18 + $0x78] sm:$0xff]  ;;  %v271_v34 = vmul.f32 128.0, %v1036_v33  ;;  %vm275_vm0 = vweird.f32 %v1036_v33 }
  0x14   : > { %v1223_v18 = vld [vmem:[%s1148_s18 + $0xa0] sm:$0xff]  ;;  %v1226_v19 = vld [vmem:[%s1148_s18 + $0x98] sm:$0xff]  ;;  %v1229_v20 = vld [vmem:[%s1148_s18 + $0x90] sm:$0xff] }
  0x15   : > { %v1235_v21 = vld [vmem:[%s1148_s18 + $0xb8] sm:$0xff]  ;;  %v1238_v22 = vld [vmem:[%s1148_s18 + $0xb0] sm:$0xff]  ;;  %v1241_v23 = vld [vmem:[%s1148_s18 + $0xa8] sm:$0xff]  ;;  %v272_v35 = vsub.f32 1.0, %v271_v34 }
  0x16   : > { %v1247_v24 = vld [vmem:[%s1148_s18 + $0xd0] sm:$0xff]  ;;  %v1250_v25 = vld [vmem:[%s1148_s18 + $0xc8] sm:$0xff]  ;;  %v1253_v26 = vld [vmem:[%s1148_s18 + $0xc0] sm:$0xff] }
  0x17   : > { %216 = vadd.xlane.f32.xlu2 %v1163_v3  ;;  %212 = vadd.xlane.f32.xlu1 %v1166_v4  ;;  %v1259_v27 = vld [vmem:[%s1148_s18 + $0xe8] sm:$0xff]  ;;  %v1262_v28 = vld [vmem:[%s1148_s18 + $0xe0] sm:$0xff]  ;;  %v1265_v29 = vld [vmem:[%s1148_s18 + $0xd8] sm:$0xff]  ;;  %v273_v36 = vmul.f32 %v1036_v33, %v272_v35 }
  0x18   : > { %208 = vadd.xlane.f32.xlu0 %v1169_v5  ;;  %v1271_v30 = vld [vmem:[%s1148_s18 + $0xf8] sm:$0xff]  ;;  %v1274_v31 = vld [vmem:[%s1148_s18 + $0xf0] sm:$0xff] }
  0x19   : > { %v274_v37 = vadd.f32 %v1036_v33, %v273_v36 }
  0x1b   : > { %v1278_v38 = vsel %vm275_vm0, %v1036_v33, %v274_v37 }
  0x1f   : > { %222 = vadd.xlane.f32.xlu2 %v1175_v6  ;;  %220 = vadd.xlane.f32.xlu1 %v1178_v7 }
  0x20   : > { %218 = vadd.xlane.f32.xlu0 %v1181_v8 }
  0x27   : > { %228 = vadd.xlane.f32.xlu2 %v1187_v9  ;;  %226 = vadd.xlane.f32.xlu1 %v1190_v10 }
  0x28   : > { %224 = vadd.xlane.f32.xlu0 %v1193_v11 }
  0x2f   : > { %234 = vadd.xlane.f32.xlu2 %v1199_v12  ;;  %232 = vadd.xlane.f32.xlu1 %v1202_v13 }
  0x30   : > { %230 = vadd.xlane.f32.xlu0 %v1205_v14 }
  0x37   : > { %240 = vadd.xlane.f32.xlu2 %v1211_v15  ;;  %238 = vadd.xlane.f32.xlu1 %v1214_v16 }
  0x38   : > { %236 = vadd.xlane.f32.xlu0 %v1217_v17 }
  0x3f   : > { %246 = vadd.xlane.f32.xlu2 %v1223_v18  ;;  %244 = vadd.xlane.f32.xlu1 %v1226_v19 }
  0x40   : > { %242 = vadd.xlane.f32.xlu0 %v1229_v20 }
  0x47   : > { %252 = vadd.xlane.f32.xlu2 %v1235_v21  ;;  %250 = vadd.xlane.f32.xlu1 %v1238_v22 }
  0x48   : > { %248 = vadd.xlane.f32.xlu0 %v1241_v23 }
  0x4f   : > { %258 = vadd.xlane.f32.xlu2 %v1247_v24  ;;  %256 = vadd.xlane.f32.xlu1 %v1250_v25 }
  0x50   : > { %254 = vadd.xlane.f32.xlu0 %v1253_v26 }
  0x57   : > { %264 = vadd.xlane.f32.xlu2 %v1259_v27  ;;  %262 = vadd.xlane.f32.xlu1 %v1262_v28 }
  0x58   : > { %260 = vadd.xlane.f32.xlu0 %v1265_v29 }
  0x5f   : > { %268 = vadd.xlane.f32.xlu1 %v1271_v30 }
  0x60   : > { %266 = vadd.xlane.f32.xlu0 %v1274_v31 }
  0x82   : > { %v215_v39 = vpop.xlane.xlu2 %214  ;;  %v211_v40 = vpop.xlane.xlu1 %210 }
  0x83   : > { %v279_v41 = vmul.f32 %v1278_v38, %v211_v40  ;;  %v207_v42 = vpop.xlane.xlu0 %206  ;;  %v281_v56 = vmul.f32 %v1278_v38, %v215_v39 }
  0x84   : > { %v277_v43 = vmul.f32 %v1278_v38, %v207_v42 }
  0x85   : > { %v1283_v44 = vsub.f32 %v1154_v1, %v279_v41  ;;  %v1312_v61 = vsub.f32 %v1151_v0, %v281_v56 }
  0x86   : > { %v1286_v45 = vsub.f32 %v1157_v2, %v277_v43 }
  0x87   : > { %v343_v46 = vmul.f32 %v1283_v44, %v1283_v44  ;;  %v345_v32 = vmul.f32 %v1312_v61, %v1312_v61 }
  0x88   : > { %v341_v47 = vmul.f32 %v1286_v45, %v1286_v45 }
  0x89   : > { %377 = vadd.xlane.f32.xlu1 %v343_v46 }
  0x8a   : > { %373 = vadd.xlane.f32.xlu2 %v341_v47  ;;  %v217_v48 = vpop.xlane.xlu2 %216  ;;  %v213_v49 = vpop.xlane.xlu1 %212 }
  0x8b   : > { %v282_v50 = vmul.f32 %v1278_v38, %v217_v48  ;;  %v280_v51 = vmul.f32 %v1278_v38, %v213_v49  ;;  %v209_v52 = vpop.xlane.xlu0 %208 }
  0x8c   : > { %v278_v53 = vmul.f32 %v1278_v38, %v209_v52 }
  0x8d   : > { %v1296_v54 = vsub.f32 %v1163_v3, %v282_v50  ;;  %v1299_v55 = vsub.f32 %v1166_v4, %v280_v51 }
  0x8e   : > { %v1303_v57 = vsub.f32 %v1169_v5, %v278_v53 }
  0x8f   : > { %v346_v58 = vmul.f32 %v1296_v54, %v1296_v54  ;;  %v344_v59 = vmul.f32 %v1299_v55, %v1299_v55 }
  0x90   : > { %v342_v60 = vmul.f32 %v1303_v57, %v1303_v57 }
  0x91   : > { %383 = vadd.xlane.f32.xlu1 %v346_v58 }
  0x92   : > { %379 = vadd.xlane.f32.xlu2 %v344_v59  ;;  %375 = vadd.xlane.f32.xlu0 %v342_v60  ;;  %v223_v62 = vpop.xlane.xlu2 %222  ;;  %v221_v63 = vpop.xlane.xlu1 %220 }
  0x93   : > { %v285_v1 = vmul.f32 %v1278_v38, %v223_v62  ;;  %v219_v2 = vpop.xlane.xlu0 %218  ;;  %v284_v0 = vmul.f32 %v1278_v38, %v221_v63 }
  0x94   : > { %v283_v3 = vmul.f32 %v1278_v38, %v219_v2 }
  0x95   : > { %v1317_v4 = vsub.f32 %v1175_v6, %v285_v1  ;;  %v1330_v6 = vsub.f32 %v1178_v7, %v284_v0 }
  0x96   : > { %v1320_v5 = vsub.f32 %v1181_v8, %v283_v3 }
  0x97   : > { %v349_v33 = vmul.f32 %v1317_v4, %v1317_v4  ;;  %v348_v42 = vmul.f32 %v1330_v6, %v1330_v6 }
  0x98   : > { %v347_v34 = vmul.f32 %v1320_v5, %v1320_v5 }
  0x99   : > { %389 = vadd.xlane.f32.xlu1 %v349_v33 }
  0x9a   : > { %381 = vadd.xlane.f32.xlu0 %v345_v32  ;;  %385 = vadd.xlane.f32.xlu2 %v347_v34  ;;  %v229_v35 = vpop.xlane.xlu2 %228  ;;  %v227_v8 = vpop.xlane.xlu1 %226 }
  0x9b   : > { %v288_v36 = vmul.f32 %v1278_v38, %v229_v35  ;;  %v225_v37 = vpop.xlane.xlu0 %224  ;;  %v287_v43 = vmul.f32 %v1278_v38, %v227_v8 }
  0x9c   : > { %v286_v39 = vmul.f32 %v1278_v38, %v225_v37 }
  0x9d   : > { %v1335_v40 = vsub.f32 %v1187_v9, %v288_v36  ;;  %v1348_v9 = vsub.f32 %v1190_v10, %v287_v43 }
  0x9e   : > { %v1338_v41 = vsub.f32 %v1193_v11, %v286_v39 }
  0x9f   : > { %v352_v7 = vmul.f32 %v1335_v40, %v1335_v40  ;;  %v351_v53 = vmul.f32 %v1348_v9, %v1348_v9 }
  0xa0   : > { %v350_v46 = vmul.f32 %v1338_v41, %v1338_v41 }
  0xa1   : > { %395 = vadd.xlane.f32.xlu1 %v352_v7 }
  0xa2   : > { %387 = vadd.xlane.f32.xlu0 %v348_v42  ;;  %391 = vadd.xlane.f32.xlu2 %v350_v46  ;;  %v235_v47 = vpop.xlane.xlu2 %234  ;;  %v233_v11 = vpop.xlane.xlu1 %232 }
  0xa3   : > { %v291_v48 = vmul.f32 %v1278_v38, %v235_v47  ;;  %v231_v49 = vpop.xlane.xlu0 %230  ;;  %v290_v56 = vmul.f32 %v1278_v38, %v233_v11 }
  0xa4   : > { %v289_v50 = vmul.f32 %v1278_v38, %v231_v49 }
  0xa5   : > { %v1353_v51 = vsub.f32 %v1199_v12, %v291_v48  ;;  %v1366_v12 = vsub.f32 %v1202_v13, %v290_v56 }
  0xa6   : > { %v1356_v52 = vsub.f32 %v1205_v14, %v289_v50 }
  0xa7   : > { %v355_v10 = vmul.f32 %v1353_v51, %v1353_v51  ;;  %v354_v3 = vmul.f32 %v1366_v12, %v1366_v12 }
  0xa8   : > { %v353_v58 = vmul.f32 %v1356_v52, %v1356_v52 }
  0xa9   : > { %401 = vadd.xlane.f32.xlu1 %v355_v10 }
  0xaa   : > { %393 = vadd.xlane.f32.xlu0 %v351_v53  ;;  %397 = vadd.xlane.f32.xlu2 %v353_v58  ;;  %v241_v59 = vpop.xlane.xlu2 %240  ;;  %v239_v14 = vpop.xlane.xlu1 %238 }
  0xab   : > { %v294_v60 = vmul.f32 %v1278_v38, %v241_v59  ;;  %v237_v62 = vpop.xlane.xlu0 %236  ;;  %v293_v32 = vmul.f32 %v1278_v38, %v239_v14 }
  0xac   : > { %v292_v63 = vmul.f32 %v1278_v38, %v237_v62 }
  0xad   : > { %v1371_v1 = vsub.f32 %v1211_v15, %v294_v60  ;;  %v1384_v15 = vsub.f32 %v1214_v16, %v293_v32 }
  0xae   : > { %v1374_v2 = vsub.f32 %v1217_v17, %v292_v63 }
  0xaf   : > { %v358_v13 = vmul.f32 %v1371_v1, %v1371_v1  ;;  %v357_v39 = vmul.f32 %v1384_v15, %v1384_v15 }
  0xb0   : > { %v356_v0 = vmul.f32 %v1374_v2, %v1374_v2 }
  0xb1   : > { %407 = vadd.xlane.f32.xlu1 %v358_v13 }
  0xb2   : > { %399 = vadd.xlane.f32.xlu0 %v354_v3  ;;  %403 = vadd.xlane.f32.xlu2 %v356_v0  ;;  %v247_v33 = vpop.xlane.xlu2 %246  ;;  %v245_v17 = vpop.xlane.xlu1 %244 }
  0xb3   : > { %v297_v34 = vmul.f32 %v1278_v38, %v247_v33  ;;  %v243_v35 = vpop.xlane.xlu0 %242  ;;  %v296_v42 = vmul.f32 %v1278_v38, %v245_v17 }
  0xb4   : > { %v295_v8 = vmul.f32 %v1278_v38, %v243_v35 }
  0xb5   : > { %v1389_v36 = vsub.f32 %v1223_v18, %v297_v34  ;;  %v1402_v18 = vsub.f32 %v1226_v19, %v296_v42 }
  0xb6   : > { %v1392_v37 = vsub.f32 %v1229_v20, %v295_v8 }
  0xb7   : > { %v361_v16 = vmul.f32 %v1389_v36, %v1389_v36  ;;  %v360_v50 = vmul.f32 %v1402_v18, %v1402_v18 }
  0xb8   : > { %v359_v43 = vmul.f32 %v1392_v37, %v1392_v37 }
  0xb9   : > { %413 = vadd.xlane.f32.xlu1 %v361_v16 }
  0xba   : > { %405 = vadd.xlane.f32.xlu0 %v357_v39  ;;  %409 = vadd.xlane.f32.xlu2 %v359_v43  ;;  %v253_v7 = vpop.xlane.xlu2 %252  ;;  %v251_v20 = vpop.xlane.xlu1 %250 }
  0xbb   : > { %v300_v46 = vmul.f32 %v1278_v38, %v253_v7  ;;  %v249_v47 = vpop.xlane.xlu0 %248  ;;  %v299_v53 = vmul.f32 %v1278_v38, %v251_v20 }
  0xbc   : > { %v298_v11 = vmul.f32 %v1278_v38, %v249_v47 }
  0xbd   : > { %v1407_v48 = vsub.f32 %v1235_v21, %v300_v46  ;;  %v1420_v21 = vsub.f32 %v1238_v22, %v299_v53 }
  0xbe   : > { %v1410_v49 = vsub.f32 %v1241_v23, %v298_v11 }
  0xbf   : > { %v364_v19 = vmul.f32 %v1407_v48, %v1407_v48  ;;  %v363_v63 = vmul.f32 %v1420_v21, %v1420_v21 }
  0xc0   : > { %v362_v56 = vmul.f32 %v1410_v49, %v1410_v49 }
  0xc1   : > { %419 = vadd.xlane.f32.xlu1 %v364_v19 }
  0xc2   : > { %411 = vadd.xlane.f32.xlu0 %v360_v50  ;;  %415 = vadd.xlane.f32.xlu2 %v362_v56  ;;  %v259_v10 = vpop.xlane.xlu2 %258  ;;  %v257_v23 = vpop.xlane.xlu1 %256 }
  0xc3   : > { %v303_v58 = vmul.f32 %v1278_v38, %v259_v10  ;;  %v255_v59 = vpop.xlane.xlu0 %254  ;;  %v302_v3 = vmul.f32 %v1278_v38, %v257_v23 }
  0xc4   : > { %v301_v14 = vmul.f32 %v1278_v38, %v255_v59 }
  0xc5   : > { %v1425_v60 = vsub.f32 %v1247_v24, %v303_v58  ;;  %v1438_v24 = vsub.f32 %v1250_v25, %v302_v3 }
  0xc6   : > { %v1428_v62 = vsub.f32 %v1253_v26, %v301_v14 }
  0xc7   : > { %v367_v22 = vmul.f32 %v1425_v60, %v1425_v60  ;;  %v366_v8 = vmul.f32 %v1438_v24, %v1438_v24 }
  0xc8   : > { %v365_v32 = vmul.f32 %v1428_v62, %v1428_v62 }
  0xc9   : > { %425 = vadd.xlane.f32.xlu1 %v367_v22 }
  0xca   : > { %417 = vadd.xlane.f32.xlu0 %v363_v63  ;;  %421 = vadd.xlane.f32.xlu2 %v365_v32  ;;  %v265_v13 = vpop.xlane.xlu2 %264  ;;  %v263_v26 = vpop.xlane.xlu1 %262 }
  0xcb   : > { %v306_v0 = vmul.f32 %v1278_v38, %v265_v13  ;;  %v261_v33 = vpop.xlane.xlu0 %260  ;;  %v305_v39 = vmul.f32 %v1278_v38, %v263_v26 }
  0xcc   : > { %v304_v17 = vmul.f32 %v1278_v38, %v261_v33 }
  0xcd   : > { %v1443_v34 = vsub.f32 %v1259_v27, %v306_v0  ;;  %v1456_v27 = vsub.f32 %v1262_v28, %v305_v39 }
  0xce   : > { %v1446_v35 = vsub.f32 %v1265_v29, %v304_v17 }
  0xcf   : > { %v370_v25 = vmul.f32 %v1443_v34, %v1443_v34  ;;  %v369_v20 = vmul.f32 %v1456_v27, %v1456_v27 }
  0xd0   : > { %v368_v42 = vmul.f32 %v1446_v35, %v1446_v35 }
  0xd1   : > { %431 = vadd.xlane.f32.xlu1 %v370_v25 }
  0xd2   : > { %423 = vadd.xlane.f32.xlu0 %v366_v8  ;;  %427 = vadd.xlane.f32.xlu2 %v368_v42  ;;  %v269_v29 = vpop.xlane.xlu1 %268 }
  0xd3   : > { %v267_v16 = vpop.xlane.xlu0 %266  ;;  %v308_v46 = vmul.f32 %v1278_v38, %v269_v29 }
  0xd4   : > { %v307_v43 = vmul.f32 %v1278_v38, %v267_v16 }
  0xd5   : > { %v1468_v28 = vsub.f32 %v1271_v30, %v308_v46 }
  0xd6   : > { %v1460_v7 = vsub.f32 %v1274_v31, %v307_v43 }
  0xd7   : > { %v372_v11 = vmul.f32 %v1468_v28, %v1468_v28 }
  0xd8   : > { %v371_v47 = vmul.f32 %v1460_v7, %v1460_v7 }
  0xda   : > { %429 = vadd.xlane.f32.xlu0 %v369_v20  ;;  %433 = vadd.xlane.f32.xlu2 %v371_v47 }
  0xe2   : > { %435 = vadd.xlane.f32.xlu0 %v372_v11 }
  0xfc   : > { %v378_v50 = vpop.xlane.xlu1 %377 }
  0xfd   : > { %v439_v31 = vmul.f32 %v378_v50, %v1278_v38  ;;  %v374_v53 = vpop.xlane.xlu2 %373 }
  0xfe   : > { %v437_v19 = vmul.f32 %v374_v53, %v1278_v38 }
  0xff   : > { %v471_v56 = vadd.f32 1e-06, %v439_v31 }
 0x100   : > { %v469_v10 = vadd.f32 1e-06, %v437_v19 }
 0x101   : > { %1037 = vrsqrt.f32 %v471_v56  ;;  %vm527_vm1 = vweird.f32 %v471_v56 }
 0x102   : > { %1039 = vrsqrt.f32 %v469_v10  ;;  %vm507_vm3 = vweird.f32 %v469_v10 }
 0x104   : > { %v384_v23 = vpop.xlane.xlu1 %383 }
 0x105   : > { %v442_v58 = vmul.f32 %v384_v23, %v1278_v38  ;;  %v380_v59 = vpop.xlane.xlu2 %379  ;;  %v376_v30 = vpop.xlane.xlu0 %375 }
 0x106   : > { %v440_v14 = vmul.f32 %v380_v59, %v1278_v38  ;;  %v438_v63 = vmul.f32 %v376_v30, %v1278_v38  ;;  %v1505_v59 = vld [vmem:[%s2116_s1] ss:$0 sm:$0xff] }
 0x107   : > { %v1038_v3 = vpop.eup %1037  ;;  %v1477_v22 = vadd.f32 1e-06, %v442_v58 }
 0x108   : > { %v1040_v32 = vpop.eup %1039  ;;  %v522_v13 = vmul.f32 %v1038_v3, %v471_v56  ;;  %v1479_v26 = vadd.f32 1e-06, %v440_v14  ;;  %v1481_v0 = vadd.f32 1e-06, %v438_v63  ;;  %vm528_vm2 = vweird.f32 %v1038_v3  ;;  %v1522_v56 = vld [vmem:[%s2117_s2] ss:$0 sm:$0xff] }
 0x109   : > { %v502_v33 = vmul.f32 %v1040_v32, %v469_v10  ;;  %1041 = vrsqrt.f32 %v1477_v22  ;;  %vm508_vm4 = vweird.f32 %v1040_v32  ;;  %vm557_vm5 = vweird.f32 %v1477_v22  ;;  %vm529_vm7 = vmor %vm527_vm1, %vm528_vm2 }
 0x10a   : > { %v523_v17 = vmul.f32 %v1038_v3, %v522_v13  ;;  %1043 = vrsqrt.f32 %v1479_v26  ;;  %vm537_vm6 = vweird.f32 %v1479_v26  ;;  %vm509_vm8 = vmor %vm507_vm3, %vm508_vm4  ;;  %vm517_vm9 = vweird.f32 %v1481_v0 }
 0x10b   : > { %v503_v8 = vmul.f32 %v1040_v32, %v502_v33  ;;  %1045 = vrsqrt.f32 %v1481_v0 }
 0x10c   : > { %v524_v39 = vmul.f32 0.5, %v523_v17  ;;  %v390_v25 = vpop.xlane.xlu1 %389 }
 0x10d   : > { %v504_v42 = vmul.f32 0.5, %v503_v8  ;;  %v445_v16 = vmul.f32 %v390_v25, %v1278_v38  ;;  %v386_v29 = vpop.xlane.xlu2 %385  ;;  %v382_v43 = vpop.xlane.xlu0 %381 }
 0x10e   : > { %v525_v20 = vsub.f32 1.5, %v524_v39  ;;  %v443_v46 = vmul.f32 %v386_v29, %v1278_v38  ;;  %v441_v63 = vmul.f32 %v382_v43, %v1278_v38 }
 0x10f   : > { %v1488_v47 = vpop.eup %1041  ;;  %v505_v11 = vsub.f32 1.5, %v504_v42  ;;  %v1491_v50 = vadd.f32 1e-06, %v445_v16 }
 0x110   : > { %v1493_v31 = vpop.eup %1043  ;;  %v526_v53 = vmul.f32 %v1038_v3, %v525_v20  ;;  %v552_v19 = vmul.f32 %v1488_v47, %v1477_v22  ;;  %v1498_v23 = vadd.f32 1e-06, %v443_v46  ;;  %vm558_vm10 = vweird.f32 %v1488_v47 }
 0x111   : > { %v1500_v58 = vpop.eup %1045  ;;  %v506_v30 = vmul.f32 %v1040_v32, %v505_v11  ;;  %v532_v14 = vmul.f32 %v1493_v31, %v1479_v26  ;;  %1047 = vrsqrt.f32 %v1491_v50  ;;  %vm538_vm11 = vweird.f32 %v1493_v31  ;;  %vm1550_vm12 = vmor %vm557_vm5, %vm558_vm10 }
 0x112   : > { %v530_v13 = vsel %vm529_vm7, %v1038_v3, %v526_v53  ;;  %v553_v33 = vmul.f32 %v1488_v47, %v552_v19  ;;  %v512_v17 = vmul.f32 %v1500_v58, %v1481_v0  ;;  %1049 = vrsqrt.f32 %v1498_v23  ;;  %vm539_vm0 = vmor %vm537_vm6, %vm538_vm11 }
 0x113   : > { %v823_v8 = vmul.f32 %v530_v13, %v1283_v44  ;;  %v510_v39 = vsel %vm509_vm8, %v1040_v32, %v506_v30  ;;  %v533_v10 = vmul.f32 %v1493_v31, %v532_v14  ;;  %v1532_v20 = vadd.f32 1e-06, %v441_v63 }
 0x114   : > { %v821_v3 = vmul.f32 %v510_v39, %v1286_v45  ;;  %v554_v25 = vmul.f32 0.5, %v553_v33  ;;  %v513_v42 = vmul.f32 %v1500_v58, %v512_v17  ;;  %v396_v16 = vpop.xlane.xlu1 %395  ;;  %vm518_vm13 = vweird.f32 %v1500_v58 }
 0x115   : > { %v859_v29 = vmul.f32 %v1505_v59, %v823_v8  ;;  %v534_v43 = vmul.f32 0.5, %v533_v10  ;;  %v392_v44 = vpop.xlane.xlu2 %391  ;;  %v388_v32 = vpop.xlane.xlu0 %387  ;;  %v448_v53 = vmul.f32 %v396_v16, %v1278_v38  ;;  %1051 = vrsqrt.f32 %v1532_v20  ;;  %vm519_vm1 = vmor %vm517_vm9, %vm518_vm13 }
 0x116   : > { %v857_v45 = vmul.f32 %v1505_v59, %v821_v3  ;;  %v555_v46 = vsub.f32 1.5, %v554_v25  ;;  %v514_v11 = vmul.f32 0.5, %v513_v42  ;;  %vm587_vm14 = vweird.f32 %v1491_v50 }
 0x117   : > { %v1543_v19 = vpop.eup %1047  ;;  %v895_v30 = vadd.f32 %v1522_v56, %v859_v29  ;;  %v535_v63 = vsub.f32 1.5, %v534_v43  ;;  %v1564_v39 = vadd.f32 1e-06, %v448_v53  ;;  %v446_v16 = vmul.f32 %v392_v44, %v1278_v38 }
 0x118   : > { %v893_v13 = vadd.f32 %v1522_v56, %v857_v45  ;;  %v556_v33 = vmul.f32 %v1488_v47, %v555_v46  ;;  %v515_v17 = vsub.f32 1.5, %v514_v11  ;;  %v582_v8 = vmul.f32 %v1543_v19, %v1491_v50  ;;  %v1566_v10 = vpop.eup %1049 }
 0x119   : > { %927 = vst [vmem:[%s1539_s25 + $0x10] sm:$0xff] %v895_v30  ;;  %v536_v22 = vmul.f32 %v1493_v31, %v535_v63  ;;  %vm588_vm15 = vweird.f32 %v1543_v19  ;;  %v444_v26 = vmul.f32 %v388_v32, %v1278_v38  ;;  %1053 = vrsqrt.f32 %v1564_v39 }
 0x11a   : > { %925 = vst [vmem:[%s1539_s25] sm:$0xff] %v893_v13  ;;  %v560_v3 = vsel %vm1550_vm12, %v1488_v47, %v556_v33  ;;  %v516_v25 = vmul.f32 %v1500_v58, %v515_v17  ;;  %v583_v42 = vmul.f32 %v1543_v19, %v582_v8  ;;  %v562_v47 = vmul.f32 %v1566_v10, %v1498_v23  ;;  %vm1606_vm3 = vmor %vm587_vm14, %vm588_vm15 }
 0x11b   : > { %v826_v29 = vmul.f32 %v560_v3, %v1296_v54  ;;  %v540_v43 = vsel %vm539_vm0, %v1493_v31, %v536_v22  ;;  %v1591_v44 = vpop.eup %1051  ;;  %vm567_vm2 = vweird.f32 %v1498_v23  ;;  %v1610_v17 = vadd.f32 1e-06, %v446_v16 }
 0x11c   : > { %v824_v45 = vmul.f32 %v540_v43, %v1299_v55  ;;  %v520_v46 = vsel %vm519_vm1, %v1500_v58, %v516_v25  ;;  %v584_v11 = vmul.f32 0.5, %v583_v42  ;;  %v402_v54 = vpop.xlane.xlu1 %401  ;;  %v563_v53 = vmul.f32 %v1566_v10, %v562_v47 }
 0x11d   : > { %v862_v31 = vmul.f32 %v1505_v59, %v826_v29  ;;  %v822_v0 = vmul.f32 %v520_v46, %v1303_v57  ;;  %v398_v30 = vpop.xlane.xlu2 %397  ;;  %v394_v14 = vpop.xlane.xlu0 %393  ;;  %v542_v58 = vmul.f32 %v1591_v44, %v1532_v20  ;;  %v1615_v25 = vadd.f32 1e-06, %v444_v26 }
 0x11e   : > { %v860_v32 = vmul.f32 %v1505_v59, %v824_v45  ;;  %v585_v55 = vsub.f32 1.5, %v584_v11  ;;  %v564_v33 = vmul.f32 0.5, %v563_v53  ;;  %vm568_vm4 = vweird.f32 %v1566_v10 }
 0x11f   : > { %v898_v63 = vadd.f32 %v1522_v56, %v862_v31  ;;  %v858_v13 = vmul.f32 %v1505_v59, %v822_v0  ;;  %v543_v3 = vmul.f32 %v1591_v44, %v542_v58  ;;  %1055 = vrsqrt.f32 %v1610_v17  ;;  %v1621_v29 = vpop.eup %1053  ;;  %vm569_vm7 = vmor %vm567_vm2, %vm568_vm4 }
 0x120   : > { %v896_v8 = vadd.f32 %v1522_v56, %v860_v32  ;;  %v586_v22 = vmul.f32 %v1543_v19, %v585_v55  ;;  %v565_v50 = vsub.f32 1.5, %v564_v33  ;;  %vm547_vm5 = vweird.f32 %v1532_v20 }
 0x121   : > { %930 = vst [vmem:[%s1539_s25 + $0x28] sm:$0xff] %v898_v63  ;;  %v894_v42 = vadd.f32 %v1522_v56, %v858_v13  ;;  %v544_v43 = vmul.f32 0.5, %v543_v3  ;;  %1057 = vrsqrt.f32 %v1615_v25  ;;  %vm548_vm6 = vweird.f32 %v1591_v44 }
 0x122   : > { %928 = vst [vmem:[%s1539_s25 + $0x18] sm:$0xff] %v896_v8  ;;  %v590_v16 = vsel %vm1606_vm3, %v1543_v19, %v586_v22  ;;  %v566_v26 = vmul.f32 %v1566_v10, %v565_v50  ;;  %v612_v45 = vmul.f32 %v1621_v29, %v1564_v39  ;;  %v451_v19 = vmul.f32 %v402_v54, %v1278_v38  ;;  %vm549_vm9 = vmor %vm547_vm5, %vm548_vm6 }
 0x123   : > { %926 = vst [vmem:[%s1539_s25 + $0x8] sm:$0xff] %v894_v42  ;;  %v829_v47 = vmul.f32 %v590_v16, %v1317_v4  ;;  %v545_v46 = vsub.f32 1.5, %v544_v43  ;;  %v449_v11 = vmul.f32 %v398_v30, %v1278_v38  ;;  %v447_v31 = vmul.f32 %v394_v14, %v1278_v38 }
 0x124   : > { %v408_v0 = vpop.xlane.xlu1 %407  ;;  %v570_v53 = vsel %vm569_vm7, %v1566_v10, %v566_v26  ;;  %v613_v32 = vmul.f32 %v1621_v29, %v612_v45  ;;  %vm617_vm8 = vweird.f32 %v1564_v39  ;;  %v1647_v30 = vadd.f32 1e-06, %v451_v19 }
 0x125   : > { %v865_v4 = vmul.f32 %v1505_v59, %v829_v47  ;;  %v454_v55 = vmul.f32 %v408_v0, %v1278_v38  ;;  %v404_v58 = vpop.xlane.xlu2 %403  ;;  %v400_v63 = vpop.xlane.xlu0 %399  ;;  %v827_v23 = vmul.f32 %v570_v53, %v1320_v5  ;;  %v546_v54 = vmul.f32 %v1591_v44, %v545_v46 }
 0x126   : > { %v1649_v14 = vpop.eup %1055  ;;  %v614_v10 = vmul.f32 0.5, %v613_v32  ;;  %vm618_vm10 = vweird.f32 %v1621_v29  ;;  %v1657_v57 = vadd.f32 1e-06, %v449_v11  ;;  %v1665_v3 = vadd.f32 1e-06, %v447_v31 }
 0x127   : > { %v901_v13 = vadd.f32 %v1522_v56, %v865_v4  ;;  %v1659_v5 = vpop.eup %1057  ;;  %v863_v33 = vmul.f32 %v1505_v59, %v827_v23  ;;  %v550_v8 = vsel %vm549_vm9, %v1591_v44, %v546_v54  ;;  %v592_v22 = vmul.f32 %v1649_v14, %v1610_v17  ;;  %vm1676_vm11 = vmor %vm617_vm8, %vm618_vm10 }
 0x128   : > { %v825_v20 = vmul.f32 %v550_v8, %v1312_v61  ;;  %v615_v42 = vsub.f32 1.5, %v614_v10  ;;  %v572_v50 = vmul.f32 %v1659_v5, %v1615_v25  ;;  %v1671_v16 = vadd.f32 1e-06, %v454_v55 }
 0x129   : > { %933 = vst [vmem:[%s1539_s25 + $0x40] sm:$0xff] %v901_v13  ;;  %v899_v43 = vadd.f32 %v1522_v56, %v863_v33  ;;  %v593_v47 = vmul.f32 %v1649_v14, %v592_v22  ;;  %vm597_vm12 = vweird.f32 %v1610_v17  ;;  %1059 = vrsqrt.f32 %v1647_v30 }
 0x12a   : > { %v861_v61 = vmul.f32 %v1505_v59, %v825_v20  ;;  %v616_v26 = vmul.f32 %v1621_v29, %v615_v42  ;;  %v573_v45 = vmul.f32 %v1659_v5, %v572_v50  ;;  %1061 = vrsqrt.f32 %v1657_v57 }
 0x12b   : > { %931 = vst [vmem:[%s1539_s25 + $0x30] sm:$0xff] %v899_v43  ;;  %v594_v39 = vmul.f32 0.5, %v593_v47  ;;  %vm598_vm13 = vweird.f32 %v1649_v14  ;;  %vm577_vm14 = vweird.f32 %v1615_v25  ;;  %1063 = vrsqrt.f32 %v1665_v3 }
 0x12c   : > { %v897_v46 = vadd.f32 %v1522_v56, %v861_v61  ;;  %v620_v19 = vsel %vm1676_vm11, %v1621_v29, %v616_v26  ;;  %v574_v11 = vmul.f32 0.5, %v573_v45  ;;  %1065 = vrsqrt.f32 %v1671_v16  ;;  %v414_v31 = vpop.xlane.xlu1 %413  ;;  %vm599_vm3 = vmor %vm597_vm12, %vm598_vm13 }
 0x12d   : > { %v410_v0 = vpop.xlane.xlu2 %409  ;;  %v832_v4 = vmul.f32 %v620_v19, %v1335_v40  ;;  %v595_v53 = vsub.f32 1.5, %v594_v39  ;;  %vm578_vm15 = vweird.f32 %v1659_v5  ;;  %v452_v32 = vmul.f32 %v404_v58, %v1278_v38  ;;  %v406_v55 = vpop.xlane.xlu0 %405 }
 0x12e   : > { %929 = vst [vmem:[%s1539_s25 + $0x20] sm:$0xff] %v897_v46  ;;  %v575_v23 = vsub.f32 1.5, %v574_v11  ;;  %vm647_vm0 = vweird.f32 %v1647_v30  ;;  %vm627_vm1 = vweird.f32 %v1657_v57  ;;  %v450_v29 = vmul.f32 %v400_v63, %v1278_v38  ;;  %vm579_vm4 = vmor %vm577_vm14, %vm578_vm15 }
 0x12f   : > { %v1703_v54 = vpop.eup %1059  ;;  %v868_v13 = vmul.f32 %v1505_v59, %v832_v4  ;;  %v596_v40 = vmul.f32 %v1649_v14, %v595_v53  ;;  %vm677_vm2 = vweird.f32 %v1671_v16  ;;  %v457_v10 = vmul.f32 %v414_v31, %v1278_v38 }
 0x130   : > { %v455_v58 = vmul.f32 %v410_v0, %v1278_v38  ;;  %v1710_v33 = vpop.eup %1061  ;;  %v576_v63 = vmul.f32 %v1659_v5, %v575_v23  ;;  %v642_v8 = vmul.f32 %v1703_v54, %v1647_v30  ;;  %v1719_v22 = vadd.f32 1e-06, %v452_v32 }
 0x131   : > { %v453_v20 = vmul.f32 %v406_v55, %v1278_v38  ;;  %v1722_v42 = vpop.eup %1063  ;;  %v904_v50 = vadd.f32 %v1522_v56, %v868_v13  ;;  %v600_v43 = vsel %vm599_vm3, %v1649_v14, %v596_v40  ;;  %vm648_vm5 = vweird.f32 %v1703_v54 }
 0x132   : > { %v622_v17 = vmul.f32 %v1710_v33, %v1657_v57  ;;  %v1066_v44 = vpop.eup %1065  ;;  %v830_v47 = vmul.f32 %v600_v43, %v1338_v41  ;;  %v580_v61 = vsel %vm579_vm4, %v1659_v5, %v576_v63  ;;  %v643_v26 = vmul.f32 %v1703_v54, %v642_v8  ;;  %vm1755_vm8 = vmor %vm647_vm0, %vm648_vm5 }
 0x133   : > { %v602_v14 = vmul.f32 %v1722_v42, %v1665_v3  ;;  %936 = vst [vmem:[%s1539_s25 + $0x58] sm:$0xff] %v904_v50  ;;  %v828_v45 = vmul.f32 %v580_v61, %v1330_v6  ;;  %v672_v39 = vmul.f32 %v1066_v44, %v1671_v16  ;;  %v1742_v46 = vadd.f32 1e-06, %v450_v29 }
 0x134   : > { %v623_v25 = vmul.f32 %v1710_v33, %v622_v17  ;;  %v866_v19 = vmul.f32 %v1505_v59, %v830_v47  ;;  %v644_v11 = vmul.f32 0.5, %v643_v26  ;;  %vm628_vm6 = vweird.f32 %v1710_v33 }
 0x135   : > { %v603_v41 = vmul.f32 %v1722_v42, %v602_v14  ;;  %v864_v5 = vmul.f32 %v1505_v59, %v828_v45  ;;  %v673_v0 = vmul.f32 %v1066_v44, %v672_v39  ;;  %1067 = vrsqrt.f32 %v1719_v22  ;;  %v1765_v8 = vpop.xlane.xlu0 %411  ;;  %vm1773_vm10 = vmor %vm627_vm1, %vm628_vm6 }
 0x136   : > { %v624_v31 = vmul.f32 0.5, %v623_v25  ;;  %v902_v6 = vadd.f32 %v1522_v56, %v866_v19  ;;  %v645_v4 = vsub.f32 1.5, %v644_v11  ;;  %vm678_vm7 = vweird.f32 %v1066_v44 }
 0x137   : > { %v604_v53 = vmul.f32 0.5, %v603_v41  ;;  %v900_v32 = vadd.f32 %v1522_v56, %v864_v5  ;;  %v674_v29 = vmul.f32 0.5, %v673_v0  ;;  %1069 = vrsqrt.f32 %v1742_v46  ;;  %vm1787_vm12 = vmor %vm677_vm2, %vm678_vm7 }
 0x138   : > { %v625_v23 = vsub.f32 1.5, %v624_v31  ;;  %934 = vst [vmem:[%s1539_s25 + $0x48] sm:$0xff] %v902_v6  ;;  %v646_v13 = vmul.f32 %v1703_v54, %v645_v4  ;;  %vm608_vm9 = vweird.f32 %v1722_v42  ;;  %v1763_v63 = vadd.f32 1e-06, %v457_v10  ;;  %v416_v10 = vpop.xlane.xlu2 %415 }
 0x139   : > { %v605_v40 = vsub.f32 1.5, %v604_v53  ;;  %932 = vst [vmem:[%s1539_s25 + $0x38] sm:$0xff] %v900_v32  ;;  %vm607_vm11 = vweird.f32 %v1665_v3  ;;  %v675_v43 = vsub.f32 1.5, %v674_v29  ;;  %v1778_v17 = vadd.f32 1e-06, %v455_v58  ;;  %v420_v58 = vpop.xlane.xlu1 %419 }
 0x13a   : > { %v626_v30 = vmul.f32 %v1710_v33, %v625_v23  ;;  %v650_v47 = vsel %vm1755_vm8, %v1703_v54, %v646_v13  ;;  %1071 = vrsqrt.f32 %v1763_v63  ;;  %v1792_v3 = vadd.f32 1e-06, %v453_v20  ;;  %vm609_vm13 = vmor %vm607_vm11, %vm608_vm9 }
 0x13b   : > { %v606_v61 = vmul.f32 %v1722_v42, %v605_v40  ;;  %v1794_v26 = vpop.eup %1067  ;;  %v835_v14 = vmul.f32 %v650_v47, %v1353_v51  ;;  %v676_v16 = vmul.f32 %v1066_v44, %v675_v43  ;;  %1073 = vrsqrt.f32 %v1778_v17 }
 0x13c   : > { %v630_v54 = vsel %vm1773_vm10, %v1710_v33, %v626_v30  ;;  %v652_v25 = vmul.f32 %v1794_v26, %v1719_v22  ;;  %vm657_vm14 = vweird.f32 %v1719_v22  ;;  %vm637_vm15 = vweird.f32 %v1742_v46 }
 0x13d   : > { %v833_v45 = vmul.f32 %v630_v54, %v1356_v52  ;;  %v610_v20 = vsel %vm609_vm13, %v1722_v42, %v606_v61  ;;  %v1807_v39 = vpop.eup %1069  ;;  %v871_v51 = vmul.f32 %v1505_v59, %v835_v14  ;;  %v680_v33 = vsel %vm1787_vm12, %v1066_v44, %v676_v16  ;;  %v1841_v40 = vpop.xlane.xlu0 %417 }
 0x13e   : > { %v831_v19 = vmul.f32 %v610_v20, %v1348_v9  ;;  %v838_v52 = vmul.f32 %v680_v33, %v1371_v1  ;;  %v653_v42 = vmul.f32 %v1794_v26, %v652_v25  ;;  %v632_v41 = vmul.f32 %v1807_v39, %v1742_v46 }
 0x13f   : > { %v869_v11 = vmul.f32 %v1505_v59, %v833_v45  ;;  %v907_v9 = vadd.f32 %v1522_v56, %v871_v51  ;;  %vm707_vm0 = vweird.f32 %v1763_v63  ;;  %1075 = vrsqrt.f32 %v1792_v3 }
 0x140   : > { %v867_v5 = vmul.f32 %v1505_v59, %v831_v19  ;;  %v1824_v44 = vpop.eup %1071  ;;  %v874_v31 = vmul.f32 %v1505_v59, %v838_v52  ;;  %v654_v0 = vmul.f32 0.5, %v653_v42  ;;  %v633_v6 = vmul.f32 %v1807_v39, %v632_v41  ;;  %v422_v47 = vpop.xlane.xlu2 %421 }
 0x141   : > { %v905_v1 = vadd.f32 %v1522_v56, %v869_v11  ;;  %v1829_v4 = vpop.eup %1073  ;;  %939 = vst [vmem:[%s1539_s25 + $0x70] sm:$0xff] %v907_v9  ;;  %vm658_vm1 = vweird.f32 %v1794_v26  ;;  %v702_v32 = vmul.f32 %v1824_v44, %v1763_v63  ;;  %vm687_vm2 = vweird.f32 %v1778_v17  ;;  %v426_v54 = vpop.xlane.xlu1 %425 }
 0x142   : > { %v903_v53 = vadd.f32 %v1522_v56, %v867_v5  ;;  %v910_v55 = vadd.f32 %v1522_v56, %v874_v31  ;;  %v655_v23 = vsub.f32 1.5, %v654_v0  ;;  %v634_v29 = vmul.f32 0.5, %v633_v6  ;;  %vm659_vm5 = vmor %vm657_vm14, %vm658_vm1 }
 0x143   : > { %937 = vst [vmem:[%s1539_s25 + $0x60] sm:$0xff] %v905_v1  ;;  %v682_v13 = vmul.f32 %v1829_v4, %v1778_v17  ;;  %vm638_vm3 = vweird.f32 %v1807_v39  ;;  %v703_v30 = vmul.f32 %v1824_v44, %v702_v32  ;;  %v460_v50 = vmul.f32 %v420_v58, %v1278_v38 }
 0x144   : > { %935 = vst [vmem:[%s1539_s25 + $0x50] sm:$0xff] %v903_v53  ;;  %v458_v43 = vmul.f32 %v416_v10, %v1278_v38  ;;  %v656_v61 = vmul.f32 %v1794_v26, %v655_v23  ;;  %v635_v57 = vsub.f32 1.5, %v634_v29  ;;  %vm708_vm4 = vweird.f32 %v1824_v44  ;;  %vm639_vm6 = vmor %vm637_vm15, %vm638_vm3 }
 0x145   : > { %942 = vst [vmem:[%s1539_s25 + $0x88] sm:$0xff] %v910_v55  ;;  %v683_v14 = vmul.f32 %v1829_v4, %v682_v13  ;;  %v1076_v16 = vpop.eup %1075  ;;  %v704_v45 = vmul.f32 0.5, %v703_v30  ;;  %v1856_v58 = vadd.f32 1e-06, %v460_v50  ;;  %v456_v20 = vmul.f32 %v1765_v8, %v1278_v38  ;;  %vm1877_vm7 = vmor %vm707_vm0, %vm708_vm4  ;;  %v1901_v55 = vpop.xlane.xlu0 %423 }
 0x146   : > { %v1858_v10 = vadd.f32 1e-06, %v458_v43  ;;  %v660_v25 = vsel %vm659_vm5, %v1794_v26, %v656_v61  ;;  %v636_v51 = vmul.f32 %v1807_v39, %v635_v57  ;;  %v662_v33 = vmul.f32 %v1076_v16, %v1792_v3 }
 0x147   : > { %v684_v19 = vmul.f32 0.5, %v683_v14  ;;  %v836_v11 = vmul.f32 %v660_v25, %v1374_v2  ;;  %v705_v22 = vsub.f32 1.5, %v704_v45  ;;  %1077 = vrsqrt.f32 %v1856_v58 }
 0x148   : > { %v463_v52 = vmul.f32 %v426_v54, %v1278_v38  ;;  %v640_v8 = vsel %vm639_vm6, %v1807_v39, %v636_v51  ;;  %vm688_vm8 = vweird.f32 %v1829_v4  ;;  %v663_v46 = vmul.f32 %v1076_v16, %v662_v33  ;;  %v428_v29 = vpop.xlane.xlu2 %427 }
 0x149   : > { %v685_v2 = vsub.f32 1.5, %v684_v19  ;;  %v872_v42 = vmul.f32 %v1505_v59, %v836_v11  ;;  %v834_v41 = vmul.f32 %v640_v8, %v1366_v12  ;;  %v706_v9 = vmul.f32 %v1824_v44, %v705_v22  ;;  %vm689_vm10 = vmor %vm687_vm2, %vm688_vm8  ;;  %v432_v54 = vpop.xlane.xlu1 %431 }
 0x14a   : > { %1079 = vrsqrt.f32 %v1858_v10  ;;  %v664_v63 = vmul.f32 0.5, %v663_v46  ;;  %vm668_vm9 = vweird.f32 %v1076_v16  ;;  %v1887_v5 = vadd.f32 1e-06, %v456_v20 }
 0x14b   : > { %v686_v39 = vmul.f32 %v1829_v4, %v685_v2  ;;  %v908_v1 = vadd.f32 %v1522_v56, %v872_v42  ;;  %v870_v31 = vmul.f32 %v1505_v59, %v834_v41  ;;  %v710_v0 = vsel %vm1877_vm7, %v1824_v44, %v706_v9 }
 0x14c   : > { %v1896_v12 = vadd.f32 1e-06, %v463_v52  ;;  %v841_v6 = vmul.f32 %v710_v0, %v1389_v36  ;;  %v665_v32 = vsub.f32 1.5, %v664_v63  ;;  %1081 = vrsqrt.f32 %v1887_v5 }
 0x14d   : > { %v690_v53 = vsel %vm689_vm10, %v1829_v4, %v686_v39  ;;  %v1903_v23 = vpop.eup %1077  ;;  %940 = vst [vmem:[%s1539_s25 + $0x78] sm:$0xff] %v908_v1  ;;  %v906_v44 = vadd.f32 %v1522_v56, %v870_v31  ;;  %vm667_vm11 = vweird.f32 %v1792_v3  ;;  %vm737_vm13 = vweird.f32 %v1856_v58  ;;  %v1965_v39 = vpop.xlane.xlu0 %429 }
 0x14e   : > { %v839_v17 = vmul.f32 %v690_v53, %v1392_v37  ;;  %1083 = vrsqrt.f32 %v1896_v12  ;;  %v877_v36 = vmul.f32 %v1505_v59, %v841_v6  ;;  %v666_v13 = vmul.f32 %v1076_v16, %v665_v32  ;;  %vm669_vm12 = vmor %vm667_vm11, %vm668_vm9 }
 0x14f   : > { %v732_v4 = vmul.f32 %v1903_v23, %v1856_v58  ;;  %938 = vst [vmem:[%s1539_s25 + $0x68] sm:$0xff] %v906_v44  ;;  %v461_v37 = vmul.f32 %v422_v47, %v1278_v38  ;;  %v459_v43 = vmul.f32 %v1841_v40, %v1278_v38  ;;  %vm717_vm14 = vweird.f32 %v1858_v10 }
 0x150   : > { %v1913_v30 = vpop.eup %1079  ;;  %v875_v50 = vmul.f32 %v1505_v59, %v839_v17  ;;  %v913_v3 = vadd.f32 %v1522_v56, %v877_v36  ;;  %v670_v61 = vsel %vm669_vm12, %v1076_v16, %v666_v13  ;;  %vm738_vm15 = vweird.f32 %v1903_v23  ;;  %v434_v31 = vpop.xlane.xlu2 %433 }
 0x151   : > { %v733_v57 = vmul.f32 %v1903_v23, %v732_v4  ;;  %v712_v14 = vmul.f32 %v1913_v30, %v1858_v10  ;;  %v837_v20 = vmul.f32 %v670_v61, %v1384_v15  ;;  %v1929_v47 = vadd.f32 1e-06, %v461_v37  ;;  %vm1955_vm2 = vmor %vm737_vm13, %vm738_vm15 }
 0x152   : > { %v911_v45 = vadd.f32 %v1522_v56, %v875_v50  ;;  %v1931_v25 = vpop.eup %1081  ;;  %945 = vst [vmem:[%s1539_s25 + $0xa0] sm:$0xff] %v913_v3  ;;  %v1936_v51 = vadd.f32 1e-06, %v459_v43  ;;  %vm697_vm0 = vweird.f32 %v1887_v5  ;;  %v466_v11 = vmul.f32 %v432_v54, %v1278_v38 }
 0x153   : > { %v734_v40 = vmul.f32 0.5, %v733_v57  ;;  %v713_v16 = vmul.f32 %v1913_v30, %v712_v14  ;;  %v873_v33 = vmul.f32 %v1505_v59, %v837_v20  ;;  %v692_v15 = vmul.f32 %v1931_v25, %v1887_v5 }
 0x154   : > { %v1938_v19 = vpop.eup %1083  ;;  %943 = vst [vmem:[%s1539_s25 + $0x90] sm:$0xff] %v911_v45  ;;  %1085 = vrsqrt.f32 %v1929_v47  ;;  %vm767_vm1 = vweird.f32 %v1896_v12  ;;  %vm718_vm3 = vweird.f32 %v1913_v30  ;;  %vm698_vm4 = vweird.f32 %v1931_v25 }
 0x155   : > { %v735_v22 = vsub.f32 1.5, %v734_v40  ;;  %v714_v52 = vmul.f32 0.5, %v713_v16  ;;  %v762_v8 = vmul.f32 %v1938_v19, %v1896_v12  ;;  %v909_v26 = vadd.f32 %v1522_v56, %v873_v33  ;;  %vm719_vm7 = vmor %vm717_vm14, %vm718_vm3 }
 0x156   : > { %v693_v46 = vmul.f32 %v1931_v25, %v692_v15  ;;  %1087 = vrsqrt.f32 %v1936_v51  ;;  %vm768_vm5 = vweird.f32 %v1938_v19  ;;  %v1969_v63 = vadd.f32 1e-06, %v466_v11  ;;  %vm699_vm9 = vmor %vm697_vm0, %vm698_vm4 }
 0x157   : > { %v736_v42 = vmul.f32 %v1903_v23, %v735_v22  ;;  %v715_v41 = vsub.f32 1.5, %v714_v52  ;;  %v763_v9 = vmul.f32 %v1938_v19, %v762_v8  ;;  %941 = vst [vmem:[%s1539_s25 + $0x80] sm:$0xff] %v909_v26  ;;  %v464_v1 = vmul.f32 %v428_v29, %v1278_v38  ;;  %vm1998_vm8 = vmor %vm767_vm1, %vm768_vm5  ;;  %v436_v22 = vpop.xlane.xlu0 %435 }
 0x158   : > { %v694_v58 = vmul.f32 0.5, %v693_v46  ;;  %vm747_vm6 = vweird.f32 %v1929_v47  ;;  %1089 = vrsqrt.f32 %v1969_v63  ;;  %v467_v4 = vmul.f32 %v434_v31, %v1278_v38 }
 0x159   : > { %v740_v0 = vsel %vm1955_vm2, %v1903_v23, %v736_v42  ;;  %v716_v6 = vmul.f32 %v1913_v30, %v715_v41  ;;  %v764_v53 = vmul.f32 0.5, %v763_v9  ;;  %v462_v23 = vmul.f32 %v1901_v55, %v1278_v38 }
 0x15a   : > { %v1977_v32 = vpop.eup %1085  ;;  %v844_v44 = vmul.f32 %v740_v0, %v1407_v48  ;;  %v695_v17 = vsub.f32 1.5, %v694_v58  ;;  %vm727_vm10 = vweird.f32 %v1936_v51  ;;  %vm797_vm11 = vweird.f32 %v1969_v63 }
 0x15b   : > { %v720_v29 = vsel %vm719_vm7, %v1913_v30, %v716_v6  ;;  %v765_v36 = vsub.f32 1.5, %v764_v53  ;;  %v742_v13 = vmul.f32 %v1977_v32, %v1929_v47  ;;  %v2002_v30 = vadd.f32 1e-06, %v464_v1 }
 0x15c   : > { %v1088_v48 = vpop.eup %1087  ;;  %v880_v50 = vmul.f32 %v1505_v59, %v844_v44  ;;  %v842_v10 = vmul.f32 %v720_v29, %v1410_v49  ;;  %v696_v37 = vmul.f32 %v1931_v25, %v695_v17  ;;  %vm748_vm12 = vweird.f32 %v1977_v32 }
 0x15d   : > { %v766_v49 = vmul.f32 %v1938_v19, %v765_v36  ;;  %v743_v43 = vmul.f32 %v1977_v32, %v742_v13  ;;  %v722_v3 = vmul.f32 %v1088_v48, %v1936_v51  ;;  %1091 = vrsqrt.f32 %v2002_v30  ;;  %vm749_vm15 = vmor %vm747_vm6, %vm748_vm12 }
 0x15e   : > { %v916_v12 = vadd.f32 %v1522_v56, %v880_v50  ;;  %v878_v61 = vmul.f32 %v1505_v59, %v842_v10  ;;  %v700_v57 = vsel %vm699_vm9, %v1931_v25, %v696_v37  ;;  %v1090_v20 = vpop.eup %1089  ;;  %v2025_v25 = vadd.f32 1e-06, %v462_v23 }
 0x15f   : > { %v840_v5 = vmul.f32 %v700_v57, %v1402_v18  ;;  %v770_v14 = vsel %vm1998_vm8, %v1938_v19, %v766_v49  ;;  %v744_v54 = vmul.f32 0.5, %v743_v43  ;;  %v723_v45 = vmul.f32 %v1088_v48, %v722_v3 }
 0x160   : > { %948 = vst [vmem:[%s1539_s25 + $0xb8] sm:$0xff] %v916_v12  ;;  %v914_v40 = vadd.f32 %v1522_v56, %v878_v61  ;;  %v847_v16 = vmul.f32 %v770_v14, %v1425_v60  ;;  %v792_v11 = vmul.f32 %v1090_v20, %v1969_v63  ;;  %vm728_vm13 = vweird.f32 %v1088_v48 }
 0x161   : > { %v876_v33 = vmul.f32 %v1505_v59, %v840_v5  ;;  %v745_v15 = vsub.f32 1.5, %v744_v54  ;;  %v724_v18 = vmul.f32 0.5, %v723_v45  ;;  %vm798_vm14 = vweird.f32 %v1090_v20  ;;  %vm729_vm0 = vmor %vm727_vm10, %vm728_vm13 }
 0x162   : > { %946 = vst [vmem:[%s1539_s25 + $0xa8] sm:$0xff] %v914_v40  ;;  %v883_v19 = vmul.f32 %v1505_v59, %v847_v16  ;;  %1093 = vrsqrt.f32 %v2025_v25  ;;  %v793_v26 = vmul.f32 %v1090_v20, %v792_v11  ;;  %v2039_v42 = vadd.f32 1e-06, %v467_v4  ;;  %vm2060_vm1 = vmor %vm797_vm11, %vm798_vm14 }
 0x163   : > { %v912_v60 = vadd.f32 %v1522_v56, %v876_v33  ;;  %v746_v52 = vmul.f32 %v1977_v32, %v745_v15  ;;  %v725_v8 = vsub.f32 1.5, %v724_v18  ;;  %v1092_v2 = vpop.eup %1091  ;;  %v465_v41 = vmul.f32 %v1965_v39, %v1278_v38 }
 0x164   : > { %v919_v46 = vadd.f32 %v1522_v56, %v883_v19  ;;  %v468_v9 = vmul.f32 %v436_v22, %v1278_v38  ;;  %v794_v31 = vmul.f32 0.5, %v793_v26  ;;  %v772_v0 = vmul.f32 %v1092_v2, %v2002_v30 }
 0x165   : > { %944 = vst [vmem:[%s1539_s25 + $0x98] sm:$0xff] %v912_v60  ;;  %v750_v58 = vsel %vm749_vm15, %v1977_v32, %v746_v52  ;;  %v726_v1 = vmul.f32 %v1088_v48, %v725_v8  ;;  %1095 = vrsqrt.f32 %v2039_v42  ;;  %v2053_v38 = vadd.f32 1e-06, %v465_v41 }
 0x166   : > { %951 = vst [vmem:[%s1539_s25 + $0xd0] sm:$0xff] %v919_v46  ;;  %v845_v6 = vmul.f32 %v750_v58, %v1428_v62  ;;  %v795_v39 = vsub.f32 1.5, %v794_v31  ;;  %v773_v53 = vmul.f32 %v1092_v2, %v772_v0  ;;  %v2064_v51 = vadd.f32 1e-06, %v468_v9 }
 0x167   : > { %v730_v47 = vsel %vm729_vm0, %v1088_v48, %v726_v1  ;;  %vm777_vm2 = vweird.f32 %v2002_v30  ;;  %vm778_vm3 = vweird.f32 %v1092_v2  ;;  %1097 = vrsqrt.f32 %v2053_v38 }
 0x168   : > { %v1094_v44 = vpop.eup %1093  ;;  %v881_v32 = vmul.f32 %v1505_v59, %v845_v6  ;;  %v843_v17 = vmul.f32 %v730_v47, %v1420_v21  ;;  %v796_v23 = vmul.f32 %v1090_v20, %v795_v39  ;;  %v774_v29 = vmul.f32 0.5, %v773_v53  ;;  %vm779_vm4 = vmor %vm777_vm2, %vm778_vm3  ;;  %v1102_v39 = vld [vmem:[%s2117_s2] ss:$0 sm:$0xff] }
 0x169   : > { %v752_v36 = vmul.f32 %v1094_v44, %v2025_v25  ;;  %1099 = vrsqrt.f32 %v2064_v51  ;;  %vm758_vm5 = vweird.f32 %v1094_v44  ;;  %vm757_vm6 = vweird.f32 %v2025_v25 }
 0x16a   : > { %v917_v13 = vadd.f32 %v1522_v56, %v881_v32  ;;  %v879_v21 = vmul.f32 %v1505_v59, %v843_v17  ;;  %v800_v63 = vsel %vm2060_vm1, %v1090_v20, %v796_v23  ;;  %v775_v4 = vsub.f32 1.5, %v774_v29  ;;  %vm759_vm7 = vmor %vm757_vm6, %vm758_vm5 }
 0x16b   : > { %v753_v48 = vmul.f32 %v1094_v44, %v752_v36  ;;  %v1096_v50 = vpop.eup %1095  ;;  %v850_v37 = vmul.f32 %v800_v63, %v1443_v34  ;;  %vm807_vm8 = vweird.f32 %v2039_v42  ;;  %vm787_vm13 = vweird.f32 %v2053_v38 }
 0x16c   : > { %949 = vst [vmem:[%s1539_s25 + $0xc0] sm:$0xff] %v917_v13  ;;  %v915_v10 = vadd.f32 %v1522_v56, %v879_v21  ;;  %v776_v55 = vmul.f32 %v1092_v2, %v775_v4  ;;  %v802_v43 = vmul.f32 %v1096_v50, %v2039_v42  ;;  %vm808_vm9 = vweird.f32 %v1096_v50 }
 0x16d   : > { %v754_v49 = vmul.f32 0.5, %v753_v48  ;;  %v886_v3 = vmul.f32 %v1505_v59, %v850_v37  ;;  %v1098_v5 = vpop.eup %1097  ;;  %vm809_vm10 = vmor %vm807_vm8, %vm808_vm9  ;;  %vm817_vm15 = vweird.f32 %v2064_v51 }
 0x16e   : > { %947 = vst [vmem:[%s1539_s25 + $0xb0] sm:$0xff] %v915_v10  ;;  %v780_v12 = vsel %vm779_vm4, %v1092_v2, %v776_v55  ;;  %v803_v57 = vmul.f32 %v1096_v50, %v802_v43  ;;  %v782_v40 = vmul.f32 %v1098_v5, %v2053_v38  ;;  %vm788_vm11 = vweird.f32 %v1098_v5 }
 0x16f   : > { %v755_v61 = vsub.f32 1.5, %v754_v49  ;;  %v922_v14 = vadd.f32 %v1522_v56, %v886_v3  ;;  %v848_v34 = vmul.f32 %v780_v12, %v1446_v35  ;;  %v1100_v54 = vpop.eup %1099  ;;  %vm789_vm14 = vmor %vm787_vm13, %vm788_vm11 }
 0x170   : > { %v804_v20 = vmul.f32 0.5, %v803_v57  ;;  %v812_v16 = vmul.f32 %v1100_v54, %v2064_v51  ;;  %v783_v35 = vmul.f32 %v1098_v5, %v782_v40  ;;  %vm818_vm12 = vweird.f32 %v1100_v54 }
 0x171   : > { %v756_v45 = vmul.f32 %v1094_v44, %v755_v61  ;;  %954 = vst [vmem:[%s1539_s25 + $0xe8] sm:$0xff] %v922_v14  ;;  %v884_v30 = vmul.f32 %v1505_v59, %v848_v34  ;;  %vm819_vm0 = vmor %vm817_vm15, %vm818_vm12 }
 0x172   : > { %v805_v15 = vsub.f32 1.5, %v804_v20  ;;  %v813_v11 = vmul.f32 %v1100_v54, %v812_v16  ;;  %v784_v19 = vmul.f32 0.5, %v783_v35 }
 0x173   : > { %v760_v33 = vsel %vm759_vm7, %v1094_v44, %v756_v45  ;;  %v920_v18 = vadd.f32 %v1522_v56, %v884_v30 }
 0x174   : > { %v846_v25 = vmul.f32 %v760_v33, %v1438_v24  ;;  %v806_v22 = vmul.f32 %v1096_v50, %v805_v15  ;;  %v814_v52 = vmul.f32 0.5, %v813_v11  ;;  %v785_v26 = vsub.f32 1.5, %v784_v19 }
 0x175   : > { %952 = vst [vmem:[%s1539_s25 + $0xd8] sm:$0xff] %v920_v18 }
 0x176   : > { %v882_v60 = vmul.f32 %v1505_v59, %v846_v25  ;;  %v810_v8 = vsel %vm809_vm10, %v1096_v50, %v806_v22  ;;  %v815_v42 = vsub.f32 1.5, %v814_v52  ;;  %v786_v24 = vmul.f32 %v1098_v5, %v785_v26  ;;  %v1101_v59 = vld [vmem:[%s2116_s1] ss:$0 sm:$0xff] }
 0x177   : > { %v851_v46 = vmul.f32 %v810_v8, %v1460_v7 }
 0x178   : > { %v918_v2 = vadd.f32 %v1522_v56, %v882_v60  ;;  %v816_v9 = vmul.f32 %v1100_v54, %v815_v42  ;;  %v790_v58 = vsel %vm789_vm14, %v1098_v5, %v786_v24 }
 0x179   : > { %v887_v41 = vmul.f32 %v1101_v59, %v851_v46  ;;  %v849_v1 = vmul.f32 %v790_v58, %v1456_v27 }
 0x17a   : > { %950 = vst [vmem:[%s1539_s25 + $0xc8] sm:$0xff] %v918_v2  ;;  %v820_v31 = vsel %vm819_vm0, %v1100_v54, %v816_v9 }
 0x17b   : > { %v923_v7 = vadd.f32 %v1522_v56, %v887_v41  ;;  %v852_v0 = vmul.f32 %v820_v31, %v1468_v28  ;;  %v885_v6 = vmul.f32 %v1101_v59, %v849_v1 }
 0x17d   : > { %955 = vst [vmem:[%s1539_s25 + $0xf0] sm:$0xff] %v923_v7  ;;  %v888_v47 = vmul.f32 %v1101_v59, %v852_v0  ;;  %v921_v53 = vadd.f32 %v1102_v39, %v885_v6 }
 0x17f   : > { %v924_v38 = vadd.f32 %v1102_v39, %v888_v47  ;;  %953 = vst [vmem:[%s1539_s25 + $0xe0] sm:$0xff] %v921_v53 }
 0x181   : > { %956 = vst [vmem:[%s1539_s25 + $0xf8] sm:$0xff] %v924_v38 }
 0x182 PF: > { %s13_s12 = sadd.s32 1, %s1109_s12  }
 0x183   : > { %p10_p4 = scmp.ge.s32.totalorder %s13_s12, 4  }
 0x185   :  { %12 = sbr.rel (!%p10_p4) target bundleno = 1 (0x1), region = 62 }

// kernel: block1d_apply.8
= control target key start
LH: loop header
LB: loop body
LE: loop exit
PB: predicated region body
PF: predicated region fallthrough
CT: control target
= control target key end

     0   :  { %s1295_s9 = smov 0   ;;  %s1658_s0 = inlined_call_operand.vmem [shape: bf16[512,128], index: 0, kind: input, shape index: {}]   ;;  %s1659_s1 = inlined_call_operand.vmem [shape: bf16[128,512], index: 1, kind: input, shape index: {}]   ;;  %s1660_s2 = inlined_call_operand.vmem [shape: f32[512,512], index: 2, kind: output, shape index: {}]  }
   0x1 LB: > { %s1011_s10 = sadd.s32 4294967295, %s1278_s9   ;;  %p1015_p0 = scmp.ge.s32.totalorder %s1278_s9, 1  ;;  %s1278_s9 = sphi %s1295_s9, %s12_s9  }
   0x2   : > { %p113_p1 = scmp.lt.s32.totalorder %s1278_s9, 3 }
   0x4   : > { %p114_p2 = pnand %p1015_p0, %p113_p1 }
   0x5   : > { %s1016_s15 = sshll.u32 (!%p114_p2), %s1011_s10, 5 }
   0x6   : > { %117 = sbr.rel (%p114_p2) target bundleno = 428 (0x1ac), region = 28  ;;  %p137_p3 = scmp.lt.s32.totalorder (!%p114_p2), %s1016_s15, 63 }
   0xb   : > { %v1199_v0 = vld [vmem:[%s1659_s1 + $0xe0] sm:$0xf]  ;;  %v1262_v1 = vld [vmem:[%s1659_s1 + $0xec] sm:$0xf0]  ;;  %v1260_v2 = vld [vmem:[%s1659_s1 + $0xe4] sm:$0xf] }
   0xc   : > { %v1200_v3 = vor.u32 %v1262_v1, %v1199_v0  ;;  %v1201_v4 = vld [vmem:[%s1659_s1 + $0xf0] sm:$0xf0]  ;;  %v1207_v5 = vld [vmem:[%s1659_s1 + $0xe8] sm:$0xf]  ;;  %v1263_v6 = vld [vmem:[%s1659_s1 + $0xf4] sm:$0xf0] }
   0xd   : > { %v1204_v7 = vor.u32 %v1260_v2, %v1201_v4  ;;  %v1208_v8 = vor.u32 %v1263_v6, %v1207_v5  ;;  %v1261_v9 = vld [vmem:[%s1659_s1 + $0xec] sm:$0xf]  ;;  %v1209_v10 = vld [vmem:[%s1659_s1 + $0xf8] sm:$0xf0]  ;;  %v1183_v11 = vld [vmem:[%s1659_s1 + $0xc0] sm:$0xf] }
   0xe   : > { %469 = vmatpush.bf16.msra.mxu0 %v1200_v3  ;;  %v1212_v12 = vor.u32 %v1261_v9, %v1209_v10  ;;  %v1258_v13 = vld [vmem:[%s1659_s1 + $0xcc] sm:$0xf0]  ;;  %v1256_v14 = vld [vmem:[%s1659_s1 + $0xc4] sm:$0xf]  ;;  %v1185_v15 = vld [vmem:[%s1659_s1 + $0xd0] sm:$0xf0] }
   0xf   : > { %558 = vmatpush.bf16.msra.mxu1 %v1204_v7  ;;  %647 = vmatpush.bf16.msra.mxu2 %v1208_v8  ;;  %v1184_v16 = vor.u32 %v1258_v13, %v1183_v11  ;;  %v1188_v17 = vor.u32 %v1256_v14, %v1185_v15  ;;  %v1191_v18 = vld [vmem:[%s1659_s1 + $0xc8] sm:$0xf]  ;;  %v1259_v19 = vld [vmem:[%s1659_s1 + $0xd4] sm:$0xf0]  ;;  %v1257_v20 = vld [vmem:[%s1659_s1 + $0xcc] sm:$0xf] }
  0x10   : > { %736 = vmatpush.bf16.msra.mxu3 %v1212_v12  ;;  %v1192_v21 = vor.u32 %v1259_v19, %v1191_v18  ;;  %v1193_v22 = vld [vmem:[%s1659_s1 + $0xd8] sm:$0xf0]  ;;  %v1167_v23 = vld [vmem:[%s1659_s1 + $0xa0] sm:$0xf]  ;;  %v1254_v24 = vld [vmem:[%s1659_s1 + $0xac] sm:$0xf0] }
  0x11   : > { %v1196_v25 = vor.u32 %v1257_v20, %v1193_v22  ;;  %v1252_v26 = vld [vmem:[%s1659_s1 + $0xa4] sm:$0xf]  ;;  %v1169_v27 = vld [vmem:[%s1659_s1 + $0xb0] sm:$0xf0]  ;;  %v1175_v28 = vld [vmem:[%s1659_s1 + $0xa8] sm:$0xf]  ;;  %v1168_v29 = vor.u32 %v1254_v24, %v1167_v23 }
  0x12   : > { %470 = vmatpush.bf16.msra.mxu0 %v1184_v16  ;;  %v1255_v30 = vld [vmem:[%s1659_s1 + $0xb4] sm:$0xf0]  ;;  %v1253_v31 = vld [vmem:[%s1659_s1 + $0xac] sm:$0xf]  ;;  %v1177_v32 = vld [vmem:[%s1659_s1 + $0xb8] sm:$0xf0]  ;;  %v1172_v33 = vor.u32 %v1252_v26, %v1169_v27 }
  0x13   : > { %559 = vmatpush.bf16.msra.mxu1 %v1188_v17  ;;  %648 = vmatpush.bf16.msra.mxu2 %v1192_v21  ;;  %v1176_v34 = vor.u32 %v1255_v30, %v1175_v28  ;;  %v1151_v35 = vld [vmem:[%s1659_s1 + $0x80] sm:$0xf]  ;;  %v1250_v36 = vld [vmem:[%s1659_s1 + $0x8c] sm:$0xf0]  ;;  %v1248_v37 = vld [vmem:[%s1659_s1 + $0x84] sm:$0xf]  ;;  %v1180_v38 = vor.u32 %v1253_v31, %v1177_v32 }
  0x14   : > { %737 = vmatpush.bf16.msra.mxu3 %v1196_v25  ;;  %v1153_v39 = vld [vmem:[%s1659_s1 + $0x90] sm:$0xf0]  ;;  %v1159_v40 = vld [vmem:[%s1659_s1 + $0x88] sm:$0xf]  ;;  %v1251_v41 = vld [vmem:[%s1659_s1 + $0x94] sm:$0xf0]  ;;  %v1152_v44 = vor.u32 %v1250_v36, %v1151_v35 }
  0x15   : > { %v1249_v42 = vld [vmem:[%s1659_s1 + $0x8c] sm:$0xf]  ;;  %v1161_v43 = vld [vmem:[%s1659_s1 + $0x98] sm:$0xf0]  ;;  %v1156_v45 = vor.u32 %v1248_v37, %v1153_v39  ;;  %v1160_v46 = vor.u32 %v1251_v41, %v1159_v40  ;;  %v1135_v47 = vld [vmem:[%s1659_s1 + $0x60] sm:$0xf] }
  0x16   : > { %471 = vmatpush.bf16.msra.mxu0 %v1168_v29  ;;  %v1246_v48 = vld [vmem:[%s1659_s1 + $0x6c] sm:$0xf0]  ;;  %v1244_v49 = vld [vmem:[%s1659_s1 + $0x64] sm:$0xf]  ;;  %v1164_v50 = vor.u32 %v1249_v42, %v1161_v43  ;;  %v1137_v51 = vld [vmem:[%s1659_s1 + $0x70] sm:$0xf0] }
  0x17   : > { %560 = vmatpush.bf16.msra.mxu1 %v1172_v33  ;;  %649 = vmatpush.bf16.msra.mxu2 %v1176_v34  ;;  %v1143_v52 = vld [vmem:[%s1659_s1 + $0x68] sm:$0xf]  ;;  %v1247_v53 = vld [vmem:[%s1659_s1 + $0x74] sm:$0xf0]  ;;  %v1245_v54 = vld [vmem:[%s1659_s1 + $0x6c] sm:$0xf]  ;;  %v1136_v56 = vor.u32 %v1246_v48, %v1135_v47  ;;  %v1140_v57 = vor.u32 %v1244_v49, %v1137_v51 }
  0x18   : > { %738 = vmatpush.bf16.msra.mxu3 %v1180_v38  ;;  %v1145_v55 = vld [vmem:[%s1659_s1 + $0x78] sm:$0xf0]  ;;  %v1144_v58 = vor.u32 %v1247_v53, %v1143_v52  ;;  %v1119_v59 = vld [vmem:[%s1659_s1 + $0x40] sm:$0xf]  ;;  %v1242_v60 = vld [vmem:[%s1659_s1 + $0x4c] sm:$0xf0] }
  0x19   : > { %v1240_v61 = vld [vmem:[%s1659_s1 + $0x44] sm:$0xf]  ;;  %v1148_v62 = vor.u32 %v1245_v54, %v1145_v55  ;;  %v1121_v63 = vld [vmem:[%s1659_s1 + $0x50] sm:$0xf0]  ;;  %v1127_v0 = vld [vmem:[%s1659_s1 + $0x48] sm:$0xf]  ;;  %v1120_v4 = vor.u32 %v1242_v60, %v1119_v59 }
  0x1a   : > { %472 = vmatpush.bf16.msra.mxu0 %v1152_v44  ;;  %v1243_v1 = vld [vmem:[%s1659_s1 + $0x54] sm:$0xf0]  ;;  %v1241_v2 = vld [vmem:[%s1659_s1 + $0x4c] sm:$0xf]  ;;  %v1129_v3 = vld [vmem:[%s1659_s1 + $0x58] sm:$0xf0]  ;;  %v1124_v6 = vor.u32 %v1240_v61, %v1121_v63 }
  0x1b   : > { %561 = vmatpush.bf16.msra.mxu1 %v1156_v45  ;;  %650 = vmatpush.bf16.msra.mxu2 %v1160_v46  ;;  %v1103_v5 = vld [vmem:[%s1659_s1 + $0x20] sm:$0xf]  ;;  %v1128_v7 = vor.u32 %v1243_v1, %v1127_v0  ;;  %v1238_v8 = vld [vmem:[%s1659_s1 + $0x2c] sm:$0xf0]  ;;  %v1236_v9 = vld [vmem:[%s1659_s1 + $0x24] sm:$0xf]  ;;  %v1132_v11 = vor.u32 %v1241_v2, %v1129_v3 }
  0x1c   : > { %739 = vmatpush.bf16.msra.mxu3 %v1164_v50  ;;  %v1105_v10 = vld [vmem:[%s1659_s1 + $0x30] sm:$0xf0]  ;;  %v1111_v12 = vld [vmem:[%s1659_s1 + $0x28] sm:$0xf]  ;;  %v1239_v13 = vld [vmem:[%s1659_s1 + $0x34] sm:$0xf0]  ;;  %v1104_v16 = vor.u32 %v1238_v8, %v1103_v5 }
  0x1d   : > { %v1237_v14 = vld [vmem:[%s1659_s1 + $0x2c] sm:$0xf]  ;;  %v1113_v15 = vld [vmem:[%s1659_s1 + $0x38] sm:$0xf0]  ;;  %v1087_v17 = vld [vmem:[%s1659_s1] sm:$0xf]  ;;  %v1108_v18 = vor.u32 %v1236_v9, %v1105_v10  ;;  %v1112_v19 = vor.u32 %v1239_v13, %v1111_v12 }
  0x1e   : > { %473 = vmatpush.bf16.msra.mxu0 %v1136_v56  ;;  %v1234_v20 = vld [vmem:[%s1659_s1 + $0xc] sm:$0xf0]  ;;  %v1232_v21 = vld [vmem:[%s1659_s1 + $0x4] sm:$0xf]  ;;  %s1662_s15 = smov (!%p137_p3, %s1016_s15), 63  ;;  %v1116_v22 = vor.u32 %v1237_v14, %v1113_v15 }
  0x1f   : > { %562 = vmatpush.bf16.msra.mxu1 %v1140_v57  ;;  %651 = vmatpush.bf16.msra.mxu2 %v1144_v58  ;;  %v1089_v23 = vld [vmem:[%s1659_s1 + $0x10] sm:$0xf0]  ;;  %v1095_v24 = vld [vmem:[%s1659_s1 + $0x8] sm:$0xf]  ;;  %v1235_v25 = vld [vmem:[%s1659_s1 + $0x14] sm:$0xf0]  ;;  %v1088_v28 = vor.u32 %v1234_v20, %v1087_v17 }
  0x20   : > { %740 = vmatpush.bf16.msra.mxu3 %v1148_v62  ;;  %v1233_v26 = vld [vmem:[%s1659_s1 + $0xc] sm:$0xf]  ;;  %v1097_v27 = vld [vmem:[%s1659_s1 + $0x18] sm:$0xf0]  ;;  %s1017_s7 = sshll.u32 %s1662_s15, 2  ;;  %v1092_v29 = vor.u32 %v1232_v21, %v1089_v23  ;;  %v1096_v30 = vor.u32 %v1235_v25, %v1095_v24  ;;  %s1215_s13 = sshll.u32 %s1662_s15, 5 }
  0x21   : > { %s1503_s12 = scalar_lea.vmem %s1658_s0, %s1017_s7  ;;  %v1100_v31 = vor.u32 %v1233_v26, %v1097_v27  ;;  %s1517_s17 = scalar_lea.vmem %s1660_s2, %s1215_s13 }
  0x22   : > { %474 = vmatpush.bf16.msra.mxu0 %v1120_v4  ;;  %v1216_v32 = vld [vmem:[%s1503_s12] sm:$0xff]  ;;  %v1217_v33 = vld [vmem:[%s1503_s12 + $0x8] sm:$0xff]  ;;  %v1218_v34 = vld [vmem:[%s1503_s12 + $0x10] sm:$0xff] }
  0x23   : > { %563 = vmatpush.bf16.msra.mxu1 %v1124_v6  ;;  %652 = vmatpush.bf16.msra.mxu2 %v1128_v7  ;;  %v1219_v35 = vld [vmem:[%s1503_s12 + $0x18] sm:$0xff]  ;;  %v1220_v36 = vld [vmem:[%s1503_s12 + $0x20] sm:$0xff]  ;;  %v1221_v37 = vld [vmem:[%s1503_s12 + $0x28] sm:$0xff] }
  0x24   : > { %741 = vmatpush.bf16.msra.mxu3 %v1132_v11  ;;  %v1222_v38 = vld [vmem:[%s1503_s12 + $0x30] sm:$0xff]  ;;  %v1223_v39 = vld [vmem:[%s1503_s12 + $0x38] sm:$0xff]  ;;  %v1224_v40 = vld [vmem:[%s1503_s12 + $0x40] sm:$0xff] }
  0x25   : > { %v1225_v48 = vld [vmem:[%s1503_s12 + $0x48] sm:$0xff]  ;;  %v1226_v57 = vld [vmem:[%s1503_s12 + $0x50] sm:$0xff]  ;;  %v1227_v2 = vld [vmem:[%s1503_s12 + $0x58] sm:$0xff] }
  0x26   : > { %475 = vmatpush.bf16.msra.mxu0 %v1104_v16  ;;  %v1228_v11 = vld [vmem:[%s1503_s12 + $0x60] sm:$0xff]  ;;  %v1229_v20 = vld [vmem:[%s1503_s12 + $0x68] sm:$0xff] }
  0x27   : > { %564 = vmatpush.bf16.msra.mxu1 %v1108_v18  ;;  %653 = vmatpush.bf16.msra.mxu2 %v1112_v19 }
  0x28   : > { %742 = vmatpush.bf16.msra.mxu3 %v1116_v22 }
  0x2a   : > { %476 = vmatpush.bf16.msra.mxu0 %v1088_v28 }
  0x2b   : > { %565 = vmatpush.bf16.msra.mxu1 %v1092_v29  ;;  %654 = vmatpush.bf16.msra.mxu2 %v1096_v30  ;;  %v1230_v29 = vld [vmem:[%s1503_s12 + $0x70] sm:$0xff] }
  0x2c   : > { %743 = vmatpush.bf16.msra.mxu3 %v1100_v31 }
  0x2d   : > { %477 = vmatmul.bf16.vlgmr.msra.gmra.mxu0 %v1216_v32 }
  0x2e   : > { %566 = vmatmul.bf16.vlgmr.msra.gmra.mxu1 %v1216_v32  ;;  %655 = vmatmul.bf16.vlgmr.msra.gmra.mxu2 %v1216_v32 }
  0x2f   : > { %744 = vmatmul.bf16.vlgmr.msra.gmra.mxu3 %v1216_v32 }
  0x3d   : > { %482 = vmatmul.bf16.gmra.mxu0 %v1217_v33 }
  0x3e   : > { %571 = vmatmul.bf16.gmra.mxu1 %v1217_v33  ;;  %660 = vmatmul.bf16.gmra.mxu2 %v1217_v33 }
  0x3f   : > { %749 = vmatmul.bf16.gmra.mxu3 %v1217_v33 }
  0x4d   : > { %487 = vmatmul.bf16.gmra.mxu0 %v1218_v34 }
  0x4e   : > { %576 = vmatmul.bf16.gmra.mxu1 %v1218_v34  ;;  %665 = vmatmul.bf16.gmra.mxu2 %v1218_v34 }
  0x4f   : > { %754 = vmatmul.bf16.gmra.mxu3 %v1218_v34 }
  0x5d   : > { %492 = vmatmul.bf16.gmra.mxu0 %v1219_v35 }
  0x5e   : > { %581 = vmatmul.bf16.gmra.mxu1 %v1219_v35  ;;  %670 = vmatmul.bf16.gmra.mxu2 %v1219_v35 }
  0x5f   : > { %759 = vmatmul.bf16.gmra.mxu3 %v1219_v35 }
  0x6d   : > { %497 = vmatmul.bf16.gmra.mxu0 %v1220_v36 }
  0x6e   : > { %586 = vmatmul.bf16.gmra.mxu1 %v1220_v36  ;;  %675 = vmatmul.bf16.gmra.mxu2 %v1220_v36 }
  0x6f   : > { %764 = vmatmul.bf16.gmra.mxu3 %v1220_v36 }
  0x7d   : > { %502 = vmatmul.bf16.gmra.mxu0 %v1221_v37 }
  0x7e   : > { %591 = vmatmul.bf16.gmra.mxu1 %v1221_v37  ;;  %680 = vmatmul.bf16.gmra.mxu2 %v1221_v37 }
  0x7f   : > { %769 = vmatmul.bf16.gmra.mxu3 %v1221_v37 }
  0x8d   : > { %507 = vmatmul.bf16.gmra.mxu0 %v1222_v38 }
  0x8e   : > { %596 = vmatmul.bf16.gmra.mxu1 %v1222_v38  ;;  %685 = vmatmul.bf16.gmra.mxu2 %v1222_v38 }
  0x8f   : > { %774 = vmatmul.bf16.gmra.mxu3 %v1222_v38  ;;  %v1231_v38 = vld [vmem:[%s1503_s12 + $0x78] sm:$0xff] }
  0x9d   : > { %512 = vmatmul.bf16.gmra.mxu0 %v1223_v39 }
  0x9e   : > { %601 = vmatmul.bf16.gmra.mxu1 %v1223_v39  ;;  %690 = vmatmul.bf16.gmra.mxu2 %v1223_v39 }
  0x9f   : > { %779 = vmatmul.bf16.gmra.mxu3 %v1223_v39 }
  0xaa   : > { %v478_v41 = vpop.f32.mrf.mxu0 }
  0xab   : > { %825 = vst [vmem:[%s1517_s17] sm:$0xff] %v478_v41  ;;  %v567_v42 = vpop.f32.mrf.mxu1 }
  0xac   : > { %826 = vst [vmem:[%s1517_s17 + $0x8] sm:$0xff] %v567_v42 }
  0xad   : > { %517 = vmatmul.bf16.gmra.mxu0 %v1224_v40 }
  0xae   : > { %606 = vmatmul.bf16.gmra.mxu1 %v1224_v40  ;;  %695 = vmatmul.bf16.gmra.mxu2 %v1224_v40 }
  0xaf   : > { %784 = vmatmul.bf16.gmra.mxu3 %v1224_v40 }
  0xb1   : > { %v656_v43 = vpop.f32.mrf.mxu2 }
  0xb2   : > { %827 = vst [vmem:[%s1517_s17 + $0x10] sm:$0xff] %v656_v43  ;;  %v745_v44 = vpop.f32.mrf.mxu3  ;;  %v480_v45 = vpop.f32.mrf.mxu0 }
  0xb3   : > { %828 = vst [vmem:[%s1517_s17 + $0x18] sm:$0xff] %v745_v44  ;;  %v569_v46 = vpop.f32.mrf.mxu1 }
  0xb4   : > { %829 = vst [vmem:[%s1517_s17 + $0x20] sm:$0xff] %v480_v45 }
  0xb5   : > { %830 = vst [vmem:[%s1517_s17 + $0x28] sm:$0xff] %v569_v46 }
  0xb9   : > { %v658_v47 = vpop.f32.mrf.mxu2 }
  0xba   : > { %831 = vst [vmem:[%s1517_s17 + $0x30] sm:$0xff] %v658_v47  ;;  %v747_v49 = vpop.f32.mrf.mxu3  ;;  %v483_v50 = vpop.f32.mrf.mxu0 }
  0xbb   : > { %832 = vst [vmem:[%s1517_s17 + $0x38] sm:$0xff] %v747_v49  ;;  %v572_v51 = vpop.f32.mrf.mxu1 }
  0xbc   : > { %833 = vst [vmem:[%s1517_s17 + $0x40] sm:$0xff] %v483_v50 }
  0xbd   : > { %834 = vst [vmem:[%s1517_s17 + $0x48] sm:$0xff] %v572_v51  ;;  %522 = vmatmul.bf16.gmra.mxu0 %v1225_v48 }
  0xbe   : > { %611 = vmatmul.bf16.gmra.mxu1 %v1225_v48  ;;  %700 = vmatmul.bf16.gmra.mxu2 %v1225_v48 }
  0xbf   : > { %789 = vmatmul.bf16.gmra.mxu3 %v1225_v48 }
  0xc1   : > { %v661_v52 = vpop.f32.mrf.mxu2 }
  0xc2   : > { %835 = vst [vmem:[%s1517_s17 + $0x50] sm:$0xff] %v661_v52  ;;  %v750_v53 = vpop.f32.mrf.mxu3  ;;  %v485_v54 = vpop.f32.mrf.mxu0 }
  0xc3   : > { %836 = vst [vmem:[%s1517_s17 + $0x58] sm:$0xff] %v750_v53  ;;  %v574_v55 = vpop.f32.mrf.mxu1 }
  0xc4   : > { %837 = vst [vmem:[%s1517_s17 + $0x60] sm:$0xff] %v485_v54 }
  0xc5   : > { %838 = vst [vmem:[%s1517_s17 + $0x68] sm:$0xff] %v574_v55 }
  0xc9   : > { %v663_v56 = vpop.f32.mrf.mxu2 }
  0xca   : > { %839 = vst [vmem:[%s1517_s17 + $0x70] sm:$0xff] %v663_v56  ;;  %v752_v58 = vpop.f32.mrf.mxu3  ;;  %v488_v59 = vpop.f32.mrf.mxu0 }
  0xcb   : > { %840 = vst [vmem:[%s1517_s17 + $0x78] sm:$0xff] %v752_v58  ;;  %v577_v60 = vpop.f32.mrf.mxu1 }
  0xcc   : > { %841 = vst [vmem:[%s1517_s17 + $0x80] sm:$0xff] %v488_v59 }
  0xcd   : > { %842 = vst [vmem:[%s1517_s17 + $0x88] sm:$0xff] %v577_v60  ;;  %527 = vmatmul.bf16.gmra.mxu0 %v1226_v57 }
  0xce   : > { %616 = vmatmul.bf16.gmra.mxu1 %v1226_v57  ;;  %705 = vmatmul.bf16.gmra.mxu2 %v1226_v57 }
  0xcf   : > { %794 = vmatmul.bf16.gmra.mxu3 %v1226_v57 }
  0xd1   : > { %v666_v61 = vpop.f32.mrf.mxu2 }
  0xd2   : > { %843 = vst [vmem:[%s1517_s17 + $0x90] sm:$0xff] %v666_v61  ;;  %v755_v62 = vpop.f32.mrf.mxu3  ;;  %v490_v63 = vpop.f32.mrf.mxu0 }
  0xd3   : > { %844 = vst [vmem:[%s1517_s17 + $0x98] sm:$0xff] %v755_v62  ;;  %v579_v0 = vpop.f32.mrf.mxu1 }
  0xd4   : > { %845 = vst [vmem:[%s1517_s17 + $0xa0] sm:$0xff] %v490_v63 }
  0xd5   : > { %846 = vst [vmem:[%s1517_s17 + $0xa8] sm:$0xff] %v579_v0 }
  0xd9   : > { %v668_v1 = vpop.f32.mrf.mxu2 }
  0xda   : > { %847 = vst [vmem:[%s1517_s17 + $0xb0] sm:$0xff] %v668_v1  ;;  %v757_v3 = vpop.f32.mrf.mxu3  ;;  %v493_v4 = vpop.f32.mrf.mxu0 }
  0xdb   : > { %848 = vst [vmem:[%s1517_s17 + $0xb8] sm:$0xff] %v757_v3  ;;  %v582_v5 = vpop.f32.mrf.mxu1 }
  0xdc   : > { %849 = vst [vmem:[%s1517_s17 + $0xc0] sm:$0xff] %v493_v4 }
  0xdd   : > { %850 = vst [vmem:[%s1517_s17 + $0xc8] sm:$0xff] %v582_v5  ;;  %532 = vmatmul.bf16.gmra.mxu0 %v1227_v2 }
  0xde   : > { %621 = vmatmul.bf16.gmra.mxu1 %v1227_v2  ;;  %710 = vmatmul.bf16.gmra.mxu2 %v1227_v2 }
  0xdf   : > { %799 = vmatmul.bf16.gmra.mxu3 %v1227_v2 }
  0xe1   : > { %v671_v6 = vpop.f32.mrf.mxu2 }
  0xe2   : > { %851 = vst [vmem:[%s1517_s17 + $0xd0] sm:$0xff] %v671_v6  ;;  %v760_v7 = vpop.f32.mrf.mxu3  ;;  %v495_v8 = vpop.f32.mrf.mxu0 }
  0xe3   : > { %852 = vst [vmem:[%s1517_s17 + $0xd8] sm:$0xff] %v760_v7  ;;  %v584_v9 = vpop.f32.mrf.mxu1 }
  0xe4   : > { %853 = vst [vmem:[%s1517_s17 + $0xe0] sm:$0xff] %v495_v8 }
  0xe5   : > { %854 = vst [vmem:[%s1517_s17 + $0xe8] sm:$0xff] %v584_v9 }
  0xe9   : > { %v673_v10 = vpop.f32.mrf.mxu2 }
  0xea   : > { %855 = vst [vmem:[%s1517_s17 + $0xf0] sm:$0xff] %v673_v10  ;;  %v762_v12 = vpop.f32.mrf.mxu3  ;;  %v498_v13 = vpop.f32.mrf.mxu0 }
  0xeb   : > { %856 = vst [vmem:[%s1517_s17 + $0xf8] sm:$0xff] %v762_v12  ;;  %v587_v14 = vpop.f32.mrf.mxu1 }
  0xec   : > { %857 = vst [vmem:[%s1517_s17 + $0x100] sm:$0xff] %v498_v13 }
  0xed   : > { %858 = vst [vmem:[%s1517_s17 + $0x108] sm:$0xff] %v587_v14  ;;  %537 = vmatmul.bf16.gmra.mxu0 %v1228_v11 }
  0xee   : > { %626 = vmatmul.bf16.gmra.mxu1 %v1228_v11  ;;  %715 = vmatmul.bf16.gmra.mxu2 %v1228_v11 }
  0xef   : > { %804 = vmatmul.bf16.gmra.mxu3 %v1228_v11 }
  0xf1   : > { %v676_v15 = vpop.f32.mrf.mxu2 }
  0xf2   : > { %859 = vst [vmem:[%s1517_s17 + $0x110] sm:$0xff] %v676_v15  ;;  %v765_v16 = vpop.f32.mrf.mxu3  ;;  %v500_v17 = vpop.f32.mrf.mxu0 }
  0xf3   : > { %860 = vst [vmem:[%s1517_s17 + $0x118] sm:$0xff] %v765_v16  ;;  %v589_v18 = vpop.f32.mrf.mxu1 }
  0xf4   : > { %861 = vst [vmem:[%s1517_s17 + $0x120] sm:$0xff] %v500_v17 }
  0xf5   : > { %862 = vst [vmem:[%s1517_s17 + $0x128] sm:$0xff] %v589_v18 }
  0xf9   : > { %v678_v19 = vpop.f32.mrf.mxu2 }
  0xfa   : > { %863 = vst [vmem:[%s1517_s17 + $0x130] sm:$0xff] %v678_v19  ;;  %v767_v21 = vpop.f32.mrf.mxu3  ;;  %v503_v22 = vpop.f32.mrf.mxu0 }
  0xfb   : > { %864 = vst [vmem:[%s1517_s17 + $0x138] sm:$0xff] %v767_v21  ;;  %v592_v23 = vpop.f32.mrf.mxu1 }
  0xfc   : > { %865 = vst [vmem:[%s1517_s17 + $0x140] sm:$0xff] %v503_v22 }
  0xfd   : > { %866 = vst [vmem:[%s1517_s17 + $0x148] sm:$0xff] %v592_v23  ;;  %542 = vmatmul.bf16.gmra.mxu0 %v1229_v20 }
  0xfe   : > { %631 = vmatmul.bf16.gmra.mxu1 %v1229_v20  ;;  %720 = vmatmul.bf16.gmra.mxu2 %v1229_v20 }
  0xff   : > { %809 = vmatmul.bf16.gmra.mxu3 %v1229_v20 }
 0x101   : > { %v681_v24 = vpop.f32.mrf.mxu2 }
 0x102   : > { %867 = vst [vmem:[%s1517_s17 + $0x150] sm:$0xff] %v681_v24  ;;  %v770_v25 = vpop.f32.mrf.mxu3  ;;  %v505_v26 = vpop.f32.mrf.mxu0 }
 0x103   : > { %868 = vst [vmem:[%s1517_s17 + $0x158] sm:$0xff] %v770_v25  ;;  %v594_v27 = vpop.f32.mrf.mxu1 }
 0x104   : > { %869 = vst [vmem:[%s1517_s17 + $0x160] sm:$0xff] %v505_v26 }
 0x105   : > { %870 = vst [vmem:[%s1517_s17 + $0x168] sm:$0xff] %v594_v27 }
 0x109   : > { %v683_v28 = vpop.f32.mrf.mxu2 }
 0x10a   : > { %871 = vst [vmem:[%s1517_s17 + $0x170] sm:$0xff] %v683_v28  ;;  %v772_v30 = vpop.f32.mrf.mxu3  ;;  %v508_v31 = vpop.f32.mrf.mxu0 }
 0x10b   : > { %872 = vst [vmem:[%s1517_s17 + $0x178] sm:$0xff] %v772_v30  ;;  %v597_v32 = vpop.f32.mrf.mxu1 }
 0x10c   : > { %873 = vst [vmem:[%s1517_s17 + $0x180] sm:$0xff] %v508_v31 }
 0x10d   : > { %874 = vst [vmem:[%s1517_s17 + $0x188] sm:$0xff] %v597_v32  ;;  %547 = vmatmul.bf16.gmra.mxu0 %v1230_v29 }
 0x10e   : > { %636 = vmatmul.bf16.gmra.mxu1 %v1230_v29  ;;  %725 = vmatmul.bf16.gmra.mxu2 %v1230_v29 }
 0x10f   : > { %814 = vmatmul.bf16.gmra.mxu3 %v1230_v29 }
 0x111   : > { %v686_v33 = vpop.f32.mrf.mxu2 }
 0x112   : > { %875 = vst [vmem:[%s1517_s17 + $0x190] sm:$0xff] %v686_v33  ;;  %v775_v34 = vpop.f32.mrf.mxu3  ;;  %v510_v35 = vpop.f32.mrf.mxu0 }
 0x113   : > { %876 = vst [vmem:[%s1517_s17 + $0x198] sm:$0xff] %v775_v34  ;;  %v599_v36 = vpop.f32.mrf.mxu1 }
 0x114   : > { %877 = vst [vmem:[%s1517_s17 + $0x1a0] sm:$0xff] %v510_v35 }
 0x115   : > { %878 = vst [vmem:[%s1517_s17 + $0x1a8] sm:$0xff] %v599_v36 }
 0x119   : > { %v688_v37 = vpop.f32.mrf.mxu2 }
 0x11a   : > { %879 = vst [vmem:[%s1517_s17 + $0x1b0] sm:$0xff] %v688_v37  ;;  %v777_v39 = vpop.f32.mrf.mxu3  ;;  %v513_v40 = vpop.f32.mrf.mxu0 }
 0x11b   : > { %880 = vst [vmem:[%s1517_s17 + $0x1b8] sm:$0xff] %v777_v39  ;;  %v602_v41 = vpop.f32.mrf.mxu1 }
 0x11c   : > { %881 = vst [vmem:[%s1517_s17 + $0x1c0] sm:$0xff] %v513_v40 }
 0x11d   : > { %882 = vst [vmem:[%s1517_s17 + $0x1c8] sm:$0xff] %v602_v41  ;;  %552 = vmatmul.bf16.gmra.mxu0 %v1231_v38 }
 0x11e   : > { %641 = vmatmul.bf16.gmra.mxu1 %v1231_v38  ;;  %730 = vmatmul.bf16.gmra.mxu2 %v1231_v38 }
 0x11f   : > { %819 = vmatmul.bf16.gmra.mxu3 %v1231_v38 }
 0x121   : > { %v691_v42 = vpop.f32.mrf.mxu2 }
 0x122   : > { %883 = vst [vmem:[%s1517_s17 + $0x1d0] sm:$0xff] %v691_v42  ;;  %v780_v43 = vpop.f32.mrf.mxu3  ;;  %v515_v44 = vpop.f32.mrf.mxu0 }
 0x123   : > { %884 = vst [vmem:[%s1517_s17 + $0x1d8] sm:$0xff] %v780_v43  ;;  %v604_v45 = vpop.f32.mrf.mxu1 }
 0x124   : > { %885 = vst [vmem:[%s1517_s17 + $0x1e0] sm:$0xff] %v515_v44 }
 0x125   : > { %886 = vst [vmem:[%s1517_s17 + $0x1e8] sm:$0xff] %v604_v45 }
 0x129   : > { %v693_v46 = vpop.f32.mrf.mxu2 }
 0x12a   : > { %887 = vst [vmem:[%s1517_s17 + $0x1f0] sm:$0xff] %v693_v46  ;;  %v782_v47 = vpop.f32.mrf.mxu3  ;;  %v518_v48 = vpop.f32.mrf.mxu0 }
 0x12b   : > { %888 = vst [vmem:[%s1517_s17 + $0x1f8] sm:$0xff] %v782_v47  ;;  %v607_v49 = vpop.f32.mrf.mxu1 }
 0x12c   : > { %889 = vst [vmem:[%s1517_s17 + $0x200] sm:$0xff] %v518_v48 }
 0x12d   : > { %890 = vst [vmem:[%s1517_s17 + $0x208] sm:$0xff] %v607_v49 }
 0x131   : > { %v696_v50 = vpop.f32.mrf.mxu2 }
 0x132   : > { %891 = vst [vmem:[%s1517_s17 + $0x210] sm:$0xff] %v696_v50  ;;  %v785_v51 = vpop.f32.mrf.mxu3  ;;  %v520_v52 = vpop.f32.mrf.mxu0 }
 0x133   : > { %892 = vst [vmem:[%s1517_s17 + $0x218] sm:$0xff] %v785_v51  ;;  %v609_v53 = vpop.f32.mrf.mxu1 }
 0x134   : > { %893 = vst [vmem:[%s1517_s17 + $0x220] sm:$0xff] %v520_v52 }
 0x135   : > { %894 = vst [vmem:[%s1517_s17 + $0x228] sm:$0xff] %v609_v53 }
 0x139   : > { %v698_v54 = vpop.f32.mrf.mxu2 }
 0x13a   : > { %895 = vst [vmem:[%s1517_s17 + $0x230] sm:$0xff] %v698_v54  ;;  %v787_v55 = vpop.f32.mrf.mxu3  ;;  %v523_v56 = vpop.f32.mrf.mxu0 }
 0x13b   : > { %896 = vst [vmem:[%s1517_s17 + $0x238] sm:$0xff] %v787_v55  ;;  %v612_v57 = vpop.f32.mrf.mxu1 }
 0x13c   : > { %897 = vst [vmem:[%s1517_s17 + $0x240] sm:$0xff] %v523_v56 }
 0x13d   : > { %898 = vst [vmem:[%s1517_s17 + $0x248] sm:$0xff] %v612_v57 }
 0x141   : > { %v701_v58 = vpop.f32.mrf.mxu2 }
 0x142   : > { %899 = vst [vmem:[%s1517_s17 + $0x250] sm:$0xff] %v701_v58  ;;  %v790_v59 = vpop.f32.mrf.mxu3  ;;  %v525_v60 = vpop.f32.mrf.mxu0 }
 0x143   : > { %900 = vst [vmem:[%s1517_s17 + $0x258] sm:$0xff] %v790_v59  ;;  %v614_v61 = vpop.f32.mrf.mxu1 }
 0x144   : > { %901 = vst [vmem:[%s1517_s17 + $0x260] sm:$0xff] %v525_v60 }
 0x145   : > { %902 = vst [vmem:[%s1517_s17 + $0x268] sm:$0xff] %v614_v61 }
 0x149   : > { %v703_v62 = vpop.f32.mrf.mxu2 }
 0x14a   : > { %903 = vst [vmem:[%s1517_s17 + $0x270] sm:$0xff] %v703_v62  ;;  %v792_v63 = vpop.f32.mrf.mxu3  ;;  %v528_v0 = vpop.f32.mrf.mxu0 }
 0x14b   : > { %904 = vst [vmem:[%s1517_s17 + $0x278] sm:$0xff] %v792_v63  ;;  %v617_v1 = vpop.f32.mrf.mxu1 }
 0x14c   : > { %905 = vst [vmem:[%s1517_s17 + $0x280] sm:$0xff] %v528_v0 }
 0x14d   : > { %906 = vst [vmem:[%s1517_s17 + $0x288] sm:$0xff] %v617_v1 }
 0x151   : > { %v706_v2 = vpop.f32.mrf.mxu2 }
 0x152   : > { %907 = vst [vmem:[%s1517_s17 + $0x290] sm:$0xff] %v706_v2  ;;  %v795_v3 = vpop.f32.mrf.mxu3  ;;  %v530_v4 = vpop.f32.mrf.mxu0 }
 0x153   : > { %908 = vst [vmem:[%s1517_s17 + $0x298] sm:$0xff] %v795_v3  ;;  %v619_v5 = vpop.f32.mrf.mxu1 }
 0x154   : > { %909 = vst [vmem:[%s1517_s17 + $0x2a0] sm:$0xff] %v530_v4 }
 0x155   : > { %910 = vst [vmem:[%s1517_s17 + $0x2a8] sm:$0xff] %v619_v5 }
 0x159   : > { %v708_v6 = vpop.f32.mrf.mxu2 }
 0x15a   : > { %911 = vst [vmem:[%s1517_s17 + $0x2b0] sm:$0xff] %v708_v6  ;;  %v797_v7 = vpop.f32.mrf.mxu3  ;;  %v533_v8 = vpop.f32.mrf.mxu0 }
 0x15b   : > { %912 = vst [vmem:[%s1517_s17 + $0x2b8] sm:$0xff] %v797_v7  ;;  %v622_v9 = vpop.f32.mrf.mxu1 }
 0x15c   : > { %913 = vst [vmem:[%s1517_s17 + $0x2c0] sm:$0xff] %v533_v8 }
 0x15d   : > { %914 = vst [vmem:[%s1517_s17 + $0x2c8] sm:$0xff] %v622_v9 }
 0x161   : > { %v711_v10 = vpop.f32.mrf.mxu2 }
 0x162   : > { %915 = vst [vmem:[%s1517_s17 + $0x2d0] sm:$0xff] %v711_v10  ;;  %v800_v11 = vpop.f32.mrf.mxu3  ;;  %v535_v12 = vpop.f32.mrf.mxu0 }
 0x163   : > { %916 = vst [vmem:[%s1517_s17 + $0x2d8] sm:$0xff] %v800_v11  ;;  %v624_v13 = vpop.f32.mrf.mxu1 }
 0x164   : > { %917 = vst [vmem:[%s1517_s17 + $0x2e0] sm:$0xff] %v535_v12 }
 0x165   : > { %918 = vst [vmem:[%s1517_s17 + $0x2e8] sm:$0xff] %v624_v13 }
 0x169   : > { %v713_v14 = vpop.f32.mrf.mxu2 }
 0x16a   : > { %919 = vst [vmem:[%s1517_s17 + $0x2f0] sm:$0xff] %v713_v14  ;;  %v802_v15 = vpop.f32.mrf.mxu3  ;;  %v538_v16 = vpop.f32.mrf.mxu0 }
 0x16b   : > { %920 = vst [vmem:[%s1517_s17 + $0x2f8] sm:$0xff] %v802_v15  ;;  %v627_v17 = vpop.f32.mrf.mxu1 }
 0x16c   : > { %921 = vst [vmem:[%s1517_s17 + $0x300] sm:$0xff] %v538_v16 }
 0x16d   : > { %922 = vst [vmem:[%s1517_s17 + $0x308] sm:$0xff] %v627_v17 }
 0x171   : > { %v716_v18 = vpop.f32.mrf.mxu2 }
 0x172   : > { %923 = vst [vmem:[%s1517_s17 + $0x310] sm:$0xff] %v716_v18  ;;  %v805_v19 = vpop.f32.mrf.mxu3  ;;  %v540_v20 = vpop.f32.mrf.mxu0 }
 0x173   : > { %924 = vst [vmem:[%s1517_s17 + $0x318] sm:$0xff] %v805_v19  ;;  %v629_v21 = vpop.f32.mrf.mxu1 }
 0x174   : > { %925 = vst [vmem:[%s1517_s17 + $0x320] sm:$0xff] %v540_v20 }
 0x175   : > { %926 = vst [vmem:[%s1517_s17 + $0x328] sm:$0xff] %v629_v21 }
 0x179   : > { %v718_v22 = vpop.f32.mrf.mxu2 }
 0x17a   : > { %927 = vst [vmem:[%s1517_s17 + $0x330] sm:$0xff] %v718_v22  ;;  %v807_v23 = vpop.f32.mrf.mxu3  ;;  %v543_v24 = vpop.f32.mrf.mxu0 }
 0x17b   : > { %928 = vst [vmem:[%s1517_s17 + $0x338] sm:$0xff] %v807_v23  ;;  %v632_v25 = vpop.f32.mrf.mxu1 }
 0x17c   : > { %929 = vst [vmem:[%s1517_s17 + $0x340] sm:$0xff] %v543_v24 }
 0x17d   : > { %930 = vst [vmem:[%s1517_s17 + $0x348] sm:$0xff] %v632_v25 }
 0x181   : > { %v721_v26 = vpop.f32.mrf.mxu2 }
 0x182   : > { %931 = vst [vmem:[%s1517_s17 + $0x350] sm:$0xff] %v721_v26  ;;  %v810_v27 = vpop.f32.mrf.mxu3  ;;  %v545_v28 = vpop.f32.mrf.mxu0 }
 0x183   : > { %932 = vst [vmem:[%s1517_s17 + $0x358] sm:$0xff] %v810_v27  ;;  %v634_v29 = vpop.f32.mrf.mxu1 }
 0x184   : > { %933 = vst [vmem:[%s1517_s17 + $0x360] sm:$0xff] %v545_v28 }
 0x185   : > { %934 = vst [vmem:[%s1517_s17 + $0x368] sm:$0xff] %v634_v29 }
 0x189   : > { %v723_v30 = vpop.f32.mrf.mxu2 }
 0x18a   : > { %935 = vst [vmem:[%s1517_s17 + $0x370] sm:$0xff] %v723_v30  ;;  %v812_v31 = vpop.f32.mrf.mxu3  ;;  %v548_v32 = vpop.f32.mrf.mxu0 }
 0x18b   : > { %936 = vst [vmem:[%s1517_s17 + $0x378] sm:$0xff] %v812_v31  ;;  %v637_v33 = vpop.f32.mrf.mxu1 }
 0x18c   : > { %937 = vst [vmem:[%s1517_s17 + $0x380] sm:$0xff] %v548_v32 }
 0x18d   : > { %938 = vst [vmem:[%s1517_s17 + $0x388] sm:$0xff] %v637_v33 }
 0x191   : > { %v726_v34 = vpop.f32.mrf.mxu2 }
 0x192   : > { %939 = vst [vmem:[%s1517_s17 + $0x390] sm:$0xff] %v726_v34  ;;  %v815_v35 = vpop.f32.mrf.mxu3  ;;  %v550_v36 = vpop.f32.mrf.mxu0 }
 0x193   : > { %940 = vst [vmem:[%s1517_s17 + $0x398] sm:$0xff] %v815_v35  ;;  %v639_v37 = vpop.f32.mrf.mxu1 }
 0x194   : > { %941 = vst [vmem:[%s1517_s17 + $0x3a0] sm:$0xff] %v550_v36 }
 0x195   : > { %942 = vst [vmem:[%s1517_s17 + $0x3a8] sm:$0xff] %v639_v37 }
 0x199   : > { %v728_v38 = vpop.f32.mrf.mxu2 }
 0x19a   : > { %943 = vst [vmem:[%s1517_s17 + $0x3b0] sm:$0xff] %v728_v38  ;;  %v817_v39 = vpop.f32.mrf.mxu3  ;;  %v553_v40 = vpop.f32.mrf.mxu0 }
 0x19b   : > { %944 = vst [vmem:[%s1517_s17 + $0x3b8] sm:$0xff] %v817_v39  ;;  %v642_v41 = vpop.f32.mrf.mxu1 }
 0x19c   : > { %945 = vst [vmem:[%s1517_s17 + $0x3c0] sm:$0xff] %v553_v40 }
 0x19d   : > { %946 = vst [vmem:[%s1517_s17 + $0x3c8] sm:$0xff] %v642_v41 }
 0x1a1   : > { %v731_v42 = vpop.f32.mrf.mxu2 }
 0x1a2   : > { %947 = vst [vmem:[%s1517_s17 + $0x3d0] sm:$0xff] %v731_v42  ;;  %v820_v43 = vpop.f32.mrf.mxu3  ;;  %v555_v44 = vpop.f32.mrf.mxu0 }
 0x1a3   : > { %948 = vst [vmem:[%s1517_s17 + $0x3d8] sm:$0xff] %v820_v43  ;;  %v644_v45 = vpop.f32.mrf.mxu1 }
 0x1a4   : > { %949 = vst [vmem:[%s1517_s17 + $0x3e0] sm:$0xff] %v555_v44 }
 0x1a5   : > { %950 = vst [vmem:[%s1517_s17 + $0x3e8] sm:$0xff] %v644_v45 }
 0x1a9   : > { %v733_v46 = vpop.f32.mrf.mxu2 }
 0x1aa   : > { %951 = vst [vmem:[%s1517_s17 + $0x3f0] sm:$0xff] %v733_v46  ;;  %v822_v47 = vpop.f32.mrf.mxu3 }
 0x1ab   : > { %952 = vst [vmem:[%s1517_s17 + $0x3f8] sm:$0xff] %v822_v47 }
 0x1ac PF: > { %s12_s9 = sadd.s32 1, %s1278_s9  }
 0x1ad   : > { %p9_p4 = scmp.ge.s32.totalorder %s12_s9, 4  }
 0x1af   :  { %11 = sbr.rel (!%p9_p4) target bundleno = 1 (0x1), region = 58 }

// kernel: block1d_apply.9
= control target key start
LH: loop header
LB: loop body
LE: loop exit
PB: predicated region body
PF: predicated region fallthrough
CT: control target
= control target key end

     0   :  { %s3197_s12 = smov 0   ;;  %s6637_s0 = inlined_call_operand.vmem [shape: f32[2,256,256], index: 0, kind: input, shape index: {}]   ;;  %s6638_s1 = inlined_call_operand.vmem [shape: f32[4,256], index: 1, kind: input, shape index: {}]   ;;  %s6639_s2 = inlined_call_operand.vmem [shape: f32[1,256], index: 2, kind: input, shape index: {}]   ;;  %s6640_s3 = inlined_call_operand.vmem [shape: f32[2,256,256], index: 3, kind: output, shape index: {}]  }
   0x1 LB: > { %s2887_s13 = sadd.s32 4294967295, %s3175_s12   ;;  %p2891_p0 = scmp.ge.s32.totalorder %s3175_s12, 1  ;;  %s3175_s12 = sphi %s3197_s12, %s13_s12  }
   0x2   : > { %p137_p1 = scmp.lt.s32.totalorder %s3175_s12, 3 }
   0x4   : > { %p138_p2 = pnand %p2891_p0, %p137_p1 }
   0x5   : > { %p161_p3 = scmp.lt.s32.totalorder (!%p138_p2), %s2887_s13, 1 }
   0x6   : > { %141 = sbr.rel (%p138_p2) target bundleno = 552 (0x228), region = 32 }
   0xb   : > { %v235_v0 = vlaneseq  ;;  %v2896_v1 = vld [vmem:[%s6638_s1 + $0x3] ss:$4 sm:$0x3]  ;;  %v1418_v2 = vld [vmem:[%s6639_s2] sm:$0x3]  ;;  %s6878_s13 = smov (!%p161_p3, %s2887_s13), 1 }
   0xc   : > { %v3211_v3 = vperm.slane %v2896_v1, 0  ;;  %v2897_v4 = vld [vmem:[%s6638_s1 + $0x2] ss:$4 sm:$0x3]  ;;  %v3223_v7 = vperm.slane %v1418_v2, 0  ;;  %v3232_v11 = vperm.slane %v2896_v1, 1 }
   0xd   : > { %v3218_v5 = vshrl.u32 %v235_v0, 7  ;;  %v2898_v6 = vld [vmem:[%s6638_s1 + $0x1] ss:$4 sm:$0x3]  ;;  %v3225_v8 = vperm.slane %v2897_v4, 0  ;;  %s2901_s24 = sshll.u32 %s6878_s13, 9 }
   0xe   : > { %v3227_v9 = vperm.slane %v2898_v6, 0  ;;  %v1284_v10 = vld [vmem:[%s6638_s1] ss:$4 sm:$0x3]  ;;  %v3237_v12 = vperm.slane %v2897_v4, 1  ;;  %v3239_v13 = vperm.slane %v2898_v6, 1  ;;  %s3246_s27 = scalar_lea.vmem %s6637_s0, %s2901_s24  ;;  %s3508_s30 = scalar_lea.vmem %s6640_s3, %s2901_s24 }
   0xf   : > { %vm403_vm0 = vcmp.lt.s32.totalorder %v3218_v5, 1  ;;  %vm468_vm1 = vcmp.ge.s32.totalorder %v3218_v5, 1  ;;  %vm763_vm2 = vcmp.lt.s32.totalorder %v3218_v5, 2  ;;  %vm828_vm3 = vcmp.ge.s32.totalorder %v3218_v5, 2  ;;  %v171_v14 = vld [vmem:[%s3246_s27] sm:$0xff]  ;;  %v3254_v15 = vld [vmem:[%s3246_s27 + $0x1f0] sm:$0xff] }
  0x10   : > { %vm1123_vm4 = vcmp.lt.s32.totalorder %v3218_v5, 3  ;;  %vm1188_vm5 = vcmp.ge.s32.totalorder %v3218_v5, 3  ;;  %v3256_v16 = vperm.slane %v1284_v10, 0  ;;  %v3259_v17 = vld [vmem:[%s3246_s27 + $0x8] sm:$0xff]  ;;  %v3261_v18 = vperm.slane %v1284_v10, 1  ;;  %v3268_v24 = vld [vmem:[%s3246_s27 + $0x1f8] sm:$0xff] }
  0x11   : > { %v3263_v19 = vperm.slane %v1418_v2, 1  ;;  %v275_v20 = vmul.f32 %v3211_v3, %v171_v14  ;;  %v339_v21 = vrot.slane %v171_v14, 7  ;;  %v401_v22 = vrot.slane %v3254_v15, 7  ;;  %v3302_v41 = vld [vmem:[%s3246_s27 + $0x10] sm:$0xff]  ;;  %v3317_v50 = vld [vmem:[%s3246_s27 + $0x18] sm:$0xff] }
  0x12   : > { %v699_v23 = vrot.slane %v171_v14, 6  ;;  %v761_v25 = vrot.slane %v3254_v15, 6  ;;  %v1059_v26 = vrot.slane %v171_v14, 5  ;;  %v1121_v27 = vrot.slane %v3254_v15, 5 }
  0x13   : > { %v276_v28 = vmul.f32 %v3232_v11, %v3259_v17  ;;  %v466_v29 = vsel %vm403_vm0, %v401_v22, %v339_v21  ;;  %v340_v30 = vrot.slane %v3259_v17, 7  ;;  %v402_v31 = vrot.slane %v3268_v24, 7 }
  0x14   : > { %v700_v32 = vrot.slane %v3259_v17, 6  ;;  %v500_v33 = vsel %vm468_vm1, %v466_v29, 0.0  ;;  %v826_v34 = vsel %vm763_vm2, %v761_v25, %v699_v23  ;;  %v1186_v35 = vsel %vm1123_vm4, %v1121_v27, %v1059_v26 }
  0x15   : > { %v762_v36 = vrot.slane %v3268_v24, 6  ;;  %v571_v37 = vmul.f32 %v3225_v8, %v500_v33  ;;  %v860_v38 = vsel %vm828_vm3, %v826_v34, 0.0  ;;  %v1220_v39 = vsel %vm1188_vm5, %v1186_v35, 0.0 }
  0x16   : > { %v467_v40 = vsel %vm403_vm0, %v402_v31, %v340_v30  ;;  %v931_v42 = vmul.f32 %v3227_v9, %v860_v38  ;;  %v1290_v43 = vmul.f32 %v3256_v16, %v1220_v39  ;;  %v1060_v49 = vrot.slane %v3259_v17, 5  ;;  %v3346_v17 = vld [vmem:[%s3246_s27 + $0x20] sm:$0xff] }
  0x17   : > { %v501_v44 = vsel %vm468_vm1, %v467_v40, 0.0  ;;  %v827_v45 = vsel %vm763_vm2, %v762_v36, %v700_v32  ;;  %v635_v46 = vadd.f32 %v571_v37, %v275_v20  ;;  %v6641_v52 = vrot.slane %v3268_v24, 5 }
  0x18   : > { %v572_v47 = vmul.f32 %v3237_v12, %v501_v44  ;;  %v861_v48 = vsel %vm828_vm3, %v827_v45, 0.0  ;;  %v277_v53 = vmul.f32 %v3211_v3, %v3302_v41  ;;  %v341_v54 = vrot.slane %v3302_v41, 7 }
  0x19   : > { %v932_v51 = vmul.f32 %v3239_v13, %v861_v48  ;;  %v995_v55 = vadd.f32 %v931_v42, %v635_v46  ;;  %v701_v57 = vrot.slane %v3302_v41, 6  ;;  %v1061_v58 = vrot.slane %v3302_v41, 5 }
  0x1a   : > { %v636_v56 = vadd.f32 %v572_v47, %v276_v28  ;;  %v1187_v59 = vsel %vm1123_vm4, %v6641_v52, %v1060_v49  ;;  %v464_v60 = vsel %vm403_vm0, %v339_v21, %v341_v54  ;;  %v278_v61 = vmul.f32 %v3232_v11, %v3317_v50 }
  0x1b   : > { %v342_v62 = vrot.slane %v3317_v50, 7  ;;  %v1354_v63 = vadd.f32 %v1290_v43, %v995_v55  ;;  %v1221_v1 = vsel %vm1188_vm5, %v1187_v59, 0.0  ;;  %v573_v2 = vmul.f32 %v3225_v8, %v464_v60  ;;  %v3379_v55 = vld [vmem:[%s3246_s27 + $0x28] sm:$0xff] }
  0x1c   : > { %v996_v0 = vadd.f32 %v932_v51, %v636_v56  ;;  %v1291_v4 = vmul.f32 %v3261_v18, %v1221_v1  ;;  %v824_v6 = vsel %vm763_vm2, %v699_v23, %v701_v57  ;;  %v1184_v10 = vsel %vm1123_vm4, %v1059_v26, %v1061_v58 }
  0x1d   : > { %v465_v14 = vsel %vm403_vm0, %v340_v30, %v342_v62  ;;  %v3349_v20 = vadd.f32 %v3223_v7, %v1354_v63  ;;  %v637_v21 = vadd.f32 %v573_v2, %v277_v53  ;;  %v933_v28 = vmul.f32 %v3227_v9, %v824_v6  ;;  %v3392_v2 = vld [vmem:[%s3246_s27 + $0x30] sm:$0xff] }
  0x1e   : > { %v1292_v29 = vmul.f32 %v3256_v16, %v1184_v10  ;;  %v1355_v33 = vadd.f32 %v1291_v4, %v996_v0  ;;  %v574_v34 = vmul.f32 %v3237_v12, %v465_v14  ;;  %v702_v23 = vrot.slane %v3317_v50, 6 }
  0x1f   : > { %v1062_v26 = vrot.slane %v3317_v50, 5  ;;  %v1488_v35 = vsub.f32 0.0, %v3349_v20  ;;  %v997_v30 = vadd.f32 %v933_v28, %v637_v21  ;;  %v279_v37 = vmul.f32 %v3211_v3, %v3346_v17 }
  0x20   : > { %v343_v38 = vrot.slane %v3346_v17, 7  ;;  %v3361_v39 = vadd.f32 %v3263_v19, %v1355_v33  ;;  %v638_v40 = vadd.f32 %v574_v34, %v278_v61  ;;  %v825_v41 = vsel %vm763_vm2, %v700_v32, %v702_v23 }
  0x21   : > { %v1185_v42 = vsel %vm1123_vm4, %v1060_v49, %v1062_v26  ;;  %v1552_v43 = vmul.f32 1.442695, %v1488_v35  ;;  %v1356_v44 = vadd.f32 %v1292_v29, %v997_v30  ;;  %v934_v45 = vmul.f32 %v3239_v13, %v825_v41 }
  0x22   : > { %v1293_v46 = vmul.f32 %v3261_v18, %v1185_v42  ;;  %v1489_v47 = vsub.f32 0.0, %v3361_v39  ;;  %v462_v48 = vsel %vm403_vm0, %v341_v54, %v343_v38  ;;  %v703_v50 = vrot.slane %v3346_v17, 6 }
  0x23   : > { %v1063_v51 = vrot.slane %v3346_v17, 5  ;;  %2911 = vpow2.f32 %v1552_v43  ;;  %v3375_v32 = vadd.f32 %v3223_v7, %v1356_v44  ;;  %v998_v49 = vadd.f32 %v934_v45, %v638_v40 }
  0x24   : > { %v575_v53 = vmul.f32 %v3225_v8, %v462_v48  ;;  %v1554_v56 = vmul.f32 1.442695, %v1489_v47  ;;  %v822_v59 = vsel %vm763_vm2, %v701_v57, %v703_v50  ;;  %v280_v60 = vmul.f32 %v3232_v11, %v3379_v55 }
  0x25   : > { %v1182_v54 = vsel %vm1123_vm4, %v1061_v58, %v1063_v51  ;;  %v1490_v61 = vsub.f32 0.0, %v3375_v32  ;;  %v1357_v63 = vadd.f32 %v1293_v46, %v998_v49  ;;  %v935_v1 = vmul.f32 %v3227_v9, %v822_v59 }
  0x26   : > { %v639_v0 = vadd.f32 %v575_v53, %v279_v37  ;;  %2913 = vpow2.f32 %v1554_v56  ;;  %v1294_v4 = vmul.f32 %v3256_v16, %v1182_v54  ;;  %v344_v57 = vrot.slane %v3379_v55, 7 }
  0x27   : > { %v704_v6 = vrot.slane %v3379_v55, 6  ;;  %v1556_v10 = vmul.f32 1.442695, %v1490_v61  ;;  %v3398_v58 = vadd.f32 %v3263_v19, %v1357_v63  ;;  %v1064_v21 = vrot.slane %v3379_v55, 5 }
  0x28   : > { %v999_v14 = vadd.f32 %v935_v1, %v639_v0  ;;  %v463_v28 = vsel %vm403_vm0, %v342_v62, %v344_v57  ;;  %v345_v33 = vrot.slane %v3392_v2, 7  ;;  %v281_v56 = vmul.f32 %v3211_v3, %v3392_v2 }
  0x29   : > { %v823_v29 = vsel %vm763_vm2, %v702_v23, %v704_v6  ;;  %v2912_v34 = vpop.eup %2911  ;;  %2915 = vpow2.f32 %v1556_v10  ;;  %v1491_v35 = vsub.f32 0.0, %v3398_v58  ;;  %v576_v37 = vmul.f32 %v3237_v12, %v463_v28 }
  0x2a   : > { %v1358_v30 = vadd.f32 %v1294_v4, %v999_v14  ;;  %v1680_v40 = vadd.f32 1.0, %v2912_v34  ;;  %v936_v41 = vmul.f32 %v3239_v13, %v823_v29  ;;  %v1183_v62 = vsel %vm1123_vm4, %v1062_v26, %v1064_v21 }
  0x2b   : > { %v1558_v42 = vmul.f32 1.442695, %v1491_v35  ;;  %v640_v43 = vadd.f32 %v576_v37, %v280_v60  ;;  %v460_v44 = vsel %vm403_vm0, %v343_v38, %v345_v33  ;;  %v1295_v48 = vmul.f32 %v3261_v18, %v1183_v62 }
  0x2c   : > { %v3418_v23 = vadd.f32 %v3223_v7, %v1358_v30  ;;  %v2914_v45 = vpop.eup %2913  ;;  %2917 = vrcp.f32 %v1680_v40  ;;  %v1753_v46 = vand.u32 2147483647, %v1680_v40  ;;  %v1755_v47 = vand.u32 2147483648, %v1680_v40 }
  0x2d   : > { %v3425_v49 = vadd.f32 1.0, %v2914_v45  ;;  %2919 = vpow2.f32 %v1558_v42  ;;  %v1000_v53 = vadd.f32 %v936_v41, %v640_v43  ;;  %v577_v59 = vmul.f32 %v3225_v8, %v460_v44 }
  0x2e   : > { %v1492_v26 = vsub.f32 0.0, %v3418_v23  ;;  %v705_v54 = vrot.slane %v3392_v2, 6  ;;  %vm1749_vm6 = vweird.f32 %v1680_v40  ;;  %vm3437_vm7 = vcmp.eq.f32.partialorder %v1753_v46, 8.507059e+37 }
  0x2f   : > { %v2916_v38 = vpop.eup %2915  ;;  %2921 = vrcp.f32 %v3425_v49  ;;  %v1768_v60 = vand.u32 2147483647, %v3425_v49  ;;  %v1770_v61 = vand.u32 2147483648, %v3425_v49  ;;  %v1359_v1 = vadd.f32 %v1295_v48, %v1000_v53 }
  0x30   : > { %v3435_v63 = vadd.f32 1.0, %v2916_v38  ;;  %v1560_v0 = vmul.f32 1.442695, %v1492_v26  ;;  %v1756_v10 = vor.u32 1.1754944e-38, %v1755_v47  ;;  %v820_v14 = vsel %vm763_vm2, %v703_v50, %v705_v54 }
  0x31   : > { %v1065_v28 = vrot.slane %v3392_v2, 5  ;;  %vm1764_vm8 = vweird.f32 %v3425_v49  ;;  %v641_v35 = vadd.f32 %v577_v59, %v281_v56  ;;  %v3451_v62 = vadd.f32 %v3263_v19, %v1359_v1  ;;  %v3471_v56 = vld [vmem:[%s3246_s27 + $0x38] sm:$0xff] }
  0x32   : > { %v2918_v29 = vpop.eup %2917  ;;  %2923 = vrcp.f32 %v3435_v63  ;;  %v1785_v34 = vand.u32 2147483648, %v3435_v63  ;;  %v1783_v41 = vand.u32 2147483647, %v3435_v63  ;;  %vm3453_vm9 = vcmp.eq.f32.partialorder %v1768_v60, 8.507059e+37 }
  0x33   : > { %v2920_v30 = vpop.eup %2919  ;;  %v1745_v37 = vmul.f32 %v2918_v29, %v1680_v40  ;;  %2925 = vpow2.f32 %v1560_v0  ;;  %v1771_v42 = vor.u32 1.1754944e-38, %v1770_v61  ;;  %v937_v44 = vmul.f32 %v3227_v9, %v820_v14 }
  0x34   : > { %v3457_v43 = vadd.f32 1.0, %v2920_v30  ;;  %vm1750_vm10 = vweird.f32 %v2918_v29  ;;  %v1493_v47 = vsub.f32 0.0, %v3451_v62  ;;  %v1180_v48 = vsel %vm1123_vm4, %v1063_v51, %v1065_v28 }
  0x35   : > { %v2922_v45 = vpop.eup %2921  ;;  %v1746_v46 = vsub.f32 1.0, %v1745_v37  ;;  %vm1779_vm11 = vweird.f32 %v3435_v63  ;;  %v1786_v53 = vor.u32 1.1754944e-38, %v1785_v34  ;;  %vm3473_vm13 = vcmp.eq.f32.partialorder %v1783_v41, 8.507059e+37  ;;  %vm3482_vm14 = vmor %vm1749_vm6, %vm1750_vm10 }
  0x36   : > { %v1760_v26 = vmul.f32 %v2922_v45, %v3425_v49  ;;  %2927 = vrcp.f32 %v3457_v43  ;;  %vm1765_vm12 = vweird.f32 %v2922_v45  ;;  %v1562_v60 = vmul.f32 1.442695, %v1493_v47  ;;  %v3653_v49 = vld [vmem:[%s3246_s27 + $0x50] sm:$0xff] }
  0x37   : > { %v1747_v59 = vmul.f32 %v2918_v29, %v1746_v46  ;;  %v3479_v17 = vmul.f32 %v3232_v11, %v3471_v56  ;;  %v1798_v1 = vand.u32 2147483647, %v3457_v43  ;;  %v1001_v14 = vadd.f32 %v937_v44, %v641_v35  ;;  %vm3499_vm1 = vmor %vm1764_vm8, %vm1765_vm12 }
  0x38   : > { %v2924_v51 = vpop.eup %2923  ;;  %v1761_v0 = vsub.f32 1.0, %v1760_v26  ;;  %v1296_v34 = vmul.f32 %v3256_v16, %v1180_v48  ;;  %vm1794_vm15 = vweird.f32 %v3457_v43  ;;  %v346_v46 = vrot.slane %v3471_v56, 7 }
  0x39   : > { %v2926_v30 = vpop.eup %2925  ;;  %v1748_v37 = vadd.f32 %v2918_v29, %v1747_v59  ;;  %v1775_v41 = vmul.f32 %v2924_v51, %v3435_v63  ;;  %v1800_v47 = vand.u32 2147483648, %v3457_v43  ;;  %2929 = vpow2.f32 %v1562_v60 }
  0x3a   : > { %v1762_v40 = vmul.f32 %v2922_v45, %v1761_v0  ;;  %v3492_v52 = vadd.f32 1.0, %v2926_v30  ;;  %vm1780_vm3 = vweird.f32 %v2924_v51  ;;  %v1360_v26 = vadd.f32 %v1296_v34, %v1001_v14 }
  0x3b   : > { %v1752_v35 = vsel %vm3482_vm14, %v2918_v29, %v1748_v37  ;;  %v1776_v48 = vsub.f32 1.0, %v1775_v41  ;;  %vm3512_vm5 = vcmp.eq.f32.partialorder %v1798_v1, 8.507059e+37  ;;  %v461_v4 = vsel %vm403_vm0, %v344_v57, %v346_v46  ;;  %vm3529_vm6 = vmor %vm1779_vm11, %vm1780_vm3  ;;  %v3579_v1 = vld [vmem:[%s3246_s27 + $0x40] sm:$0xff] }
  0x3c   : > { %v2928_v59 = vpop.eup %2927  ;;  %v1757_v29 = vsel %vm3437_vm7, %v1756_v10, %v1752_v35  ;;  %v1763_v60 = vadd.f32 %v2922_v45, %v1762_v40  ;;  %2931 = vrcp.f32 %v3492_v52  ;;  %v1813_v34 = vand.u32 2147483647, %v3492_v52 }
  0x3d   : > { %v2704_v61 = vmul.f32 %v1757_v29, %v3349_v20  ;;  %v1777_v0 = vmul.f32 %v2924_v51, %v1776_v48  ;;  %v1790_v14 = vmul.f32 %v2928_v59, %v3457_v43  ;;  %v1801_v20 = vor.u32 1.1754944e-38, %v1800_v47 }
  0x3e   : > { %v1767_v10 = vsel %vm3499_vm1, %v2922_v45, %v1763_v60  ;;  %v3535_v30 = vadd.f32 %v3223_v7, %v1360_v26  ;;  %vm1795_vm7 = vweird.f32 %v2928_v59  ;;  %vm1809_vm8 = vweird.f32 %v3492_v52 }
  0x3f   : > { %2768 = vst [vmem:[%s3508_s30] sm:$0xff] %v2704_v61  ;;  %v1772_v57 = vsel %vm3453_vm9, %v1771_v42, %v1767_v10  ;;  %v1778_v37 = vadd.f32 %v2924_v51, %v1777_v0  ;;  %v1791_v41 = vsub.f32 1.0, %v1790_v14  ;;  %v2930_v45 = vpop.eup %2929  ;;  %v578_v47 = vmul.f32 %v3237_v12, %v461_v4  ;;  %vm3554_vm9 = vmor %vm1794_vm15, %vm1795_vm7 }
  0x40   : > { %v2705_v63 = vmul.f32 %v1772_v57, %v3361_v39  ;;  %v1494_v40 = vsub.f32 0.0, %v3535_v30  ;;  %v1815_v48 = vand.u32 2147483648, %v3492_v52  ;;  %v3547_v50 = vadd.f32 1.0, %v2930_v45  ;;  %v3586_v57 = vld [vmem:[%s3246_s27 + $0x48] sm:$0xff] }
  0x41   : > { %v1782_v35 = vsel %vm3529_vm6, %v2924_v51, %v1778_v37  ;;  %v1792_v44 = vmul.f32 %v2928_v59, %v1791_v41  ;;  %vm3558_vm10 = vcmp.eq.f32.partialorder %v1813_v34, 8.507059e+37  ;;  %v706_v60 = vrot.slane %v3471_v56, 6 }
  0x42   : > { %v2932_v42 = vpop.eup %2931  ;;  %2769 = vst [vmem:[%s3508_s30 + $0x8] sm:$0xff] %v2705_v63  ;;  %v1787_v39 = vsel %vm3473_vm13, %v1786_v53, %v1782_v35  ;;  %v1564_v51 = vmul.f32 1.442695, %v1494_v40  ;;  %v1066_v43 = vrot.slane %v3471_v56, 5  ;;  %2933 = vrcp.f32 %v3547_v50 }
  0x43   : > { %v2706_v61 = vmul.f32 %v1787_v39, %v3375_v32  ;;  %v1793_v0 = vadd.f32 %v2928_v59, %v1792_v44  ;;  %v1805_v38 = vmul.f32 %v2932_v42, %v3492_v52  ;;  %vm1810_vm11 = vweird.f32 %v2932_v42 }
  0x44   : > { %v1828_v53 = vand.u32 2147483647, %v3547_v50  ;;  %v642_v14 = vadd.f32 %v578_v47, %v3479_v17  ;;  %2935 = vpow2.f32 %v1564_v51  ;;  %v821_v32 = vsel %vm763_vm2, %v704_v6, %v706_v60  ;;  %vm3599_vm13 = vmor %vm1809_vm8, %vm1810_vm11 }
  0x45   : > { %2770 = vst [vmem:[%s3508_s30 + $0x10] sm:$0xff] %v2706_v61  ;;  %v1797_v4 = vsel %vm3554_vm9, %v2928_v59, %v1793_v0  ;;  %v1806_v10 = vsub.f32 1.0, %v1805_v38  ;;  %v1816_v17 = vor.u32 1.1754944e-38, %v1815_v48  ;;  %vm1824_vm12 = vweird.f32 %v3547_v50 }
  0x46   : > { %v1802_v34 = vsel %vm3512_vm5, %v1801_v20, %v1797_v4  ;;  %v938_v59 = vmul.f32 %v3239_v13, %v821_v32  ;;  %v1830_v45 = vand.u32 2147483648, %v3547_v50  ;;  %v1181_v6 = vsel %vm1123_vm4, %v1064_v21, %v1066_v43 }
  0x47   : > { %v2707_v37 = vmul.f32 %v1802_v34, %v3398_v58  ;;  %v1807_v41 = vmul.f32 %v2932_v42, %v1806_v10  ;;  %v1297_v58 = vmul.f32 %v3261_v18, %v1181_v6  ;;  %v347_v63 = vrot.slane %v3579_v1, 7 }
  0x48   : > { %v1002_v20 = vadd.f32 %v938_v59, %v642_v14  ;;  %v707_v40 = vrot.slane %v3579_v1, 6  ;;  %vm3607_vm14 = vcmp.eq.f32.partialorder %v1828_v53, 8.507059e+37  ;;  %v283_v52 = vmul.f32 %v3211_v3, %v3579_v1  ;;  %v2934_v44 = vpop.eup %2933 }
  0x49   : > { %2771 = vst [vmem:[%s3508_s30 + $0x18] sm:$0xff] %v2707_v37  ;;  %v1808_v47 = vadd.f32 %v2932_v42, %v1807_v41  ;;  %v1067_v21 = vrot.slane %v3579_v1, 5  ;;  %v348_v35 = vrot.slane %v3586_v57, 7  ;;  %v458_v39 = vsel %vm403_vm0, %v345_v33, %v347_v63 }
  0x4a   : > { %v1361_v48 = vadd.f32 %v1297_v58, %v1002_v20  ;;  %v818_v26 = vsel %vm763_vm2, %v705_v54, %v707_v40  ;;  %v708_v51 = vrot.slane %v3586_v57, 6  ;;  %v2936_v61 = vpop.eup %2935  ;;  %v1820_v38 = vmul.f32 %v2934_v44, %v3547_v50 }
  0x4b   : > { %v1812_v0 = vsel %vm3599_vm13, %v2932_v42, %v1808_v47  ;;  %vm1825_vm15 = vweird.f32 %v2934_v44  ;;  %v579_v53 = vmul.f32 %v3225_v8, %v458_v39  ;;  %v3632_v14 = vadd.f32 1.0, %v2936_v61 }
  0x4c   : > { %v1817_v33 = vsel %vm3558_vm10, %v1816_v17, %v1812_v0  ;;  %v3635_v54 = vadd.f32 %v3263_v19, %v1361_v48  ;;  %v939_v4 = vmul.f32 %v3227_v9, %v818_v26  ;;  %v1821_v42 = vsub.f32 1.0, %v1820_v38  ;;  %vm3658_vm1 = vmor %vm1824_vm12, %vm1825_vm15 }
  0x4d   : > { %v2708_v10 = vmul.f32 %v1817_v33, %v3418_v23  ;;  %v643_v32 = vadd.f32 %v579_v53, %v283_v52  ;;  %v1178_v29 = vsel %vm1123_vm4, %v1065_v28, %v1067_v21  ;;  %v1831_v34 = vor.u32 1.1754944e-38, %v1830_v45 }
  0x4e   : > { %2937 = vrcp.f32 %v3632_v14  ;;  %v1843_v17 = vand.u32 2147483647, %v3632_v14  ;;  %v284_v59 = vmul.f32 %v3232_v11, %v3586_v57  ;;  %v1822_v37 = vmul.f32 %v2934_v44, %v1821_v42 }
  0x4f   : > { %2772 = vst [vmem:[%s3508_s30 + $0x20] sm:$0xff] %v2708_v10  ;;  %v1495_v23 = vsub.f32 0.0, %v3635_v54  ;;  %v1003_v41 = vadd.f32 %v939_v4, %v643_v32  ;;  %v1298_v6 = vmul.f32 %v3256_v16, %v1178_v29  ;;  %vm1839_vm3 = vweird.f32 %v3632_v14  ;;  %v3708_v29 = vld [vmem:[%s3246_s27 + $0x58] sm:$0xff] }
  0x50   : > { %v1845_v28 = vand.u32 2147483648, %v3632_v14  ;;  %v459_v45 = vsel %vm403_vm0, %v346_v46, %v348_v35  ;;  %v819_v50 = vsel %vm763_vm2, %v706_v60, %v708_v51  ;;  %v1823_v20 = vadd.f32 %v2934_v44, %v1822_v37 }
  0x51   : > { %v1566_v58 = vmul.f32 1.442695, %v1495_v23  ;;  %v1362_v47 = vadd.f32 %v1298_v6, %v1003_v41  ;;  %v580_v52 = vmul.f32 %v3237_v12, %v459_v45  ;;  %v940_v48 = vmul.f32 %v3239_v13, %v819_v50 }
  0x52   : > { %v1068_v39 = vrot.slane %v3586_v57, 5  ;;  %v285_v26 = vmul.f32 %v3211_v3, %v3653_v49  ;;  %v349_v46 = vrot.slane %v3653_v49, 7  ;;  %v1827_v61 = vsel %vm3658_vm1, %v2934_v44, %v1823_v20 }
  0x53   : > { %vm3684_vm5 = vcmp.eq.f32.partialorder %v1843_v17, 8.507059e+37  ;;  %2939 = vpow2.f32 %v1566_v58  ;;  %v3689_v0 = vadd.f32 %v3223_v7, %v1362_v47  ;;  %v644_v38 = vadd.f32 %v580_v52, %v284_v59 }
  0x54   : > { %v2938_v53 = vpop.eup %2937  ;;  %v1832_v33 = vsel %vm3607_vm14, %v1831_v34, %v1827_v61  ;;  %v1179_v44 = vsel %vm1123_vm4, %v1066_v43, %v1068_v39  ;;  %v456_v4 = vsel %vm403_vm0, %v347_v63, %v349_v46  ;;  %v709_v10 = vrot.slane %v3653_v49, 6 }
  0x55   : > { %v2709_v42 = vmul.f32 %v1832_v33, %v3451_v62  ;;  %v1835_v32 = vmul.f32 %v2938_v53, %v3632_v14  ;;  %vm1840_vm6 = vweird.f32 %v2938_v53  ;;  %v1496_v55 = vsub.f32 0.0, %v3689_v0 }
  0x56   : > { %v1004_v56 = vadd.f32 %v940_v48, %v644_v38  ;;  %v1299_v34 = vmul.f32 %v3261_v18, %v1179_v44  ;;  %v581_v43 = vmul.f32 %v3225_v8, %v456_v4  ;;  %v816_v63 = vsel %vm763_vm2, %v707_v40, %v709_v10  ;;  %vm3732_vm7 = vmor %vm1839_vm3, %vm1840_vm6 }
  0x57   : > { %2773 = vst [vmem:[%s3508_s30 + $0x28] sm:$0xff] %v2709_v42  ;;  %v1836_v62 = vsub.f32 1.0, %v1835_v32  ;;  %v1568_v17 = vmul.f32 1.442695, %v1496_v55  ;;  %v941_v59 = vmul.f32 %v3227_v9, %v816_v63  ;;  %v1069_v37 = vrot.slane %v3653_v49, 5 }
  0x58   : > { %v1846_v23 = vor.u32 1.1754944e-38, %v1845_v28  ;;  %v1363_v41 = vadd.f32 %v1299_v34, %v1004_v56  ;;  %v645_v6 = vadd.f32 %v581_v43, %v285_v26  ;;  %v350_v2 = vrot.slane %v3708_v29, 7  ;;  %v3786_v28 = vld [vmem:[%s3246_s27 + $0x68] sm:$0xff] }
  0x59   : > { %v2940_v45 = vpop.eup %2939  ;;  %v1837_v50 = vmul.f32 %v2938_v53, %v1836_v62  ;;  %2941 = vpow2.f32 %v1568_v17  ;;  %v1176_v40 = vsel %vm1123_vm4, %v1067_v21, %v1069_v37  ;;  %v710_v20 = vrot.slane %v3708_v29, 6 }
  0x5a   : > { %v1687_v58 = vadd.f32 1.0, %v2940_v45  ;;  %v3737_v47 = vadd.f32 %v3263_v19, %v1363_v41  ;;  %v1005_v52 = vadd.f32 %v941_v59, %v645_v6  ;;  %v1300_v1 = vmul.f32 %v3256_v16, %v1176_v40 }
  0x5b   : > { %v1838_v48 = vadd.f32 %v2938_v53, %v1837_v50  ;;  %v286_v21 = vmul.f32 %v3232_v11, %v3708_v29  ;;  %v457_v14 = vsel %vm403_vm0, %v348_v35, %v350_v2  ;;  %v817_v26 = vsel %vm763_vm2, %v708_v51, %v710_v20  ;;  %v3760_v35 = vld [vmem:[%s3246_s27 + $0x60] sm:$0xff] }
  0x5c   : > { %2943 = vrcp.f32 %v1687_v58  ;;  %v1070_v61 = vrot.slane %v3708_v29, 5  ;;  %v1497_v33 = vsub.f32 0.0, %v3737_v47  ;;  %v1364_v44 = vadd.f32 %v1300_v1, %v1005_v52  ;;  %v3897_v29 = vld [vmem:[%s3246_s27 + $0x70] sm:$0xff] }
  0x5d   : > { %v1842_v38 = vsel %vm3732_vm7, %v2938_v53, %v1838_v48  ;;  %v582_v4 = vmul.f32 %v3237_v12, %v457_v14  ;;  %v1858_v32 = vand.u32 2147483647, %v1687_v58  ;;  %v1860_v55 = vand.u32 2147483648, %v1687_v58 }
  0x5e   : > { %v1847_v42 = vsel %vm3684_vm5, %v1846_v23, %v1842_v38  ;;  %v942_v51 = vmul.f32 %v3239_v13, %v817_v26  ;;  %v1570_v43 = vmul.f32 1.442695, %v1497_v33  ;;  %v3767_v53 = vadd.f32 %v3223_v7, %v1364_v44 }
  0x5f   : > { %v2942_v56 = vpop.eup %2941  ;;  %v2710_v34 = vmul.f32 %v1847_v42, %v3535_v30  ;;  %v646_v63 = vadd.f32 %v582_v4, %v286_v21  ;;  %vm1854_vm8 = vweird.f32 %v1687_v58  ;;  %v1177_v60 = vsel %vm1123_vm4, %v1068_v39, %v1070_v61 }
  0x60   : > { %v1688_v62 = vadd.f32 1.0, %v2942_v56  ;;  %v351_v17 = vrot.slane %v3760_v35, 7  ;;  %2945 = vpow2.f32 %v1570_v43  ;;  %v1498_v30 = vsub.f32 0.0, %v3767_v53 }
  0x61   : > { %2774 = vst [vmem:[%s3508_s30 + $0x30] sm:$0xff] %v2710_v34  ;;  %v1006_v59 = vadd.f32 %v942_v51, %v646_v63  ;;  %v1301_v23 = vmul.f32 %v3261_v18, %v1177_v60  ;;  %vm3779_vm9 = vcmp.eq.f32.partialorder %v1858_v32, 8.507059e+37  ;;  %v1861_v45 = vor.u32 1.1754944e-38, %v1860_v55 }
  0x62   : > { %v2944_v41 = vpop.eup %2943  ;;  %2947 = vrcp.f32 %v1688_v62  ;;  %v287_v57 = vmul.f32 %v3211_v3, %v3760_v35  ;;  %vm1869_vm10 = vweird.f32 %v1688_v62  ;;  %v1572_v50 = vmul.f32 1.442695, %v1498_v30 }
  0x63   : > { %v1850_v39 = vmul.f32 %v2944_v41, %v1687_v58  ;;  %v1365_v40 = vadd.f32 %v1301_v23, %v1006_v59  ;;  %vm1855_vm11 = vweird.f32 %v2944_v41  ;;  %v1873_v52 = vand.u32 2147483647, %v1688_v62 }
  0x64   : > { %v454_v1 = vsel %vm403_vm0, %v349_v46, %v351_v17  ;;  %v711_v48 = vrot.slane %v3760_v35, 6  ;;  %2949 = vpow2.f32 %v1572_v50  ;;  %v1875_v38 = vand.u32 2147483648, %v1688_v62  ;;  %vm3811_vm12 = vmor %vm1854_vm8, %vm1855_vm11 }
  0x65   : > { %v1851_v21 = vsub.f32 1.0, %v1850_v39  ;;  %v3796_v14 = vadd.f32 %v3263_v19, %v1365_v40  ;;  %v583_v26 = vmul.f32 %v3225_v8, %v454_v1  ;;  %v1071_v44 = vrot.slane %v3760_v35, 5 }
  0x66   : > { %v814_v33 = vsel %vm763_vm2, %v709_v10, %v711_v48  ;;  %v352_v46 = vrot.slane %v3786_v28, 7  ;;  %v2946_v4 = vpop.eup %2945  ;;  %v288_v63 = vmul.f32 %v3232_v11, %v3786_v28  ;;  %v712_v23 = vrot.slane %v3786_v28, 6 }
  0x67   : > { %v1852_v42 = vmul.f32 %v2944_v41, %v1851_v21  ;;  %v1499_v32 = vsub.f32 0.0, %v3796_v14  ;;  %v647_v55 = vadd.f32 %v583_v26, %v287_v57  ;;  %v943_v51 = vmul.f32 %v3227_v9, %v814_v33 }
  0x68   : > { %v2948_v56 = vpop.eup %2947  ;;  %v3815_v43 = vadd.f32 1.0, %v2946_v4  ;;  %v1174_v10 = vsel %vm1123_vm4, %v1069_v37, %v1071_v44  ;;  %v455_v58 = vsel %vm403_vm0, %v350_v2, %v352_v46  ;;  %vm3839_vm14 = vcmp.eq.f32.partialorder %v1873_v52, 8.507059e+37 }
  0x69   : > { %v1853_v60 = vadd.f32 %v2944_v41, %v1852_v42  ;;  %v1865_v30 = vmul.f32 %v2948_v56, %v1688_v62  ;;  %v1574_v59 = vmul.f32 1.442695, %v1499_v32  ;;  %vm1870_vm13 = vweird.f32 %v2948_v56 }
  0x6a   : > { %2951 = vrcp.f32 %v3815_v43  ;;  %v1888_v49 = vand.u32 2147483647, %v3815_v43  ;;  %v1890_v37 = vand.u32 2147483648, %v3815_v43  ;;  %v2950_v57 = vpop.eup %2949  ;;  %v1007_v2 = vadd.f32 %v943_v51, %v647_v55  ;;  %vm3850_vm15 = vmor %vm1869_vm10, %vm1870_vm13 }
  0x6b   : > { %v1857_v39 = vsel %vm3811_vm12, %v2944_v41, %v1853_v60  ;;  %v1866_v50 = vsub.f32 1.0, %v1865_v30  ;;  %2953 = vpow2.f32 %v1574_v59  ;;  %v3843_v21 = vadd.f32 1.0, %v2950_v57 }
  0x6c   : > { %v1862_v40 = vsel %vm3779_vm9, %v1861_v45, %v1857_v39  ;;  %v1302_v4 = vmul.f32 %v3256_v16, %v1174_v10  ;;  %v584_v41 = vmul.f32 %v3237_v12, %v455_v58  ;;  %v1876_v6 = vor.u32 1.1754944e-38, %v1875_v38 }
  0x6d   : > { %v2711_v26 = vmul.f32 %v1862_v40, %v3635_v54  ;;  %v1867_v33 = vmul.f32 %v2948_v56, %v1866_v50  ;;  %vm1884_vm1 = vweird.f32 %v3815_v43  ;;  %v1891_v45 = vor.u32 1.1754944e-38, %v1890_v37 }
  0x6e   : > { %2955 = vrcp.f32 %v3843_v21  ;;  %vm3857_vm3 = vcmp.eq.f32.partialorder %v1888_v49, 8.507059e+37  ;;  %v1366_v32 = vadd.f32 %v1302_v4, %v1007_v2  ;;  %v648_v55 = vadd.f32 %v584_v41, %v288_v63 }
  0x6f   : > { %2775 = vst [vmem:[%s3508_s30 + $0x38] sm:$0xff] %v2711_v26  ;;  %v1868_v52 = vadd.f32 %v2948_v56, %v1867_v33  ;;  %v815_v62 = vsel %vm763_vm2, %v710_v20, %v712_v23  ;;  %v1903_v51 = vand.u32 2147483647, %v3843_v21  ;;  %v1905_v34 = vand.u32 2147483648, %v3843_v21 }
  0x70   : > { %v2952_v38 = vpop.eup %2951  ;;  %v944_v10 = vmul.f32 %v3239_v13, %v815_v62  ;;  %v1072_v58 = vrot.slane %v3786_v28, 5  ;;  %v3875_v20 = vadd.f32 %v3223_v7, %v1366_v32  ;;  %vm1899_vm6 = vweird.f32 %v3843_v21  ;;  %v3914_v32 = vld [vmem:[%s3246_s27 + $0x78] sm:$0xff] }
  0x71   : > { %v2954_v60 = vpop.eup %2953  ;;  %v1872_v63 = vsel %vm3850_vm15, %v2948_v56, %v1868_v52  ;;  %v1880_v30 = vmul.f32 %v2952_v38, %v3815_v43  ;;  %vm1885_vm5 = vweird.f32 %v2952_v38  ;;  %vm3891_vm7 = vcmp.eq.f32.partialorder %v1903_v51, 8.507059e+37 }
  0x72   : > { %v1877_v59 = vsel %vm3839_vm14, %v1876_v6, %v1872_v63  ;;  %v3879_v49 = vadd.f32 1.0, %v2954_v60  ;;  %v1008_v37 = vadd.f32 %v944_v10, %v648_v55  ;;  %v1175_v56 = vsel %vm1123_vm4, %v1070_v61, %v1072_v58  ;;  %vm3906_vm9 = vmor %vm1884_vm1, %vm1885_vm5 }
  0x73   : > { %v2712_v57 = vmul.f32 %v1877_v59, %v3689_v0  ;;  %v1881_v39 = vsub.f32 1.0, %v1880_v30  ;;  %v1500_v50 = vsub.f32 0.0, %v3875_v20  ;;  %v1303_v2 = vmul.f32 %v3261_v18, %v1175_v56 }
  0x74   : > { %v2956_v40 = vpop.eup %2955  ;;  %v1906_v26 = vor.u32 1.1754944e-38, %v1905_v34  ;;  %2957 = vrcp.f32 %v3879_v49  ;;  %vm1914_vm8 = vweird.f32 %v3879_v49  ;;  %v1918_v33 = vand.u32 2147483647, %v3879_v49 }
  0x75   : > { %2776 = vst [vmem:[%s3508_s30 + $0x40] sm:$0xff] %v2712_v57  ;;  %v1882_v0 = vmul.f32 %v2952_v38, %v1881_v39  ;;  %v1895_v61 = vmul.f32 %v2956_v40, %v3843_v21  ;;  %v1576_v4 = vmul.f32 1.442695, %v1500_v50  ;;  %vm1900_vm10 = vweird.f32 %v2956_v40 }
  0x76   : > { %v1920_v42 = vand.u32 2147483648, %v3879_v49  ;;  %v1367_v6 = vadd.f32 %v1303_v2, %v1008_v37  ;;  %v289_v52 = vmul.f32 %v3211_v3, %v3897_v29  ;;  %v353_v51 = vrot.slane %v3897_v29, 7  ;;  %vm3938_vm11 = vmor %vm1899_vm6, %vm1900_vm10 }
  0x77   : > { %v1883_v55 = vadd.f32 %v2952_v38, %v1882_v0  ;;  %v1896_v62 = vsub.f32 1.0, %v1895_v61  ;;  %2959 = vpow2.f32 %v1576_v4  ;;  %v713_v34 = vrot.slane %v3897_v29, 6 }
  0x78   : > { %v3918_v43 = vadd.f32 %v3263_v19, %v1367_v6  ;;  %v1073_v10 = vrot.slane %v3897_v29, 5  ;;  %v290_v60 = vmul.f32 %v3232_v11, %v3914_v32  ;;  %v452_v59 = vsel %vm403_vm0, %v351_v17, %v353_v51 }
  0x79   : > { %v1887_v63 = vsel %vm3906_vm9, %v2952_v38, %v1883_v55  ;;  %v1897_v30 = vmul.f32 %v2956_v40, %v1896_v62  ;;  %v354_v37 = vrot.slane %v3914_v32, 7  ;;  %v585_v50 = vmul.f32 %v3225_v8, %v452_v59 }
  0x7a   : > { %v2958_v56 = vpop.eup %2957  ;;  %v1892_v57 = vsel %vm3857_vm3, %v1891_v45, %v1887_v63  ;;  %v1501_v39 = vsub.f32 0.0, %v3918_v43  ;;  %v812_v17 = vsel %vm763_vm2, %v711_v48, %v713_v34  ;;  %v1172_v4 = vsel %vm1123_vm4, %v1071_v44, %v1073_v10 }
  0x7b   : > { %v2713_v45 = vmul.f32 %v1892_v57, %v3737_v47  ;;  %v1898_v54 = vadd.f32 %v2956_v40, %v1897_v30  ;;  %v1910_v21 = vmul.f32 %v2958_v56, %v3879_v49  ;;  %vm1915_vm12 = vweird.f32 %v2958_v56 }
  0x7c   : > { %v1578_v2 = vmul.f32 1.442695, %v1501_v39  ;;  %v649_v0 = vadd.f32 %v585_v50, %v289_v52  ;;  %v945_v61 = vmul.f32 %v3227_v9, %v812_v17  ;;  %v1304_v6 = vmul.f32 %v3256_v16, %v1172_v4  ;;  %vm3979_vm13 = vmor %vm1914_vm8, %vm1915_vm12 }
  0x7d   : > { %v2960_v41 = vpop.eup %2959  ;;  %2777 = vst [vmem:[%s3508_s30 + $0x48] sm:$0xff] %v2713_v45  ;;  %v1902_v47 = vsel %vm3938_vm11, %v2956_v40, %v1898_v54  ;;  %v1911_v48 = vsub.f32 1.0, %v1910_v21  ;;  %v453_v35 = vsel %vm403_vm0, %v352_v46, %v354_v37  ;;  %v714_v30 = vrot.slane %v3914_v32, 6 }
  0x7e   : > { %v1907_v44 = vsel %vm3891_vm7, %v1906_v26, %v1902_v47  ;;  %v3971_v52 = vadd.f32 1.0, %v2960_v41  ;;  %2961 = vpow2.f32 %v1578_v2  ;;  %v1009_v55 = vadd.f32 %v945_v61, %v649_v0  ;;  %v3990_v26 = vld [vmem:[%s3246_s27 + $0x80] sm:$0xff] }
  0x7f   : > { %v2714_v40 = vmul.f32 %v1907_v44, %v3767_v53  ;;  %v1912_v62 = vmul.f32 %v2958_v56, %v1911_v48  ;;  %v586_v63 = vmul.f32 %v3237_v12, %v453_v35  ;;  %vm3983_vm14 = vcmp.eq.f32.partialorder %v1918_v33, 8.507059e+37  ;;  %v4039_v35 = vld [vmem:[%s3246_s27 + $0x88] sm:$0xff] }
  0x80   : > { %v1921_v1 = vor.u32 1.1754944e-38, %v1920_v42  ;;  %2963 = vrcp.f32 %v3971_v52  ;;  %v1933_v53 = vand.u32 2147483647, %v3971_v52  ;;  %v1368_v38 = vadd.f32 %v1304_v6, %v1009_v55 }
  0x81   : > { %2778 = vst [vmem:[%s3508_s30 + $0x50] sm:$0xff] %v2714_v40  ;;  %v1913_v57 = vadd.f32 %v2958_v56, %v1912_v62  ;;  %v650_v39 = vadd.f32 %v586_v63, %v290_v60  ;;  %v813_v49 = vsel %vm763_vm2, %v712_v23, %v714_v30  ;;  %v1935_v33 = vand.u32 2147483648, %v3971_v52 }
  0x82   : > { %v946_v42 = vmul.f32 %v3239_v13, %v813_v49  ;;  %v1074_v50 = vrot.slane %v3914_v32, 5  ;;  %vm1929_vm15 = vweird.f32 %v3971_v52  ;;  %v4006_v60 = vadd.f32 %v3223_v7, %v1368_v38  ;;  %v4063_v38 = vld [vmem:[%s3246_s27 + $0x90] sm:$0xff] }
  0x83   : > { %v1917_v17 = vsel %vm3979_vm13, %v2958_v56, %v1913_v57  ;;  %v355_v45 = vrot.slane %v3990_v26, 7  ;;  %v715_v56 = vrot.slane %v3990_v26, 6  ;;  %vm4017_vm1 = vcmp.eq.f32.partialorder %v1933_v53, 8.507059e+37 }
  0x84   : > { %v2962_v54 = vpop.eup %2961  ;;  %v1922_v23 = vsel %vm3983_vm14, %v1921_v1, %v1917_v17  ;;  %v1010_v21 = vadd.f32 %v946_v42, %v650_v39  ;;  %v1173_v2 = vsel %vm1123_vm4, %v1072_v58, %v1074_v50  ;;  %v1502_v41 = vsub.f32 0.0, %v4006_v60 }
  0x85   : > { %v2715_v0 = vmul.f32 %v1922_v23, %v3796_v14  ;;  %v4021_v4 = vadd.f32 1.0, %v2962_v54  ;;  %v1305_v47 = vmul.f32 %v3261_v18, %v1173_v2  ;;  %v1936_v6 = vor.u32 1.1754944e-38, %v1935_v33 }
  0x86   : > { %v2964_v48 = vpop.eup %2963  ;;  %v450_v28 = vsel %vm403_vm0, %v353_v51, %v355_v45  ;;  %v810_v14 = vsel %vm763_vm2, %v713_v34, %v715_v56  ;;  %v1075_v58 = vrot.slane %v3990_v26, 5  ;;  %v291_v51 = vmul.f32 %v3211_v3, %v3990_v26 }
  0x87   : > { %2779 = vst [vmem:[%s3508_s30 + $0x58] sm:$0xff] %v2715_v0  ;;  %v1925_v44 = vmul.f32 %v2964_v48, %v3971_v52  ;;  %2965 = vrcp.f32 %v4021_v4  ;;  %v292_v55 = vmul.f32 %v3232_v11, %v4039_v35  ;;  %vm1930_vm3 = vweird.f32 %v2964_v48 }
  0x88   : > { %vm1944_vm5 = vweird.f32 %v4021_v4  ;;  %v1580_v34 = vmul.f32 1.442695, %v1502_v41  ;;  %v1369_v40 = vadd.f32 %v1305_v47, %v1010_v21  ;;  %v587_v63 = vmul.f32 %v3225_v8, %v450_v28  ;;  %vm4070_vm6 = vmor %vm1929_vm15, %vm1930_vm3 }
  0x89   : > { %v1926_v62 = vsub.f32 1.0, %v1925_v44  ;;  %v947_v59 = vmul.f32 %v3227_v9, %v810_v14  ;;  %v1170_v46 = vsel %vm1123_vm4, %v1073_v10, %v1075_v58  ;;  %v1948_v1 = vand.u32 2147483647, %v4021_v4 }
  0x8a   : > { %v1950_v53 = vand.u32 2147483648, %v4021_v4  ;;  %2967 = vpow2.f32 %v1580_v34  ;;  %v4060_v57 = vadd.f32 %v3263_v19, %v1369_v40  ;;  %v651_v49 = vadd.f32 %v587_v63, %v291_v51 }
  0x8b   : > { %v1927_v39 = vmul.f32 %v2964_v48, %v1926_v62  ;;  %v1306_v33 = vmul.f32 %v3256_v16, %v1170_v46  ;;  %v356_v42 = vrot.slane %v4039_v35, 7  ;;  %v716_v17 = vrot.slane %v4039_v35, 6 }
  0x8c   : > { %v1503_v10 = vsub.f32 0.0, %v4060_v57  ;;  %v1076_v54 = vrot.slane %v4039_v35, 5  ;;  %v293_v23 = vmul.f32 %v3211_v3, %v4063_v38  ;;  %v1011_v0 = vadd.f32 %v947_v59, %v651_v49 }
  0x8d   : > { %v2966_v21 = vpop.eup %2965  ;;  %v1928_v2 = vadd.f32 %v2964_v48, %v1927_v39  ;;  %v451_v52 = vsel %vm403_vm0, %v354_v37, %v356_v42  ;;  %v357_v41 = vrot.slane %v4063_v38, 7  ;;  %v811_v37 = vsel %vm763_vm2, %v714_v30, %v716_v17 }
  0x8e   : > { %v1940_v47 = vmul.f32 %v2966_v21, %v4021_v4  ;;  %vm1945_vm7 = vweird.f32 %v2966_v21  ;;  %v1582_v28 = vmul.f32 1.442695, %v1503_v10  ;;  %v588_v14 = vmul.f32 %v3237_v12, %v451_v52 }
  0x8f   : > { %v1932_v44 = vsel %vm4070_vm6, %v2964_v48, %v1928_v2  ;;  %v1370_v51 = vadd.f32 %v1306_v33, %v1011_v0  ;;  %v1171_v34 = vsel %vm1123_vm4, %v1074_v50, %v1076_v54  ;;  %v948_v30 = vmul.f32 %v3239_v13, %v811_v37  ;;  %vm4121_vm8 = vmor %vm1944_vm5, %vm1945_vm7 }
  0x90   : > { %v2968_v40 = vpop.eup %2967  ;;  %v1937_v62 = vsel %vm4017_vm1, %v1936_v6, %v1932_v44  ;;  %v1941_v63 = vsub.f32 1.0, %v1940_v47  ;;  %2969 = vpow2.f32 %v1582_v28  ;;  %v652_v48 = vadd.f32 %v588_v14, %v292_v55 }
  0x91   : > { %v2716_v59 = vmul.f32 %v1937_v62, %v3875_v20  ;;  %v4103_v46 = vadd.f32 1.0, %v2968_v40  ;;  %v4106_v32 = vadd.f32 %v3223_v7, %v1370_v51  ;;  %v1307_v49 = vmul.f32 %v3261_v18, %v1171_v34  ;;  %v4160_v40 = vld [vmem:[%s3246_s27 + $0x98] sm:$0xff] }
  0x92   : > { %v1942_v39 = vmul.f32 %v2966_v21, %v1941_v63  ;;  %v448_v50 = vsel %vm403_vm0, %v355_v45, %v357_v41  ;;  %v717_v61 = vrot.slane %v4063_v38, 6  ;;  %vm4125_vm9 = vcmp.eq.f32.partialorder %v1948_v1, 8.507059e+37 }
  0x93   : > { %2780 = vst [vmem:[%s3508_s30 + $0x60] sm:$0xff] %v2716_v59  ;;  %v1951_v55 = vor.u32 1.1754944e-38, %v1950_v53  ;;  %2971 = vrcp.f32 %v4103_v46  ;;  %v1504_v45 = vsub.f32 0.0, %v4106_v32  ;;  %v1012_v29 = vadd.f32 %v948_v30, %v652_v48  ;;  %v4173_v59 = vld [vmem:[%s3246_s27 + $0xa0] sm:$0xff] }
  0x94   : > { %v1943_v33 = vadd.f32 %v2966_v21, %v1942_v39  ;;  %v589_v10 = vmul.f32 %v3225_v8, %v448_v50  ;;  %v1963_v2 = vand.u32 2147483647, %v4103_v46  ;;  %v1965_v4 = vand.u32 2147483648, %v4103_v46 }
  0x95   : > { %v808_v1 = vsel %vm763_vm2, %v715_v56, %v717_v61  ;;  %v1077_v53 = vrot.slane %v4063_v38, 5  ;;  %v1584_v47 = vmul.f32 1.442695, %v1504_v45  ;;  %v1371_v28 = vadd.f32 %v1307_v49, %v1012_v29 }
  0x96   : > { %v2970_v0 = vpop.eup %2969  ;;  %v1947_v52 = vsel %vm4121_vm8, %v2966_v21, %v1943_v33  ;;  %v653_v14 = vadd.f32 %v589_v10, %v293_v23  ;;  %v949_v37 = vmul.f32 %v3227_v9, %v808_v1  ;;  %vm1959_vm10 = vweird.f32 %v4103_v46 }
  0x97   : > { %v1952_v44 = vsel %vm4125_vm9, %v1951_v55, %v1947_v52  ;;  %v4145_v51 = vadd.f32 1.0, %v2970_v0  ;;  %v1168_v56 = vsel %vm1123_vm4, %v1075_v58, %v1077_v53  ;;  %2973 = vpow2.f32 %v1584_v47 }
  0x98   : > { %v2717_v21 = vmul.f32 %v1952_v44, %v3918_v43  ;;  %v4156_v23 = vadd.f32 %v3263_v19, %v1371_v28  ;;  %v1308_v34 = vmul.f32 %v3256_v16, %v1168_v56  ;;  %vm4163_vm11 = vcmp.eq.f32.partialorder %v1963_v2, 8.507059e+37 }
  0x99   : > { %v2972_v62 = vpop.eup %2971  ;;  %v1966_v26 = vor.u32 1.1754944e-38, %v1965_v4  ;;  %2975 = vrcp.f32 %v4145_v51  ;;  %vm1974_vm12 = vweird.f32 %v4145_v51  ;;  %v1013_v48 = vadd.f32 %v949_v37, %v653_v14 }
  0x9a   : > { %2781 = vst [vmem:[%s3508_s30 + $0x68] sm:$0xff] %v2717_v21  ;;  %v1955_v43 = vmul.f32 %v2972_v62, %v4103_v46  ;;  %v1505_v58 = vsub.f32 0.0, %v4156_v23  ;;  %vm1960_vm13 = vweird.f32 %v2972_v62  ;;  %v1978_v30 = vand.u32 2147483647, %v4145_v51 }
  0x9b   : > { %v1980_v39 = vand.u32 2147483648, %v4145_v51  ;;  %v358_v49 = vrot.slane %v4160_v40, 7  ;;  %v1372_v6 = vadd.f32 %v1308_v34, %v1013_v48  ;;  %v718_v55 = vrot.slane %v4160_v40, 6  ;;  %vm4196_vm14 = vmor %vm1959_vm10, %vm1960_vm13 }
  0x9c   : > { %v1956_v50 = vsub.f32 1.0, %v1955_v43  ;;  %v1586_v20 = vmul.f32 1.442695, %v1505_v58  ;;  %v294_v33 = vmul.f32 %v3232_v11, %v4160_v40  ;;  %v1078_v29 = vrot.slane %v4160_v40, 5 }
  0x9d   : > { %v449_v45 = vsel %vm403_vm0, %v356_v42, %v358_v49  ;;  %v359_v10 = vrot.slane %v4173_v59, 7  ;;  %v2974_v2 = vpop.eup %2973  ;;  %v4190_v1 = vadd.f32 %v3223_v7, %v1372_v6  ;;  %vm4200_vm15 = vcmp.eq.f32.partialorder %v1978_v30, 8.507059e+37 }
  0x9e   : > { %v1957_v4 = vmul.f32 %v2972_v62, %v1956_v50  ;;  %2977 = vpow2.f32 %v1586_v20  ;;  %v590_v0 = vmul.f32 %v3237_v12, %v449_v45  ;;  %v4204_v28 = vadd.f32 1.0, %v2974_v2  ;;  %v4239_v2 = vld [vmem:[%s3246_s27 + $0xa8] sm:$0xff] }
  0x9f   : > { %v2976_v52 = vpop.eup %2975  ;;  %v809_v14 = vsel %vm763_vm2, %v716_v17, %v718_v55  ;;  %v1169_v46 = vsel %vm1123_vm4, %v1076_v54, %v1078_v29  ;;  %v1506_v56 = vsub.f32 0.0, %v4190_v1  ;;  %v446_v21 = vsel %vm403_vm0, %v357_v41, %v359_v10 }
  0xa0   : > { %v1958_v44 = vadd.f32 %v2972_v62, %v1957_v4  ;;  %v1970_v37 = vmul.f32 %v2976_v52, %v4145_v51  ;;  %vm1975_vm1 = vweird.f32 %v2976_v52  ;;  %2979 = vrcp.f32 %v4204_v28 }
  0xa1   : > { %v1993_v35 = vand.u32 2147483647, %v4204_v28  ;;  %v1995_v17 = vand.u32 2147483648, %v4204_v28  ;;  %v1588_v43 = vmul.f32 1.442695, %v1506_v56  ;;  %v654_v58 = vadd.f32 %v590_v0, %v294_v33  ;;  %vm4244_vm3 = vmor %vm1974_vm12, %vm1975_vm1 }
  0xa2   : > { %v1962_v54 = vsel %vm4196_vm14, %v2972_v62, %v1958_v44  ;;  %v1971_v34 = vsub.f32 1.0, %v1970_v37  ;;  %v1981_v30 = vor.u32 1.1754944e-38, %v1980_v39  ;;  %v950_v41 = vmul.f32 %v3239_v13, %v809_v14 }
  0xa3   : > { %v1967_v48 = vsel %vm4163_vm11, %v1966_v26, %v1962_v54  ;;  %v295_v50 = vmul.f32 %v3211_v3, %v4173_v59  ;;  %2981 = vpow2.f32 %v1588_v43  ;;  %v1309_v62 = vmul.f32 %v3261_v18, %v1169_v46 }
  0xa4   : > { %v2978_v20 = vpop.eup %2977  ;;  %v2718_v6 = vmul.f32 %v1967_v48, %v4006_v60  ;;  %v1972_v45 = vmul.f32 %v2976_v52, %v1971_v34  ;;  %vm1989_vm5 = vweird.f32 %v4204_v28  ;;  %v1014_v39 = vadd.f32 %v950_v41, %v654_v58 }
  0xa5   : > { %v4249_v26 = vadd.f32 1.0, %v2978_v20  ;;  %v591_v60 = vmul.f32 %v3225_v8, %v446_v21  ;;  %vm4253_vm6 = vcmp.eq.f32.partialorder %v1993_v35, 8.507059e+37  ;;  %v1996_v0 = vor.u32 1.1754944e-38, %v1995_v17 }
  0xa6   : > { %2782 = vst [vmem:[%s3508_s30 + $0x70] sm:$0xff] %v2718_v6  ;;  %v1973_v33 = vadd.f32 %v2976_v52, %v1972_v45  ;;  %v719_v51 = vrot.slane %v4173_v59, 6  ;;  %v2980_v47 = vpop.eup %2979  ;;  %v1079_v14 = vrot.slane %v4173_v59, 5  ;;  %v296_v46 = vmul.f32 %v3232_v11, %v4239_v2 }
  0xa7   : > { %2983 = vrcp.f32 %v4249_v26  ;;  %v360_v44 = vrot.slane %v4239_v2, 7  ;;  %v1985_v56 = vmul.f32 %v2980_v47, %v4204_v28  ;;  %v2008_v21 = vand.u32 2147483647, %v4249_v26 }
  0xa8   : > { %v1977_v37 = vsel %vm4244_vm3, %v2976_v52, %v1973_v33  ;;  %v1373_v35 = vadd.f32 %v1309_v62, %v1014_v39  ;;  %vm1990_vm7 = vweird.f32 %v2980_v47  ;;  %v2010_v54 = vand.u32 2147483648, %v4249_v26 }
  0xa9   : > { %v1982_v17 = vsel %vm4200_vm15, %v1981_v30, %v1977_v37  ;;  %v655_v34 = vadd.f32 %v591_v60, %v295_v50  ;;  %v2982_v43 = vpop.eup %2981  ;;  %v1986_v48 = vsub.f32 1.0, %v1985_v56  ;;  %v806_v52 = vsel %vm763_vm2, %v717_v61, %v719_v51  ;;  %vm4302_vm9 = vmor %vm1989_vm5, %vm1990_vm7 }
  0xaa   : > { %v2719_v58 = vmul.f32 %v1982_v17, %v4060_v57  ;;  %v4272_v41 = vadd.f32 %v3263_v19, %v1373_v35  ;;  %v4280_v42 = vadd.f32 1.0, %v2982_v43  ;;  %v951_v30 = vmul.f32 %v3227_v9, %v806_v52 }
  0xab   : > { %v1166_v57 = vsel %vm1123_vm4, %v1077_v53, %v1079_v14  ;;  %v447_v50 = vsel %vm403_vm0, %v358_v49, %v360_v44  ;;  %v1987_v61 = vmul.f32 %v2980_v47, %v1986_v48  ;;  %vm2004_vm8 = vweird.f32 %v4249_v26 }
  0xac   : > { %2783 = vst [vmem:[%s3508_s30 + $0x78] sm:$0xff] %v2719_v58  ;;  %v1507_v20 = vsub.f32 0.0, %v4272_v41  ;;  %v592_v6 = vmul.f32 %v3237_v12, %v447_v50  ;;  %vm4306_vm10 = vcmp.eq.f32.partialorder %v2008_v21, 8.507059e+37  ;;  %v2011_v49 = vor.u32 1.1754944e-38, %v2010_v54  ;;  %v4317_v21 = vld [vmem:[%s3246_s27 + $0xb0] sm:$0xff] }
  0xad   : > { %v2984_v38 = vpop.eup %2983  ;;  %2985 = vrcp.f32 %v4280_v42  ;;  %v1310_v62 = vmul.f32 %v3256_v16, %v1166_v57  ;;  %v1988_v63 = vadd.f32 %v2980_v47, %v1987_v61  ;;  %vm2019_vm11 = vweird.f32 %v4280_v42 }
  0xae   : > { %v2000_v39 = vmul.f32 %v2984_v38, %v4249_v26  ;;  %v2023_v28 = vand.u32 2147483647, %v4280_v42  ;;  %v1590_v60 = vmul.f32 1.442695, %v1507_v20  ;;  %vm2005_vm12 = vweird.f32 %v2984_v38 }
  0xaf   : > { %v2025_v33 = vand.u32 2147483648, %v4280_v42  ;;  %v1015_v37 = vadd.f32 %v951_v30, %v655_v34  ;;  %v656_v56 = vadd.f32 %v592_v6, %v296_v46  ;;  %v1992_v35 = vsel %vm4302_vm9, %v2980_v47, %v1988_v63  ;;  %vm4338_vm13 = vmor %vm2004_vm8, %vm2005_vm12 }
  0xb0   : > { %v2001_v17 = vsub.f32 1.0, %v2000_v39  ;;  %2987 = vpow2.f32 %v1590_v60  ;;  %v720_v54 = vrot.slane %v4239_v2, 6  ;;  %v1997_v43 = vsel %vm4253_vm6, %v1996_v0, %v1992_v35 }
  0xb1   : > { %v1374_v58 = vadd.f32 %v1310_v62, %v1015_v37  ;;  %v1080_v48 = vrot.slane %v4239_v2, 5  ;;  %v297_v34 = vmul.f32 %v3211_v3, %v4317_v21  ;;  %v2720_v46 = vmul.f32 %v1997_v43, %v4106_v32 }
  0xb2   : > { %v2002_v52 = vmul.f32 %v2984_v38, %v2001_v17  ;;  %v807_v47 = vsel %vm763_vm2, %v718_v55, %v720_v54  ;;  %v361_v30 = vrot.slane %v4317_v21, 7  ;;  %v721_v50 = vrot.slane %v4317_v21, 6 }
  0xb3   : > { %v2986_v4 = vpop.eup %2985  ;;  %v4343_v32 = vadd.f32 %v3223_v7, %v1374_v58  ;;  %v952_v57 = vmul.f32 %v3239_v13, %v807_v47  ;;  %v1167_v55 = vsel %vm1123_vm4, %v1078_v29, %v1080_v48  ;;  %2784 = vst [vmem:[%s3508_s30 + $0x80] sm:$0xff] %v2720_v46  ;;  %v1081_v46 = vrot.slane %v4317_v21, 5 }
  0xb4   : > { %v2003_v26 = vadd.f32 %v2984_v38, %v2002_v52  ;;  %v2015_v61 = vmul.f32 %v2986_v4, %v4280_v42  ;;  %vm2020_vm14 = vweird.f32 %v2986_v4  ;;  %v1311_v20 = vmul.f32 %v3261_v18, %v1167_v55 }
  0xb5   : > { %v1508_v6 = vsub.f32 0.0, %v4343_v32  ;;  %v1016_v53 = vadd.f32 %v952_v57, %v656_v56  ;;  %v444_v40 = vsel %vm403_vm0, %v359_v10, %v361_v30  ;;  %v804_v29 = vsel %vm763_vm2, %v719_v51, %v721_v50  ;;  %vm4380_vm15 = vmor %vm2019_vm11, %vm2020_vm14 }
  0xb6   : > { %v2988_v62 = vpop.eup %2987  ;;  %v2007_v63 = vsel %vm4338_vm13, %v2984_v38, %v2003_v26  ;;  %v2016_v39 = vsub.f32 1.0, %v2015_v61  ;;  %v593_v60 = vmul.f32 %v3225_v8, %v444_v40  ;;  %v953_v37 = vmul.f32 %v3227_v9, %v804_v29  ;;  %v4407_v61 = vld [vmem:[%s3246_s27 + $0xc0] sm:$0xff] }
  0xb7   : > { %v2012_v10 = vsel %vm4306_vm10, %v2011_v49, %v2007_v63  ;;  %v1699_v56 = vadd.f32 1.0, %v2988_v62  ;;  %v1592_v35 = vmul.f32 1.442695, %v1508_v6  ;;  %v1375_v17 = vadd.f32 %v1311_v20, %v1016_v53  ;;  %v4389_v49 = vld [vmem:[%s3246_s27 + $0xb8] sm:$0xff] }
  0xb8   : > { %v2721_v43 = vmul.f32 %v2012_v10, %v4156_v23  ;;  %v2017_v51 = vmul.f32 %v2986_v4, %v2016_v39  ;;  %v657_v58 = vadd.f32 %v593_v60, %v297_v34  ;;  %vm4384_vm1 = vcmp.eq.f32.partialorder %v2023_v28, 8.507059e+37 }
  0xb9   : > { %v2026_v45 = vor.u32 1.1754944e-38, %v2025_v33  ;;  %2989 = vrcp.f32 %v1699_v56  ;;  %v4393_v34 = vadd.f32 %v3263_v19, %v1375_v17  ;;  %vm2034_vm3 = vweird.f32 %v1699_v56 }
  0xba   : > { %2785 = vst [vmem:[%s3508_s30 + $0x88] sm:$0xff] %v2721_v43  ;;  %v2018_v23 = vadd.f32 %v2986_v4, %v2017_v51  ;;  %2991 = vpow2.f32 %v1592_v35  ;;  %v1017_v42 = vadd.f32 %v953_v37, %v657_v58  ;;  %v2038_v47 = vand.u32 2147483647, %v1699_v56 }
  0xbb   : > { %v2040_v0 = vand.u32 2147483648, %v1699_v56  ;;  %v1164_v28 = vsel %vm1123_vm4, %v1079_v14, %v1081_v46  ;;  %v1509_v57 = vsub.f32 0.0, %v4393_v34  ;;  %v362_v26 = vrot.slane %v4389_v49, 7 }
  0xbc   : > { %v2022_v33 = vsel %vm4380_vm15, %v2986_v4, %v2018_v23  ;;  %v1312_v55 = vmul.f32 %v3256_v16, %v1164_v28  ;;  %v298_v59 = vmul.f32 %v3232_v11, %v4389_v49  ;;  %v722_v14 = vrot.slane %v4389_v49, 6 }
  0xbd   : > { %v2027_v20 = vsel %vm4384_vm1, %v2026_v45, %v2022_v33  ;;  %v1082_v6 = vrot.slane %v4389_v49, 5  ;;  %v1594_v53 = vmul.f32 1.442695, %v1509_v57  ;;  %v445_v29 = vsel %vm403_vm0, %v360_v44, %v362_v26 }
  0xbe   : > { %v2722_v4 = vmul.f32 %v2027_v20, %v4190_v1  ;;  %v1376_v40 = vadd.f32 %v1312_v55, %v1017_v42  ;;  %v594_v63 = vmul.f32 %v3237_v12, %v445_v29  ;;  %v805_v39 = vsel %vm763_vm2, %v720_v54, %v722_v14 }
  0xbf   : > { %v2990_v62 = vpop.eup %2989  ;;  %v1165_v1 = vsel %vm1123_vm4, %v1080_v48, %v1082_v6  ;;  %v363_v60 = vrot.slane %v4407_v61, 7  ;;  %2993 = vpow2.f32 %v1594_v53  ;;  %v954_v17 = vmul.f32 %v3239_v13, %v805_v39 }
  0xc0   : > { %v2992_v44 = vpop.eup %2991  ;;  %2786 = vst [vmem:[%s3508_s30 + $0x90] sm:$0xff] %v2722_v4  ;;  %v2030_v37 = vmul.f32 %v2990_v62, %v1699_v56  ;;  %vm2035_vm5 = vweird.f32 %v2990_v62  ;;  %v4438_v10 = vadd.f32 %v3223_v7, %v1376_v40  ;;  %v658_v54 = vadd.f32 %v594_v63, %v298_v59  ;;  %v4476_v59 = vld [vmem:[%s3246_s27 + $0xc8] sm:$0xff] }
  0xc1   : > { %v4440_v35 = vadd.f32 1.0, %v2992_v44  ;;  %v1313_v2 = vmul.f32 %v3261_v18, %v1165_v1  ;;  %v442_v51 = vsel %vm403_vm0, %v361_v30, %v363_v60  ;;  %v723_v58 = vrot.slane %v4407_v61, 6  ;;  %vm4463_vm7 = vmor %vm2034_vm3, %vm2035_vm5 }
  0xc2   : > { %v2031_v43 = vsub.f32 1.0, %v2030_v37  ;;  %v1510_v48 = vsub.f32 0.0, %v4438_v10  ;;  %vm4452_vm6 = vcmp.eq.f32.partialorder %v2038_v47, 8.507059e+37  ;;  %v299_v45 = vmul.f32 %v3211_v3, %v4407_v61 }
  0xc3   : > { %2995 = vrcp.f32 %v4440_v35  ;;  %v2053_v52 = vand.u32 2147483647, %v4440_v35  ;;  %v1018_v28 = vadd.f32 %v954_v17, %v658_v54  ;;  %v595_v33 = vmul.f32 %v3225_v8, %v442_v51 }
  0xc4   : > { %v2032_v23 = vmul.f32 %v2990_v62, %v2031_v43  ;;  %v1596_v42 = vmul.f32 1.442695, %v1510_v48  ;;  %v2041_v47 = vor.u32 1.1754944e-38, %v2040_v0  ;;  %v2055_v57 = vand.u32 2147483648, %v4440_v35 }
  0xc5   : > { %v802_v55 = vsel %vm763_vm2, %v721_v50, %v723_v58  ;;  %v1083_v20 = vrot.slane %v4407_v61, 5  ;;  %v2994_v4 = vpop.eup %2993  ;;  %vm2049_vm8 = vweird.f32 %v4440_v35  ;;  %v1377_v53 = vadd.f32 %v1313_v2, %v1018_v28 }
  0xc6   : > { %v2033_v56 = vadd.f32 %v2990_v62, %v2032_v23  ;;  %2997 = vpow2.f32 %v1596_v42  ;;  %v4479_v0 = vadd.f32 1.0, %v2994_v4  ;;  %v659_v40 = vadd.f32 %v595_v33, %v299_v45  ;;  %v4533_v4 = vld [vmem:[%s3246_s27 + $0xd0] sm:$0xff] }
  0xc7   : > { %v955_v29 = vmul.f32 %v3227_v9, %v802_v55  ;;  %v1162_v50 = vsel %vm1123_vm4, %v1081_v46, %v1083_v20  ;;  %vm4490_vm9 = vcmp.eq.f32.partialorder %v2053_v52, 8.507059e+37  ;;  %v4495_v1 = vadd.f32 %v3263_v19, %v1377_v53 }
  0xc8   : > { %v2037_v63 = vsel %vm4463_vm7, %v2990_v62, %v2033_v56  ;;  %v364_v44 = vrot.slane %v4476_v59, 7  ;;  %v2056_v54 = vor.u32 1.1754944e-38, %v2055_v57  ;;  %2999 = vrcp.f32 %v4479_v0 }
  0xc9   : > { %v2996_v37 = vpop.eup %2995  ;;  %v2042_v21 = vsel %vm4452_vm6, %v2041_v47, %v2037_v63  ;;  %v1314_v46 = vmul.f32 %v3256_v16, %v1162_v50  ;;  %v2068_v2 = vand.u32 2147483647, %v4479_v0  ;;  %v300_v43 = vmul.f32 %v3232_v11, %v4476_v59 }
  0xca   : > { %v2723_v62 = vmul.f32 %v2042_v21, %v4272_v41  ;;  %v2045_v17 = vmul.f32 %v2996_v37, %v4440_v35  ;;  %v2070_v48 = vand.u32 2147483648, %v4479_v0  ;;  %v1511_v51 = vsub.f32 0.0, %v4495_v1 }
  0xcb   : > { %v1019_v38 = vadd.f32 %v955_v29, %v659_v40  ;;  %v443_v41 = vsel %vm403_vm0, %v362_v26, %v364_v44  ;;  %vm2050_vm10 = vweird.f32 %v2996_v37  ;;  %v724_v42 = vrot.slane %v4476_v59, 6 }
  0xcc   : > { %v2998_v52 = vpop.eup %2997  ;;  %2787 = vst [vmem:[%s3508_s30 + $0x98] sm:$0xff] %v2723_v62  ;;  %v2046_v45 = vsub.f32 1.0, %v2045_v17  ;;  %v596_v23 = vmul.f32 %v3237_v12, %v443_v41  ;;  %vm2064_vm11 = vweird.f32 %v4479_v0  ;;  %v1598_v33 = vmul.f32 1.442695, %v1511_v51  ;;  %vm4537_vm13 = vmor %vm2049_vm8, %vm2050_vm10 }
  0xcd   : > { %v4519_v28 = vadd.f32 1.0, %v2998_v52  ;;  %v1378_v30 = vadd.f32 %v1314_v46, %v1019_v38  ;;  %vm4521_vm12 = vcmp.eq.f32.partialorder %v2068_v2, 8.507059e+37  ;;  %v803_v26 = vsel %vm763_vm2, %v722_v14, %v724_v42 }
  0xce   : > { %v2047_v47 = vmul.f32 %v2996_v37, %v2046_v45  ;;  %v1084_v55 = vrot.slane %v4476_v59, 5  ;;  %v3000_v56 = vpop.eup %2999  ;;  %v2071_v40 = vor.u32 1.1754944e-38, %v2070_v48  ;;  %v660_v29 = vadd.f32 %v596_v23, %v300_v43 }
  0xcf   : > { %3001 = vrcp.f32 %v4519_v28  ;;  %v301_v50 = vmul.f32 %v3211_v3, %v4533_v4  ;;  %v2060_v14 = vmul.f32 %v3000_v56, %v4479_v0  ;;  %vm2079_vm14 = vweird.f32 %v4519_v28 }
  0xd0   : > { %v2048_v63 = vadd.f32 %v2996_v37, %v2047_v47  ;;  %v2083_v21 = vand.u32 2147483647, %v4519_v28  ;;  %3003 = vpow2.f32 %v1598_v33  ;;  %vm2065_vm15 = vweird.f32 %v3000_v56 }
  0xd1   : > { %v2085_v35 = vand.u32 2147483648, %v4519_v28  ;;  %v4549_v46 = vadd.f32 %v3223_v7, %v1378_v30  ;;  %v956_v62 = vmul.f32 %v3239_v13, %v803_v26  ;;  %v2061_v2 = vsub.f32 1.0, %v2060_v14  ;;  %vm4576_vm1 = vmor %vm2064_vm11, %vm2065_vm15 }
  0xd2   : > { %v2052_v17 = vsel %vm4537_vm13, %v2996_v37, %v2048_v63  ;;  %v1163_v43 = vsel %vm1123_vm4, %v1082_v6, %v1084_v55  ;;  %v365_v48 = vrot.slane %v4533_v4, 7  ;;  %v725_v6 = vrot.slane %v4533_v4, 6 }
  0xd3   : > { %v2057_v51 = vsel %vm4490_vm9, %v2056_v54, %v2052_v17  ;;  %v1512_v38 = vsub.f32 0.0, %v4549_v46  ;;  %v1020_v41 = vadd.f32 %v956_v62, %v660_v29  ;;  %v1315_v52 = vmul.f32 %v3261_v18, %v1163_v43 }
  0xd4   : > { %v2724_v37 = vmul.f32 %v2057_v51, %v4343_v32  ;;  %v2062_v45 = vmul.f32 %v3000_v56, %v2061_v2  ;;  %v440_v49 = vsel %vm403_vm0, %v363_v60, %v365_v48  ;;  %v1085_v30 = vrot.slane %v4533_v4, 5 }
  0xd5   : > { %v3002_v39 = vpop.eup %3001  ;;  %v1600_v23 = vmul.f32 1.442695, %v1512_v38  ;;  %v1379_v32 = vadd.f32 %v1315_v52, %v1020_v41  ;;  %v597_v33 = vmul.f32 %v3225_v8, %v440_v49  ;;  %v800_v0 = vsel %vm763_vm2, %v723_v58, %v725_v6 }
  0xd6   : > { %v3004_v47 = vpop.eup %3003  ;;  %2788 = vst [vmem:[%s3508_s30 + $0xa0] sm:$0xff] %v2724_v37  ;;  %v2063_v60 = vadd.f32 %v3000_v56, %v2062_v45  ;;  %v2075_v26 = vmul.f32 %v3002_v39, %v4519_v28  ;;  %vm2080_vm3 = vweird.f32 %v3002_v39  ;;  %v957_v17 = vmul.f32 %v3227_v9, %v800_v0 }
  0xd7   : > { %v4590_v53 = vadd.f32 1.0, %v3004_v47  ;;  %3005 = vpow2.f32 %v1600_v23  ;;  %v4593_v29 = vadd.f32 %v3263_v19, %v1379_v32  ;;  %v661_v63 = vadd.f32 %v597_v33, %v301_v50  ;;  %vm4619_vm6 = vmor %vm2079_vm14, %vm2080_vm3 }
  0xd8   : > { %v2067_v14 = vsel %vm4576_vm1, %v3000_v56, %v2063_v60  ;;  %v2076_v62 = vsub.f32 1.0, %v2075_v26  ;;  %v1160_v58 = vsel %vm1123_vm4, %v1083_v20, %v1085_v30  ;;  %vm4606_vm5 = vcmp.eq.f32.partialorder %v2083_v21, 8.507059e+37  ;;  %v4612_v56 = vld [vmem:[%s3246_s27 + $0xd8] sm:$0xff] }
  0xd9   : > { %v2072_v2 = vsel %vm4521_vm12, %v2071_v40, %v2067_v14  ;;  %3007 = vrcp.f32 %v4590_v53  ;;  %v2086_v38 = vor.u32 1.1754944e-38, %v2085_v35  ;;  %v1513_v61 = vsub.f32 0.0, %v4593_v29 }
  0xda   : > { %v2725_v50 = vmul.f32 %v2072_v2, %v4393_v34  ;;  %v2077_v51 = vmul.f32 %v3002_v39, %v2076_v62  ;;  %vm2094_vm7 = vweird.f32 %v4590_v53  ;;  %v2098_v57 = vand.u32 2147483647, %v4590_v53  ;;  %v4665_v2 = vld [vmem:[%s3246_s27 + $0xe0] sm:$0xff] }
  0xdb   : > { %v1021_v40 = vadd.f32 %v957_v17, %v661_v63  ;;  %v1316_v21 = vmul.f32 %v3256_v16, %v1160_v58  ;;  %v2100_v35 = vand.u32 2147483648, %v4590_v53  ;;  %v1602_v41 = vmul.f32 1.442695, %v1513_v61 }
  0xdc   : > { %2789 = vst [vmem:[%s3508_s30 + $0xa8] sm:$0xff] %v2725_v50  ;;  %v2078_v34 = vadd.f32 %v3002_v39, %v2077_v51  ;;  %v366_v52 = vrot.slane %v4612_v56, 7  ;;  %v302_v45 = vmul.f32 %v3232_v11, %v4612_v56  ;;  %v726_v49 = vrot.slane %v4612_v56, 6 }
  0xdd   : > { %v3006_v37 = vpop.eup %3005  ;;  %v1380_v28 = vadd.f32 %v1316_v21, %v1021_v40  ;;  %v1086_v54 = vrot.slane %v4612_v56, 5  ;;  %3009 = vpow2.f32 %v1602_v41  ;;  %vm4657_vm8 = vcmp.eq.f32.partialorder %v2098_v57, 8.507059e+37 }
  0xde   : > { %v2082_v23 = vsel %vm4619_vm6, %v3002_v39, %v2078_v34  ;;  %v4635_v32 = vadd.f32 1.0, %v3006_v37  ;;  %v441_v33 = vsel %vm403_vm0, %v364_v44, %v366_v52  ;;  %v801_v0 = vsel %vm763_vm2, %v724_v42, %v726_v49 }
  0xdf   : > { %v3008_v47 = vpop.eup %3007  ;;  %v2087_v60 = vsel %vm4606_vm5, %v2086_v38, %v2082_v23  ;;  %v4646_v26 = vadd.f32 %v3223_v7, %v1380_v28  ;;  %v598_v39 = vmul.f32 %v3237_v12, %v441_v33  ;;  %v2101_v62 = vor.u32 1.1754944e-38, %v2100_v35 }
  0xe0   : > { %v2726_v63 = vmul.f32 %v2087_v60, %v4438_v10  ;;  %v2090_v44 = vmul.f32 %v3008_v47, %v4590_v53  ;;  %3011 = vrcp.f32 %v4635_v32  ;;  %vm2095_vm9 = vweird.f32 %v3008_v47 }
  0xe1   : > { %v2113_v17 = vand.u32 2147483647, %v4635_v32  ;;  %v1514_v58 = vsub.f32 0.0, %v4646_v26  ;;  %v662_v43 = vadd.f32 %v598_v39, %v302_v45  ;;  %v958_v10 = vmul.f32 %v3239_v13, %v801_v0  ;;  %vm4684_vm10 = vmor %vm2094_vm7, %vm2095_vm9  ;;  %v4708_v0 = vld [vmem:[%s3246_s27 + $0xe8] sm:$0xff] }
  0xe2   : > { %2790 = vst [vmem:[%s3508_s30 + $0xb0] sm:$0xff] %v2726_v63  ;;  %v2091_v42 = vsub.f32 1.0, %v2090_v44  ;;  %v1161_v50 = vsel %vm1123_vm4, %v1084_v55, %v1086_v54  ;;  %v2115_v51 = vand.u32 2147483648, %v4635_v32  ;;  %v303_v20 = vmul.f32 %v3211_v3, %v4665_v2 }
  0xe3   : > { %v1604_v38 = vmul.f32 1.442695, %v1514_v58  ;;  %v1317_v61 = vmul.f32 %v3261_v18, %v1161_v50  ;;  %v3010_v57 = vpop.eup %3009  ;;  %v1022_v21 = vadd.f32 %v958_v10, %v662_v43  ;;  %v367_v34 = vrot.slane %v4665_v2, 7 }
  0xe4   : > { %v2092_v40 = vmul.f32 %v3008_v47, %v2091_v42  ;;  %v727_v35 = vrot.slane %v4665_v2, 6  ;;  %vm2109_vm11 = vweird.f32 %v4635_v32  ;;  %vm4689_vm12 = vcmp.eq.f32.partialorder %v2113_v17, 8.507059e+37 }
  0xe5   : > { %v1705_v41 = vadd.f32 1.0, %v3010_v57  ;;  %3013 = vpow2.f32 %v1604_v38  ;;  %v1381_v45 = vadd.f32 %v1317_v61, %v1022_v21  ;;  %v438_v53 = vsel %vm403_vm0, %v365_v48, %v367_v34 }
  0xe6   : > { %v3012_v37 = vpop.eup %3011  ;;  %v2093_v28 = vadd.f32 %v3008_v47, %v2092_v40  ;;  %v798_v23 = vsel %vm763_vm2, %v725_v6, %v727_v35  ;;  %v2116_v60 = vor.u32 1.1754944e-38, %v2115_v51  ;;  %v1087_v39 = vrot.slane %v4665_v2, 5 }
  0xe7   : > { %v2105_v33 = vmul.f32 %v3012_v37, %v4635_v32  ;;  %3015 = vrcp.f32 %v1705_v41  ;;  %vm2110_vm13 = vweird.f32 %v3012_v37  ;;  %v4713_v48 = vadd.f32 %v3263_v19, %v1381_v45 }
  0xe8   : > { %v2097_v63 = vsel %vm4684_vm10, %v3008_v47, %v2093_v28  ;;  %v304_v44 = vmul.f32 %v3232_v11, %v4708_v0  ;;  %v599_v58 = vmul.f32 %v3225_v8, %v438_v53  ;;  %v959_v42 = vmul.f32 %v3227_v9, %v798_v23  ;;  %vm4734_vm14 = vmor %vm2109_vm11, %vm2110_vm13 }
  0xe9   : > { %v2102_v6 = vsel %vm4657_vm8, %v2101_v62, %v2097_v63  ;;  %v2106_v17 = vsub.f32 1.0, %v2105_v33  ;;  %v2128_v10 = vand.u32 2147483647, %v1705_v41  ;;  %v2130_v47 = vand.u32 2147483648, %v1705_v41 }
  0xea   : > { %v2727_v43 = vmul.f32 %v2102_v6, %v4495_v1  ;;  %v1515_v50 = vsub.f32 0.0, %v4713_v48  ;;  %v663_v61 = vadd.f32 %v599_v58, %v303_v20  ;;  %v1158_v14 = vsel %vm1123_vm4, %v1085_v30, %v1087_v39  ;;  %v4760_v58 = vld [vmem:[%s3246_s27 + $0xf0] sm:$0xff] }
  0xeb   : > { %v3014_v51 = vpop.eup %3013  ;;  %v2107_v38 = vmul.f32 %v3012_v37, %v2106_v17  ;;  %v368_v62 = vrot.slane %v4708_v0, 7  ;;  %vm2124_vm15 = vweird.f32 %v1705_v41  ;;  %v1318_v40 = vmul.f32 %v3256_v16, %v1158_v14 }
  0xec   : > { %2791 = vst [vmem:[%s3508_s30 + $0xb8] sm:$0xff] %v2727_v43  ;;  %v4738_v57 = vadd.f32 1.0, %v3014_v51  ;;  %v1606_v20 = vmul.f32 1.442695, %v1515_v50  ;;  %v1023_v30 = vadd.f32 %v959_v42, %v663_v61  ;;  %v728_v59 = vrot.slane %v4708_v0, 6 }
  0xed   : > { %v3016_v4 = vpop.eup %3015  ;;  %v2108_v21 = vadd.f32 %v3012_v37, %v2107_v38  ;;  %v439_v32 = vsel %vm403_vm0, %v366_v52, %v368_v62  ;;  %vm4748_vm1 = vcmp.eq.f32.partialorder %v2128_v10, 8.507059e+37  ;;  %v2131_v53 = vor.u32 1.1754944e-38, %v2130_v47 }
  0xee   : > { %v2120_v28 = vmul.f32 %v3016_v4, %v1705_v41  ;;  %3017 = vrcp.f32 %v4738_v57  ;;  %vm2125_vm3 = vweird.f32 %v3016_v4  ;;  %v1088_v33 = vrot.slane %v4708_v0, 5 }
  0xef   : > { %v2112_v23 = vsel %vm4734_vm14, %v3012_v37, %v2108_v21  ;;  %3019 = vpow2.f32 %v1606_v20  ;;  %v1382_v6 = vadd.f32 %v1318_v40, %v1023_v30  ;;  %v600_v17 = vmul.f32 %v3237_v12, %v439_v32  ;;  %vm4778_vm6 = vmor %vm2124_vm15, %vm2125_vm3 }
  0xf0   : > { %v2117_v52 = vsel %vm4689_vm12, %v2116_v60, %v2112_v23  ;;  %v2121_v63 = vsub.f32 1.0, %v2120_v28  ;;  %vm2139_vm5 = vweird.f32 %v4738_v57  ;;  %v2143_v37 = vand.u32 2147483647, %v4738_v57 }
  0xf1   : > { %v2728_v42 = vmul.f32 %v2117_v52, %v4549_v46  ;;  %v799_v55 = vsel %vm763_vm2, %v726_v49, %v728_v59  ;;  %v4772_v43 = vadd.f32 %v3223_v7, %v1382_v6  ;;  %v664_v10 = vadd.f32 %v600_v17, %v304_v44 }
  0xf2   : > { %v2122_v60 = vmul.f32 %v3016_v4, %v2121_v63  ;;  %v960_v47 = vmul.f32 %v3239_v13, %v799_v55  ;;  %v2145_v50 = vand.u32 2147483648, %v4738_v57  ;;  %v1159_v49 = vsel %vm1123_vm4, %v1086_v54, %v1088_v33 }
  0xf3   : > { %2792 = vst [vmem:[%s3508_s30 + $0xc0] sm:$0xff] %v2728_v42  ;;  %v369_v44 = vrot.slane %v4760_v58, 7  ;;  %v729_v51 = vrot.slane %v4760_v58, 6  ;;  %v1516_v41 = vsub.f32 0.0, %v4772_v43  ;;  %v1319_v1 = vmul.f32 %v3261_v18, %v1159_v49 }
  0xf4   : > { %v3018_v38 = vpop.eup %3017  ;;  %v2123_v61 = vadd.f32 %v3016_v4, %v2122_v60  ;;  %v1024_v14 = vadd.f32 %v960_v47, %v664_v10  ;;  %v305_v56 = vmul.f32 %v3211_v3, %v4760_v58  ;;  %vm4816_vm8 = vcmp.eq.f32.partialorder %v2143_v37, 8.507059e+37 }
  0xf5   : > { %v3020_v20 = vpop.eup %3019  ;;  %v2135_v40 = vmul.f32 %v3018_v38, %v4738_v57  ;;  %v436_v54 = vsel %vm403_vm0, %v367_v34, %v369_v44  ;;  %v796_v21 = vsel %vm763_vm2, %v727_v35, %v729_v51  ;;  %v1608_v28 = vmul.f32 1.442695, %v1516_v41 }
  0xf6   : > { %v2127_v30 = vsel %vm4778_vm6, %v3016_v4, %v2123_v61  ;;  %v4810_v32 = vadd.f32 1.0, %v3020_v20  ;;  %v1383_v23 = vadd.f32 %v1319_v1, %v1024_v14  ;;  %vm2140_vm7 = vweird.f32 %v3018_v38  ;;  %v4823_v4 = vld [vmem:[%s3246_s27 + $0xf8] sm:$0xff] }
  0xf7   : > { %v2132_v52 = vsel %vm4748_vm1, %v2131_v53, %v2127_v30  ;;  %v2136_v63 = vsub.f32 1.0, %v2135_v40  ;;  %v601_v34 = vmul.f32 %v3225_v8, %v436_v54  ;;  %v961_v35 = vmul.f32 %v3227_v9, %v796_v21  ;;  %vm4831_vm9 = vmor %vm2139_vm5, %vm2140_vm7  ;;  %v4875_v21 = vld [vmem:[%s3246_s27 + $0x100] sm:$0xff] }
  0xf8   : > { %v2729_v6 = vmul.f32 %v2132_v52, %v4593_v29  ;;  %3021 = vrcp.f32 %v4810_v32  ;;  %v2146_v55 = vor.u32 1.1754944e-38, %v2145_v50  ;;  %v4826_v45 = vadd.f32 %v3263_v19, %v1383_v23 }
  0xf9   : > { %v2137_v42 = vmul.f32 %v3018_v38, %v2136_v63  ;;  %3023 = vpow2.f32 %v1608_v28  ;;  %v2158_v53 = vand.u32 2147483647, %v4810_v32  ;;  %v2160_v37 = vand.u32 2147483648, %v4810_v32 }
  0xfa   : > { %2793 = vst [vmem:[%s3508_s30 + $0xc8] sm:$0xff] %v2729_v6  ;;  %v665_v60 = vadd.f32 %v601_v34, %v305_v56  ;;  %v1089_v10 = vrot.slane %v4760_v58, 5  ;;  %v1517_v46 = vsub.f32 0.0, %v4826_v45  ;;  %v306_v50 = vmul.f32 %v3232_v11, %v4823_v4 }
  0xfb   : > { %v2138_v47 = vadd.f32 %v3018_v38, %v2137_v42  ;;  %v370_v57 = vrot.slane %v4823_v4, 7  ;;  %v730_v41 = vrot.slane %v4823_v4, 6  ;;  %v1090_v14 = vrot.slane %v4823_v4, 5 }
  0xfc   : > { %v1025_v49 = vadd.f32 %v961_v35, %v665_v60  ;;  %v1156_v61 = vsel %vm1123_vm4, %v1087_v39, %v1089_v10  ;;  %v1610_v20 = vmul.f32 1.442695, %v1517_v46  ;;  %vm2154_vm10 = vweird.f32 %v4810_v32 }
  0xfd   : > { %v2142_v1 = vsel %vm4831_vm9, %v3018_v38, %v2138_v47  ;;  %v1320_v40 = vmul.f32 %v3256_v16, %v1156_v61  ;;  %v437_v2 = vsel %vm403_vm0, %v368_v62, %v370_v57  ;;  %v797_v38 = vsel %vm763_vm2, %v728_v59, %v730_v41 }
  0xfe   : > { %v3022_v56 = vpop.eup %3021  ;;  %v2147_v39 = vsel %vm4816_vm8, %v2146_v55, %v2142_v1  ;;  %v602_v54 = vmul.f32 %v3237_v12, %v437_v2  ;;  %v1157_v62 = vsel %vm1123_vm4, %v1088_v33, %v1090_v14  ;;  %3025 = vpow2.f32 %v1610_v20 }
  0xff   : > { %v3024_v30 = vpop.eup %3023  ;;  %v2730_v28 = vmul.f32 %v2147_v39, %v4646_v26  ;;  %v2150_v23 = vmul.f32 %v3022_v56, %v4810_v32  ;;  %v1384_v59 = vadd.f32 %v1320_v40, %v1025_v49  ;;  %v962_v34 = vmul.f32 %v3239_v13, %v797_v38 }
 0x100   : > { %v4880_v52 = vadd.f32 1.0, %v3024_v30  ;;  %v666_v63 = vadd.f32 %v602_v54, %v306_v50  ;;  %vm2155_vm11 = vweird.f32 %v3022_v56  ;;  %v1321_v33 = vmul.f32 %v3261_v18, %v1157_v62 }
 0x101   : > { %2794 = vst [vmem:[%s3508_s30 + $0xd0] sm:$0xff] %v2730_v28  ;;  %v2151_v0 = vsub.f32 1.0, %v2150_v23  ;;  %v371_v6 = vrot.slane %v4875_v21, 7  ;;  %vm4886_vm12 = vcmp.eq.f32.partialorder %v2158_v53, 8.507059e+37  ;;  %v2161_v17 = vor.u32 1.1754944e-38, %v2160_v37  ;;  %vm4904_vm13 = vmor %vm2154_vm10, %vm2155_vm11 }
 0x102   : > { %3027 = vrcp.f32 %v4880_v52  ;;  %v307_v35 = vmul.f32 %v3211_v3, %v4875_v21  ;;  %v4894_v55 = vadd.f32 %v3223_v7, %v1384_v59  ;;  %v1026_v29 = vadd.f32 %v962_v34, %v666_v63 }
 0x103   : > { %v2152_v42 = vmul.f32 %v3022_v56, %v2151_v0  ;;  %v434_v53 = vsel %vm403_vm0, %v369_v44, %v371_v6  ;;  %v2173_v60 = vand.u32 2147483647, %v4880_v52  ;;  %v2175_v47 = vand.u32 2147483648, %v4880_v52 }
 0x104   : > { %v603_v46 = vmul.f32 %v3225_v8, %v434_v53  ;;  %v731_v50 = vrot.slane %v4875_v21, 6  ;;  %v3026_v49 = vpop.eup %3025  ;;  %vm2169_vm14 = vweird.f32 %v4880_v52  ;;  %v1518_v44 = vsub.f32 0.0, %v4894_v55 }
 0x105   : > { %v2153_v61 = vadd.f32 %v3022_v56, %v2152_v42  ;;  %v1385_v32 = vadd.f32 %v1321_v33, %v1026_v29  ;;  %v4914_v1 = vadd.f32 1.0, %v3026_v49  ;;  %v1091_v2 = vrot.slane %v4875_v21, 5 }
 0x106   : > { %v667_v20 = vadd.f32 %v603_v46, %v307_v35  ;;  %v794_v40 = vsel %vm763_vm2, %v729_v51, %v731_v50  ;;  %v1612_v54 = vmul.f32 1.442695, %v1518_v44  ;;  %vm4931_vm15 = vcmp.eq.f32.partialorder %v2173_v60, 8.507059e+37 }
 0x107   : > { %v2157_v39 = vsel %vm4904_vm13, %v3022_v56, %v2153_v61  ;;  %v4926_v38 = vadd.f32 %v3263_v19, %v1385_v32  ;;  %v963_v62 = vmul.f32 %v3227_v9, %v794_v40  ;;  %v2176_v51 = vor.u32 1.1754944e-38, %v2175_v47  ;;  %v4937_v56 = vld [vmem:[%s3246_s27 + $0x108] sm:$0xff] }
 0x108   : > { %v3028_v30 = vpop.eup %3027  ;;  %v2162_v28 = vsel %vm4886_vm12, %v2161_v17, %v2157_v39  ;;  %3029 = vrcp.f32 %v4914_v1  ;;  %vm2184_vm1 = vweird.f32 %v4914_v1  ;;  %v308_v34 = vmul.f32 %v3232_v11, %v4937_v56  ;;  %v4947_v17 = vld [vmem:[%s3246_s27 + $0x110] sm:$0xff] }
 0x109   : > { %v2731_v59 = vmul.f32 %v2162_v28, %v4713_v48  ;;  %v2165_v63 = vmul.f32 %v3028_v30, %v4880_v52  ;;  %v2188_v0 = vand.u32 2147483647, %v4914_v1  ;;  %3031 = vpow2.f32 %v1612_v54 }
 0x10a   : > { %v1519_v33 = vsub.f32 0.0, %v4926_v38  ;;  %v1027_v26 = vadd.f32 %v963_v62, %v667_v20  ;;  %vm2170_vm3 = vweird.f32 %v3028_v30  ;;  %v1154_v48 = vsel %vm1123_vm4, %v1089_v10, %v1091_v2 }
 0x10b   : > { %2795 = vst [vmem:[%s3508_s30 + $0xd8] sm:$0xff] %v2731_v59  ;;  %v2166_v35 = vsub.f32 1.0, %v2165_v63  ;;  %v372_v42 = vrot.slane %v4937_v56, 7  ;;  %v1322_v53 = vmul.f32 %v3256_v16, %v1154_v48  ;;  %v732_v37 = vrot.slane %v4937_v56, 6  ;;  %vm4970_vm5 = vmor %vm2169_vm14, %vm2170_vm3 }
 0x10c   : > { %v1614_v29 = vmul.f32 1.442695, %v1519_v33  ;;  %v1092_v60 = vrot.slane %v4937_v56, 5  ;;  %v2190_v46 = vand.u32 2147483648, %v4914_v1  ;;  %v373_v10 = vrot.slane %v4947_v17, 7 }
 0x10d   : > { %v2167_v47 = vmul.f32 %v3028_v30, %v2166_v35  ;;  %v435_v58 = vsel %vm403_vm0, %v370_v57, %v372_v42  ;;  %v1386_v44 = vadd.f32 %v1322_v53, %v1027_v26  ;;  %v795_v57 = vsel %vm763_vm2, %v730_v41, %v732_v37 }
 0x10e   : > { %v3030_v49 = vpop.eup %3029  ;;  %3033 = vpow2.f32 %v1614_v29  ;;  %v604_v32 = vmul.f32 %v3237_v12, %v435_v58  ;;  %v964_v52 = vmul.f32 %v3239_v13, %v795_v57  ;;  %v1155_v28 = vsel %vm1123_vm4, %v1090_v14, %v1092_v60 }
 0x10f   : > { %v2168_v20 = vadd.f32 %v3028_v30, %v2167_v47  ;;  %v2180_v40 = vmul.f32 %v3030_v49, %v4914_v1  ;;  %vm2185_vm6 = vweird.f32 %v3030_v49  ;;  %v3032_v39 = vpop.eup %3031  ;;  %v4984_v54 = vadd.f32 %v3223_v7, %v1386_v44 }
 0x110   : > { %v668_v62 = vadd.f32 %v604_v32, %v308_v34  ;;  %v432_v41 = vsel %vm403_vm0, %v371_v6, %v373_v10  ;;  %v5000_v34 = vadd.f32 1.0, %v3032_v39  ;;  %v1323_v33 = vmul.f32 %v3261_v18, %v1155_v28  ;;  %vm5014_vm7 = vmor %vm2184_vm1, %vm2185_vm6  ;;  %v5040_v39 = vld [vmem:[%s3246_s27 + $0x118] sm:$0xff] }
 0x111   : > { %v2172_v59 = vsel %vm4970_vm5, %v3028_v30, %v2168_v20  ;;  %v2181_v63 = vsub.f32 1.0, %v2180_v40  ;;  %v1520_v14 = vsub.f32 0.0, %v4984_v54  ;;  %v309_v35 = vmul.f32 %v3211_v3, %v4947_v17 }
 0x112   : > { %v2177_v4 = vsel %vm4931_vm15, %v2176_v51, %v2172_v59  ;;  %v1028_v26 = vadd.f32 %v964_v52, %v668_v62  ;;  %3035 = vrcp.f32 %v5000_v34  ;;  %v605_v30 = vmul.f32 %v3225_v8, %v432_v41 }
 0x113   : > { %v2732_v6 = vmul.f32 %v2177_v4, %v4772_v43  ;;  %v2182_v48 = vmul.f32 %v3030_v49, %v2181_v63  ;;  %v2191_v51 = vor.u32 1.1754944e-38, %v2190_v46  ;;  %v1616_v53 = vmul.f32 1.442695, %v1520_v14 }
 0x114   : > { %v3034_v29 = vpop.eup %3033  ;;  %v1387_v47 = vadd.f32 %v1323_v33, %v1028_v26  ;;  %vm2189_vm8 = vcmp.eq.f32.partialorder %v2188_v0, 8.507059e+37  ;;  %v733_v61 = vrot.slane %v4947_v17, 6  ;;  %v2203_v44 = vand.u32 2147483647, %v5000_v34 }
 0x115   : > { %2796 = vst [vmem:[%s3508_s30 + $0xe0] sm:$0xff] %v2732_v6  ;;  %v2183_v58 = vadd.f32 %v3030_v49, %v2182_v48  ;;  %v5019_v43 = vadd.f32 1.0, %v3034_v29  ;;  %v2205_v32 = vand.u32 2147483648, %v5000_v34  ;;  %3037 = vpow2.f32 %v1616_v53 }
 0x116   : > { %v5025_v1 = vadd.f32 %v3263_v19, %v1387_v47  ;;  %vm2199_vm9 = vweird.f32 %v5000_v34  ;;  %v669_v0 = vadd.f32 %v605_v30, %v309_v35  ;;  %v792_v52 = vsel %vm763_vm2, %v731_v50, %v733_v61 }
 0x117   : > { %v2187_v46 = vsel %vm5014_vm7, %v3030_v49, %v2183_v58  ;;  %3039 = vrcp.f32 %v5019_v43  ;;  %v2218_v20 = vand.u32 2147483647, %v5019_v43  ;;  %v2220_v28 = vand.u32 2147483648, %v5019_v43 }
 0x118   : > { %v2192_v57 = vsel %vm2189_vm8, %v2191_v51, %v2187_v46  ;;  %v1521_v40 = vsub.f32 0.0, %v5025_v1  ;;  %v3036_v49 = vpop.eup %3035  ;;  %v965_v41 = vmul.f32 %v3227_v9, %v792_v52  ;;  %v1093_v59 = vrot.slane %v4947_v17, 5 }
 0x119   : > { %v2733_v62 = vmul.f32 %v2192_v57, %v4826_v45  ;;  %v2195_v63 = vmul.f32 %v3036_v49, %v5000_v34  ;;  %vm5047_vm10 = vcmp.eq.f32.partialorder %v2203_v44, 8.507059e+37  ;;  %v2206_v4 = vor.u32 1.1754944e-38, %v2205_v32  ;;  %v5077_v32 = vld [vmem:[%s3246_s27 + $0x120] sm:$0xff] }
 0x11a   : > { %v1618_v14 = vmul.f32 1.442695, %v1521_v40  ;;  %vm2214_vm11 = vweird.f32 %v5019_v43  ;;  %v1029_v50 = vadd.f32 %v965_v41, %v669_v0  ;;  %v1152_v45 = vsel %vm1123_vm4, %v1091_v2, %v1093_v59 }
 0x11b   : > { %2797 = vst [vmem:[%s3508_s30 + $0xe8] sm:$0xff] %v2733_v62  ;;  %v374_v26 = vrot.slane %v5040_v39, 7  ;;  %v3038_v35 = vpop.eup %3037  ;;  %v2196_v6 = vsub.f32 1.0, %v2195_v63  ;;  %vm2200_vm12 = vweird.f32 %v3036_v49  ;;  %vm5060_vm13 = vcmp.eq.f32.partialorder %v2218_v20, 8.507059e+37 }
 0x11c   : > { %3041 = vpow2.f32 %v1618_v14  ;;  %v1324_v30 = vmul.f32 %v3256_v16, %v1152_v45  ;;  %v2221_v23 = vor.u32 1.1754944e-38, %v2220_v28  ;;  %v5065_v51 = vadd.f32 1.0, %v3038_v35  ;;  %vm5081_vm14 = vmor %vm2199_vm9, %vm2200_vm12 }
 0x11d   : > { %v3040_v29 = vpop.eup %3039  ;;  %v433_v21 = vsel %vm403_vm0, %v372_v42, %v374_v26  ;;  %v734_v2 = vrot.slane %v5040_v39, 6  ;;  %v2197_v53 = vmul.f32 %v3036_v49, %v2196_v6  ;;  %v1094_v44 = vrot.slane %v5040_v39, 5 }
 0x11e   : > { %v2210_v47 = vmul.f32 %v3040_v29, %v5019_v43  ;;  %v1388_v58 = vadd.f32 %v1324_v30, %v1029_v50  ;;  %vm2215_vm15 = vweird.f32 %v3040_v29  ;;  %3043 = vrcp.f32 %v5065_v51 }
 0x11f   : > { %v310_v42 = vmul.f32 %v3232_v11, %v5040_v39  ;;  %v311_v0 = vmul.f32 %v3211_v3, %v5077_v32  ;;  %v2198_v57 = vadd.f32 %v3036_v49, %v2197_v53  ;;  %v606_v34 = vmul.f32 %v3237_v12, %v433_v21  ;;  %vm5117_vm3 = vmor %vm2214_vm11, %vm2215_vm15 }
 0x120   : > { %v2211_v20 = vsub.f32 1.0, %v2210_v47  ;;  %v5091_v40 = vadd.f32 %v3223_v7, %v1388_v58  ;;  %vm2229_vm1 = vweird.f32 %v5065_v51  ;;  %v2233_v52 = vand.u32 2147483647, %v5065_v51 }
 0x121   : > { %v2235_v62 = vand.u32 2147483648, %v5065_v51  ;;  %v793_v28 = vsel %vm763_vm2, %v732_v37, %v734_v2  ;;  %v2202_v63 = vsel %vm5081_vm14, %v3036_v49, %v2198_v57  ;;  %v1153_v45 = vsel %vm1123_vm4, %v1092_v60, %v1094_v44 }
 0x122   : > { %v3042_v41 = vpop.eup %3041  ;;  %v2212_v14 = vmul.f32 %v3040_v29, %v2211_v20  ;;  %v1522_v50 = vsub.f32 0.0, %v5091_v40  ;;  %v2207_v35 = vsel %vm5047_vm10, %v2206_v4, %v2202_v63  ;;  %v670_v6 = vadd.f32 %v606_v34, %v310_v42  ;;  %v5142_v34 = vld [vmem:[%s3246_s27 + $0x128] sm:$0xff] }
 0x123   : > { %v5121_v49 = vadd.f32 1.0, %v3042_v41  ;;  %v966_v30 = vmul.f32 %v3239_v13, %v793_v28  ;;  %v2734_v56 = vmul.f32 %v2207_v35, %v4894_v55  ;;  %v375_v60 = vrot.slane %v5077_v32, 7 }
 0x124   : > { %v2213_v21 = vadd.f32 %v3040_v29, %v2212_v14  ;;  %v1620_v53 = vmul.f32 1.442695, %v1522_v50  ;;  %v3044_v33 = vpop.eup %3043  ;;  %vm5126_vm5 = vcmp.eq.f32.partialorder %v2233_v52, 8.507059e+37  ;;  %v2236_v43 = vor.u32 1.1754944e-38, %v2235_v62 }
 0x125   : > { %3045 = vrcp.f32 %v5121_v49  ;;  %v1325_v47 = vmul.f32 %v3261_v18, %v1153_v45  ;;  %2798 = vst [vmem:[%s3508_s30 + $0xf0] sm:$0xff] %v2734_v56  ;;  %v2225_v55 = vmul.f32 %v3044_v33, %v5065_v51  ;;  %vm2244_vm6 = vweird.f32 %v5121_v49 }
 0x126   : > { %v2217_v58 = vsel %vm5117_vm3, %v3040_v29, %v2213_v21  ;;  %v2248_v46 = vand.u32 2147483647, %v5121_v49  ;;  %3047 = vpow2.f32 %v1620_v53  ;;  %vm2230_vm7 = vweird.f32 %v3044_v33 }
 0x127   : > { %v2222_v42 = vsel %vm5060_vm13, %v2221_v23, %v2217_v58  ;;  %v2250_v57 = vand.u32 2147483648, %v5121_v49  ;;  %v1030_v20 = vadd.f32 %v966_v30, %v670_v6  ;;  %v2226_v29 = vsub.f32 1.0, %v2225_v55  ;;  %vm5168_vm8 = vmor %vm2229_vm1, %vm2230_vm7 }
 0x128   : > { %v2735_v52 = vmul.f32 %v2222_v42, %v4926_v38  ;;  %v430_v62 = vsel %vm403_vm0, %v373_v10, %v375_v60  ;;  %v735_v28 = vrot.slane %v5077_v32, 6  ;;  %v1095_v41 = vrot.slane %v5077_v32, 5 }
 0x129   : > { %v1389_v48 = vadd.f32 %v1325_v47, %v1030_v20  ;;  %v607_v23 = vmul.f32 %v3225_v8, %v430_v62  ;;  %v312_v63 = vmul.f32 %v3232_v11, %v5142_v34  ;;  %v2227_v38 = vmul.f32 %v3044_v33, %v2226_v29 }
 0x12a   : > { %2799 = vst [vmem:[%s3508_s30 + $0xf8] sm:$0xff] %v2735_v52  ;;  %v790_v14 = vsel %vm763_vm2, %v733_v61, %v735_v28  ;;  %v376_v10 = vrot.slane %v5142_v34, 7  ;;  %v736_v50 = vrot.slane %v5142_v34, 6  ;;  %v1150_v61 = vsel %vm1123_vm4, %v1093_v59, %v1095_v41 }
 0x12b   : > { %v3046_v45 = vpop.eup %3045  ;;  %v5173_v37 = vadd.f32 %v3263_v19, %v1389_v48  ;;  %v671_v6 = vadd.f32 %v607_v23, %v311_v0  ;;  %v967_v30 = vmul.f32 %v3227_v9, %v790_v14  ;;  %v2228_v21 = vadd.f32 %v3044_v33, %v2227_v38  ;;  %v5212_v23 = vld [vmem:[%s3246_s27 + $0x130] sm:$0xff] }
 0x12c   : > { %v3048_v56 = vpop.eup %3047  ;;  %v2240_v51 = vmul.f32 %v3046_v45, %v5121_v49  ;;  %vm2245_vm9 = vweird.f32 %v3046_v45  ;;  %v1326_v53 = vmul.f32 %v3256_v16, %v1150_v61  ;;  %v431_v17 = vsel %vm403_vm0, %v374_v26, %v376_v10 }
 0x12d   : > { %v5184_v47 = vadd.f32 1.0, %v3048_v56  ;;  %v1523_v0 = vsub.f32 0.0, %v5173_v37  ;;  %v1031_v58 = vadd.f32 %v967_v30, %v671_v6  ;;  %v2232_v59 = vsel %vm5168_vm8, %v3044_v33, %v2228_v21  ;;  %vm5217_vm12 = vmor %vm2244_vm6, %vm2245_vm9 }
 0x12e   : > { %v2241_v55 = vsub.f32 1.0, %v2240_v51  ;;  %v608_v42 = vmul.f32 %v3237_v12, %v431_v17  ;;  %v791_v20 = vsel %vm763_vm2, %v734_v2, %v736_v50  ;;  %v2237_v52 = vsel %vm5126_vm5, %v2236_v43, %v2232_v59 }
 0x12f   : > { %vm5204_vm10 = vcmp.eq.f32.partialorder %v2248_v46, 8.507059e+37  ;;  %v2251_v26 = vor.u32 1.1754944e-38, %v2250_v57  ;;  %3049 = vrcp.f32 %v5184_v47  ;;  %v2736_v33 = vmul.f32 %v2237_v52, %v4984_v54 }
 0x130   : > { %v2242_v62 = vmul.f32 %v3046_v45, %v2241_v55  ;;  %vm2259_vm11 = vweird.f32 %v5184_v47  ;;  %v1622_v48 = vmul.f32 1.442695, %v1523_v0  ;;  %v2263_v4 = vand.u32 2147483647, %v5184_v47 }
 0x131   : > { %v1390_v43 = vadd.f32 %v1326_v53, %v1031_v58  ;;  %v672_v46 = vadd.f32 %v608_v42, %v312_v63  ;;  %v968_v57 = vmul.f32 %v3239_v13, %v791_v20  ;;  %2800 = vst [vmem:[%s3508_s30 + $0x100] sm:$0xff] %v2736_v33  ;;  %v2265_v38 = vand.u32 2147483648, %v5184_v47 }
 0x132   : > { %v2243_v54 = vadd.f32 %v3046_v45, %v2242_v62  ;;  %3051 = vpow2.f32 %v1622_v48  ;;  %v1096_v14 = vrot.slane %v5142_v34, 5  ;;  %v313_v6 = vmul.f32 %v3211_v3, %v5212_v23 }
 0x133   : > { %v5227_v35 = vadd.f32 %v3223_v7, %v1390_v43  ;;  %v1032_v49 = vadd.f32 %v968_v57, %v672_v46  ;;  %v377_v30 = vrot.slane %v5212_v23, 7  ;;  %v737_v56 = vrot.slane %v5212_v23, 6 }
 0x134   : > { %v2247_v63 = vsel %vm5217_vm12, %v3046_v45, %v2243_v54  ;;  %v1151_v61 = vsel %vm1123_vm4, %v1094_v44, %v1096_v14  ;;  %v1097_v21 = vrot.slane %v5212_v23, 5  ;;  %vm5287_vm15 = vcmp.eq.f32.partialorder %v2263_v4, 8.507059e+37 }
 0x135   : > { %v3050_v51 = vpop.eup %3049  ;;  %v2252_v53 = vsel %vm5204_vm10, %v2251_v26, %v2247_v63  ;;  %v1524_v0 = vsub.f32 0.0, %v5227_v35  ;;  %v1327_v45 = vmul.f32 %v3261_v18, %v1151_v61  ;;  %v428_v39 = vsel %vm403_vm0, %v375_v60, %v377_v30  ;;  %v5268_v60 = vld [vmem:[%s3246_s27 + $0x138] sm:$0xff] }
 0x136   : > { %v2737_v44 = vmul.f32 %v2252_v53, %v5025_v1  ;;  %v2255_v58 = vmul.f32 %v3050_v51, %v5184_v47  ;;  %vm2260_vm13 = vweird.f32 %v3050_v51  ;;  %v609_v17 = vmul.f32 %v3225_v8, %v428_v39  ;;  %v5317_v39 = vld [vmem:[%s3246_s27 + $0x140] sm:$0xff] }
 0x137   : > { %v1624_v59 = vmul.f32 1.442695, %v1524_v0  ;;  %v1391_v55 = vadd.f32 %v1327_v45, %v1032_v49  ;;  %v788_v42 = vsel %vm763_vm2, %v735_v28, %v737_v56  ;;  %v1148_v1 = vsel %vm1123_vm4, %v1095_v41, %v1097_v21  ;;  %vm5283_vm14 = vmor %vm2259_vm11, %vm2260_vm13 }
 0x138   : > { %v3052_v20 = vpop.eup %3051  ;;  %2801 = vst [vmem:[%s3508_s30 + $0x108] sm:$0xff] %v2737_v44  ;;  %v2256_v52 = vsub.f32 1.0, %v2255_v58  ;;  %v673_v29 = vadd.f32 %v609_v17, %v313_v6  ;;  %v969_v26 = vmul.f32 %v3227_v9, %v788_v42  ;;  %v1328_v33 = vmul.f32 %v3256_v16, %v1148_v1 }
 0x139   : > { %v5273_v62 = vadd.f32 1.0, %v3052_v20  ;;  %3053 = vpow2.f32 %v1624_v59  ;;  %v5276_v28 = vadd.f32 %v3263_v19, %v1391_v55  ;;  %v378_v41 = vrot.slane %v5268_v60, 7 }
 0x13a   : > { %v2257_v32 = vmul.f32 %v3050_v51, %v2256_v52  ;;  %v1033_v48 = vadd.f32 %v969_v26, %v673_v29  ;;  %v738_v2 = vrot.slane %v5268_v60, 6  ;;  %v2266_v57 = vor.u32 1.1754944e-38, %v2265_v38 }
 0x13b   : > { %3055 = vrcp.f32 %v5273_v62  ;;  %v314_v54 = vmul.f32 %v3232_v11, %v5268_v60  ;;  %v1525_v6 = vsub.f32 0.0, %v5276_v28  ;;  %v429_v47 = vsel %vm403_vm0, %v376_v10, %v378_v41 }
 0x13c   : > { %v2258_v49 = vadd.f32 %v3050_v51, %v2257_v32  ;;  %v1392_v63 = vadd.f32 %v1328_v33, %v1033_v48  ;;  %vm2274_vm1 = vweird.f32 %v5273_v62  ;;  %v2278_v4 = vand.u32 2147483647, %v5273_v62 }
 0x13d   : > { %v610_v38 = vmul.f32 %v3237_v12, %v429_v47  ;;  %v789_v61 = vsel %vm763_vm2, %v736_v50, %v738_v2  ;;  %v1626_v0 = vmul.f32 1.442695, %v1525_v6  ;;  %v2280_v17 = vand.u32 2147483648, %v5273_v62  ;;  %v5361_v47 = vld [vmem:[%s3246_s27 + $0x148] sm:$0xff] }
 0x13e   : > { %v2262_v53 = vsel %vm5283_vm14, %v3050_v51, %v2258_v49  ;;  %v5313_v45 = vadd.f32 %v3223_v7, %v1392_v63  ;;  %v970_v10 = vmul.f32 %v3239_v13, %v789_v61  ;;  %v1098_v50 = vrot.slane %v5268_v60, 5 }
 0x13f   : > { %v3054_v44 = vpop.eup %3053  ;;  %v2267_v58 = vsel %vm5287_vm15, %v2266_v57, %v2262_v53  ;;  %v674_v59 = vadd.f32 %v610_v38, %v314_v54  ;;  %3057 = vpow2.f32 %v1626_v0  ;;  %v379_v29 = vrot.slane %v5317_v39, 7 }
 0x140   : > { %v2738_v51 = vmul.f32 %v2267_v58, %v5091_v40  ;;  %v5324_v55 = vadd.f32 1.0, %v3054_v44  ;;  %v1526_v42 = vsub.f32 0.0, %v5313_v45  ;;  %v1149_v52 = vsel %vm1123_vm4, %v1096_v14, %v1098_v50 }
 0x141   : > { %v3056_v1 = vpop.eup %3055  ;;  %v1034_v20 = vadd.f32 %v970_v10, %v674_v59  ;;  %v739_v26 = vrot.slane %v5317_v39, 6  ;;  %v315_v33 = vmul.f32 %v3211_v3, %v5317_v39  ;;  %v1329_v14 = vmul.f32 %v3261_v18, %v1149_v52 }
 0x142   : > { %2802 = vst [vmem:[%s3508_s30 + $0x110] sm:$0xff] %v2738_v51  ;;  %v2270_v40 = vmul.f32 %v3056_v1, %v5273_v62  ;;  %vm2275_vm3 = vweird.f32 %v3056_v1  ;;  %3059 = vrcp.f32 %v5324_v55  ;;  %v2293_v32 = vand.u32 2147483647, %v5324_v55 }
 0x143   : > { %v2295_v34 = vand.u32 2147483648, %v5324_v55  ;;  %v1628_v48 = vmul.f32 1.442695, %v1526_v42  ;;  %v426_v46 = vsel %vm403_vm0, %v377_v30, %v379_v29  ;;  %v786_v57 = vsel %vm763_vm2, %v737_v56, %v739_v26  ;;  %vm5374_vm7 = vmor %vm2274_vm1, %vm2275_vm3 }
 0x144   : > { %v2271_v43 = vsub.f32 1.0, %v2270_v40  ;;  %v1099_v54 = vrot.slane %v5317_v39, 5  ;;  %vm5356_vm5 = vcmp.eq.f32.partialorder %v2278_v4, 8.507059e+37  ;;  %v2281_v6 = vor.u32 1.1754944e-38, %v2280_v17 }
 0x145   : > { %3061 = vpow2.f32 %v1628_v48  ;;  %v1393_v63 = vadd.f32 %v1329_v14, %v1034_v20  ;;  %v3058_v38 = vpop.eup %3057  ;;  %vm2289_vm6 = vweird.f32 %v5324_v55  ;;  %v611_v61 = vmul.f32 %v3225_v8, %v426_v46 }
 0x146   : > { %v2272_v30 = vmul.f32 %v3056_v1, %v2271_v43  ;;  %v1146_v56 = vsel %vm1123_vm4, %v1097_v21, %v1099_v54  ;;  %vm5378_vm8 = vcmp.eq.f32.partialorder %v2293_v32, 8.507059e+37  ;;  %v5382_v0 = vadd.f32 1.0, %v3058_v38 }
 0x147   : > { %v5385_v10 = vadd.f32 %v3263_v19, %v1393_v63  ;;  %v971_v23 = vmul.f32 %v3227_v9, %v786_v57  ;;  %v2296_v58 = vor.u32 1.1754944e-38, %v2295_v34  ;;  %v675_v17 = vadd.f32 %v611_v61, %v315_v33 }
 0x148   : > { %v3060_v44 = vpop.eup %3059  ;;  %v2273_v21 = vadd.f32 %v3056_v1, %v2272_v30  ;;  %v380_v62 = vrot.slane %v5361_v47, 7  ;;  %3063 = vrcp.f32 %v5382_v0  ;;  %v1330_v51 = vmul.f32 %v3256_v16, %v1146_v56 }
 0x149   : > { %v2285_v59 = vmul.f32 %v3060_v44, %v5324_v55  ;;  %vm2290_vm9 = vweird.f32 %v3060_v44  ;;  %v2308_v20 = vand.u32 2147483647, %v5382_v0  ;;  %v2310_v52 = vand.u32 2147483648, %v5382_v0 }
 0x14a   : > { %v2277_v42 = vsel %vm5374_vm7, %v3056_v1, %v2273_v21  ;;  %v1527_v40 = vsub.f32 0.0, %v5385_v10  ;;  %v1035_v48 = vadd.f32 %v971_v23, %v675_v17  ;;  %v427_v1 = vsel %vm403_vm0, %v378_v41, %v380_v62  ;;  %vm5416_vm10 = vmor %vm2289_vm6, %vm2290_vm9 }
 0x14b   : > { %v3062_v33 = vpop.eup %3061  ;;  %v2282_v32 = vsel %vm5356_vm5, %v2281_v6, %v2277_v42  ;;  %v2286_v34 = vsub.f32 1.0, %v2285_v59  ;;  %v316_v46 = vmul.f32 %v3232_v11, %v5361_v47  ;;  %v740_v57 = vrot.slane %v5361_v47, 6  ;;  %v5434_v59 = vld [vmem:[%s3246_s27 + $0x150] sm:$0xff] }
 0x14c   : > { %v2739_v14 = vmul.f32 %v2282_v32, %v5173_v37  ;;  %v5406_v43 = vadd.f32 1.0, %v3062_v33  ;;  %v1630_v6 = vmul.f32 1.442695, %v1527_v40  ;;  %v1394_v63 = vadd.f32 %v1330_v51, %v1035_v48 }
 0x14d   : > { %v2287_v49 = vmul.f32 %v3060_v44, %v2286_v34  ;;  %v612_v38 = vmul.f32 %v3237_v12, %v427_v1  ;;  %vm2304_vm11 = vweird.f32 %v5382_v0  ;;  %vm5421_vm12 = vcmp.eq.f32.partialorder %v2308_v20, 8.507059e+37 }
 0x14e   : > { %2803 = vst [vmem:[%s3508_s30 + $0x118] sm:$0xff] %v2739_v14  ;;  %v2311_v30 = vor.u32 1.1754944e-38, %v2310_v52  ;;  %3065 = vrcp.f32 %v5406_v43  ;;  %v3064_v61 = vpop.eup %3063  ;;  %vm2319_vm13 = vweird.f32 %v5406_v43  ;;  %v5428_v55 = vadd.f32 %v3223_v7, %v1394_v63 }
 0x14f   : > { %v2288_v56 = vadd.f32 %v3060_v44, %v2287_v49  ;;  %3067 = vpow2.f32 %v1630_v6  ;;  %v2300_v4 = vmul.f32 %v3064_v61, %v5382_v0  ;;  %v2323_v23 = vand.u32 2147483647, %v5406_v43 }
 0x150   : > { %v2325_v21 = vand.u32 2147483648, %v5406_v43  ;;  %v676_v17 = vadd.f32 %v612_v38, %v316_v46  ;;  %v1528_v42 = vsub.f32 0.0, %v5428_v55  ;;  %v787_v20 = vsel %vm763_vm2, %v738_v2, %v740_v57 }
 0x151   : > { %v2292_v51 = vsel %vm5416_vm10, %v3060_v44, %v2288_v56  ;;  %v1100_v52 = vrot.slane %v5361_v47, 5  ;;  %v2301_v33 = vsub.f32 1.0, %v2300_v4  ;;  %vm2305_vm14 = vweird.f32 %v3064_v61 }
 0x152   : > { %v2297_v40 = vsel %vm5378_vm8, %v2296_v58, %v2292_v51  ;;  %v972_v32 = vmul.f32 %v3239_v13, %v787_v20  ;;  %v1632_v34 = vmul.f32 1.442695, %v1528_v42  ;;  %v381_v48 = vrot.slane %v5434_v59, 7  ;;  %vm5462_vm15 = vmor %vm2304_vm11, %vm2305_vm14  ;;  %v5493_v20 = vld [vmem:[%s3246_s27 + $0x158] sm:$0xff]  ;;  %v5547_v51 = vld [vmem:[%s3246_s27 + $0x160] sm:$0xff] }
 0x153   : > { %v2740_v44 = vmul.f32 %v2297_v40, %v5227_v35  ;;  %v1147_v2 = vsel %vm1123_vm4, %v1098_v50, %v1100_v52  ;;  %v2302_v14 = vmul.f32 %v3064_v61, %v2301_v33  ;;  %v741_v46 = vrot.slane %v5434_v59, 6 }
 0x154   : > { %v3066_v1 = vpop.eup %3065  ;;  %v1036_v53 = vadd.f32 %v972_v32, %v676_v17  ;;  %v1331_v58 = vmul.f32 %v3261_v18, %v1147_v2  ;;  %3069 = vpow2.f32 %v1632_v34  ;;  %v317_v50 = vmul.f32 %v3211_v3, %v5434_v59 }
 0x155   : > { %v3068_v49 = vpop.eup %3067  ;;  %2804 = vst [vmem:[%s3508_s30 + $0x120] sm:$0xff] %v2740_v44  ;;  %v2315_v60 = vmul.f32 %v3066_v1, %v5406_v43  ;;  %v424_v6 = vsel %vm403_vm0, %v379_v29, %v381_v48  ;;  %v2303_v63 = vadd.f32 %v3064_v61, %v2302_v14  ;;  %vm2320_vm1 = vweird.f32 %v3066_v1 }
 0x156   : > { %v5475_v0 = vadd.f32 1.0, %v3068_v49  ;;  %v1395_v38 = vadd.f32 %v1331_v58, %v1036_v53  ;;  %v613_v41 = vmul.f32 %v3225_v8, %v424_v6  ;;  %v784_v4 = vsel %vm763_vm2, %v739_v26, %v741_v46  ;;  %vm5505_vm5 = vmor %vm2319_vm13, %vm2320_vm1 }
 0x157   : > { %v2316_v56 = vsub.f32 1.0, %v2315_v60  ;;  %v1101_v17 = vrot.slane %v5434_v59, 5  ;;  %v2307_v29 = vsel %vm5462_vm15, %v3064_v61, %v2303_v63  ;;  %vm5487_vm3 = vcmp.eq.f32.partialorder %v2323_v23, 8.507059e+37 }
 0x158   : > { %v2326_v42 = vor.u32 1.1754944e-38, %v2325_v21  ;;  %3071 = vrcp.f32 %v5475_v0  ;;  %v2312_v40 = vsel %vm5421_vm12, %v2311_v30, %v2307_v29  ;;  %v5498_v26 = vadd.f32 %v3263_v19, %v1395_v38 }
 0x159   : > { %v2317_v33 = vmul.f32 %v3066_v1, %v2316_v56  ;;  %v318_v61 = vmul.f32 %v3232_v11, %v5493_v20  ;;  %v2741_v23 = vmul.f32 %v2312_v40, %v5276_v28  ;;  %v2338_v32 = vand.u32 2147483647, %v5475_v0 }
 0x15a   : > { %v677_v44 = vadd.f32 %v613_v41, %v317_v50  ;;  %v973_v37 = vmul.f32 %v3227_v9, %v784_v4  ;;  %v3070_v30 = vpop.eup %3069  ;;  %v2340_v2 = vand.u32 2147483648, %v5475_v0  ;;  %v1529_v14 = vsub.f32 0.0, %v5498_v26 }
 0x15b   : > { %v2318_v34 = vadd.f32 %v3066_v1, %v2317_v33  ;;  %v1144_v28 = vsel %vm1123_vm4, %v1099_v54, %v1101_v17  ;;  %2805 = vst [vmem:[%s3508_s30 + $0x128] sm:$0xff] %v2741_v23  ;;  %v5520_v43 = vadd.f32 1.0, %v3070_v30  ;;  %v382_v49 = vrot.slane %v5493_v20, 7 }
 0x15c   : > { %v1037_v53 = vadd.f32 %v973_v37, %v677_v44  ;;  %v1332_v58 = vmul.f32 %v3256_v16, %v1144_v28  ;;  %vm2334_vm6 = vweird.f32 %v5475_v0  ;;  %v1634_v60 = vmul.f32 1.442695, %v1529_v14 }
 0x15d   : > { %v2322_v35 = vsel %vm5505_vm5, %v3066_v1, %v2318_v34  ;;  %v742_v39 = vrot.slane %v5493_v20, 6  ;;  %vm5530_vm7 = vcmp.eq.f32.partialorder %v2338_v32, 8.507059e+37  ;;  %3073 = vrcp.f32 %v5520_v43 }
 0x15e   : > { %v3072_v50 = vpop.eup %3071  ;;  %v2327_v54 = vsel %vm5487_vm3, %v2326_v42, %v2322_v35  ;;  %v1102_v63 = vrot.slane %v5493_v20, 5  ;;  %v2341_v41 = vor.u32 1.1754944e-38, %v2340_v2  ;;  %vm2349_vm8 = vweird.f32 %v5520_v43 }
 0x15f   : > { %v2742_v1 = vmul.f32 %v2327_v54, %v5313_v45  ;;  %v2330_v38 = vmul.f32 %v3072_v50, %v5475_v0  ;;  %v2353_v56 = vand.u32 2147483647, %v5520_v43  ;;  %3075 = vpow2.f32 %v1634_v60 }
 0x160   : > { %v1396_v4 = vadd.f32 %v1332_v58, %v1037_v53  ;;  %v425_v29 = vsel %vm403_vm0, %v380_v62, %v382_v49  ;;  %vm2335_vm9 = vweird.f32 %v3072_v50  ;;  %v785_v40 = vsel %vm763_vm2, %v740_v57, %v742_v39 }
 0x161   : > { %2806 = vst [vmem:[%s3508_s30 + $0x130] sm:$0xff] %v2742_v1  ;;  %v2331_v45 = vsub.f32 1.0, %v2330_v38  ;;  %v614_v42 = vmul.f32 %v3237_v12, %v425_v29  ;;  %v2355_v33 = vand.u32 2147483648, %v5520_v43  ;;  %v974_v62 = vmul.f32 %v3239_v13, %v785_v40  ;;  %vm5572_vm10 = vmor %vm2334_vm6, %vm2335_vm9 }
 0x162   : > { %v5559_v23 = vadd.f32 %v3223_v7, %v1396_v4  ;;  %v1145_v21 = vsel %vm1123_vm4, %v1100_v52, %v1102_v63  ;;  %v383_v57 = vrot.slane %v5547_v51, 7  ;;  %v319_v47 = vmul.f32 %v3211_v3, %v5547_v51 }
 0x163   : > { %v2332_v32 = vmul.f32 %v3072_v50, %v2331_v45  ;;  %v678_v44 = vadd.f32 %v614_v42, %v318_v61  ;;  %v1333_v37 = vmul.f32 %v3261_v18, %v1145_v21  ;;  %v3074_v30 = vpop.eup %3073  ;;  %v743_v52 = vrot.slane %v5547_v51, 6  ;;  %v5607_v42 = vld [vmem:[%s3246_s27 + $0x168] sm:$0xff] }
 0x164   : > { %v1530_v2 = vsub.f32 0.0, %v5559_v23  ;;  %v1103_v61 = vrot.slane %v5547_v51, 5  ;;  %v2345_v28 = vmul.f32 %v3074_v30, %v5520_v43  ;;  %vm2350_vm11 = vweird.f32 %v3074_v30 }
 0x165   : > { %v2333_v14 = vadd.f32 %v3072_v50, %v2332_v32  ;;  %v1038_v53 = vadd.f32 %v974_v62, %v678_v44  ;;  %v3076_v0 = vpop.eup %3075  ;;  %v422_v35 = vsel %vm403_vm0, %v381_v48, %v383_v57  ;;  %v782_v60 = vsel %vm763_vm2, %v741_v46, %v743_v52  ;;  %vm5613_vm12 = vmor %vm2349_vm8, %vm2350_vm11 }
 0x166   : > { %v1636_v58 = vmul.f32 1.442695, %v1530_v2  ;;  %v1142_v54 = vsel %vm1123_vm4, %v1101_v17, %v1103_v61  ;;  %v2346_v38 = vsub.f32 1.0, %v2345_v28  ;;  %v1721_v48 = vadd.f32 1.0, %v3076_v0 }
 0x167   : > { %v2337_v1 = vsel %vm5572_vm10, %v3072_v50, %v2333_v14  ;;  %v1397_v4 = vadd.f32 %v1333_v37, %v1038_v53  ;;  %v615_v46 = vmul.f32 %v3225_v8, %v422_v35  ;;  %v975_v45 = vmul.f32 %v3227_v9, %v782_v60 }
 0x168   : > { %v2342_v29 = vsel %vm5530_vm7, %v2341_v41, %v2337_v1  ;;  %3077 = vpow2.f32 %v1636_v58  ;;  %v2347_v17 = vmul.f32 %v3074_v30, %v2346_v38  ;;  %vm5617_vm13 = vcmp.eq.f32.partialorder %v2353_v56, 8.507059e+37 }
 0x169   : > { %v2743_v59 = vmul.f32 %v2342_v29, %v5385_v10  ;;  %3079 = vrcp.f32 %v1721_v48  ;;  %v2356_v41 = vor.u32 1.1754944e-38, %v2355_v33  ;;  %v5622_v40 = vadd.f32 %v3263_v19, %v1397_v4  ;;  %v5663_v29 = vld [vmem:[%s3246_s27 + $0x170] sm:$0xff] }
 0x16a   : > { %v679_v62 = vadd.f32 %v615_v46, %v319_v47  ;;  %v2348_v10 = vadd.f32 %v3074_v30, %v2347_v17  ;;  %v1334_v21 = vmul.f32 %v3256_v16, %v1142_v54  ;;  %v384_v32 = vrot.slane %v5607_v42, 7 }
 0x16b   : > { %2807 = vst [vmem:[%s3508_s30 + $0x138] sm:$0xff] %v2743_v59  ;;  %v744_v43 = vrot.slane %v5607_v42, 6  ;;  %v2368_v44 = vand.u32 2147483647, %v1721_v48  ;;  %v1531_v37 = vsub.f32 0.0, %v5622_v40  ;;  %v320_v34 = vmul.f32 %v3232_v11, %v5607_v42  ;;  %v5671_v59 = vld [vmem:[%s3246_s27 + $0x178] sm:$0xff] }
 0x16c   : > { %v1039_v56 = vadd.f32 %v975_v45, %v679_v62  ;;  %v2352_v33 = vsel %vm5613_vm12, %v3074_v30, %v2348_v10  ;;  %v423_v2 = vsel %vm403_vm0, %v382_v49, %v384_v32  ;;  %v1104_v14 = vrot.slane %v5607_v42, 5 }
 0x16d   : > { %v783_v47 = vsel %vm763_vm2, %v742_v39, %v744_v43  ;;  %v2357_v30 = vsel %vm5617_vm13, %v2356_v41, %v2352_v33  ;;  %v1638_v53 = vmul.f32 1.442695, %v1531_v37  ;;  %v616_v58 = vmul.f32 %v3237_v12, %v423_v2 }
 0x16e   : > { %v3078_v28 = vpop.eup %3077  ;;  %v1398_v0 = vadd.f32 %v1334_v21, %v1039_v56  ;;  %v2744_v35 = vmul.f32 %v2357_v30, %v5428_v55  ;;  %v2370_v60 = vand.u32 2147483648, %v1721_v48  ;;  %v1143_v39 = vsel %vm1123_vm4, %v1102_v63, %v1104_v14 }
 0x16f   : > { %v3080_v49 = vpop.eup %3079  ;;  %v5650_v54 = vadd.f32 1.0, %v3078_v28  ;;  %3081 = vpow2.f32 %v1638_v53  ;;  %v976_v4 = vmul.f32 %v3239_v13, %v783_v47  ;;  %vm2364_vm14 = vweird.f32 %v1721_v48 }
 0x170   : > { %v2360_v1 = vmul.f32 %v3080_v49, %v1721_v48  ;;  %v5659_v38 = vadd.f32 %v3223_v7, %v1398_v0  ;;  %2808 = vst [vmem:[%s3508_s30 + $0x140] sm:$0xff] %v2744_v35  ;;  %vm2365_vm15 = vweird.f32 %v3080_v49  ;;  %v680_v63 = vadd.f32 %v616_v58, %v320_v34 }
 0x171   : > { %3083 = vrcp.f32 %v5650_v54  ;;  %v2383_v55 = vand.u32 2147483647, %v5650_v54  ;;  %v1335_v45 = vmul.f32 %v3261_v18, %v1143_v39  ;;  %vm5673_vm1 = vcmp.eq.f32.partialorder %v2368_v44, 8.507059e+37  ;;  %vm5682_vm5 = vmor %vm2364_vm14, %vm2365_vm15 }
 0x172   : > { %v2361_v20 = vsub.f32 1.0, %v2360_v1  ;;  %v1532_v46 = vsub.f32 0.0, %v5659_v38  ;;  %v2371_v50 = vor.u32 1.1754944e-38, %v2370_v60  ;;  %vm2379_vm3 = vweird.f32 %v5650_v54 }
 0x173   : > { %v385_v6 = vrot.slane %v5663_v29, 7  ;;  %v1040_v10 = vadd.f32 %v976_v4, %v680_v63  ;;  %v745_v21 = vrot.slane %v5663_v29, 6  ;;  %v2385_v44 = vand.u32 2147483648, %v5650_v54 }
 0x174   : > { %v2362_v41 = vmul.f32 %v3080_v49, %v2361_v20  ;;  %v1640_v62 = vmul.f32 1.442695, %v1532_v46  ;;  %v1105_v34 = vrot.slane %v5663_v29, 5  ;;  %v386_v33 = vrot.slane %v5671_v59, 7 }
 0x175   : > { %v420_v56 = vsel %vm403_vm0, %v383_v57, %v385_v6  ;;  %v3082_v2 = vpop.eup %3081  ;;  %vm5695_vm6 = vcmp.eq.f32.partialorder %v2383_v55, 8.507059e+37  ;;  %v1399_v28 = vadd.f32 %v1335_v45, %v1040_v10  ;;  %v321_v30 = vmul.f32 %v3211_v3, %v5663_v29 }
 0x176   : > { %v2363_v47 = vadd.f32 %v3080_v49, %v2362_v41  ;;  %3085 = vpow2.f32 %v1640_v62  ;;  %v5701_v0 = vadd.f32 1.0, %v3082_v2  ;;  %v617_v57 = vmul.f32 %v3225_v8, %v420_v56 }
 0x177   : > { %v3084_v53 = vpop.eup %3083  ;;  %v780_v58 = vsel %vm763_vm2, %v743_v52, %v745_v21  ;;  %v1140_v35 = vsel %vm1123_vm4, %v1103_v61, %v1105_v34  ;;  %v5720_v1 = vadd.f32 %v3263_v19, %v1399_v28  ;;  %v421_v52 = vsel %vm403_vm0, %v384_v32, %v386_v33 }
 0x178   : > { %v2367_v60 = vsel %vm5682_vm5, %v3080_v49, %v2363_v47  ;;  %v2375_v39 = vmul.f32 %v3084_v53, %v5650_v54  ;;  %vm2380_vm7 = vweird.f32 %v3084_v53  ;;  %3087 = vrcp.f32 %v5701_v0 }
 0x179   : > { %v2372_v51 = vsel %vm5673_vm1, %v2371_v50, %v2367_v60  ;;  %v2398_v61 = vand.u32 2147483647, %v5701_v0  ;;  %v2400_v55 = vand.u32 2147483648, %v5701_v0  ;;  %v1533_v20 = vsub.f32 0.0, %v5720_v1  ;;  %vm5744_vm8 = vmor %vm2379_vm3, %vm2380_vm7 }
 0x17a   : > { %v2745_v49 = vmul.f32 %v2372_v51, %v5498_v26  ;;  %v2376_v4 = vsub.f32 1.0, %v2375_v39  ;;  %v2386_v46 = vor.u32 1.1754944e-38, %v2385_v44  ;;  %v681_v63 = vadd.f32 %v617_v57, %v321_v30  ;;  %v5757_v30 = vld [vmem:[%s3246_s27 + $0x180] sm:$0xff] }
 0x17b   : > { %v977_v45 = vmul.f32 %v3227_v9, %v780_v58  ;;  %v322_v32 = vmul.f32 %v3232_v11, %v5671_v59  ;;  %v1642_v41 = vmul.f32 1.442695, %v1533_v20  ;;  %v1336_v62 = vmul.f32 %v3256_v16, %v1140_v35 }
 0x17c   : > { %v3086_v17 = vpop.eup %3085  ;;  %2809 = vst [vmem:[%s3508_s30 + $0x148] sm:$0xff] %v2745_v49  ;;  %v2377_v50 = vmul.f32 %v3084_v53, %v2376_v4  ;;  %v618_v26 = vmul.f32 %v3237_v12, %v421_v52  ;;  %vm2394_vm9 = vweird.f32 %v5701_v0  ;;  %v746_v56 = vrot.slane %v5671_v59, 6 }
 0x17d   : > { %v5749_v37 = vadd.f32 1.0, %v3086_v17  ;;  %v1041_v44 = vadd.f32 %v977_v45, %v681_v63  ;;  %vm5752_vm10 = vcmp.eq.f32.partialorder %v2398_v61, 8.507059e+37  ;;  %v2401_v28 = vor.u32 1.1754944e-38, %v2400_v55 }
 0x17e   : > { %v2378_v2 = vadd.f32 %v3084_v53, %v2377_v50  ;;  %3089 = vpow2.f32 %v1642_v41  ;;  %v3088_v54 = vpop.eup %3087  ;;  %v682_v57 = vadd.f32 %v618_v26, %v322_v32  ;;  %v1106_v58 = vrot.slane %v5671_v59, 5  ;;  %v5906_v59 = vld [vmem:[%s3246_s27 + $0x198] sm:$0xff] }
 0x17f   : > { %3091 = vrcp.f32 %v5749_v37  ;;  %v323_v35 = vmul.f32 %v3211_v3, %v5757_v30  ;;  %v2390_v39 = vmul.f32 %v3088_v54, %v5701_v0  ;;  %v2413_v52 = vand.u32 2147483647, %v5749_v37 }
 0x180   : > { %v2382_v60 = vsel %vm5744_vm8, %v3084_v53, %v2378_v2  ;;  %v1400_v51 = vadd.f32 %v1336_v62, %v1041_v44  ;;  %vm2395_vm11 = vweird.f32 %v3088_v54  ;;  %v2415_v49 = vand.u32 2147483648, %v5749_v37 }
 0x181   : > { %v2387_v61 = vsel %vm5695_vm6, %v2386_v46, %v2382_v60  ;;  %v781_v4 = vsel %vm763_vm2, %v744_v43, %v746_v56  ;;  %v2391_v55 = vsub.f32 1.0, %v2390_v39  ;;  %v1141_v48 = vsel %vm1123_vm4, %v1104_v14, %v1106_v58  ;;  %vm5796_vm12 = vmor %vm2394_vm9, %vm2395_vm11 }
 0x182   : > { %v2746_v53 = vmul.f32 %v2387_v61, %v5559_v23  ;;  %v5778_v20 = vadd.f32 %v3223_v7, %v1400_v51  ;;  %v978_v63 = vmul.f32 %v3239_v13, %v781_v4  ;;  %v387_v46 = vrot.slane %v5757_v30, 7  ;;  %v5827_v61 = vld [vmem:[%s3246_s27 + $0x188] sm:$0xff] }
 0x183   : > { %v747_v45 = vrot.slane %v5757_v30, 6  ;;  %v1107_v43 = vrot.slane %v5757_v30, 5  ;;  %v2392_v32 = vmul.f32 %v3088_v54, %v2391_v55  ;;  %v1337_v41 = vmul.f32 %v3261_v18, %v1141_v48  ;;  %v5838_v55 = vld [vmem:[%s3246_s27 + $0x190] sm:$0xff] }
 0x184   : > { %v3090_v23 = vpop.eup %3089  ;;  %2810 = vst [vmem:[%s3508_s30 + $0x150] sm:$0xff] %v2746_v53  ;;  %v1534_v17 = vsub.f32 0.0, %v5778_v20  ;;  %v1042_v50 = vadd.f32 %v978_v63, %v682_v57  ;;  %vm2409_vm13 = vweird.f32 %v5749_v37  ;;  %vm5801_vm14 = vcmp.eq.f32.partialorder %v2413_v52, 8.507059e+37 }
 0x185   : > { %v3092_v62 = vpop.eup %3091  ;;  %v2416_v26 = vor.u32 1.1754944e-38, %v2415_v49  ;;  %v1725_v10 = vadd.f32 1.0, %v3090_v23  ;;  %v2393_v44 = vadd.f32 %v3088_v54, %v2392_v32  ;;  %v418_v0 = vsel %vm403_vm0, %v385_v6, %v387_v46 }
 0x186   : > { %v2405_v2 = vmul.f32 %v3092_v62, %v5749_v37  ;;  %v1644_v57 = vmul.f32 1.442695, %v1534_v17  ;;  %vm2410_vm15 = vweird.f32 %v3092_v62  ;;  %v778_v60 = vsel %vm763_vm2, %v745_v21, %v747_v45 }
 0x187   : > { %3093 = vrcp.f32 %v1725_v10  ;;  %v1138_v39 = vsel %vm1123_vm4, %v1105_v34, %v1107_v43  ;;  %v2397_v6 = vsel %vm5796_vm12, %v3088_v54, %v2393_v44  ;;  %v1401_v51 = vadd.f32 %v1337_v41, %v1042_v50  ;;  %vm5843_vm3 = vmor %vm2409_vm13, %vm2410_vm15 }
 0x188   : > { %v2406_v52 = vsub.f32 1.0, %v2405_v2  ;;  %3095 = vpow2.f32 %v1644_v57  ;;  %v2402_v49 = vsel %vm5752_vm10, %v2401_v28, %v2397_v6  ;;  %vm2424_vm1 = vweird.f32 %v1725_v10 }
 0x189   : > { %v2428_v21 = vand.u32 2147483647, %v1725_v10  ;;  %v619_v4 = vmul.f32 %v3225_v8, %v418_v0  ;;  %v2747_v29 = vmul.f32 %v2402_v49, %v5622_v40  ;;  %v5834_v34 = vadd.f32 %v3263_v19, %v1401_v51 }
 0x18a   : > { %v2407_v53 = vmul.f32 %v3092_v62, %v2406_v52  ;;  %v979_v54 = vmul.f32 %v3227_v9, %v778_v60  ;;  %v2430_v28 = vand.u32 2147483648, %v1725_v10  ;;  %v1338_v48 = vmul.f32 %v3256_v16, %v1138_v39 }
 0x18b   : > { %v683_v63 = vadd.f32 %v619_v4, %v323_v35  ;;  %v388_v40 = vrot.slane %v5827_v61, 7  ;;  %2811 = vst [vmem:[%s3508_s30 + $0x158] sm:$0xff] %v2747_v29  ;;  %v1535_v32 = vsub.f32 0.0, %v5834_v34  ;;  %v324_v17 = vmul.f32 %v3232_v11, %v5827_v61 }
 0x18c   : > { %v2408_v23 = vadd.f32 %v3092_v62, %v2407_v53  ;;  %v748_v50 = vrot.slane %v5827_v61, 6  ;;  %v1108_v42 = vrot.slane %v5827_v61, 5  ;;  %v389_v44 = vrot.slane %v5838_v55, 7 }
 0x18d   : > { %v3094_v37 = vpop.eup %3093  ;;  %v1043_v41 = vadd.f32 %v979_v54, %v683_v63  ;;  %v419_v35 = vsel %vm403_vm0, %v386_v33, %v388_v40  ;;  %v1646_v60 = vmul.f32 1.442695, %v1535_v32  ;;  %vm5874_vm6 = vcmp.eq.f32.partialorder %v2428_v21, 8.507059e+37 }
 0x18e   : > { %v3096_v2 = vpop.eup %3095  ;;  %v2412_v57 = vsel %vm5843_vm3, %v3092_v62, %v2408_v23  ;;  %v2420_v0 = vmul.f32 %v3094_v37, %v1725_v10  ;;  %vm2425_vm5 = vweird.f32 %v3094_v37  ;;  %v620_v51 = vmul.f32 %v3237_v12, %v419_v35 }
 0x18f   : > { %v2417_v39 = vsel %vm5801_vm14, %v2416_v26, %v2412_v57  ;;  %v1726_v6 = vadd.f32 1.0, %v3096_v2  ;;  %v1402_v52 = vadd.f32 %v1338_v48, %v1043_v41  ;;  %3097 = vpow2.f32 %v1646_v60  ;;  %vm5885_vm7 = vmor %vm2424_vm1, %vm2425_vm5 }
 0x190   : > { %v2748_v33 = vmul.f32 %v2417_v39, %v5659_v38  ;;  %v2421_v49 = vsub.f32 1.0, %v2420_v0  ;;  %v779_v62 = vsel %vm763_vm2, %v746_v56, %v748_v50  ;;  %v2431_v14 = vor.u32 1.1754944e-38, %v2430_v28 }
 0x191   : > { %3099 = vrcp.f32 %v1726_v6  ;;  %v5880_v38 = vadd.f32 %v3223_v7, %v1402_v52  ;;  %v684_v29 = vadd.f32 %v620_v51, %v324_v17  ;;  %v980_v53 = vmul.f32 %v3239_v13, %v779_v62 }
 0x192   : > { %2812 = vst [vmem:[%s3508_s30 + $0x160] sm:$0xff] %v2748_v33  ;;  %v2422_v26 = vmul.f32 %v3094_v37, %v2421_v49  ;;  %vm2439_vm8 = vweird.f32 %v1726_v6  ;;  %v1139_v56 = vsel %vm1123_vm4, %v1106_v58, %v1108_v42  ;;  %v325_v21 = vmul.f32 %v3211_v3, %v5838_v55 }
 0x193   : > { %v416_v10 = vsel %vm403_vm0, %v387_v46, %v389_v44  ;;  %v1536_v28 = vsub.f32 0.0, %v5880_v38  ;;  %v1044_v63 = vadd.f32 %v980_v53, %v684_v29  ;;  %v1339_v48 = vmul.f32 %v3261_v18, %v1139_v56  ;;  %v5939_v29 = vld [vmem:[%s3246_s27 + $0x1a0] sm:$0xff] }
 0x194   : > { %v2423_v47 = vadd.f32 %v3094_v37, %v2422_v26  ;;  %v2443_v23 = vand.u32 2147483647, %v1726_v6  ;;  %v2445_v58 = vand.u32 2147483648, %v1726_v6  ;;  %v621_v32 = vmul.f32 %v3225_v8, %v416_v10 }
 0x195   : > { %v749_v17 = vrot.slane %v5838_v55, 6  ;;  %v3098_v41 = vpop.eup %3097  ;;  %v1648_v2 = vmul.f32 1.442695, %v1536_v28  ;;  %v1403_v46 = vadd.f32 %v1339_v48, %v1044_v63  ;;  %v1109_v57 = vrot.slane %v5838_v55, 5 }
 0x196   : > { %v2427_v35 = vsel %vm5885_vm7, %v3094_v37, %v2423_v47  ;;  %v1727_v39 = vadd.f32 1.0, %v3098_v41  ;;  %v390_v37 = vrot.slane %v5906_v59, 7  ;;  %v685_v49 = vadd.f32 %v621_v32, %v325_v21 }
 0x197   : > { %v3100_v0 = vpop.eup %3099  ;;  %v2432_v60 = vsel %vm5874_vm6, %v2431_v14, %v2427_v35  ;;  %v776_v52 = vsel %vm763_vm2, %v747_v45, %v749_v17  ;;  %3101 = vpow2.f32 %v1648_v2  ;;  %vm5923_vm10 = vcmp.eq.f32.partialorder %v2443_v23, 8.507059e+37 }
 0x198   : > { %v2749_v51 = vmul.f32 %v2432_v60, %v5720_v1  ;;  %v2435_v33 = vmul.f32 %v3100_v0, %v1726_v6  ;;  %vm2440_vm9 = vweird.f32 %v3100_v0  ;;  %v2446_v4 = vor.u32 1.1754944e-38, %v2445_v58 }
 0x199   : > { %3103 = vrcp.f32 %v1727_v39  ;;  %v5929_v26 = vadd.f32 %v3263_v19, %v1403_v46  ;;  %v981_v45 = vmul.f32 %v3227_v9, %v776_v52  ;;  %v1136_v1 = vsel %vm1123_vm4, %v1107_v43, %v1109_v57  ;;  %vm5953_vm12 = vmor %vm2439_vm8, %vm2440_vm9 }
 0x19a   : > { %2813 = vst [vmem:[%s3508_s30 + $0x168] sm:$0xff] %v2749_v51  ;;  %v2436_v14 = vsub.f32 1.0, %v2435_v33  ;;  %v2458_v53 = vand.u32 2147483647, %v1727_v39  ;;  %v1340_v54 = vmul.f32 %v3256_v16, %v1136_v1  ;;  %v326_v56 = vmul.f32 %v3232_v11, %v5906_v59 }
 0x19b   : > { %v417_v21 = vsel %vm403_vm0, %v388_v40, %v390_v37  ;;  %vm2454_vm11 = vweird.f32 %v1727_v39  ;;  %v1537_v30 = vsub.f32 0.0, %v5929_v26  ;;  %v1045_v43 = vadd.f32 %v981_v45, %v685_v49 }
 0x19c   : > { %v2437_v10 = vmul.f32 %v3100_v0, %v2436_v14  ;;  %v622_v28 = vmul.f32 %v3237_v12, %v417_v21  ;;  %v750_v63 = vrot.slane %v5906_v59, 6  ;;  %v1110_v48 = vrot.slane %v5906_v59, 5 }
 0x19d   : > { %v391_v23 = vrot.slane %v5939_v29, 7  ;;  %v3102_v40 = vpop.eup %3101  ;;  %v2460_v32 = vand.u32 2147483648, %v1727_v39  ;;  %v1650_v41 = vmul.f32 1.442695, %v1537_v30  ;;  %v1404_v35 = vadd.f32 %v1340_v54, %v1045_v43 }
 0x19e   : > { %v2438_v58 = vadd.f32 %v3100_v0, %v2437_v10  ;;  %vm5961_vm13 = vcmp.eq.f32.partialorder %v2458_v53, 8.507059e+37  ;;  %v1728_v46 = vadd.f32 1.0, %v3102_v40  ;;  %v777_v60 = vsel %vm763_vm2, %v748_v50, %v750_v63 }
 0x19f   : > { %v3104_v2 = vpop.eup %3103  ;;  %v1137_v52 = vsel %vm1123_vm4, %v1108_v42, %v1110_v48  ;;  %3105 = vpow2.f32 %v1650_v41  ;;  %v414_v50 = vsel %vm403_vm0, %v389_v44, %v391_v23  ;;  %v686_v61 = vadd.f32 %v622_v28, %v326_v56 }
 0x1a0   : > { %v2442_v51 = vsel %vm5953_vm12, %v3100_v0, %v2438_v58  ;;  %v2450_v33 = vmul.f32 %v3104_v2, %v1727_v39  ;;  %3107 = vrcp.f32 %v1728_v46  ;;  %v327_v42 = vmul.f32 %v3211_v3, %v5939_v29 }
 0x1a1   : > { %v2447_v49 = vsel %vm5923_vm10, %v2446_v4, %v2442_v51  ;;  %vm2455_vm14 = vweird.f32 %v3104_v2  ;;  %v5991_v45 = vadd.f32 %v3223_v7, %v1404_v35  ;;  %v2461_v1 = vor.u32 1.1754944e-38, %v2460_v32 }
 0x1a2   : > { %v2750_v0 = vmul.f32 %v2447_v49, %v5778_v20  ;;  %v2451_v14 = vsub.f32 1.0, %v2450_v33  ;;  %v982_v53 = vmul.f32 %v3239_v13, %v777_v60  ;;  %v1341_v44 = vmul.f32 %v3261_v18, %v1137_v52  ;;  %v6000_v20 = vld [vmem:[%s3246_s27 + $0x1a8] sm:$0xff]  ;;  %vm6003_vm1 = vmor %vm2454_vm11, %vm2455_vm14 }
 0x1a3   : > { %v623_v62 = vmul.f32 %v3225_v8, %v414_v50  ;;  %vm2469_vm15 = vweird.f32 %v1728_v46  ;;  %v1538_v54 = vsub.f32 0.0, %v5991_v45  ;;  %v751_v56 = vrot.slane %v5939_v29, 6 }
 0x1a4   : > { %2814 = vst [vmem:[%s3508_s30 + $0x170] sm:$0xff] %v2750_v0  ;;  %v2452_v4 = vmul.f32 %v3104_v2, %v2451_v14  ;;  %v2473_v10 = vand.u32 2147483647, %v1728_v46  ;;  %v2475_v30 = vand.u32 2147483648, %v1728_v46  ;;  %v1046_v43 = vadd.f32 %v982_v53, %v686_v61 }
 0x1a5   : > { %v1111_v47 = vrot.slane %v5939_v29, 5  ;;  %v3106_v28 = vpop.eup %3105  ;;  %v1652_v58 = vmul.f32 1.442695, %v1538_v54  ;;  %v687_v32 = vadd.f32 %v623_v62, %v327_v42  ;;  %v774_v39 = vsel %vm763_vm2, %v749_v17, %v751_v56  ;;  %v6051_v62 = vld [vmem:[%s3246_s27 + $0x1b0] sm:$0xff] }
 0x1a6   : > { %v2453_v40 = vadd.f32 %v3104_v2, %v2452_v4  ;;  %v3108_v41 = vpop.eup %3107  ;;  %v6014_v35 = vadd.f32 1.0, %v3106_v28  ;;  %v1405_v60 = vadd.f32 %v1341_v44, %v1046_v43  ;;  %v983_v52 = vmul.f32 %v3227_v9, %v774_v39 }
 0x1a7   : > { %v392_v51 = vrot.slane %v6000_v20, 7  ;;  %v2465_v50 = vmul.f32 %v3108_v41, %v1728_v46  ;;  %3109 = vpow2.f32 %v1652_v58  ;;  %v1134_v17 = vsel %vm1123_vm4, %v1109_v57, %v1111_v47 }
 0x1a8   : > { %v2457_v33 = vsel %vm6003_vm1, %v3104_v2, %v2453_v40  ;;  %vm2470_vm3 = vweird.f32 %v3108_v41  ;;  %vm6028_vm5 = vcmp.eq.f32.partialorder %v2473_v10, 8.507059e+37  ;;  %3111 = vrcp.f32 %v6014_v35 }
 0x1a9   : > { %v2462_v49 = vsel %vm5961_vm13, %v2461_v1, %v2457_v33  ;;  %v2466_v42 = vsub.f32 1.0, %v2465_v50  ;;  %v2488_v0 = vand.u32 2147483647, %v6014_v35  ;;  %v6036_v55 = vadd.f32 %v3263_v19, %v1405_v60  ;;  %vm6055_vm7 = vmor %vm2469_vm15, %vm2470_vm3 }
 0x1aa   : > { %v2751_v2 = vmul.f32 %v2462_v49, %v5834_v34  ;;  %v2476_v57 = vor.u32 1.1754944e-38, %v2475_v30  ;;  %v1047_v14 = vadd.f32 %v983_v52, %v687_v32  ;;  %v1342_v6 = vmul.f32 %v3256_v16, %v1134_v17 }
 0x1ab   : > { %v415_v1 = vsel %vm403_vm0, %v390_v37, %v392_v51  ;;  %v2467_v53 = vmul.f32 %v3108_v41, %v2466_v42  ;;  %vm2484_vm6 = vweird.f32 %v6014_v35  ;;  %v1539_v34 = vsub.f32 0.0, %v6036_v55 }
 0x1ac   : > { %2815 = vst [vmem:[%s3508_s30 + $0x178] sm:$0xff] %v2751_v2  ;;  %v328_v44 = vmul.f32 %v3232_v11, %v6000_v20  ;;  %v1406_v54 = vadd.f32 %v1342_v6, %v1047_v14  ;;  %v624_v37 = vmul.f32 %v3237_v12, %v415_v1  ;;  %v752_v21 = vrot.slane %v6000_v20, 6  ;;  %v6107_v1 = vld [vmem:[%s3246_s27 + $0x1b8] sm:$0xff] }
 0x1ad   : > { %v1112_v10 = vrot.slane %v6000_v20, 5  ;;  %v3110_v30 = vpop.eup %3109  ;;  %v2468_v43 = vadd.f32 %v3108_v41, %v2467_v53  ;;  %vm6062_vm8 = vcmp.eq.f32.partialorder %v2488_v0, 8.507059e+37  ;;  %v2490_v40 = vand.u32 2147483648, %v6014_v35 }
 0x1ae   : > { %v1654_v46 = vmul.f32 1.442695, %v1539_v34  ;;  %v3112_v58 = vpop.eup %3111  ;;  %v6067_v32 = vadd.f32 1.0, %v3110_v30  ;;  %v6070_v39 = vadd.f32 %v3223_v7, %v1406_v54  ;;  %v775_v60 = vsel %vm763_vm2, %v750_v63, %v752_v21 }
 0x1af   : > { %v393_v52 = vrot.slane %v6051_v62, 7  ;;  %v2472_v33 = vsel %vm6055_vm7, %v3108_v41, %v2468_v43  ;;  %v2480_v50 = vmul.f32 %v3112_v58, %v6014_v35  ;;  %v1135_v17 = vsel %vm1123_vm4, %v1110_v48, %v1112_v10 }
 0x1b0   : > { %3113 = vpow2.f32 %v1654_v46  ;;  %v2477_v49 = vsel %vm6028_vm5, %v2476_v57, %v2472_v33  ;;  %v688_v63 = vadd.f32 %v624_v37, %v328_v44  ;;  %v329_v41 = vmul.f32 %v3211_v3, %v6051_v62 }
 0x1b1   : > { %3115 = vrcp.f32 %v6067_v32  ;;  %v2752_v2 = vmul.f32 %v2477_v49, %v5880_v38  ;;  %v2481_v42 = vsub.f32 1.0, %v2480_v50  ;;  %vm2485_vm9 = vweird.f32 %v3112_v58 }
 0x1b2   : > { %v1540_v0 = vsub.f32 0.0, %v6070_v39  ;;  %v2491_v59 = vor.u32 1.1754944e-38, %v2490_v40  ;;  %v984_v14 = vmul.f32 %v3239_v13, %v775_v60  ;;  %v1343_v48 = vmul.f32 %v3261_v18, %v1135_v17  ;;  %vm6111_vm11 = vmor %vm2484_vm6, %vm2485_vm9 }
 0x1b3   : > { %v412_v61 = vsel %vm403_vm0, %v391_v23, %v393_v52  ;;  %2816 = vst [vmem:[%s3508_s30 + $0x180] sm:$0xff] %v2752_v2  ;;  %v2482_v57 = vmul.f32 %v3112_v58, %v2481_v42  ;;  %vm2499_vm10 = vweird.f32 %v6067_v32  ;;  %v2503_v34 = vand.u32 2147483647, %v6067_v32 }
 0x1b4   : > { %v1656_v38 = vmul.f32 1.442695, %v1540_v0  ;;  %v625_v6 = vmul.f32 %v3225_v8, %v412_v61  ;;  %v1048_v44 = vadd.f32 %v984_v14, %v688_v63  ;;  %v753_v23 = vrot.slane %v6051_v62, 6 }
 0x1b5   : > { %v1113_v4 = vrot.slane %v6051_v62, 5  ;;  %v2483_v37 = vadd.f32 %v3112_v58, %v2482_v57  ;;  %v2505_v30 = vand.u32 2147483648, %v6067_v32  ;;  %v394_v33 = vrot.slane %v6107_v1, 7 }
 0x1b6   : > { %v3114_v54 = vpop.eup %3113  ;;  %3117 = vpow2.f32 %v1656_v38  ;;  %v689_v43 = vadd.f32 %v625_v6, %v329_v41  ;;  %v1407_v35 = vadd.f32 %v1343_v48, %v1048_v44  ;;  %v772_v60 = vsel %vm763_vm2, %v751_v56, %v753_v23 }
 0x1b7   : > { %v3116_v40 = vpop.eup %3115  ;;  %v6119_v46 = vadd.f32 1.0, %v3114_v54  ;;  %v2487_v50 = vsel %vm6111_vm11, %v3112_v58, %v2483_v37  ;;  %v985_v49 = vmul.f32 %v3227_v9, %v772_v60  ;;  %v1132_v63 = vsel %vm1123_vm4, %v1111_v47, %v1113_v4 }
 0x1b8   : > { %v2495_v17 = vmul.f32 %v3116_v40, %v6067_v32  ;;  %v2492_v56 = vsel %vm6062_vm8, %v2491_v59, %v2487_v50  ;;  %vm2500_vm12 = vweird.f32 %v3116_v40  ;;  %v330_v58 = vmul.f32 %v3232_v11, %v6107_v1  ;;  %v6178_v32 = vld [vmem:[%s3246_s27 + $0x1c0] sm:$0xff] }
 0x1b9   : > { %3119 = vrcp.f32 %v6119_v46  ;;  %v2753_v41 = vmul.f32 %v2492_v56, %v5929_v26  ;;  %v2518_v42 = vand.u32 2147483647, %v6119_v46  ;;  %v6146_v0 = vadd.f32 %v3263_v19, %v1407_v35  ;;  %vm6166_vm14 = vmor %vm2499_vm10, %vm2500_vm12 }
 0x1ba   : > { %v2496_v2 = vsub.f32 1.0, %v2495_v17  ;;  %v2520_v29 = vand.u32 2147483648, %v6119_v46  ;;  %v1049_v47 = vadd.f32 %v985_v49, %v689_v43  ;;  %v1344_v28 = vmul.f32 %v3256_v16, %v1132_v63 }
 0x1bb   : > { %v413_v59 = vsel %vm403_vm0, %v392_v51, %v394_v33  ;;  %2817 = vst [vmem:[%s3508_s30 + $0x188] sm:$0xff] %v2753_v41  ;;  %vm6157_vm13 = vcmp.eq.f32.partialorder %v2503_v34, 8.507059e+37  ;;  %v1541_v61 = vsub.f32 0.0, %v6146_v0  ;;  %v2506_v51 = vor.u32 1.1754944e-38, %v2505_v30 }
 0x1bc   : > { %v3118_v14 = vpop.eup %3117  ;;  %v2497_v26 = vmul.f32 %v3116_v40, %v2496_v2  ;;  %v626_v57 = vmul.f32 %v3237_v12, %v413_v59  ;;  %vm2514_vm15 = vweird.f32 %v6119_v46  ;;  %v1408_v53 = vadd.f32 %v1344_v28, %v1049_v47 }
 0x1bd   : > { %v1732_v6 = vadd.f32 1.0, %v3118_v14  ;;  %vm6171_vm1 = vcmp.eq.f32.partialorder %v2518_v42, 8.507059e+37  ;;  %v1658_v54 = vmul.f32 1.442695, %v1541_v61  ;;  %v754_v37 = vrot.slane %v6107_v1, 6 }
 0x1be   : > { %v2498_v34 = vadd.f32 %v3116_v40, %v2497_v26  ;;  %v1114_v43 = vrot.slane %v6107_v1, 5  ;;  %v2521_v60 = vor.u32 1.1754944e-38, %v2520_v29  ;;  %v690_v30 = vadd.f32 %v626_v57, %v330_v58  ;;  %v6204_v29 = vld [vmem:[%s3246_s27 + $0x1c8] sm:$0xff] }
 0x1bf   : > { %v3120_v35 = vpop.eup %3119  ;;  %3121 = vrcp.f32 %v1732_v6  ;;  %v331_v50 = vmul.f32 %v3211_v3, %v6178_v32  ;;  %vm2529_vm3 = vweird.f32 %v1732_v6  ;;  %v2533_v56 = vand.u32 2147483647, %v1732_v6 }
 0x1c0   : > { %v2502_v17 = vsel %vm6166_vm14, %v3116_v40, %v2498_v34  ;;  %v2510_v49 = vmul.f32 %v3120_v35, %v6119_v46  ;;  %3123 = vpow2.f32 %v1658_v54  ;;  %vm2515_vm5 = vweird.f32 %v3120_v35 }
 0x1c1   : > { %v2507_v63 = vsel %vm6157_vm13, %v2506_v51, %v2502_v17  ;;  %v6188_v41 = vadd.f32 %v3223_v7, %v1408_v53  ;;  %v773_v40 = vsel %vm763_vm2, %v752_v21, %v754_v37  ;;  %v1133_v42 = vsel %vm1123_vm4, %v1112_v10, %v1114_v43  ;;  %vm6216_vm6 = vmor %vm2514_vm15, %vm2515_vm5 }
 0x1c2   : > { %v2754_v58 = vmul.f32 %v2507_v63, %v5991_v45  ;;  %v2511_v2 = vsub.f32 1.0, %v2510_v49  ;;  %v986_v45 = vmul.f32 %v3239_v13, %v773_v40  ;;  %v1345_v28 = vmul.f32 %v3261_v18, %v1133_v42 }
 0x1c3   : > { %v1542_v47 = vsub.f32 0.0, %v6188_v41  ;;  %v395_v59 = vrot.slane %v6178_v32, 7  ;;  %v2535_v21 = vand.u32 2147483648, %v1732_v6  ;;  %v755_v26 = vrot.slane %v6178_v32, 6 }
 0x1c4   : > { %2818 = vst [vmem:[%s3508_s30 + $0x190] sm:$0xff] %v2754_v58  ;;  %v2512_v14 = vmul.f32 %v3120_v35, %v2511_v2  ;;  %v1115_v20 = vrot.slane %v6178_v32, 5  ;;  %v1050_v57 = vadd.f32 %v986_v45, %v690_v30  ;;  %v396_v51 = vrot.slane %v6204_v29, 7 }
 0x1c5   : > { %v3122_v48 = vpop.eup %3121  ;;  %v1660_v61 = vmul.f32 1.442695, %v1542_v47  ;;  %v410_v38 = vsel %vm403_vm0, %v393_v52, %v395_v59  ;;  %v770_v30 = vsel %vm763_vm2, %v753_v23, %v755_v26  ;;  %vm6241_vm8 = vcmp.eq.f32.partialorder %v2533_v56, 8.507059e+37 }
 0x1c6   : > { %v3124_v53 = vpop.eup %3123  ;;  %v2513_v34 = vadd.f32 %v3120_v35, %v2512_v14  ;;  %v2525_v54 = vmul.f32 %v3122_v48, %v1732_v6  ;;  %vm2530_vm7 = vweird.f32 %v3122_v48  ;;  %v627_v46 = vmul.f32 %v3225_v8, %v410_v38 }
 0x1c7   : > { %v6228_v17 = vadd.f32 1.0, %v3124_v53  ;;  %3125 = vpow2.f32 %v1660_v61  ;;  %v1409_v49 = vadd.f32 %v1345_v28, %v1050_v57  ;;  %v987_v2 = vmul.f32 %v3227_v9, %v770_v30  ;;  %vm6254_vm9 = vmor %vm2529_vm3, %vm2530_vm7 }
 0x1c8   : > { %v2517_v52 = vsel %vm6216_vm6, %v3120_v35, %v2513_v34  ;;  %v2526_v63 = vsub.f32 1.0, %v2525_v54  ;;  %v691_v58 = vadd.f32 %v627_v46, %v331_v50  ;;  %v2536_v47 = vor.u32 1.1754944e-38, %v2535_v21 }
 0x1c9   : > { %v2522_v40 = vsel %vm6171_vm1, %v2521_v60, %v2517_v52  ;;  %3127 = vrcp.f32 %v6228_v17  ;;  %v6248_v35 = vadd.f32 %v3263_v19, %v1409_v49  ;;  %v332_v50 = vmul.f32 %v3232_v11, %v6204_v29 }
 0x1ca   : > { %v2755_v23 = vmul.f32 %v2522_v40, %v6036_v55  ;;  %v2527_v45 = vmul.f32 %v3122_v48, %v2526_v63  ;;  %v2548_v60 = vand.u32 2147483647, %v6228_v17  ;;  %v1051_v56 = vadd.f32 %v987_v2, %v691_v58  ;;  %v6302_v2 = vld [vmem:[%s3246_s27 + $0x1d0] sm:$0xff] }
 0x1cb   : > { %v1130_v55 = vsel %vm1123_vm4, %v1113_v4, %v1115_v20  ;;  %v411_v6 = vsel %vm403_vm0, %v394_v33, %v396_v51  ;;  %vm2544_vm10 = vweird.f32 %v6228_v17  ;;  %v1543_v14 = vsub.f32 0.0, %v6248_v35 }
 0x1cc   : > { %2819 = vst [vmem:[%s3508_s30 + $0x198] sm:$0xff] %v2755_v23  ;;  %v2528_v28 = vadd.f32 %v3122_v48, %v2527_v45  ;;  %v1346_v21 = vmul.f32 %v3256_v16, %v1130_v55  ;;  %v2550_v62 = vand.u32 2147483648, %v6228_v17  ;;  %v628_v4 = vmul.f32 %v3237_v12, %v411_v6 }
 0x1cd   : > { %v3126_v10 = vpop.eup %3125  ;;  %v756_v61 = vrot.slane %v6204_v29, 6  ;;  %v1116_v57 = vrot.slane %v6204_v29, 5  ;;  %v1662_v53 = vmul.f32 1.442695, %v1543_v14  ;;  %vm6283_vm11 = vcmp.eq.f32.partialorder %v2548_v60, 8.507059e+37 }
 0x1ce   : > { %v2532_v33 = vsel %vm6254_vm9, %v3122_v48, %v2528_v28  ;;  %v1734_v38 = vadd.f32 1.0, %v3126_v10  ;;  %v1410_v34 = vadd.f32 %v1346_v21, %v1051_v56  ;;  %v692_v58 = vadd.f32 %v628_v4, %v332_v50 }
 0x1cf   : > { %v3128_v54 = vpop.eup %3127  ;;  %v2537_v46 = vsel %vm6241_vm8, %v2536_v47, %v2532_v33  ;;  %v771_v30 = vsel %vm763_vm2, %v754_v37, %v756_v61  ;;  %v1131_v48 = vsel %vm1123_vm4, %v1114_v43, %v1116_v57  ;;  %v2551_v40 = vor.u32 1.1754944e-38, %v2550_v62  ;;  %v6313_v47 = vld [vmem:[%s3246_s27 + $0x1d8] sm:$0xff] }
 0x1d0   : > { %v2756_v52 = vmul.f32 %v2537_v46, %v6070_v39  ;;  %v2540_v63 = vmul.f32 %v3128_v54, %v6228_v17  ;;  %3129 = vrcp.f32 %v1734_v38  ;;  %vm2545_vm12 = vweird.f32 %v3128_v54 }
 0x1d1   : > { %3131 = vpow2.f32 %v1662_v53  ;;  %v333_v37 = vmul.f32 %v3211_v3, %v6302_v2  ;;  %v6308_v42 = vadd.f32 %v3223_v7, %v1410_v34  ;;  %v988_v43 = vmul.f32 %v3239_v13, %v771_v30  ;;  %vm6322_vm14 = vmor %vm2544_vm10, %vm2545_vm12 }
 0x1d2   : > { %2820 = vst [vmem:[%s3508_s30 + $0x1a0] sm:$0xff] %v2756_v52  ;;  %v2541_v1 = vsub.f32 1.0, %v2540_v63  ;;  %v1347_v39 = vmul.f32 %v3261_v18, %v1131_v48  ;;  %vm2559_vm13 = vweird.f32 %v1734_v38  ;;  %v2563_v23 = vand.u32 2147483647, %v1734_v38 }
 0x1d3   : > { %v397_v45 = vrot.slane %v6302_v2, 7  ;;  %v757_v50 = vrot.slane %v6302_v2, 6  ;;  %v1544_v60 = vsub.f32 0.0, %v6308_v42  ;;  %v1052_v56 = vadd.f32 %v988_v43, %v692_v58 }
 0x1d4   : > { %v2542_v44 = vmul.f32 %v3128_v54, %v2541_v1  ;;  %v1117_v55 = vrot.slane %v6302_v2, 5  ;;  %v2565_v28 = vand.u32 2147483648, %v1734_v38  ;;  %v398_v17 = vrot.slane %v6313_v47, 7 }
 0x1d5   : > { %v408_v14 = vsel %vm403_vm0, %v395_v59, %v397_v45  ;;  %v768_v21 = vsel %vm763_vm2, %v755_v26, %v757_v50  ;;  %v1664_v4 = vmul.f32 1.442695, %v1544_v60  ;;  %v1411_v33 = vadd.f32 %v1347_v39, %v1052_v56 }
 0x1d6   : > { %v3130_v10 = vpop.eup %3129  ;;  %v2543_v62 = vadd.f32 %v3128_v54, %v2542_v44  ;;  %v629_v53 = vmul.f32 %v3225_v8, %v408_v14  ;;  %v989_v59 = vmul.f32 %v3227_v9, %v768_v21  ;;  %v1128_v26 = vsel %vm1123_vm4, %v1115_v20, %v1117_v55 }
 0x1d7   : > { %v3132_v34 = vpop.eup %3131  ;;  %v2555_v46 = vmul.f32 %v3130_v10, %v1734_v38  ;;  %vm2560_vm15 = vweird.f32 %v3130_v10  ;;  %3133 = vpow2.f32 %v1664_v4  ;;  %v6350_v52 = vadd.f32 %v3263_v19, %v1411_v33 }
 0x1d8   : > { %v2547_v30 = vsel %vm6322_vm14, %v3128_v54, %v2543_v62  ;;  %v1735_v48 = vadd.f32 1.0, %v3132_v34  ;;  %v693_v1 = vadd.f32 %v629_v53, %v333_v37  ;;  %v1348_v43 = vmul.f32 %v3256_v16, %v1128_v26  ;;  %vm6364_vm3 = vmor %vm2559_vm13, %vm2560_vm15  ;;  %v6402_v26 = vld [vmem:[%s3246_s27 + $0x1e0] sm:$0xff] }
 0x1d9   : > { %v2552_v63 = vsel %vm6283_vm11, %v2551_v40, %v2547_v30  ;;  %v2556_v58 = vsub.f32 1.0, %v2555_v46  ;;  %vm6356_vm1 = vcmp.eq.f32.partialorder %v2563_v23, 8.507059e+37  ;;  %v2566_v39 = vor.u32 1.1754944e-38, %v2565_v28 }
 0x1da   : > { %v2757_v32 = vmul.f32 %v2552_v63, %v6146_v0  ;;  %3135 = vrcp.f32 %v1735_v48  ;;  %v1545_v44 = vsub.f32 0.0, %v6350_v52  ;;  %v1053_v60 = vadd.f32 %v989_v59, %v693_v1 }
 0x1db   : > { %v2557_v54 = vmul.f32 %v3130_v10, %v2556_v58  ;;  %v334_v0 = vmul.f32 %v3232_v11, %v6313_v47  ;;  %v409_v40 = vsel %vm403_vm0, %v396_v51, %v398_v17  ;;  %v758_v37 = vrot.slane %v6313_v47, 6 }
 0x1dc   : > { %2821 = vst [vmem:[%s3508_s30 + $0x1a8] sm:$0xff] %v2757_v32  ;;  %v1118_v23 = vrot.slane %v6313_v47, 5  ;;  %v2578_v38 = vand.u32 2147483647, %v1735_v48  ;;  %v1666_v6 = vmul.f32 1.442695, %v1545_v44  ;;  %v1412_v28 = vadd.f32 %v1348_v43, %v1053_v60 }
 0x1dd   : > { %v2558_v56 = vadd.f32 %v3130_v10, %v2557_v54  ;;  %v3134_v14 = vpop.eup %3133  ;;  %v2580_v21 = vand.u32 2147483648, %v1735_v48  ;;  %v630_v62 = vmul.f32 %v3237_v12, %v409_v40  ;;  %v769_v51 = vsel %vm763_vm2, %v756_v61, %v758_v37 }
 0x1de   : > { %v1129_v4 = vsel %vm1123_vm4, %v1116_v57, %v1118_v23  ;;  %v6393_v53 = vadd.f32 1.0, %v3134_v14  ;;  %3137 = vpow2.f32 %v1666_v6  ;;  %v6396_v34 = vadd.f32 %v3223_v7, %v1412_v28 }
 0x1df   : > { %v2562_v33 = vsel %vm6364_vm3, %v3130_v10, %v2558_v56  ;;  %vm2574_vm5 = vweird.f32 %v1735_v48  ;;  %v694_v59 = vadd.f32 %v630_v62, %v334_v0  ;;  %v990_v29 = vmul.f32 %v3239_v13, %v769_v51 }
 0x1e0   : > { %v3136_v46 = vpop.eup %3135  ;;  %v2567_v61 = vsel %vm6356_vm1, %v2566_v39, %v2562_v33  ;;  %3139 = vrcp.f32 %v6393_v53  ;;  %v1349_v30 = vmul.f32 %v3261_v18, %v1129_v4  ;;  %vm6407_vm7 = vcmp.eq.f32.partialorder %v2578_v38, 8.507059e+37 }
 0x1e1   : > { %v2758_v57 = vmul.f32 %v2567_v61, %v6188_v41  ;;  %v2570_v10 = vmul.f32 %v3136_v46, %v1735_v48  ;;  %vm2575_vm6 = vweird.f32 %v3136_v46  ;;  %v2581_v58 = vor.u32 1.1754944e-38, %v2580_v21 }
 0x1e2   : > { %v1546_v1 = vsub.f32 0.0, %v6396_v34  ;;  %v1054_v32 = vadd.f32 %v990_v29, %v694_v59  ;;  %v399_v20 = vrot.slane %v6402_v26, 7  ;;  %v759_v41 = vrot.slane %v6402_v26, 6  ;;  %vm6432_vm8 = vmor %vm2574_vm5, %vm2575_vm6  ;;  %v6462_v29 = vld [vmem:[%s3246_s27 + $0x1e8] sm:$0xff] }
 0x1e3   : > { %2822 = vst [vmem:[%s3508_s30 + $0x1b0] sm:$0xff] %v2758_v57  ;;  %v2571_v43 = vsub.f32 1.0, %v2570_v10  ;;  %v2593_v54 = vand.u32 2147483647, %v6393_v53  ;;  %v2595_v39 = vand.u32 2147483648, %v6393_v53  ;;  %v1119_v60 = vrot.slane %v6402_v26, 5 }
 0x1e4   : > { %v1668_v44 = vmul.f32 1.442695, %v1546_v1  ;;  %v3138_v49 = vpop.eup %3137  ;;  %v1413_v40 = vadd.f32 %v1349_v30, %v1054_v32  ;;  %v406_v56 = vsel %vm403_vm0, %v397_v45, %v399_v20  ;;  %v766_v38 = vsel %vm763_vm2, %v757_v50, %v759_v41 }
 0x1e5   : > { %v2572_v0 = vmul.f32 %v3136_v46, %v2571_v43  ;;  %v6436_v28 = vadd.f32 1.0, %v3138_v49  ;;  %v335_v45 = vmul.f32 %v3211_v3, %v6402_v26  ;;  %v631_v14 = vmul.f32 %v3225_v8, %v406_v56 }
 0x1e6   : > { %3141 = vpow2.f32 %v1668_v44  ;;  %v3140_v21 = vpop.eup %3139  ;;  %vm2589_vm9 = vweird.f32 %v6393_v53  ;;  %v6443_v50 = vadd.f32 %v3263_v19, %v1413_v40  ;;  %v1126_v48 = vsel %vm1123_vm4, %v1117_v55, %v1119_v60 }
 0x1e7   : > { %v2573_v62 = vadd.f32 %v3136_v46, %v2572_v0  ;;  %v2585_v51 = vmul.f32 %v3140_v21, %v6393_v53  ;;  %vm6452_vm10 = vcmp.eq.f32.partialorder %v2593_v54, 8.507059e+37  ;;  %3143 = vrcp.f32 %v6436_v28 }
 0x1e8   : > { %v991_v33 = vmul.f32 %v3227_v9, %v766_v38  ;;  %vm2590_vm11 = vweird.f32 %v3140_v21  ;;  %v2596_v59 = vor.u32 1.1754944e-38, %v2595_v39  ;;  %v1547_v2 = vsub.f32 0.0, %v6443_v50 }
 0x1e9   : > { %v2577_v61 = vsel %vm6432_vm8, %v3136_v46, %v2573_v62  ;;  %v2586_v57 = vsub.f32 1.0, %v2585_v51  ;;  %v695_v10 = vadd.f32 %v631_v14, %v335_v45  ;;  %v1350_v30 = vmul.f32 %v3256_v16, %v1126_v48  ;;  %vm6476_vm12 = vmor %vm2589_vm9, %vm2590_vm11 }
 0x1ea   : > { %v2582_v55 = vsel %vm6407_vm7, %v2581_v58, %v2577_v61  ;;  %v2608_v43 = vand.u32 2147483647, %v6436_v28  ;;  %v2610_v46 = vand.u32 2147483648, %v6436_v28  ;;  %v1670_v32 = vmul.f32 1.442695, %v1547_v2 }
 0x1eb   : > { %v2759_v1 = vmul.f32 %v2582_v55, %v6248_v35  ;;  %v2587_v39 = vmul.f32 %v3140_v21, %v2586_v57  ;;  %v1055_v44 = vadd.f32 %v991_v33, %v695_v10  ;;  %v400_v49 = vrot.slane %v6462_v29, 7  ;;  %v3167_v10 = vld [vmem:[%s3246_s27 + $0x1f0] sm:$0xff] }
 0x1ec   : > { %v3142_v54 = vpop.eup %3141  ;;  %v760_v0 = vrot.slane %v6462_v29, 6  ;;  %vm2604_vm13 = vweird.f32 %v6436_v28  ;;  %3145 = vpow2.f32 %v1670_v32  ;;  %v336_v58 = vmul.f32 %v3232_v11, %v6462_v29 }
 0x1ed   : > { %2823 = vst [vmem:[%s3508_s30 + $0x1b8] sm:$0xff] %v2759_v1  ;;  %v6481_v35 = vadd.f32 1.0, %v3142_v54  ;;  %v3144_v40 = vpop.eup %3143  ;;  %v2588_v56 = vadd.f32 %v3140_v21, %v2587_v39  ;;  %v1414_v38 = vadd.f32 %v1350_v30, %v1055_v44  ;;  %v407_v53 = vsel %vm403_vm0, %v398_v17, %v400_v49 }
 0x1ee   : > { %v767_v6 = vsel %vm763_vm2, %v758_v37, %v760_v0  ;;  %v2600_v45 = vmul.f32 %v3144_v40, %v6436_v28  ;;  %vm6498_vm14 = vcmp.eq.f32.partialorder %v2608_v43, 8.507059e+37  ;;  %v1120_v62 = vrot.slane %v6462_v29, 5 }
 0x1ef   : > { %3147 = vrcp.f32 %v6481_v35  ;;  %v2592_v17 = vsel %vm6476_vm12, %v3140_v21, %v2588_v56  ;;  %vm2605_vm15 = vweird.f32 %v3144_v40  ;;  %v2611_v48 = vor.u32 1.1754944e-38, %v2610_v46 }
 0x1f0   : > { %v6507_v51 = vadd.f32 %v3223_v7, %v1414_v38  ;;  %v2597_v37 = vsel %vm6452_vm10, %v2596_v59, %v2592_v17  ;;  %v2601_v33 = vsub.f32 1.0, %v2600_v45  ;;  %v632_v61 = vmul.f32 %v3237_v12, %v407_v53  ;;  %vm6534_vm1 = vmor %vm2604_vm13, %vm2605_vm15 }
 0x1f1   : > { %v992_v2 = vmul.f32 %v3239_v13, %v767_v6  ;;  %v2760_v55 = vmul.f32 %v2597_v37, %v6308_v42  ;;  %v2623_v57 = vand.u32 2147483647, %v6481_v35  ;;  %v337_v30 = vmul.f32 %v3167_v10, %v3211_v3 }
 0x1f2   : > { %v1548_v21 = vsub.f32 0.0, %v6507_v51  ;;  %v3146_v1 = vpop.eup %3145  ;;  %v2602_v43 = vmul.f32 %v3144_v40, %v2601_v33  ;;  %v696_v46 = vadd.f32 %v632_v61, %v336_v58  ;;  %v1127_v4 = vsel %vm1123_vm4, %v1118_v23, %v1120_v62 }
 0x1f3   : > { %v404_v42 = vsel %vm403_vm0, %v399_v20, %v401_v22  ;;  %2824 = vst [vmem:[%s3508_s30 + $0x1c0] sm:$0xff] %v2760_v55  ;;  %v6538_v59 = vadd.f32 1.0, %v3146_v1  ;;  %v1351_v23 = vmul.f32 %v3261_v18, %v1127_v4  ;;  %vm2619_vm3 = vweird.f32 %v6481_v35 }
 0x1f4   : > { %v1672_v47 = vmul.f32 1.442695, %v1548_v21  ;;  %v633_v32 = vmul.f32 %v3225_v8, %v404_v42  ;;  %v2603_v39 = vadd.f32 %v3144_v40, %v2602_v43  ;;  %v2625_v22 = vand.u32 2147483648, %v6481_v35 }
 0x1f5   : > { %v3148_v54 = vpop.eup %3147  ;;  %v1056_v20 = vadd.f32 %v992_v2, %v696_v46  ;;  %vm6545_vm5 = vcmp.eq.f32.partialorder %v2623_v57, 8.507059e+37  ;;  %3149 = vrcp.f32 %v6538_v59  ;;  %v764_v8 = vsel %vm763_vm2, %v759_v41, %v761_v25 }
 0x1f6   : > { %v2615_v28 = vmul.f32 %v3148_v54, %v6481_v35  ;;  %v2607_v63 = vsel %vm6534_vm1, %v3144_v40, %v2603_v39  ;;  %vm2620_vm6 = vweird.f32 %v3148_v54  ;;  %3151 = vpow2.f32 %v1672_v47 }
 0x1f7   : > { %v1124_v58 = vsel %vm1123_vm4, %v1119_v60, %v1121_v27  ;;  %v2612_v56 = vsel %vm6498_vm14, %v2611_v48, %v2607_v63  ;;  %v1415_v53 = vadd.f32 %v1351_v23, %v1056_v20  ;;  %v697_v25 = vadd.f32 %v633_v32, %v337_v30  ;;  %v3168_v27 = vld [vmem:[%s3246_s27 + $0x1f8] sm:$0xff]  ;;  %vm6579_vm8 = vmor %vm2619_vm3, %vm2620_vm6 }
 0x1f8   : > { %v2616_v38 = vsub.f32 1.0, %v2615_v28  ;;  %v2761_v41 = vmul.f32 %v2612_v56, %v6350_v52  ;;  %v2626_v6 = vor.u32 1.1754944e-38, %v2625_v22  ;;  %vm2634_vm7 = vweird.f32 %v6538_v59 }
 0x1f9   : > { %v993_v40 = vmul.f32 %v3227_v9, %v764_v8  ;;  %v6570_v15 = vadd.f32 %v3263_v19, %v1415_v53  ;;  %v1352_v26 = vmul.f32 %v3256_v16, %v1124_v58  ;;  %v338_v60 = vmul.f32 %v3168_v27, %v3232_v11 }
 0x1fa   : > { %v2617_v45 = vmul.f32 %v3148_v54, %v2616_v38  ;;  %2825 = vst [vmem:[%s3508_s30 + $0x1c8] sm:$0xff] %v2761_v41  ;;  %v2638_v14 = vand.u32 2147483647, %v6538_v59  ;;  %v405_v16 = vsel %vm403_vm0, %v400_v49, %v402_v31  ;;  %v765_v11 = vsel %vm763_vm2, %v760_v0, %v762_v36 }
 0x1fb   : > { %v1057_v9 = vadd.f32 %v993_v40, %v697_v25  ;;  %v3150_v35 = vpop.eup %3149  ;;  %v2640_v48 = vand.u32 2147483648, %v6538_v59  ;;  %v1549_v37 = vsub.f32 0.0, %v6570_v15  ;;  %v634_v33 = vmul.f32 %v3237_v12, %v405_v16 }
 0x1fc   : > { %v2618_v17 = vadd.f32 %v3148_v54, %v2617_v45  ;;  %v3152_v61 = vpop.eup %3151  ;;  %v2630_v2 = vmul.f32 %v3150_v35, %v6538_v59  ;;  %v994_v31 = vmul.f32 %v3239_v13, %v765_v11  ;;  %v6876_v49 = vrot.slane %v3268_v24, 5 }
 0x1fd   : > { %v1416_v55 = vadd.f32 %v1352_v26, %v1057_v9  ;;  %v1740_v57 = vadd.f32 1.0, %v3152_v61  ;;  %v1674_v21 = vmul.f32 1.442695, %v1549_v37  ;;  %v698_v12 = vadd.f32 %v634_v33, %v338_v60 }
 0x1fe   : > { %v1125_v36 = vsel %vm1123_vm4, %v1120_v62, %v6876_v49  ;;  %v2622_v0 = vsel %vm6579_vm8, %v3148_v54, %v2618_v17  ;;  %v2631_v30 = vsub.f32 1.0, %v2630_v2  ;;  %vm2635_vm0 = vweird.f32 %v3150_v35 }
 0x1ff   : > { %v2627_v10 = vsel %vm6545_vm5, %v2626_v6, %v2622_v0  ;;  %v6612_v13 = vadd.f32 %v3223_v7, %v1416_v55  ;;  %3153 = vrcp.f32 %v1740_v57  ;;  %v1353_v5 = vmul.f32 %v3261_v18, %v1125_v36  ;;  %vm2636_vm2 = vmor %vm2634_vm7, %vm2635_vm0 }
 0x200   : > { %v2762_v24 = vmul.f32 %v2627_v10, %v6396_v34  ;;  %v2632_v29 = vmul.f32 %v3150_v35, %v2631_v30  ;;  %3155 = vpow2.f32 %v1674_v21  ;;  %v2641_v1 = vor.u32 1.1754944e-38, %v2640_v48 }
 0x201   : > { %v1550_v62 = vsub.f32 0.0, %v6612_v13  ;;  %v1058_v43 = vadd.f32 %v994_v31, %v698_v12  ;;  %vm2639_vm4 = vcmp.eq.f32.partialorder %v2638_v14, 8.507059e+37  ;;  %v2655_v59 = vand.u32 2147483648, %v1740_v57 }
 0x202   : > { %2826 = vst [vmem:[%s3508_s30 + $0x1d0] sm:$0xff] %v2762_v24  ;;  %v2633_v46 = vadd.f32 %v3150_v35, %v2632_v29  ;;  %vm2649_vm9 = vweird.f32 %v1740_v57  ;;  %v2653_v20 = vand.u32 2147483647, %v1740_v57 }
 0x203   : > { %v1676_v7 = vmul.f32 1.442695, %v1550_v62  ;;  %v1417_v4 = vadd.f32 %v1353_v5, %v1058_v43 }
 0x204   : > { %v2637_v42 = vsel %vm2636_vm2, %v3150_v35, %v2633_v46  ;;  %vm2654_vm12 = vcmp.eq.f32.partialorder %v2653_v20, 8.507059e+37 }
 0x205   : > { %3157 = vpow2.f32 %v1676_v7  ;;  %v3154_v34 = vpop.eup %3153  ;;  %v2642_v3 = vsel %vm2639_vm4, %v2641_v1, %v2637_v42  ;;  %v6621_v18 = vadd.f32 %v3263_v19, %v1417_v4  ;;  %v2656_v19 = vor.u32 1.1754944e-38, %v2655_v59 }
 0x206   : > { %v3156_v47 = vpop.eup %3155  ;;  %v2763_v23 = vmul.f32 %v2642_v3, %v6443_v50  ;;  %v2645_v32 = vmul.f32 %v3154_v34, %v1740_v57  ;;  %vm2650_vm10 = vweird.f32 %v3154_v34 }
 0x207   : > { %v1741_v54 = vadd.f32 1.0, %v3156_v47  ;;  %v1551_v39 = vsub.f32 0.0, %v6621_v18  ;;  %vm2651_vm11 = vmor %vm2649_vm9, %vm2650_vm10 }
 0x208   : > { %2827 = vst [vmem:[%s3508_s30 + $0x1d8] sm:$0xff] %v2763_v23  ;;  %v2646_v22 = vsub.f32 1.0, %v2645_v32 }
 0x209   : > { %3159 = vrcp.f32 %v1741_v54  ;;  %v1678_v8 = vmul.f32 1.442695, %v1551_v39  ;;  %v2668_v41 = vand.u32 2147483647, %v1741_v54  ;;  %v2670_v6 = vand.u32 2147483648, %v1741_v54 }
 0x20a   : > { %v2647_v44 = vmul.f32 %v3154_v34, %v2646_v22  ;;  %vm2664_vm13 = vweird.f32 %v1741_v54 }
 0x20b   : > { %v3158_v28 = vpop.eup %3157  ;;  %3161 = vpow2.f32 %v1678_v8  ;;  %vm2669_vm15 = vcmp.eq.f32.partialorder %v2668_v41, 8.507059e+37  ;;  %v2671_v14 = vor.u32 1.1754944e-38, %v2670_v6 }
 0x20c   : > { %v1742_v63 = vadd.f32 1.0, %v3158_v28  ;;  %v2648_v58 = vadd.f32 %v3154_v34, %v2647_v44 }
 0x20e   : > { %3163 = vrcp.f32 %v1742_v63  ;;  %v2652_v50 = vsel %vm2651_vm11, %v3154_v34, %v2648_v58  ;;  %vm2679_vm3 = vweird.f32 %v1742_v63  ;;  %v2685_v9 = vand.u32 2147483648, %v1742_v63 }
 0x20f   : > { %v3160_v56 = vpop.eup %3159  ;;  %v2657_v38 = vsel %vm2654_vm12, %v2656_v19, %v2652_v50  ;;  %v2683_v11 = vand.u32 2147483647, %v1742_v63 }
 0x210   : > { %v2764_v53 = vmul.f32 %v2657_v38, %v6507_v51  ;;  %v2660_v25 = vmul.f32 %v3160_v56, %v1741_v54  ;;  %vm2665_vm14 = vweird.f32 %v3160_v56  ;;  %v2686_v37 = vor.u32 1.1754944e-38, %v2685_v9 }
 0x211   : > { %v3162_v40 = vpop.eup %3161  ;;  %vm2666_vm1 = vmor %vm2664_vm13, %vm2665_vm14  ;;  %vm2684_vm7 = vcmp.eq.f32.partialorder %v2683_v11, 8.507059e+37 }
 0x212   : > { %2828 = vst [vmem:[%s3508_s30 + $0x1e0] sm:$0xff] %v2764_v53  ;;  %v2661_v45 = vsub.f32 1.0, %v2660_v25  ;;  %v1743_v27 = vadd.f32 1.0, %v3162_v40 }
 0x214   : > { %v3164_v26 = vpop.eup %3163  ;;  %v2662_v60 = vmul.f32 %v3160_v56, %v2661_v45  ;;  %3165 = vrcp.f32 %v1743_v27  ;;  %vm2694_vm8 = vweird.f32 %v1743_v27  ;;  %v2700_v36 = vand.u32 2147483648, %v1743_v27 }
 0x215   : > { %v2675_v52 = vmul.f32 %v3164_v26, %v1742_v63  ;;  %vm2680_vm5 = vweird.f32 %v3164_v26  ;;  %v2698_v21 = vand.u32 2147483647, %v1743_v27 }
 0x216   : > { %v2663_v51 = vadd.f32 %v3160_v56, %v2662_v60  ;;  %vm2681_vm6 = vmor %vm2679_vm3, %vm2680_vm5  ;;  %v2701_v10 = vor.u32 1.1754944e-38, %v2700_v36 }
 0x217   : > { %v2676_v16 = vsub.f32 1.0, %v2675_v52  ;;  %vm2699_vm4 = vcmp.eq.f32.partialorder %v2698_v21, 8.507059e+37 }
 0x218   : > { %v2667_v35 = vsel %vm2666_vm1, %v3160_v56, %v2663_v51 }
 0x219   : > { %v2677_v17 = vmul.f32 %v3164_v26, %v2676_v16  ;;  %v2672_v48 = vsel %vm2669_vm15, %v2671_v14, %v2667_v35 }
 0x21a   : > { %v2765_v33 = vmul.f32 %v2672_v48, %v6570_v15  ;;  %v3166_v2 = vpop.eup %3165 }
 0x21b   : > { %v2678_v61 = vadd.f32 %v3164_v26, %v2677_v17  ;;  %v2690_v31 = vmul.f32 %v3166_v2, %v1743_v27  ;;  %vm2695_vm0 = vweird.f32 %v3166_v2 }
 0x21c   : > { %2829 = vst [vmem:[%s3508_s30 + $0x1e8] sm:$0xff] %v2765_v33  ;;  %vm2696_vm2 = vmor %vm2694_vm8, %vm2695_vm0 }
 0x21d   : > { %v2682_v55 = vsel %vm2681_vm6, %v3164_v26, %v2678_v61  ;;  %v2691_v57 = vsub.f32 1.0, %v2690_v31 }
 0x21e   : > { %v2687_v49 = vsel %vm2684_vm7, %v2686_v37, %v2682_v55 }
 0x21f   : > { %v2766_v0 = vmul.f32 %v2687_v49, %v6612_v13  ;;  %v2692_v12 = vmul.f32 %v3166_v2, %v2691_v57 }
 0x221   : > { %2830 = vst [vmem:[%s3508_s30 + $0x1f0] sm:$0xff] %v2766_v0  ;;  %v2693_v15 = vadd.f32 %v3166_v2, %v2692_v12 }
 0x223   : > { %v2697_v30 = vsel %vm2696_vm2, %v3166_v2, %v2693_v15 }
 0x224   : > { %v2702_v24 = vsel %vm2699_vm4, %v2701_v10, %v2697_v30 }
 0x225   : > { %v2767_v5 = vmul.f32 %v2702_v24, %v6621_v18 }
 0x227   : > { %2831 = vst [vmem:[%s3508_s30 + $0x1f8] sm:$0xff] %v2767_v5 }
 0x228 PF: > { %s13_s12 = sadd.s32 1, %s3175_s12  }
 0x229   : > { %p10_p4 = scmp.ge.s32.totalorder %s13_s12, 4  }
 0x22b   :  { %12 = sbr.rel (!%p10_p4) target bundleno = 1 (0x1), region = 65 }

// kernel: block1d_apply.10
= control target key start
LH: loop header
LB: loop body
LE: loop exit
PB: predicated region body
PF: predicated region fallthrough
CT: control target
= control target key end

     0   :  { %s2904_s13 = smov 0   ;;  %s2906_s14 = smov 0   ;;  %s4256_s0 = inlined_call_operand.vmem [shape: f32[2,256,256], index: 0, kind: input, shape index: {}]   ;;  %s4257_s1 = inlined_call_operand.vmem [shape: f32[2,256,256], index: 1, kind: input, shape index: {}]   ;;  %s4258_s2 = inlined_call_operand.vmem [shape: bf16[256,8], index: 2, kind: input, shape index: {}]   ;;  %s4259_s3 = inlined_call_operand.vmem [shape: bf16[16,256], index: 3, kind: input, shape index: {}]   ;;  %s4260_s4 = inlined_call_operand.vmem [shape: bf16[16,256], index: 4, kind: input, shape index: {}]   ;;  %s4261_s5 = inlined_call_operand.vmem [shape: bf16[8,256], index: 5, kind: input, shape index: {}]   ;;  %s4262_s6 = inlined_call_operand.vmem [shape: f32[1,256], index: 6, kind: input, shape index: {}]   ;;  %s4263_s7 = inlined_call_operand.vmem [shape: f32[16,256], index: 7, kind: input, shape index: {}]   ;;  %s4264_s8 = inlined_call_operand.vmem [shape: f32[1,256], index: 8, kind: input, shape index: {}]   ;;  %s4265_s9 = inlined_call_operand.vmem [shape: bf16[256,128], index: 9, kind: input, shape index: {}]   ;;  %s4266_s10 = inlined_call_operand.vmem [shape: f32[2,256,128], index: 10, kind: output, shape index: {}]  }
   0x1   :  { %s2908_s15 = smov 0   ;;  %s2910_s16 = smov 0  }
   0x2   :  { %s2912_s17 = smov 0  }
   0x3 LB: > { %4349 = sst [smem:[#allocation4_spill]] %s2822_s15  ;;  %s29_s18 = sadd.s32 1, %s2822_s15  ;;  %s2830_s17 = sphi %s2912_s17, %s20_s17   ;;  %s2826_s16 = sphi %s2910_s16, %s4506_s16   ;;  %s2822_s15 = sphi %s2908_s15, %s4505_s15   ;;  %s2818_s14 = sphi %s2906_s14, %s4504_s14   ;;  %s2814_s13 = sphi %s2904_s13, %s4503_s13  }
   0x4   : > { %4350 = sst [smem:[#allocation5_spill]] %s2826_s16  ;;  %s32_s19 = sadd.s32 1, %s2826_s16 }
   0x5   : > { %p30_p0 = scmp.ge.s32.totalorder %s29_s18, 16  ;;  %p2308_p1 = scmp.ge.s32.totalorder %s2830_s17, 1 }
   0x6   : > { %p352_p2 = scmp.lt.s32.totalorder %s2830_s17, 33 }
   0x7   : > { %s4508_s18 = smov (%p30_p0, %s29_s18), 0  ;;  %s4510_s19 = smov (!%p30_p0, %s32_s19), %s2826_s16 }
   0x8   : > { %4351 = sst [smem:[#allocation6_spill]] %s4508_s18  ;;  %p353_p3 = pnand %p2308_p1, %p352_p2 }
   0x9   : > { %p34_p4 = scmp.ge.s32.totalorder %s4510_s19, 2 }
   0xa   : > { %356 = sbr.rel (%p353_p3) target bundleno = 870 (0x366), region = 60 }
   0xb   : > { %s4512_s19 = smov (%p34_p4, %s4510_s19), 0 }
   0xc   : > { %4352 = sst [smem:[#allocation7_spill]] %s4512_s19 }
   0xf   : > { %s2309_s20 = sshll.u32 %s2814_s13, 1  ;;  %p410_p5 = scmp.lt.s32.totalorder %s2818_s14, 1 }
  0x10   : > { %p412_p6 = scmp.lt.s32.totalorder %s2309_s20, 31  ;;  %p2320_p7 = scmp.ne.s32.totalorder %s2814_s13, 0 }
  0x11   : > { %s4514_s14 = smov (!%p410_p5, %s2818_s14), 1 }
  0x12   : > { %s4516_s20 = smov (!%p412_p6, %s2309_s20), 31  ;;  %s2311_s21 = sshll.u32 %s4514_s14, 6 }
  0x13   : > { %s2318_s22 = sshll.u32 %s4514_s14, 5  ;;  %s2310_s23 = sshll.u32 %s4516_s20, 1 }
  0x14   : > { %s437_s24 = sadd.s32 %s2318_s22, %s4516_s20  ;;  %s416_s25 = sadd.s32 %s2311_s21, %s2310_s23 }
  0x15   : > { %s2319_s26 = sshll.u32 %s437_s24, 3  ;;  %s2312_s27 = sshll.u32 %s416_s25, 3 }
  0x16   : > { %s2940_s30 = scalar_lea.vmem %s4266_s10, %s2319_s26  ;;  %s2945_s19 = scalar_lea.vmem %s4256_s0, %s2312_s27 }
  0x17   : > { %s2950_s15 = scalar_lea.vmem %s4257_s1, %s2312_s27  ;;  %445 = sbr.rel (%p2320_p7) target bundleno = 33 (0x21), region = 64 }
  0x1c   : > { %v2832_v0 = vmov 0.0  }
  0x1d   : > { %446 = vst [vmem:[#allocation2 + $0x10] sm:$0xff] %v2832_v0 }
  0x1e   : > { %447 = vst [vmem:[#allocation2] sm:$0xff] %v2832_v0 }
  0x1f   : > { %448 = vst [vmem:[#allocation2 + $0x18] sm:$0xff] %v2832_v0 }
  0x20   : > { %449 = vst [vmem:[#allocation2 + $0x8] sm:$0xff] %v2832_v0 }
  0x21 PF: > { %v2476_v1 = vld [vmem:[%s4258_s2 + $0x38] sm:$0xff]  ;;  %v2475_v3 = vld [vmem:[%s4258_s2 + $0x30] sm:$0xff]  ;;  %v2474_v5 = vld [vmem:[%s4258_s2 + $0x28] sm:$0xff]  ;;  %vm633_vm0 = vcmask 1043456   ;;  %vm629_vm1 = vcmask 64512   ;;  %v4271_v49 = vmov 3  }
  0x22   : > { %v2484_v2 = vld [vmem:[%s4258_s2 + $0x78] sm:$0xff]  ;;  %588 = vmatpush.bf16.msra.mxu0 %v2476_v1  ;;  %v2483_v4 = vld [vmem:[%s4258_s2 + $0x70] sm:$0xff]  ;;  %v2482_v6 = vld [vmem:[%s4258_s2 + $0x68] sm:$0xff]  ;;  %2565 = vset.pattern.permute.xlu1 %v4271_v49  ;;  %v4272_v50 = vmov 1   ;;  %v4275_v51 = vmov 0   ;;  %v4311_v59 = vmov 8  }
  0x23   : > { %602 = vmatpush.bf16.msra.mxu1 %v2484_v2  ;;  %v2473_v7 = vld [vmem:[%s4258_s2 + $0x20] sm:$0xff]  ;;  %v2472_v9 = vld [vmem:[%s4258_s2 + $0x18] sm:$0xff]  ;;  %v2471_v11 = vld [vmem:[%s4258_s2 + $0x10] sm:$0xff]  ;;  %2563 = vset.pattern.permute.xlu2 %v4272_v50  ;;  %v2837_v60 = vmov 2   ;;  %v4301_v61 = vmov 4   ;;  %v4278_v62 = vmov 9  }
  0x24   : > { %v2481_v8 = vld [vmem:[%s4258_s2 + $0x60] sm:$0xff]  ;;  %v2480_v10 = vld [vmem:[%s4258_s2 + $0x58] sm:$0xff]  ;;  %v2479_v12 = vld [vmem:[%s4258_s2 + $0x50] sm:$0xff]  ;;  %2562 = vset.pattern.permute.xlu0 %v4275_v51  ;;  %v4284_v63 = vmov 5   ;;  %v4309_v0 = vmov 10   ;;  %v4273_v1 = vmov 13  }
  0x25   : > { %v2470_v13 = vld [vmem:[%s4258_s2 + $0x8] sm:$0xff]  ;;  %v2469_v15 = vld [vmem:[%s4258_s2] sm:$0xff]  ;;  %v3005_v18 = vld [vmem:[%s2945_s19 + $0x10] sm:$0xff]  ;;  %v4297_v2 = vmov 6   ;;  %vm865_vm2 = vcmask 1040384  }
  0x26   : > { %589 = vmatpush.bf16.msra.mxu0 %v2475_v3  ;;  %v2478_v14 = vld [vmem:[%s4258_s2 + $0x48] sm:$0xff]  ;;  %v2477_v16 = vld [vmem:[%s4258_s2 + $0x40] sm:$0xff]  ;;  %v3011_v20 = vld [vmem:[%s2945_s19 + $0x18] sm:$0xff]  ;;  %v4299_v3 = vmov 15  }
  0x27   : > { %603 = vmatpush.bf16.msra.mxu1 %v2483_v4  ;;  %v3002_v17 = vld [vmem:[%s2945_s19] sm:$0xff]  ;;  %v3008_v19 = vld [vmem:[%s2945_s19 + $0x8] sm:$0xff] }
  0x28   : > { %v458_v21 = vpack.c.bf16 %v3005_v18, %v3002_v17  ;;  %v459_v22 = vpack.c.bf16 %v3011_v20, %v3008_v19  ;;  %v617_v23 = vld [vmem:[%s4261_s5] sm:$0xff]  ;;  %v2486_v38 = vld [vmem:[%s4259_s3 + $0x4] sm:$0xf0]  ;;  %v2391_v40 = vld [vmem:[%s4259_s3 + $0x8] sm:$0xf0] }
  0x29   : > { %v625_v24 = vunpack.c.l.b16 %v617_v23  ;;  %v626_v25 = vunpack.c.h.b16 %v617_v23  ;;  %v2389_v37 = vld [vmem:[%s4259_s3] sm:$0xf]  ;;  %v2485_v39 = vld [vmem:[%s4259_s3 + $0x4] sm:$0xf]  ;;  %v2488_v44 = vld [vmem:[%s4260_s4 + $0x4] sm:$0xf0] }
  0x2a   : > { %590 = vmatpush.bf16.msra.mxu0 %v2474_v5  ;;  %v2390_v41 = vor.u32 %v2486_v38, %v2389_v37  ;;  %v2394_v42 = vor.u32 %v2485_v39, %v2391_v40  ;;  %v2397_v43 = vld [vmem:[%s4260_s4] sm:$0xf]  ;;  %v2487_v45 = vld [vmem:[%s4260_s4 + $0x4] sm:$0xf]  ;;  %v2399_v46 = vld [vmem:[%s4260_s4 + $0x8] sm:$0xf0] }
  0x2b   : > { %604 = vmatpush.bf16.msra.mxu1 %v2482_v6  ;;  %v627_v26 = vpack.c.b16 %v625_v24, %v625_v24  ;;  %v628_v27 = vpack.c.b16 %v626_v25, %v626_v25  ;;  %v2398_v47 = vor.u32 %v2488_v44, %v2397_v43  ;;  %v2402_v48 = vor.u32 %v2487_v45, %v2399_v46 }
  0x2c   : > { %v4285_v6 = vmov 14  }
  0x2d   : > { %v635_v28 = vsel %vm633_vm0, %v627_v26, 0  ;;  %v638_v29 = vsel %vm633_vm0, %v628_v27, 0 }
  0x2e   : > { %591 = vmatpush.bf16.msra.mxu0 %v2473_v7  ;;  %647 = vmatpush.bf16.msra.mxu2 %v635_v28 }
  0x2f   : > { %605 = vmatpush.bf16.msra.mxu1 %v2481_v8  ;;  %661 = vmatpush.bf16.msra.mxu3 %v638_v29  ;;  %v4270_v8 = vmov 7  }
  0x32   : > { %592 = vmatpush.bf16.msra.mxu0 %v2472_v9  ;;  %727 = vmatpush.bf16.xpose.msrb.mxu2 %v458_v21  ;;  %v618_v9 = vld [vmem:[%s4262_s6] sm:$0x3] }
  0x33   : > { %606 = vmatpush.bf16.msra.mxu1 %v2480_v10  ;;  %741 = vmatpush.bf16.xpose.msrb.mxu3 %v459_v22  ;;  %v621_v10 = vperm.slane %v618_v9, 1 }
  0x36   : > { %593 = vmatpush.bf16.msra.mxu0 %v2471_v11  ;;  %v620_v11 = vperm.slane %v618_v9, 0 }
  0x37   : > { %607 = vmatpush.bf16.msra.mxu1 %v2479_v12  ;;  %v4318_v12 = vmov 11  }
  0x3a   : > { %594 = vmatpush.bf16.msra.mxu0 %v2470_v13 }
  0x3b   : > { %608 = vmatpush.bf16.msra.mxu1 %v2478_v14 }
  0x3e   : > { %595 = vmatpush.bf16.msra.mxu0 %v2469_v15 }
  0x3f   : > { %609 = vmatpush.bf16.msra.mxu1 %v2477_v16 }
  0x41   : > { %596 = vmatmul.bf16.vlgmr.msra.gmra.mxu0 %v458_v21 }
  0x42   : > { %610 = vmatmul.bf16.vlgmr.msra.gmra.mxu1 %v459_v22 }
  0xbe   : > { %v597_v30 = vpop.f32.mrf.mxu0 }
  0xbf   : > { %v611_v31 = vpop.f32.mrf.mxu1 }
  0xc0   : > { %v612_v34 = vadd.f32 %v611_v31, %v597_v30 }
  0xc6   : > { %v599_v32 = vpop.f32.mrf.mxu0 }
  0xc7   : > { %v613_v33 = vpop.f32.mrf.mxu1 }
  0xc8   : > { %v614_v35 = vadd.f32 %v613_v33, %v599_v32 }
  0xca   : > { %v616_v36 = vpack.c.bf16 %v614_v35, %v612_v34 }
  0xcc   : > { %2385 = vmatmul.msk.bf16.vlgmr.msra.gmra.mxu2 %vm629_vm1, %v616_v36  ;;  %2386 = vmatmul.msk.bf16.vlgmr.msra.gmra.mxu3 %vm629_vm1, %v616_v36 }
  0xcd   : > { %767 = vmatpush.bf16.xpose.msra.mxu2 %v458_v21  ;;  %781 = vmatpush.bf16.xpose.msra.mxu3 %v459_v22  ;;  %v4269_v21 = vmov 12  }
  0xdc   : > { %728 = vmatmul.bf16.vlgmr.msrb.gmra.mxu2 %v2390_v41  ;;  %742 = vmatmul.bf16.vlgmr.msrb.gmra.mxu3 %v2394_v42 }
  0xec   : > { %768 = vmatmul.bf16.vlgmr.msra.gmra.mxu2 %v2398_v47  ;;  %782 = vmatmul.bf16.vlgmr.msra.gmra.mxu3 %v2402_v48 }
 0x14f   : > { %v649_v52 = vpop.f32.mrf.mxu2  ;;  %v663_v53 = vpop.f32.mrf.mxu3 }
 0x150   : > { %v3072_v13 = vadd.f32 %v663_v53, %v621_v10  ;;  %v3076_v14 = vadd.f32 %v649_v52, %v620_v11 }
 0x152   : > { %v673_v15 = vand.u32 2147483647, %v3072_v13  ;;  %v672_v16 = vand.u32 2147483647, %v3076_v14  ;;  %v669_v45 = vmax.f32 %v3072_v13, 0.0  ;;  %v668_v46 = vmax.f32 %v3076_v14, 0.0 }
 0x154   : > { %v677_v22 = vsub.f32 0.0, %v673_v15  ;;  %v676_v23 = vsub.f32 0.0, %v672_v16 }
 0x156   : > { %v682_v24 = vmul.f32 1.442695, %v677_v22  ;;  %v680_v25 = vmul.f32 1.442695, %v676_v23 }
 0x157   : > { %v3047_v54 = vpop.f32.mrf.mxu2  ;;  %v3049_v55 = vpop.f32.mrf.mxu3 }
 0x158   : > { %2627 = vpow2.f32 %v682_v24  ;;  %v3092_v26 = vadd.f32 %v3047_v54, %v620_v11  ;;  %v3095_v27 = vadd.f32 %v3049_v55, %v621_v10 }
 0x159   : > { %2629 = vpow2.f32 %v680_v25 }
 0x15a   : > { %v674_v32 = vand.u32 2147483647, %v3092_v26  ;;  %v675_v34 = vand.u32 2147483647, %v3095_v27 }
 0x15c   : > { %v678_v37 = vsub.f32 0.0, %v674_v32  ;;  %v679_v38 = vsub.f32 0.0, %v675_v34  ;;  %v670_v32 = vmax.f32 %v3092_v26, 0.0  ;;  %v671_v34 = vmax.f32 %v3095_v27, 0.0 }
 0x15e   : > { %v2628_v28 = vpop.eup %2627  ;;  %v684_v39 = vmul.f32 1.442695, %v678_v37  ;;  %v686_v40 = vmul.f32 1.442695, %v679_v38 }
 0x15f   : > { %v729_v56 = vpop.f32.mrf.mxu2  ;;  %v743_v57 = vpop.f32.mrf.mxu3  ;;  %v689_v33 = vadd.f32 1.0, %v2628_v28 }
 0x160   : > { %v744_v58 = vadd.f32 %v743_v57, %v729_v56  ;;  %v2630_v31 = vpop.eup %2629 }
 0x161   : > { %v688_v36 = vadd.f32 1.0, %v2630_v31  ;;  %2631 = vlog2.f32 %v689_v33 }
 0x162   : > { %1029 = vperm.xlu1 %2565, %v744_v58   ;;  %889 = vperm.xlu2 %2563, %v744_v58  }
 0x163   : > { %812 = vperm.xlu0 %2562, %v744_v58   ;;  %2633 = vlog2.f32 %v688_v36 }
 0x164   : > { %2635 = vpow2.f32 %v684_v39 }
 0x165   : > { %2637 = vpow2.f32 %v686_v40 }
 0x167   : > { %v731_v4 = vpop.f32.mrf.mxu2  ;;  %v745_v5 = vpop.f32.mrf.mxu3 }
 0x168   : > { %v3061_v7 = vadd.f32 %v745_v5, %v731_v4  ;;  %v2632_v41 = vpop.eup %2631  ;;  %v3137_v5 = vld [vmem:[%s4263_s7] sm:$0xff] }
 0x169   : > { %v2634_v42 = vpop.eup %2633  ;;  %v695_v43 = vmul.f32 0.6931472, %v2632_v41 }
 0x16a   : > { %2570 = vset.pattern.permute.xlu1 %v4311_v59  ;;  %2564 = vset.pattern.permute.xlu2 %v2837_v60  ;;  %v693_v44 = vmul.f32 0.6931472, %v2634_v42  ;;  %v2636_v47 = vpop.eup %2635 }
 0x16b   : > { %2566 = vset.pattern.permute.xlu0 %v4301_v61  ;;  %1379 = vperm.xlu1 %2570, %v744_v58   ;;  %v3115_v48 = vadd.f32 %v695_v43, %v669_v45  ;;  %v2638_v53 = vpop.eup %2637  ;;  %v690_v55 = vadd.f32 1.0, %v2636_v47 }
 0x16c   : > { %959 = vperm.xlu2 %2564, %v744_v58   ;;  %1099 = vperm.xlu0 %2566, %v744_v58   ;;  %v3119_v54 = vadd.f32 %v693_v44, %v668_v46  ;;  %v691_v56 = vadd.f32 1.0, %v2638_v53 }
 0x16d   : > { %v797_v57 = vperm.slane %v3115_v48, 0  ;;  %2639 = vlog2.f32 %v690_v55  ;;  %v875_v15 = vperm.slane %v3115_v48, 1  ;;  %v945_v24 = vperm.slane %v3115_v48, 2 }
 0x16e   : > { %v796_v4 = vperm.slane %v3119_v54, 0  ;;  %2641 = vlog2.f32 %v691_v56  ;;  %v874_v22 = vperm.slane %v3119_v54, 1  ;;  %v3173_v36 = vmul.f32 %v3115_v48, %v3008_v19 }
 0x16f   : > { %v769_v29 = vpop.f32.mrf.mxu2  ;;  %v783_v30 = vpop.f32.mrf.mxu3  ;;  %v4277_v39 = vperm.slane %v3115_v48, 3  ;;  %v4276_v46 = vperm.slane %v3119_v54, 3 }
 0x170   : > { %v3099_v35 = vadd.f32 %v783_v30, %v769_v29  ;;  %v798_v13 = vmul.f32 %v796_v4, %v3137_v5  ;;  %v3156_v30 = vmul.f32 %v3119_v54, %v3002_v17  ;;  %v876_v33 = vmul.f32 %v874_v22, %v3137_v5 }
 0x171   : > { %v944_v17 = vperm.slane %v3119_v54, 2  ;;  %v4288_v47 = vperm.slane %v3173_v36, 1  ;;  %v4289_v53 = vperm.slane %v3173_v36, 2  ;;  %v4306_v55 = vperm.slane %v3173_v36, 5 }
 0x172   : > { %v802_v28 = vmul.f32 1.442695, %v798_v13  ;;  %v4290_v40 = vperm.slane %v3156_v30, 1  ;;  %v4286_v41 = vperm.slane %v3156_v30, 2  ;;  %v4304_v27 = vperm.slane %v3156_v30, 5 }
 0x173   : > { %2571 = vset.pattern.permute.xlu1 %v4278_v62  ;;  %v2640_v25 = vpop.eup %2639  ;;  %v4293_v19 = vperm.slane %v3156_v30, 3  ;;  %v880_v44 = vmul.f32 1.442695, %v876_v33  ;;  %v946_v45 = vmul.f32 %v944_v17, %v3137_v5  ;;  %v4279_v13 = vperm.slane %v3115_v48, 4  ;;  %v792_v33 = vld [vmem:[#allocation2 + $0x10] sm:$0xff] }
 0x174   : > { %2567 = vset.pattern.permute.xlu2 %v4284_v63  ;;  %2572 = vset.pattern.permute.xlu0 %v4309_v0  ;;  %v2642_v29 = vpop.eup %2641  ;;  %v697_v37 = vmul.f32 0.6931472, %v2640_v25 }
 0x175   : > { %1449 = vperm.xlu1 %2571, %v744_v58   ;;  %1169 = vperm.xlu2 %2567, %v744_v58   ;;  %v699_v38 = vmul.f32 0.6931472, %v2642_v29  ;;  %v4280_v29 = vperm.slane %v3173_v36, 0 }
 0x176   : > { %1519 = vperm.xlu0 %2572, %v744_v58  }
 0x177   : > { %v771_v9 = vpop.f32.mrf.mxu2  ;;  %v785_v10 = vpop.f32.mrf.mxu3 }
 0x178   : > { %v3148_v16 = vadd.f32 %v785_v10, %v771_v9  ;;  %v3192_v9 = vadd.f32 %v697_v37, %v670_v32  ;;  %v3194_v10 = vadd.f32 %v699_v38, %v671_v34  ;;  %v793_v34 = vld [vmem:[#allocation2] sm:$0xff]  ;;  %v1016_v37 = vmul.f32 %v4276_v46, %v3137_v5 }
 0x179   : > { %v4282_v38 = vperm.slane %v3119_v54, 4 }
 0x17d   : > { %2575 = vset.pattern.permute.xlu1 %v4273_v1  ;;  %2568 = vset.pattern.permute.xlu2 %v4297_v2 }
 0x17e   : > { %2577 = vset.pattern.permute.xlu0 %v4299_v3  ;;  %1729 = vperm.xlu1 %2575, %v744_v58  }
 0x17f   : > { %1239 = vperm.xlu2 %2568, %v744_v58   ;;  %1869 = vperm.xlu0 %2577, %v744_v58  }
 0x186   : > { %2576 = vset.pattern.permute.xlu1 %v4285_v6 }
 0x187   : > { %2569 = vset.pattern.permute.xlu2 %v4270_v8  ;;  %2578 = vset.pattern.permute.xlu0 %v4275_v51 }
 0x188   : > { %1799 = vperm.xlu1 %2576, %v744_v58   ;;  %1309 = vperm.xlu2 %2569, %v744_v58  }
 0x189   : > { %817 = vperm.xlu0 %2578, %v3061_v7  }
 0x190   : > { %2580 = vset.pattern.permute.xlu1 %v2837_v60  ;;  %2573 = vset.pattern.permute.xlu2 %v4318_v12 }
 0x191   : > { %2583 = vset.pattern.permute.xlu0 %v4284_v63  ;;  %1589 = vperm.xlu2 %2573, %v744_v58  }
 0x192   : > { %963 = vperm.xlu1 %2580, %v3061_v7   ;;  %1173 = vperm.xlu0 %2583, %v3061_v7  }
 0x199   : > { %2574 = vset.pattern.permute.xlu2 %v4269_v21 }
 0x19a   : > { %2582 = vset.pattern.permute.xlu1 %v4301_v61  ;;  %2585 = vset.pattern.permute.xlu0 %v4270_v8 }
 0x19b   : > { %1659 = vperm.xlu2 %2574, %v744_v58   ;;  %1103 = vperm.xlu1 %2582, %v3061_v7   ;;  %v3130_v58 = vld [vmem:[%s4263_s7 + $0x8] sm:$0xff] }
 0x19c   : > { %1313 = vperm.xlu0 %2585, %v3061_v7   ;;  %v799_v11 = vmul.f32 %v797_v57, %v3130_v58  ;;  %v877_v31 = vmul.f32 %v875_v15, %v3130_v58  ;;  %v947_v26 = vmul.f32 %v945_v24, %v3130_v58 }
 0x19e   : > { %v804_v23 = vmul.f32 1.442695, %v799_v11  ;;  %v882_v42 = vmul.f32 1.442695, %v877_v31  ;;  %v952_v56 = vmul.f32 1.442695, %v947_v26  ;;  %v1017_v11 = vmul.f32 %v4277_v39, %v3130_v58 }
 0x19f   : > { %v4281_v31 = vperm.slane %v3156_v30, 0  ;;  %v950_v26 = vmul.f32 1.442695, %v946_v45 }
 0x1a0   : > { %2643 = vpow2.f32 %v804_v23  ;;  %v3203_v23 = vld [vmem:[%s4263_s7 + $0x18] sm:$0xff] }
 0x1a1   : > { %2645 = vpow2.f32 %v802_v28  ;;  %v4295_v28 = vperm.slane %v3173_v36, 3 }
 0x1a2   : > { %2647 = vpow2.f32 %v882_v42 }
 0x1a3   : > { %2579 = vset.pattern.permute.xlu2 %v4272_v50  ;;  %2584 = vset.pattern.permute.xlu1 %v4297_v2  ;;  %2649 = vpow2.f32 %v880_v44  ;;  %v3224_v44 = vmul.f32 %v797_v57, %v3203_v23 }
 0x1a4   : > { %2590 = vset.pattern.permute.xlu0 %v4269_v21  ;;  %1243 = vperm.xlu1 %2584, %v3061_v7   ;;  %2651 = vpow2.f32 %v952_v56  ;;  %v1022_v56 = vmul.f32 1.442695, %v1017_v11  ;;  %v4321_v11 = vperm.slane %v3119_v54, 5 }
 0x1a5   : > { %893 = vperm.xlu2 %2579, %v3061_v7   ;;  %1663 = vperm.xlu0 %2590, %v3061_v7   ;;  %2653 = vpow2.f32 %v950_v26 }
 0x1a6   : > { %v2644_v25 = vpop.eup %2643  ;;  %2655 = vpow2.f32 %v1022_v56 }
 0x1a7   : > { %v2646_v32 = vpop.eup %2645 }
 0x1a8   : > { %v826_v46 = vmul.f32 %v2646_v32, %v792_v33  ;;  %v2648_v39 = vpop.eup %2647 }
 0x1a9   : > { %v2650_v32 = vpop.eup %2649 }
 0x1ac   : > { %2588 = vset.pattern.permute.xlu1 %v4309_v0 }
 0x1ad   : > { %2581 = vset.pattern.permute.xlu2 %v4271_v49  ;;  %2595 = vset.pattern.permute.xlu0 %v4272_v50  ;;  %v1087_v50 = vmul.f32 %v4279_v13, %v3130_v58 }
 0x1ae   : > { %1523 = vperm.xlu1 %2588, %v3061_v7   ;;  %1033 = vperm.xlu2 %2581, %v3061_v7  }
 0x1af   : > { %911 = vperm.xlu0 %2595, %v3099_v35   ;;  %v1092_v26 = vmul.f32 1.442695, %v1087_v50  ;;  %v1156_v50 = vmul.f32 %v4321_v11, %v3137_v5 }
 0x1b6   : > { %2589 = vset.pattern.permute.xlu1 %v4318_v12  ;;  %2586 = vset.pattern.permute.xlu2 %v4311_v59 }
 0x1b7   : > { %2601 = vset.pattern.permute.xlu0 %v4270_v8  ;;  %1593 = vperm.xlu1 %2589, %v3061_v7   ;;  %v4283_v8 = vperm.slane %v3115_v48, 5 }
 0x1b8   : > { %1383 = vperm.xlu2 %2586, %v3061_v7   ;;  %1331 = vperm.xlu0 %2601, %v3099_v35  }
 0x1bc   : > { %v3117_v52 = vpop.permute.xlu2 %889 }
 0x1bf   : > { %2593 = vset.pattern.permute.xlu1 %v4299_v3 }
 0x1c0   : > { %2587 = vset.pattern.permute.xlu2 %v4278_v62  ;;  %2606 = vset.pattern.permute.xlu0 %v4269_v21  ;;  %v4312_v21 = vperm.slane %v3173_v36, 6 }
 0x1c1   : > { %1873 = vperm.xlu1 %2593, %v3061_v7   ;;  %1453 = vperm.xlu2 %2587, %v3061_v7  }
 0x1c2   : > { %1681 = vperm.xlu0 %2606, %v3099_v35  }
 0x1c6   : > { %v3145_v14 = vpop.permute.xlu2 %959 }
 0x1c9   : > { %2594 = vset.pattern.permute.xlu1 %v4275_v51  ;;  %2591 = vset.pattern.permute.xlu2 %v4273_v1  ;;  %v827_v1 = vmul.f32 %v2644_v25, %v793_v34  ;;  %v1157_v25 = vmul.f32 %v4283_v8, %v3130_v58  ;;  %v4303_v34 = vperm.slane %v3156_v30, 4 }
 0x1ca   : > { %2611 = vset.pattern.permute.xlu0 %v2837_v60  ;;  %836 = vperm.xlu1 %2594, %v3099_v35  }
 0x1cb   : > { %1733 = vperm.xlu2 %2591, %v3061_v7   ;;  %985 = vperm.xlu0 %2611, %v3148_v16  }
 0x1cf   : > { %v3182_v43 = vpop.permute.xlu2 %1169 }
 0x1d2   : > { %2597 = vset.pattern.permute.xlu1 %v4271_v49  ;;  %v3229_v49 = vmul.f32 %v3194_v10, %v3011_v20  ;;  %v1020_v20 = vmul.f32 1.442695, %v1016_v37  ;;  %v4316_v37 = vperm.slane %v3115_v48, 6 }
 0x1d3   : > { %2592 = vset.pattern.permute.xlu2 %v4285_v6  ;;  %2618 = vset.pattern.permute.xlu0 %v4278_v62 }
 0x1d4   : > { %1051 = vperm.xlu1 %2597, %v3099_v35   ;;  %1803 = vperm.xlu2 %2592, %v3061_v7   ;;  %v3217_v42 = vpop.permute.xlu1 %1029  ;;  %v3233_v7 = vmul.f32 %v3192_v9, %v3005_v18  ;;  %v1086_v18 = vmul.f32 %v4282_v38, %v3137_v5  ;;  %2657 = vpow2.f32 %v1020_v20  ;;  %v968_v20 = vmul.f32 %v4286_v41, %v3145_v14 }
 0x1d5   : > { %1475 = vperm.xlu0 %2618, %v3148_v16   ;;  %v813_v45 = vpop.permute.xlu0 %812  ;;  %2659 = vpow2.f32 %v1092_v26  ;;  %v1160_v41 = vmul.f32 1.442695, %v1156_v50  ;;  %v4305_v50 = vperm.slane %v3194_v10, 1 }
 0x1d6   : > { %v822_v57 = vmul.f32 %v4281_v31, %v813_v45  ;;  %v823_v51 = vmul.f32 %v4280_v29, %v813_v45  ;;  %v4287_v45 = vperm.slane %v3115_v48, 7  ;;  %v2652_v29 = vpop.eup %2651  ;;  %v1090_v56 = vmul.f32 1.442695, %v1086_v18 }
 0x1d7   : > { %v4294_v31 = vperm.slane %v3119_v54, 6 }
 0x1d8   : > { %v3246_v62 = vadd.f32 %v826_v46, %v822_v57  ;;  %v3248_v13 = vadd.f32 %v827_v1, %v823_v51  ;;  %v898_v51 = vmul.f32 %v4290_v40, %v3117_v52  ;;  %v899_v1 = vmul.f32 %v4288_v47, %v3117_v52 }
 0x1d9   : > { %v3254_v33 = vpop.permute.xlu2 %1239  ;;  %v1162_v52 = vmul.f32 1.442695, %v1157_v25  ;;  %v4292_v25 = vperm.slane %v3119_v54, 7  ;;  %2661 = vpow2.f32 %v1090_v56  ;;  %v4296_v47 = vperm.slane %v3192_v9, 0 }
 0x1da   : > { %v902_v46 = vmul.f32 %v2650_v32, %v3246_v62  ;;  %v903_v57 = vmul.f32 %v2648_v39, %v3248_v13  ;;  %v4291_v32 = vperm.slane %v3194_v10, 0  ;;  %v2654_v39 = vpop.eup %2653 }
 0x1db   : > { %2663 = vpow2.f32 %v1162_v52  ;;  %v1296_v56 = vmul.f32 %v4292_v25, %v3137_v5  ;;  %v1039_v52 = vmul.f32 %v4295_v28, %v3217_v42 }
 0x1dc   : > { %v3270_v38 = vadd.f32 %v902_v46, %v898_v51  ;;  %v3272_v8 = vadd.f32 %v903_v57, %v899_v1  ;;  %2599 = vset.pattern.permute.xlu1 %v4284_v63  ;;  %2596 = vset.pattern.permute.xlu2 %v2837_v60  ;;  %v1227_v51 = vmul.f32 %v4316_v37, %v3130_v58  ;;  %2665 = vpow2.f32 %v1160_v41 }
 0x1dd   : > { %2623 = vset.pattern.permute.xlu0 %v4285_v6  ;;  %1191 = vperm.xlu1 %2599, %v3099_v35   ;;  %v3282_v18 = vpop.permute.xlu1 %1379  ;;  %v1297_v60 = vmul.f32 %v4287_v45, %v3130_v58  ;;  %v969_v1 = vmul.f32 %v4289_v53, %v3145_v14  ;;  %v2656_v6 = vpop.eup %2655  ;;  %v1226_v45 = vmul.f32 %v4294_v31, %v3137_v5  ;;  %v4302_v31 = vperm.slane %v3173_v36, 4 }
 0x1de   : > { %4353 = vst [vmem:[#allocation8_spill] sm:$0xff] %v3272_v8  ;;  %v972_v46 = vmul.f32 %v2654_v39, %v3270_v38  ;;  %v973_v57 = vmul.f32 %v2652_v29, %v3272_v8  ;;  %981 = vperm.xlu2 %2596, %v3099_v35   ;;  %1825 = vperm.xlu0 %2623, %v3148_v16   ;;  %v1100_v63 = vpop.permute.xlu0 %1099  ;;  %v2658_v26 = vpop.eup %2657  ;;  %v1232_v53 = vmul.f32 1.442695, %v1227_v51  ;;  %v1300_v41 = vmul.f32 1.442695, %v1296_v56 }
 0x1df   : > { %v1367_v29 = vmul.f32 %v4291_v32, %v3130_v58  ;;  %v1302_v40 = vmul.f32 1.442695, %v1297_v60  ;;  %v1230_v60 = vmul.f32 1.442695, %v1226_v45  ;;  %v4298_v32 = vperm.slane %v3192_v9, 1  ;;  %v2660_v25 = vpop.eup %2659 }
 0x1e0   : > { %v3302_v14 = vadd.f32 %v973_v57, %v969_v1  ;;  %v3304_v39 = vadd.f32 %v972_v46, %v968_v20  ;;  %v1038_v1 = vmul.f32 %v4293_v19, %v3217_v42  ;;  %v1366_v57 = vmul.f32 %v4296_v47, %v3137_v5  ;;  %v2662_v28 = vpop.eup %2661 }
 0x1e1   : > { %2667 = vpow2.f32 %v1232_v53  ;;  %v1437_v45 = vmul.f32 %v4305_v50, %v3130_v58  ;;  %v2664_v47 = vpop.eup %2663  ;;  %v4308_v53 = vperm.slane %v3156_v30, 6 }
 0x1e2   : > { %v1043_v20 = vmul.f32 %v2656_v6, %v3302_v14  ;;  %v1042_v46 = vmul.f32 %v2658_v26, %v3304_v39  ;;  %v3321_v51 = vpop.permute.xlu2 %1309  ;;  %v1372_v6 = vmul.f32 1.442695, %v1367_v29  ;;  %v1108_v26 = vmul.f32 %v4303_v34, %v1100_v63 }
 0x1e3   : > { %2669 = vpow2.f32 %v1302_v40  ;;  %v1370_v56 = vmul.f32 1.442695, %v1366_v57  ;;  %v4307_v40 = vperm.slane %v3194_v10, 2  ;;  %v2666_v57 = vpop.eup %2665 }
 0x1e4   : > { %v3327_v19 = vadd.f32 %v1043_v20, %v1039_v52  ;;  %v3330_v42 = vadd.f32 %v1042_v46, %v1038_v1  ;;  %v1109_v1 = vmul.f32 %v4302_v31, %v1100_v63  ;;  %2671 = vpow2.f32 %v1230_v60  ;;  %v3362_v60 = vld [vmem:[%s4263_s7 + $0x10] sm:$0xff] }
 0x1e5   : > { %2600 = vset.pattern.permute.xlu1 %v4297_v2  ;;  %2673 = vpow2.f32 %v1372_v6  ;;  %v4319_v2 = vperm.slane %v3229_v49, 0  ;;  %v1178_v6 = vmul.f32 %v4304_v27, %v3182_v43  ;;  %v4310_v31 = vperm.slane %v3192_v9, 2 }
 0x1e6   : > { %v1113_v52 = vmul.f32 %v2660_v25, %v3327_v19  ;;  %v1112_v29 = vmul.f32 %v2662_v28, %v3330_v42  ;;  %2598 = vset.pattern.permute.xlu2 %v4301_v61  ;;  %1261 = vperm.xlu1 %2600, %v3099_v35   ;;  %v1436_v25 = vmul.f32 %v4298_v32, %v3137_v5  ;;  %v4320_v32 = vperm.slane %v3233_v7, 0 }
 0x1e7   : > { %1121 = vperm.xlu2 %2598, %v3099_v35   ;;  %v3346_v20 = vpop.permute.xlu1 %1449  ;;  %2626 = vset.pattern.permute.xlu0 %v4299_v3  ;;  %2675 = vpow2.f32 %v1300_v41  ;;  %v2668_v3 = vpop.eup %2667  ;;  %v800_v41 = vmul.f32 %v796_v4, %v3362_v60 }
 0x1e8   : > { %v3352_v63 = vadd.f32 %v1112_v29, %v1108_v26  ;;  %v3354_v28 = vadd.f32 %v1113_v52, %v1109_v1  ;;  %v3357_v46 = vpop.permute.xlu0 %1519  ;;  %v1442_v26 = vmul.f32 1.442695, %v1437_v45  ;;  %v1179_v52 = vmul.f32 %v4306_v55, %v3182_v43 }
 0x1e9   : > { %2677 = vpow2.f32 %v1370_v56  ;;  %v1440_v61 = vmul.f32 1.442695, %v1436_v25  ;;  %v2670_v45 = vpop.eup %2669  ;;  %v1507_v43 = vmul.f32 %v4307_v40, %v3130_v58  ;;  %v4315_v25 = vperm.slane %v3173_v36, 7 }
 0x1ea   : > { %4354 = vst [vmem:[#allocation9_spill] sm:$0xff] %v3352_v63  ;;  %v1182_v1 = vmul.f32 %v2666_v57, %v3352_v63  ;;  %v1183_v29 = vmul.f32 %v2664_v47, %v3354_v28  ;;  %v4313_v47 = vperm.slane %v3194_v10, 3  ;;  %v2672_v56 = vpop.eup %2671  ;;  %v4314_v57 = vperm.slane %v3156_v30, 7 }
 0x1eb   : > { %4355 = vst [vmem:[#allocation10_spill] sm:$0xff] %v3354_v28  ;;  %v3375_v34 = vpop.permute.xlu2 %1589  ;;  %2679 = vpow2.f32 %v1442_v26  ;;  %v808_v55 = vmul.f32 1.442695, %v3224_v44  ;;  %v2674_v4 = vpop.eup %2673  ;;  %v1506_v44 = vmul.f32 %v4310_v31, %v3137_v5  ;;  %v4317_v26 = vperm.slane %v3192_v9, 3 }
 0x1ec   : > { %v3380_v27 = vadd.f32 %v1182_v1, %v1178_v6  ;;  %v3382_v50 = vadd.f32 %v1183_v29, %v1179_v52  ;;  %v1248_v6 = vmul.f32 %v4308_v53, %v3254_v33  ;;  %v1249_v52 = vmul.f32 %v4312_v21, %v3254_v33 }
 0x1ed   : > { %v2676_v40 = vpop.eup %2675  ;;  %2681 = vpow2.f32 %v1440_v61  ;;  %v806_v53 = vmul.f32 1.442695, %v800_v41  ;;  %v1577_v61 = vmul.f32 %v4313_v47, %v3130_v58  ;;  %v879_v41 = vmul.f32 %v875_v15, %v3203_v23 }
 0x1ee   : > { %4356 = vst [vmem:[#allocation11_spill] sm:$0xff] %v3380_v27  ;;  %v1252_v1 = vmul.f32 %v2672_v56, %v3380_v27  ;;  %v1253_v29 = vmul.f32 %v2668_v3, %v3382_v50  ;;  %2604 = vset.pattern.permute.xlu1 %v4309_v0  ;;  %v1512_v3 = vmul.f32 1.442695, %v1507_v43  ;;  %2683 = vpow2.f32 %v808_v55 }
 0x1ef   : > { %4357 = vst [vmem:[#allocation12_spill] sm:$0xff] %v3382_v50  ;;  %2602 = vset.pattern.permute.xlu2 %v4311_v59  ;;  %1541 = vperm.xlu1 %2604, %v3099_v35   ;;  %v2678_v31 = vpop.eup %2677  ;;  %v878_v43 = vmul.f32 %v874_v22, %v3362_v60  ;;  %v1510_v47 = vmul.f32 1.442695, %v1506_v44  ;;  %v1576_v22 = vmul.f32 %v4317_v26, %v3137_v5  ;;  %2685 = vpow2.f32 %v806_v53 }
 0x1f0   : > { %v3406_v33 = vadd.f32 %v1252_v1, %v1248_v6  ;;  %v3408_v56 = vadd.f32 %v1253_v29, %v1249_v52  ;;  %1401 = vperm.xlu2 %2602, %v3099_v35   ;;  %v3414_v0 = vpop.permute.xlu1 %1729  ;;  %v1318_v6 = vmul.f32 %v4314_v57, %v3321_v51  ;;  %v1319_v52 = vmul.f32 %v4315_v25, %v3321_v51 }
 0x1f1   : > { %v3417_v21 = vpop.permute.xlu0 %1869  ;;  %v3433_v29 = vpop.eup %2679  ;;  %2687 = vpow2.f32 %v1512_v3  ;;  %v1582_v51 = vmul.f32 1.442695, %v1577_v61  ;;  %v884_v37 = vmul.f32 1.442695, %v878_v43  ;;  %v949_v44 = vmul.f32 %v945_v24, %v3203_v23 }
 0x1f2   : > { %4358 = vst [vmem:[#allocation13_spill] sm:$0xff] %v3406_v33  ;;  %v1322_v1 = vmul.f32 %v2676_v40, %v3406_v33  ;;  %v1323_v55 = vmul.f32 %v2670_v45, %v3408_v56  ;;  %v886_v45 = vmul.f32 1.442695, %v879_v41  ;;  %v948_v26 = vmul.f32 %v944_v17, %v3362_v60 }
 0x1f3   : > { %4359 = vst [vmem:[#allocation14_spill] sm:$0xff] %v3408_v56  ;;  %v2682_v25 = vpop.eup %2681  ;;  %v1388_v53 = vmul.f32 %v4320_v32, %v3282_v18  ;;  %v1389_v3 = vmul.f32 %v4319_v2, %v3282_v18  ;;  %2689 = vpow2.f32 %v1510_v47  ;;  %v794_v47 = vld [vmem:[#allocation2 + $0x18] sm:$0xff]  ;;  %v4366_v18 = vperm.slane %v3115_v48, 5 }
 0x1f4   : > { %v3439_v59 = vadd.f32 %v1322_v1, %v1318_v6  ;;  %v3441_v57 = vadd.f32 %v1323_v55, %v1319_v52  ;;  %v2684_v43 = vpop.eup %2683  ;;  %v1580_v52 = vmul.f32 1.442695, %v1576_v22  ;;  %2691 = vpow2.f32 %v1582_v51 }
 0x1f5   : > { %v3443_v40 = vpop.permute.xlu2 %1659  ;;  %v4362_v55 = vmov 9   ;;  %2693 = vpow2.f32 %v886_v45  ;;  %v956_v22 = vmul.f32 1.442695, %v949_v44  ;;  %v4364_v51 = vperm.slane %v3119_v54, 3 }
 0x1f6   : > { %v1392_v61 = vmul.f32 %v2678_v31, %v3439_v59  ;;  %v1393_v41 = vmul.f32 %v2674_v4, %v3441_v57  ;;  %v2686_v31 = vpop.eup %2685  ;;  %v795_v4 = vld [vmem:[#allocation2 + $0x8] sm:$0xff]  ;;  %2695 = vpow2.f32 %v884_v37  ;;  %v954_v32 = vmul.f32 1.442695, %v948_v26 }
 0x1f7   : > { %2605 = vset.pattern.permute.xlu1 %v4318_v12  ;;  %2697 = vpow2.f32 %v1580_v52  ;;  %v4365_v44 = vperm.slane %v3115_v48, 4  ;;  %v4367_v6 = vperm.slane %v3119_v54, 4  ;;  %v829_v24 = vmul.f32 %v2684_v43, %v795_v4 }
 0x1f8   : > { %v3462_v17 = vadd.f32 %v1392_v61, %v1388_v53  ;;  %v3464_v1 = vadd.f32 %v1393_v41, %v1389_v3  ;;  %2603 = vset.pattern.permute.xlu2 %v4362_v55  ;;  %1611 = vperm.xlu1 %2605, %v3099_v35   ;;  %v4363_v53 = vperm.slane %v3115_v48, 3  ;;  %v1018_v3 = vmul.f32 %v4364_v51, %v3362_v60  ;;  %v3476_v41 = vpop.eup %2687 }
 0x1f9   : > { %1471 = vperm.xlu2 %2603, %v3099_v35   ;;  %v1159_v51 = vmul.f32 %v4366_v18, %v3203_v23  ;;  %v1088_v55 = vmul.f32 %v4367_v6, %v3362_v60  ;;  %v4368_v12 = vperm.slane %v3156_v30, 0  ;;  %v4369_v37 = vperm.slane %v3173_v36, 0  ;;  %v2690_v11 = vpop.eup %2689 }
 0x1fa   : > { %4360 = vst [vmem:[#allocation15_spill] sm:$0xff] %v3462_v17  ;;  %v1019_v61 = vmul.f32 %v4363_v53, %v3203_v23  ;;  %v3480_v2 = vpop.permute.xlu1 %1799  ;;  %v1089_v53 = vmul.f32 %v4365_v44, %v3203_v23  ;;  %v828_v52 = vmul.f32 %v2686_v31, %v794_v47  ;;  %2699 = vpow2.f32 %v956_v22  ;;  %v3496_v28 = vpop.eup %2691 }
 0x1fb   : > { %4361 = vst [vmem:[#allocation16_spill] sm:$0xff] %v3464_v1  ;;  %v818_v45 = vpop.permute.xlu0 %817  ;;  %v1024_v33 = vmul.f32 1.442695, %v1018_v3  ;;  %2701 = vpow2.f32 %v954_v32  ;;  %v2694_v6 = vpop.eup %2693  ;;  %v1166_v47 = vmul.f32 1.442695, %v1159_v51  ;;  %v4371_v22 = vperm.slane %v3115_v48, 6 }
 0x1fc   : > { %v824_v15 = vmul.f32 %v4368_v12, %v818_v45  ;;  %v825_v26 = vmul.f32 %v4369_v37, %v818_v45  ;;  %v1026_v44 = vmul.f32 1.442695, %v1019_v61  ;;  %v4370_v12 = vperm.slane %v3119_v54, 5  ;;  %v2696_v3 = vpop.eup %2695 }
 0x1fd   : > { %v1096_v31 = vmul.f32 1.442695, %v1089_v53  ;;  %v1094_v45 = vmul.f32 1.442695, %v1088_v55  ;;  %v1229_v61 = vmul.f32 %v4371_v22, %v3203_v23  ;;  %v4372_v32 = vmov 0   ;;  %v3516_v51 = vpop.eup %2697 }
 0x1fe   : > { %v3498_v18 = vadd.f32 %v828_v52, %v824_v15  ;;  %v3500_v63 = vadd.f32 %v829_v24, %v825_v26  ;;  %v1158_v43 = vmul.f32 %v4370_v12, %v3362_v60  ;;  %v1462_v15 = vmul.f32 %v2682_v25, %v3462_v17 }
 0x1ff   : > { %v894_v4 = vpop.permute.xlu2 %893  ;;  %v1463_v24 = vmul.f32 %v3433_v29, %v3464_v1  ;;  %v4373_v37 = vperm.slane %v3156_v30, 1  ;;  %v4374_v52 = vperm.slane %v3173_v36, 1  ;;  %v4375_v55 = vmov 13  }
 0x200   : > { %2609 = vset.pattern.permute.xlu1 %v4372_v32  ;;  %v904_v12 = vmul.f32 %v2696_v3, %v3498_v18  ;;  %v905_v25 = vmul.f32 %v2694_v6, %v3500_v63  ;;  %2703 = vpow2.f32 %v1026_v44  ;;  %v4376_v29 = vperm.slane %v3115_v48, 7  ;;  %v2700_v3 = vpop.eup %2699 }
 0x201   : > { %v900_v26 = vmul.f32 %v4373_v37, %v894_v4  ;;  %v901_v53 = vmul.f32 %v4374_v52, %v894_v4  ;;  %2607 = vset.pattern.permute.xlu2 %v4375_v55  ;;  %841 = vperm.xlu1 %2609, %v3148_v16   ;;  %v4377_v32 = vperm.slane %v3233_v7, 1  ;;  %v4378_v4 = vperm.slane %v3229_v49, 1  ;;  %v2702_v17 = vpop.eup %2701 }
 0x202   : > { %v1299_v22 = vmul.f32 %v4376_v29, %v3203_v23  ;;  %1751 = vperm.xlu2 %2607, %v3099_v35   ;;  %2705 = vpow2.f32 %v1024_v33  ;;  %v1164_v56 = vmul.f32 1.442695, %v1158_v43  ;;  %v1236_v6 = vmul.f32 1.442695, %v1229_v61 }
 0x203   : > { %v1458_v37 = vmul.f32 %v4377_v32, %v3346_v20  ;;  %v1459_v52 = vmul.f32 %v4378_v4, %v3346_v20  ;;  %v3532_v1 = vadd.f32 %v904_v12, %v900_v26  ;;  %v3534_v44 = vadd.f32 %v905_v25, %v901_v53 }
 0x204   : > { %v4381_v48 = vperm.slane %v3119_v54, 6  ;;  %v964_v20 = vpop.permute.xlu1 %963  ;;  %v3543_v4 = vpop.permute.xlu0 %1173  ;;  %2707 = vpow2.f32 %v1096_v31  ;;  %v4382_v43 = vperm.slane %v3156_v30, 2  ;;  %v4383_v61 = vperm.slane %v3173_v36, 2 }
 0x205   : > { %4379 = vst [vmem:[#allocation17_spill] sm:$0xff] %v3532_v1  ;;  %v3539_v32 = vadd.f32 %v1462_v15, %v1458_v37  ;;  %v3541_v50 = vadd.f32 %v1463_v24, %v1459_v52  ;;  %v974_v12 = vmul.f32 %v2702_v17, %v3532_v1  ;;  %v975_v25 = vmul.f32 %v2700_v3, %v3534_v44 }
 0x206   : > { %4380 = vst [vmem:[#allocation18_spill] sm:$0xff] %v3534_v44  ;;  %v1228_v29 = vmul.f32 %v4381_v48, %v3362_v60  ;;  %v970_v26 = vmul.f32 %v4382_v43, %v964_v20  ;;  %v971_v53 = vmul.f32 %v4383_v61, %v964_v20  ;;  %2709 = vpow2.f32 %v1094_v45  ;;  %v2704_v52 = vpop.eup %2703 }
 0x207   : > { %v1306_v15 = vmul.f32 1.442695, %v1299_v22  ;;  %v4384_v24 = vperm.slane %v3119_v54, 7  ;;  %v4385_v20 = vperm.slane %v3194_v10, 0  ;;  %v1533_v45 = vmul.f32 %v3476_v41, %v3541_v50 }
 0x208   : > { %v3556_v48 = vadd.f32 %v974_v12, %v970_v26  ;;  %v3558_v33 = vadd.f32 %v975_v25, %v971_v53  ;;  %v1234_v43 = vmul.f32 1.442695, %v1228_v29  ;;  %v2706_v61 = vpop.eup %2705  ;;  %v1532_v22 = vmul.f32 %v2690_v11, %v3539_v32  ;;  %v1034_v54 = vpop.permute.xlu2 %1033 }
 0x209   : > { %v1298_v37 = vmul.f32 %v4384_v24, %v3362_v60  ;;  %v1369_v17 = vmul.f32 %v4385_v20, %v3203_v23  ;;  %2711 = vpow2.f32 %v1166_v47  ;;  %v4386_v3 = vperm.slane %v3194_v10, 4 }
 0x20a   : > { %v4387_v12 = vmov 1   ;;  %v4388_v29 = vperm.slane %v3156_v30, 3  ;;  %v4389_v25 = vperm.slane %v3173_v36, 3  ;;  %v1044_v20 = vmul.f32 %v2706_v61, %v3556_v48  ;;  %v2708_v31 = vpop.eup %2707 }
 0x20b   : > { %v1647_v26 = vmul.f32 %v4386_v3, %v3130_v58  ;;  %2610 = vset.pattern.permute.xlu1 %v4387_v12  ;;  %v1045_v41 = vmul.f32 %v2704_v52, %v3558_v33  ;;  %v4390_v11 = vmov 14   ;;  %2713 = vpow2.f32 %v1164_v56 }
 0x20c   : > { %v1040_v53 = vmul.f32 %v4388_v29, %v1034_v54  ;;  %v1041_v24 = vmul.f32 %v4389_v25, %v1034_v54  ;;  %2608 = vset.pattern.permute.xlu2 %v4390_v11  ;;  %915 = vperm.xlu1 %2610, %v3148_v16   ;;  %v1304_v47 = vmul.f32 1.442695, %v1298_v37  ;;  %v4391_v3 = vperm.slane %v3194_v10, 1  ;;  %v2710_v11 = vpop.eup %2709 }
 0x20d   : > { %v4392_v29 = vperm.slane %v3192_v9, 4  ;;  %v4393_v61 = vperm.slane %v3233_v7, 2  ;;  %v4394_v52 = vperm.slane %v3229_v49, 2  ;;  %1821 = vperm.xlu2 %2608, %v3099_v35   ;;  %2715 = vpow2.f32 %v1236_v6  ;;  %v1104_v8 = vpop.permute.xlu1 %1103 }
 0x20e   : > { %v1439_v12 = vmul.f32 %v4391_v3, %v3203_v23  ;;  %v3591_v56 = vadd.f32 %v1044_v20, %v1040_v53  ;;  %v3593_v37 = vadd.f32 %v1045_v41, %v1041_v24  ;;  %v1652_v3 = vmul.f32 1.442695, %v1647_v26  ;;  %v3607_v41 = vpop.permute.xlu0 %1313 }
 0x20f   : > { %v1646_v44 = vmul.f32 %v4392_v29, %v3137_v5  ;;  %v1528_v54 = vmul.f32 %v4393_v61, %v3357_v46  ;;  %v1529_v25 = vmul.f32 %v4394_v52, %v3357_v46  ;;  %v2712_v53 = vpop.eup %2711  ;;  %v4397_v24 = vperm.slane %v3156_v30, 4 }
 0x210   : > { %v1114_v46 = vmul.f32 %v2710_v11, %v3591_v56  ;;  %v1115_v52 = vmul.f32 %v2708_v31, %v3593_v37  ;;  %v4398_v6 = vperm.slane %v3173_v36, 4  ;;  %2717 = vpow2.f32 %v1306_v15 }
 0x211   : > { %v3597_v27 = vadd.f32 %v1532_v22, %v1528_v54  ;;  %v3599_v61 = vadd.f32 %v1533_v45, %v1529_v25  ;;  %v1110_v20 = vmul.f32 %v4397_v24, %v1104_v8  ;;  %v4399_v22 = vperm.slane %v3192_v9, 0  ;;  %v2714_v29 = vpop.eup %2713 }
 0x212   : > { %v1111_v26 = vmul.f32 %v4398_v6, %v1104_v8  ;;  %2719 = vpow2.f32 %v1234_v43  ;;  %v1376_v54 = vmul.f32 1.442695, %v1369_v17  ;;  %v1446_v25 = vmul.f32 1.442695, %v1439_v12 }
 0x213   : > { %4395 = vst [vmem:[#allocation19_spill] sm:$0xff] %v3597_v27  ;;  %v1368_v45 = vmul.f32 %v4399_v22, %v3362_v60  ;;  %v1650_v11 = vmul.f32 1.442695, %v1646_v44  ;;  %v3612_v31 = vadd.f32 %v1114_v46, %v1110_v20  ;;  %2721 = vpow2.f32 %v1304_v47  ;;  %v2716_v17 = vpop.eup %2715 }
 0x214   : > { %4396 = vst [vmem:[#allocation20_spill] sm:$0xff] %v3599_v61  ;;  %v3614_v1 = vadd.f32 %v1115_v52, %v1111_v26  ;;  %v4402_v8 = vperm.slane %v3194_v10, 5  ;;  %v1602_v15 = vmul.f32 %v3516_v51, %v3597_v27  ;;  %v1603_v6 = vmul.f32 %v3496_v28, %v3599_v61  ;;  %v3635_v28 = vpop.permute.xlu2 %1383 }
 0x215   : > { %4400 = vst [vmem:[#allocation21_spill] sm:$0xff] %v3612_v31  ;;  %2723 = vpow2.f32 %v1652_v3  ;;  %v4403_v44 = vperm.slane %v3192_v9, 5  ;;  %v4404_v12 = vperm.slane %v3156_v30, 5  ;;  %v4405_v46 = vperm.slane %v3173_v36, 5 }
 0x216   : > { %4401 = vst [vmem:[#allocation22_spill] sm:$0xff] %v3614_v1  ;;  %v1717_v24 = vmul.f32 %v4402_v8, %v3130_v58  ;;  %v1184_v20 = vmul.f32 %v2714_v29, %v3612_v31  ;;  %v1185_v51 = vmul.f32 %v2712_v53, %v3614_v1  ;;  %v4406_v26 = vmov 4   ;;  %v1244_v27 = vpop.permute.xlu1 %1243 }
 0x217   : > { %v1716_v43 = vmul.f32 %v4403_v44, %v3137_v5  ;;  %v1180_v47 = vmul.f32 %v4404_v12, %v3543_v4  ;;  %v1181_v52 = vmul.f32 %v4405_v46, %v3543_v4  ;;  %2613 = vset.pattern.permute.xlu1 %v4406_v26  ;;  %v4407_v3 = vmov 3   ;;  %v2718_v12 = vpop.eup %2717 }
 0x218   : > { %2612 = vset.pattern.permute.xlu2 %v4407_v3  ;;  %1125 = vperm.xlu1 %2613, %v3148_v16   ;;  %v1374_v22 = vmul.f32 1.442695, %v1368_v45  ;;  %v4408_v8 = vperm.slane %v3192_v9, 1  ;;  %2725 = vpow2.f32 %v1650_v11  ;;  %v4409_v29 = vperm.slane %v3233_v7, 3  ;;  %v2720_v61 = vpop.eup %2719 }
 0x219   : > { %v4410_v46 = vperm.slane %v3229_v49, 3  ;;  %1055 = vperm.xlu2 %2612, %v3148_v16   ;;  %v3650_v3 = vadd.f32 %v1184_v20, %v1180_v47  ;;  %v3652_v45 = vadd.f32 %v1185_v51, %v1181_v52  ;;  %2727 = vpow2.f32 %v1376_v54  ;;  %v2722_v1 = vpop.eup %2721 }
 0x21a   : > { %v1438_v44 = vmul.f32 %v4408_v8, %v3362_v60  ;;  %v1598_v53 = vmul.f32 %v4409_v29, %v3375_v34  ;;  %v4338_v11 = vperm.slane %v3192_v9, 6  ;;  %v1722_v8 = vmul.f32 1.442695, %v1717_v24 }
 0x21b   : > { %v1599_v26 = vmul.f32 %v4410_v46, %v3375_v34  ;;  %4411 = vst [vmem:[#allocation23_spill] sm:$0xff] %v3652_v45  ;;  %v1720_v4 = vmul.f32 1.442695, %v1716_v43  ;;  %v1254_v34 = vmul.f32 %v2720_v61, %v3650_v3  ;;  %v1255_v46 = vmul.f32 %v2716_v17, %v3652_v45  ;;  %v2724_v47 = vpop.eup %2723  ;;  %v3666_v43 = vpop.permute.xlu0 %1663 }
 0x21c   : > { %v3655_v31 = vadd.f32 %v1602_v15, %v1598_v53  ;;  %v4413_v20 = vperm.slane %v3156_v30, 6  ;;  %v4414_v51 = vperm.slane %v3173_v36, 6  ;;  %2729 = vpow2.f32 %v1446_v25 }
 0x21d   : > { %v3657_v29 = vadd.f32 %v1603_v6, %v1599_v26  ;;  %2731 = vpow2.f32 %v1374_v22  ;;  %v4415_v15 = vperm.slane %v3194_v10, 2  ;;  %v4416_v61 = vperm.slane %v3192_v9, 2 }
 0x21e   : > { %v1250_v54 = vmul.f32 %v4413_v20, %v1244_v27  ;;  %v1251_v24 = vmul.f32 %v4414_v51, %v1244_v27  ;;  %v4417_v53 = vperm.slane %v3194_v10, 6  ;;  %v2726_v20 = vpop.eup %2725  ;;  %2733 = vpow2.f32 %v1722_v8 }
 0x21f   : > { %4412 = vst [vmem:[#allocation24_spill] sm:$0xff] %v3657_v29  ;;  %v1509_v6 = vmul.f32 %v4415_v15, %v3203_v23  ;;  %v1508_v17 = vmul.f32 %v4416_v61, %v3362_v60  ;;  %v1786_v25 = vmul.f32 %v4338_v11, %v3137_v5  ;;  %v1444_v22 = vmul.f32 1.442695, %v1438_v44  ;;  %v2728_v61 = vpop.eup %2727  ;;  %v1454_v44 = vpop.permute.xlu2 %1453 }
 0x220   : > { %v1787_v26 = vmul.f32 %v4417_v53, %v3130_v58  ;;  %v3677_v52 = vadd.f32 %v1254_v34, %v1250_v54  ;;  %v3679_v27 = vadd.f32 %v1255_v46, %v1251_v24  ;;  %v1673_v51 = vmul.f32 %v2724_v47, %v3657_v29 }
 0x221   : > { %v1672_v15 = vmul.f32 %v2726_v20, %v3655_v31  ;;  %2735 = vpow2.f32 %v1720_v4  ;;  %v4418_v53 = vperm.slane %v3156_v30, 7  ;;  %v4419_v34 = vperm.slane %v3173_v36, 7 }
 0x222   : > { %v1324_v8 = vmul.f32 %v2722_v1, %v3677_v52  ;;  %v1325_v54 = vmul.f32 %v2718_v12, %v3679_v27  ;;  %v4420_v24 = vmov 7   ;;  %v4421_v47 = vperm.slane %v3233_v7, 4 }
 0x223   : > { %v1320_v45 = vmul.f32 %v4418_v53, %v3607_v41  ;;  %v1321_v46 = vmul.f32 %v4419_v34, %v3607_v41  ;;  %2616 = vset.pattern.permute.xlu1 %v4420_v24  ;;  %v4422_v20 = vperm.slane %v3229_v49, 4  ;;  %v4423_v53 = vmov 5   ;;  %v2730_v41 = vpop.eup %2729  ;;  %v3732_v29 = vpop.permute.xlu0 %911 }
 0x224   : > { %v1668_v4 = vmul.f32 %v4421_v47, %v3443_v40  ;;  %2614 = vset.pattern.permute.xlu2 %v4423_v53  ;;  %1335 = vperm.xlu1 %2616, %v3148_v16   ;;  %v1792_v36 = vmul.f32 1.442695, %v1787_v26  ;;  %v1790_v24 = vmul.f32 1.442695, %v1786_v25  ;;  %v2732_v11 = vpop.eup %2731  ;;  %2737 = vpow2.f32 %v1444_v22  ;;  %v3723_v22 = vpop.permute.xlu1 %1523 }
 0x225   : > { %v1669_v30 = vmul.f32 %v4422_v20, %v3443_v40  ;;  %v3704_v12 = vadd.f32 %v1324_v8, %v1320_v45  ;;  %v3706_v34 = vadd.f32 %v1325_v54, %v1321_v46  ;;  %1195 = vperm.xlu2 %2614, %v3148_v16   ;;  %v2734_v26 = vpop.eup %2733  ;;  %v4425_v45 = vperm.slane %v3233_v7, 0 }
 0x226   : > { %v3713_v53 = vadd.f32 %v1672_v15, %v1668_v4  ;;  %v4426_v46 = vperm.slane %v3229_v49, 0  ;;  %v1516_v40 = vmul.f32 1.442695, %v1509_v6  ;;  %2739 = vpow2.f32 %v1792_v36 }
 0x227   : > { %4424 = vst [vmem:[#allocation25_spill] sm:$0xff] %v3706_v34  ;;  %v3711_v20 = vadd.f32 %v1673_v51, %v1669_v30  ;;  %v1390_v8 = vmul.f32 %v4425_v45, %v3635_v28  ;;  %v1394_v25 = vmul.f32 %v2732_v11, %v3704_v12  ;;  %v1395_v47 = vmul.f32 %v2728_v61, %v3706_v34  ;;  %v2736_v1 = vpop.eup %2735 }
 0x228   : > { %v1391_v54 = vmul.f32 %v4426_v46, %v3635_v28  ;;  %v1514_v51 = vmul.f32 1.442695, %v1508_v17  ;;  %v4427_v15 = vperm.slane %v3194_v10, 7  ;;  %2741 = vpow2.f32 %v1790_v24 }
 0x229   : > { %v3728_v30 = vadd.f32 %v1394_v25, %v1390_v8  ;;  %v4430_v28 = vperm.slane %v3192_v9, 7  ;;  %v4431_v6 = vperm.slane %v3233_v7, 5  ;;  %v4432_v61 = vperm.slane %v3229_v49, 5 }
 0x22a   : > { %v1857_v4 = vmul.f32 %v4427_v15, %v3130_v58  ;;  %v3730_v45 = vadd.f32 %v1395_v47, %v1391_v54  ;;  %v1743_v58 = vmul.f32 %v2734_v26, %v3711_v20  ;;  %v1742_v47 = vmul.f32 %v2736_v1, %v3713_v53  ;;  %v2738_v8 = vpop.eup %2737  ;;  %v3757_v1 = vpop.permute.xlu2 %1733 }
 0x22b   : > { %4428 = vst [vmem:[#allocation26_spill] sm:$0xff] %v3728_v30  ;;  %v1856_v11 = vmul.f32 %v4430_v28, %v3137_v5  ;;  %v1738_v17 = vmul.f32 %v4431_v6, %v3414_v0  ;;  %v1739_v36 = vmul.f32 %v4432_v61, %v3414_v0  ;;  %v4433_v46 = vmov 8  }
 0x22c   : > { %4429 = vst [vmem:[#allocation27_spill] sm:$0xff] %v3730_v45  ;;  %2617 = vset.pattern.permute.xlu1 %v4433_v46  ;;  %v4434_v24 = vperm.slane %v3194_v10, 3  ;;  %v1862_v15 = vmul.f32 1.442695, %v1857_v4  ;;  %v1464_v28 = vmul.f32 %v2738_v8, %v3728_v30  ;;  %v1465_v0 = vmul.f32 %v2730_v41, %v3730_v45  ;;  %v2740_v61 = vpop.eup %2739  ;;  %v1594_v45 = vpop.permute.xlu1 %1593 }
 0x22d   : > { %v3749_v5 = vadd.f32 %v1743_v58, %v1739_v36  ;;  %v3751_v25 = vadd.f32 %v1742_v47, %v1738_v17  ;;  %2743 = vpow2.f32 %v1516_v40  ;;  %v4435_v26 = vmov 6   ;;  %1405 = vperm.xlu1 %2617, %v3148_v16  }
 0x22e   : > { %v1579_v54 = vmul.f32 %v4434_v24, %v3203_v23  ;;  %2615 = vset.pattern.permute.xlu2 %v4435_v26  ;;  %v1860_v6 = vmul.f32 1.442695, %v1856_v11  ;;  %2745 = vpow2.f32 %v1514_v51  ;;  %v4436_v17 = vperm.slane %v3192_v9, 3  ;;  %v2742_v36 = vpop.eup %2741 }
 0x22f   : > { %1265 = vperm.xlu2 %2615, %v3148_v16   ;;  %v4342_v58 = vperm.slane %v3229_v49, 6  ;;  %v4437_v41 = vperm.slane %v3233_v7, 1  ;;  %v4438_v47 = vperm.slane %v3229_v49, 1  ;;  %v4343_v46 = vperm.slane %v3233_v7, 6 }
 0x230   : > { %v1578_v4 = vmul.f32 %v4436_v17, %v3362_v60  ;;  %v1813_v11 = vmul.f32 %v2740_v61, %v3749_v5  ;;  %v1812_v51 = vmul.f32 %v2742_v36, %v3751_v25  ;;  %2747 = vpow2.f32 %v1862_v15  ;;  %v1332_v61 = vpop.permute.xlu0 %1331 }
 0x231   : > { %v1460_v40 = vmul.f32 %v4437_v41, %v1454_v44  ;;  %v1461_v8 = vmul.f32 %v4438_v47, %v1454_v44  ;;  %v1586_v17 = vmul.f32 1.442695, %v1579_v54  ;;  %2749 = vpow2.f32 %v1860_v6 }
 0x232   : > { %v1808_v41 = vmul.f32 %v4343_v46, %v3480_v2  ;;  %v1809_v44 = vmul.f32 %v4342_v58, %v3480_v2  ;;  %v1584_v47 = vmul.f32 1.442695, %v1578_v4  ;;  %v4439_v15 = vperm.slane %v3194_v10, 4 }
 0x233   : > { %v3771_v24 = vadd.f32 %v1464_v28, %v1460_v40  ;;  %v3773_v26 = vadd.f32 %v1465_v0, %v1461_v8  ;;  %v2744_v30 = vpop.eup %2743  ;;  %v3785_v0 = vmul.f32 %v1332_v61, %v3439_v59  ;;  %v3788_v54 = vmul.f32 %v1332_v61, %v3441_v57 }
 0x234   : > { %v1649_v28 = vmul.f32 %v4439_v15, %v3203_v23  ;;  %v2746_v6 = vpop.eup %2745  ;;  %v3790_v36 = vadd.f32 %v1813_v11, %v1809_v44  ;;  %v3792_v40 = vadd.f32 %v1812_v51, %v1808_v41  ;;  %2751 = vpow2.f32 %v1586_v17  ;;  %v3804_v51 = vpop.permute.xlu2 %1803 }
 0x235   : > { %4440 = vst [vmem:[#allocation28_spill] sm:$0xff] %v3785_v0  ;;  %v1534_v2 = vmul.f32 %v2746_v6, %v3771_v24  ;;  %v1535_v4 = vmul.f32 %v2744_v30, %v3773_v26  ;;  %v4442_v8 = vmov 12   ;;  %v4346_v23 = vperm.slane %v3229_v49, 7  ;;  %v3829_v0 = vpop.permute.xlu1 %1873 }
 0x236   : > { %4441 = vst [vmem:[#allocation29_spill] sm:$0xff] %v3788_v54  ;;  %2621 = vset.pattern.permute.xlu1 %v4442_v8  ;;  %v2748_v58 = vpop.eup %2747  ;;  %v4344_v59 = vperm.slane %v3233_v7, 7  ;;  %2753 = vpow2.f32 %v1584_v47  ;;  %v4443_v57 = vperm.slane %v3192_v9, 4  ;;  %v4444_v44 = vmov 10  }
 0x237   : > { %2619 = vset.pattern.permute.xlu2 %v4444_v44  ;;  %1685 = vperm.xlu1 %2621, %v3148_v16   ;;  %v2750_v30 = vpop.eup %2749  ;;  %v4445_v17 = vperm.slane %v3233_v7, 2  ;;  %v4446_v61 = vperm.slane %v3229_v49, 2  ;;  %v1656_v47 = vmul.f32 1.442695, %v1649_v28  ;;  %v1879_v8 = vmul.f32 %v4346_v23, %v3417_v21 }
 0x238   : > { %v1648_v11 = vmul.f32 %v4443_v57, %v3362_v60  ;;  %1545 = vperm.xlu2 %2619, %v3148_v16   ;;  %v1878_v6 = vmul.f32 %v4344_v59, %v3417_v21  ;;  %v1883_v57 = vmul.f32 %v2748_v58, %v3790_v36  ;;  %v1882_v44 = vmul.f32 %v2750_v30, %v3792_v40  ;;  %v1682_v34 = vpop.permute.xlu0 %1681  ;;  %v2787_v21 = vld [vmem:[%s4263_s7 + $0x18] sm:$0xff] }
 0x239   : > { %v1530_v41 = vmul.f32 %v4445_v17, %v3723_v22  ;;  %v1531_v15 = vmul.f32 %v4446_v61, %v3723_v22  ;;  %2755 = vpow2.f32 %v1656_v47  ;;  %v4449_v58 = vperm.slane %v3194_v10, 5 }
 0x23a   : > { %v1654_v22 = vmul.f32 1.442695, %v1648_v11  ;;  %v3825_v28 = vadd.f32 %v1883_v57, %v1879_v8  ;;  %v3827_v61 = vadd.f32 %v1882_v44, %v1878_v6  ;;  %v2752_v54 = vpop.eup %2751  ;;  %v3846_v47 = vmul.f32 %v1682_v34, %v3711_v20 }
 0x23b   : > { %v3821_v17 = vadd.f32 %v1534_v2, %v1530_v41  ;;  %v3823_v46 = vadd.f32 %v1535_v4, %v1531_v15  ;;  %v1719_v2 = vmul.f32 %v2787_v21, %v4449_v58  ;;  %v4450_v4 = vperm.slane %v3192_v9, 5 }
 0x23c   : > { %4447 = vst [vmem:[#allocation30_spill] sm:$0xff] %v3825_v28  ;;  %v2754_v59 = vpop.eup %2753  ;;  %v3843_v15 = vmul.f32 %v1682_v34, %v3713_v53  ;;  %2757 = vpow2.f32 %v1654_v22  ;;  %v4451_v6 = vperm.slane %v3233_v7, 3  ;;  %v4452_v57 = vperm.slane %v3229_v49, 3  ;;  %v982_v53 = vpop.permute.xlu2 %981 }
 0x23d   : > { %4448 = vst [vmem:[#allocation31_spill] sm:$0xff] %v3827_v61  ;;  %v1718_v11 = vmul.f32 %v4450_v4, %v3362_v60  ;;  %v1604_v30 = vmul.f32 %v2754_v59, %v3821_v17  ;;  %v1605_v41 = vmul.f32 %v2752_v54, %v3823_v46  ;;  %v4453_v59 = vmov 11   ;;  %v3861_v4 = vpop.permute.xlu1 %836 }
 0x23e   : > { %1925 = vst [vmem:[#allocation2] sm:$0xff] %v3825_v28  ;;  %v1600_v8 = vmul.f32 %v4451_v6, %v1594_v45  ;;  %v1601_v44 = vmul.f32 %v4452_v57, %v1594_v45  ;;  %v1726_v34 = vmul.f32 1.442695, %v1719_v2  ;;  %v4454_v45 = vperm.slane %v3194_v10, 6 }
 0x23f   : > { %1924 = vst [vmem:[#allocation2 + $0x10] sm:$0xff] %v3827_v61  ;;  %2622 = vset.pattern.permute.xlu1 %v4375_v55  ;;  %v1724_v22 = vmul.f32 1.442695, %v1718_v11  ;;  %v2756_v55 = vpop.eup %2755  ;;  %v4455_v2 = vperm.slane %v3192_v9, 6  ;;  %v988_v11 = vmul.f32 %v982_v53, %v3304_v39 }
 0x240   : > { %2620 = vset.pattern.permute.xlu2 %v4453_v59  ;;  %1755 = vperm.xlu1 %2622, %v3148_v16   ;;  %v3857_v20 = vadd.f32 %v1604_v30, %v1600_v8  ;;  %v3859_v54 = vadd.f32 %v1605_v41, %v1601_v44  ;;  %2759 = vpow2.f32 %v1726_v34  ;;  %v1789_v6 = vmul.f32 %v2787_v21, %v4454_v45  ;;  %v986_v23 = vpop.permute.xlu0 %985 }
 0x241   : > { %1615 = vperm.xlu2 %2620, %v3148_v16   ;;  %2761 = vpow2.f32 %v1724_v22  ;;  %v1788_v30 = vmul.f32 %v4455_v2, %v3362_v60  ;;  %v989_v41 = vmul.f32 %v982_v53, %v3302_v14  ;;  %v990_v8 = vmul.f32 %v986_v23, %v3556_v48 }
 0x242   : > { %v2758_v58 = vpop.eup %2757  ;;  %v1675_v59 = vmul.f32 %v2756_v55, %v3859_v54  ;;  %v991_v44 = vmul.f32 %v986_v23, %v3558_v33  ;;  %v4456_v34 = vperm.slane %v3233_v7, 4  ;;  %v4457_v55 = vperm.slane %v3229_v49, 4 }
 0x243   : > { %v1674_v57 = vmul.f32 %v2758_v58, %v3857_v20  ;;  %v4458_v45 = vmov 15   ;;  %v992_v28 = vadd.f32 %v990_v8, %v988_v11  ;;  %v1796_v48 = vmul.f32 1.442695, %v1789_v6 }
 0x244   : > { %v1670_v58 = vmul.f32 %v4456_v34, %v3666_v43  ;;  %v1671_v22 = vmul.f32 %v4457_v55, %v3666_v43  ;;  %v999_v2 = vadd.f32 %v991_v44, %v989_v41  ;;  %v3888_v33 = vpop.permute.xlu2 %1121  ;;  %v1794_v34 = vmul.f32 1.442695, %v1788_v30 }
 0x245   : > { %v993_v53 = vrot.slane %v992_v28, 4  ;;  %2763 = vpow2.f32 %v1796_v48  ;;  %v4460_v6 = vperm.slane %v3192_v9, 7 }
 0x246   : > { %v3883_v14 = vadd.f32 %v1674_v57, %v1670_v58  ;;  %v3885_v39 = vadd.f32 %v1675_v59, %v1671_v22  ;;  %v2760_v23 = vpop.eup %2759  ;;  %v1000_v43 = vrot.slane %v999_v2, 4  ;;  %v4459_v57 = vperm.slane %v3194_v10, 7  ;;  %v3894_v58 = vpop.permute.xlu1 %1051 }
 0x247   : > { %v2762_v55 = vpop.eup %2761  ;;  %v994_v11 = vadd.f32 %v993_v53, %v992_v28  ;;  %2765 = vpow2.f32 %v1794_v34  ;;  %v1858_v30 = vmul.f32 %v4460_v6, %v3362_v60  ;;  %v4461_v28 = vperm.slane %v3233_v7, 5 }
 0x248   : > { %2624 = vset.pattern.permute.xlu1 %v4458_v45  ;;  %v1001_v41 = vadd.f32 %v1000_v43, %v999_v2  ;;  %v1745_v8 = vmul.f32 %v2760_v23, %v3885_v39  ;;  %v1859_v59 = vmul.f32 %v2787_v21, %v4459_v57  ;;  %v868_v43 = vlaneseq }
 0x249   : > { %2625 = vset.pattern.permute.xlu2 %v4458_v45  ;;  %1891 = vperm.xlu1 %2624, %v3099_v35   ;;  %v1744_v35 = vmul.f32 %v2762_v55, %v3883_v14  ;;  %v995_v44 = vrot.slane %v994_v11, 2  ;;  %v1740_v22 = vmul.f32 %v4461_v28, %v3757_v1  ;;  %v4462_v45 = vperm.slane %v3229_v49, 5 }
 0x24a   : > { %1895 = vperm.xlu2 %2625, %v3148_v16   ;;  %v1002_v16 = vrot.slane %v1001_v41, 2  ;;  %v1866_v53 = vmul.f32 1.442695, %v1859_v59  ;;  %v1864_v60 = vmul.f32 1.442695, %v1858_v30  ;;  %vm3913_vm3 = vcmp.lt.s32.totalorder %v868_v43, 256 }
 0x24b   : > { %v1741_v2 = vmul.f32 %v4462_v45, %v3757_v1  ;;  %v996_v48 = vadd.f32 %v995_v44, %v994_v11  ;;  %v3907_v23 = vadd.f32 %v1744_v35, %v1740_v22  ;;  %v2764_v57 = vpop.eup %2763  ;;  %v4465_v35 = vperm.slane %v3233_v7, 6  ;;  %v1476_v45 = vpop.permute.xlu0 %1475 }
 0x24c   : > { %v1003_v10 = vadd.f32 %v1002_v16, %v1001_v41  ;;  %v3909_v9 = vpop.permute.xlu2 %1401  ;;  %2767 = vpow2.f32 %v1866_v53  ;;  %v4466_v44 = vperm.slane %v3229_v49, 6 }
 0x24d   : > { %v3905_v21 = vadd.f32 %v1745_v8, %v1741_v2  ;;  %v997_v34 = vrot.slane %v996_v48, 1  ;;  %v2766_v6 = vpop.eup %2765  ;;  %2769 = vpow2.f32 %v1864_v60  ;;  %v1810_v59 = vmul.f32 %v4465_v35, %v3804_v51 }
 0x24e   : > { %v1004_v55 = vrot.slane %v1003_v10, 1  ;;  %v1814_v1 = vmul.f32 %v2766_v6, %v3907_v23  ;;  %v1811_v16 = vmul.f32 %v4466_v44, %v3804_v51 }
 0x24f   : > { %v1815_v61 = vmul.f32 %v2764_v57, %v3905_v21  ;;  %v998_v41 = vadd.f32 %v997_v34, %v996_v48  ;;  %v3923_v30 = vpop.permute.xlu1 %1191  ;;  %v1480_v34 = vmul.f32 %v1476_v45, %v3771_v24  ;;  %v4467_v57 = vperm.slane %v3233_v7, 7 }
 0x250   : > { %v1005_v28 = vadd.f32 %v1004_v55, %v1003_v10  ;;  %v1818_v48 = vadd.f32 %v1814_v1, %v1810_v59  ;;  %v1481_v55 = vmul.f32 %v1476_v45, %v3773_v26 }
 0x251   : > { %v1819_v2 = vadd.f32 %v1815_v61, %v1811_v16  ;;  %v1880_v6 = vmul.f32 %v4467_v57, %v3829_v0 }
 0x252   : > { %v1008_v8 = vrot.slane %v1005_v28, 7  ;;  %v2768_v10 = vpop.eup %2767  ;;  %v4468_v28 = vperm.slane %v3229_v49, 7 }
 0x253   : > { %v2770_v43 = vpop.eup %2769 }
 0x254   : > { %v1009_v22 = vsel %vm865_vm2, %v998_v41, %v1008_v8  ;;  %v1472_v53 = vpop.permute.xlu2 %1471  ;;  %v1881_v61 = vmul.f32 %v4468_v28, %v3829_v0  ;;  %v1884_v1 = vmul.f32 %v2770_v43, %v1818_v48  ;;  %v1885_v41 = vmul.f32 %v2768_v10, %v1819_v2 }
 0x255   : > { %1012 = vst.msk [vmem:[#allocation3 + $0x2] ss:$8 sm:$0x3] %vm3913_vm3, %v1009_v22  ;;  %v1478_v60 = vmul.f32 %v1472_v53, %v3539_v32  ;;  %v1479_v51 = vmul.f32 %v1472_v53, %v3541_v50 }
 0x256   : > { %v3938_v59 = vadd.f32 %v1884_v1, %v1880_v6  ;;  %v3940_v24 = vadd.f32 %v1885_v41, %v1881_v61 }
 0x257   : > { %v1482_v8 = vadd.f32 %v1480_v34, %v1478_v60  ;;  %v1489_v35 = vadd.f32 %v1481_v55, %v1479_v51  ;;  %v1826_v60 = vpop.permute.xlu0 %1825 }
 0x258   : > { %v3942_v44 = vpop.permute.xlu1 %1261  ;;  %1926 = vst [vmem:[#allocation2 + $0x18] sm:$0xff] %v3938_v59  ;;  %v1830_v28 = vmul.f32 %v1826_v60, %v1818_v48  ;;  %v1831_v1 = vmul.f32 %v1826_v60, %v1819_v2 }
 0x259   : > { %v1483_v26 = vrot.slane %v1482_v8, 4  ;;  %v1490_v32 = vrot.slane %v1489_v35, 4  ;;  %1927 = vst [vmem:[#allocation2 + $0x8] sm:$0xff] %v3940_v24 }
 0x25b   : > { %v1484_v7 = vadd.f32 %v1483_v26, %v1482_v8  ;;  %v1491_v50 = vadd.f32 %v1490_v32, %v1489_v35 }
 0x25c   : > { %v1752_v16 = vpop.permute.xlu2 %1751 }
 0x25d   : > { %v1485_v49 = vrot.slane %v1484_v7, 2  ;;  %v1492_v0 = vrot.slane %v1491_v50, 2  ;;  %v3947_v22 = vmul.f32 %v1752_v16, %v3751_v25  ;;  %v3950_v45 = vmul.f32 %v1752_v16, %v3749_v5 }
 0x25e   : > { %v1058_v16 = vmul.f32 %v3894_v58, %v3330_v42  ;;  %v845_v42 = vmul.f32 %v3861_v4, %v3248_v13 }
 0x25f   : > { %v1486_v10 = vadd.f32 %v1485_v49, %v1484_v7  ;;  %v1493_v53 = vadd.f32 %v1492_v0, %v1491_v50 }
 0x261   : > { %v1487_v43 = vrot.slane %v1486_v10, 1  ;;  %v1494_v34 = vrot.slane %v1493_v53, 1  ;;  %v3952_v55 = vpop.permute.xlu1 %1541 }
 0x263   : > { %v1495_v51 = vadd.f32 %v1494_v34, %v1493_v53  ;;  %v1488_v57 = vadd.f32 %v1487_v43, %v1486_v10 }
 0x265   : > { %v1498_v6 = vrot.slane %v1495_v51, 7 }
 0x267   : > { %v1822_v61 = vpop.permute.xlu2 %1821  ;;  %v1499_v41 = vsel %vm865_vm2, %v1488_v57, %v1498_v6  ;;  %v844_v6 = vmul.f32 %v3861_v4, %v3246_v62 }
 0x268   : > { %v1828_v25 = vmul.f32 %v1822_v61, %v3792_v40  ;;  %v1829_v5 = vmul.f32 %v1822_v61, %v3790_v36  ;;  %1502 = vst.msk [vmem:[#allocation3 + $0x11] ss:$8 sm:$0x3] %vm3913_vm3, %v1499_v41  ;;  %v1059_v36 = vmul.f32 %v3894_v58, %v3327_v19  ;;  %v918_v58 = vmul.f32 %v3732_v29, %v3270_v38 }
 0x26a   : > { %v1832_v8 = vadd.f32 %v1830_v28, %v1828_v25  ;;  %v1839_v35 = vadd.f32 %v1831_v1, %v1829_v5  ;;  %v3959_v7 = vpop.permute.xlu1 %1611 }
 0x26c   : > { %v1833_v26 = vrot.slane %v1832_v8, 4  ;;  %v1840_v32 = vrot.slane %v1839_v35, 4 }
 0x26e   : > { %v1834_v50 = vadd.f32 %v1833_v26, %v1832_v8  ;;  %v1841_v49 = vadd.f32 %v1840_v32, %v1839_v35  ;;  %v4469_v26 = vld [vmem:[#allocation8_spill] sm:$0xff] }
 0x26f   : > { %v919_v32 = vmul.f32 %v3732_v29, %v4469_v26 }
 0x270   : > { %v1835_v48 = vrot.slane %v1834_v50, 2  ;;  %v1842_v0 = vrot.slane %v1841_v49, 2 }
 0x272   : > { %v1836_v53 = vadd.f32 %v1835_v48, %v1834_v50  ;;  %v1843_v43 = vadd.f32 %v1842_v0, %v1841_v49  ;;  %v4470_v50 = vld [vmem:[#allocation11_spill] sm:$0xff] }
 0x273   : > { %v1056_v2 = vpop.permute.xlu2 %1055  ;;  %v842_v1 = vpop.permute.xlu1 %841  ;;  %v1198_v13 = vmul.f32 %v3923_v30, %v4470_v50 }
 0x274   : > { %v1060_v40 = vmul.f32 %v1056_v2, %v3591_v56  ;;  %v1061_v10 = vmul.f32 %v1056_v2, %v3593_v37  ;;  %v1837_v51 = vrot.slane %v1836_v53, 1  ;;  %v1844_v57 = vrot.slane %v1843_v43, 1  ;;  %v4471_v2 = vld [vmem:[#allocation12_spill] sm:$0xff] }
 0x275   : > { %v846_v56 = vmul.f32 %v842_v1, %v3498_v18  ;;  %v847_v37 = vmul.f32 %v842_v1, %v3500_v63 }
 0x276   : > { %v1062_v34 = vadd.f32 %v1060_v40, %v1058_v16  ;;  %v1069_v60 = vadd.f32 %v1061_v10, %v1059_v36  ;;  %v1845_v19 = vadd.f32 %v1844_v57, %v1843_v43  ;;  %v1838_v5 = vadd.f32 %v1837_v51, %v1836_v53  ;;  %v4472_v40 = vld [vmem:[#allocation23_spill] sm:$0xff]  ;;  %v4473_v53 = vld [vmem:[#allocation9_spill] sm:$0xff]  ;;  %v4474_v57 = vld [vmem:[#allocation10_spill] sm:$0xff] }
 0x277   : > { %v848_v35 = vadd.f32 %v846_v56, %v844_v6  ;;  %v855_v62 = vadd.f32 %v847_v37, %v845_v42  ;;  %v1199_v16 = vmul.f32 %v3923_v30, %v4471_v2  ;;  %v3988_v43 = vmul.f32 %v3888_v33, %v4473_v53 }
 0x278   : > { %v1063_v28 = vrot.slane %v1062_v34, 4  ;;  %v1070_v61 = vrot.slane %v1069_v60, 4  ;;  %v1848_v8 = vrot.slane %v1845_v19, 7 }
 0x279   : > { %v849_v48 = vrot.slane %v848_v35, 4  ;;  %v856_v0 = vrot.slane %v855_v62, 4 }
 0x27a   : > { %v1064_v41 = vadd.f32 %v1063_v28, %v1062_v34  ;;  %v1071_v25 = vadd.f32 %v1070_v61, %v1069_v60  ;;  %v1849_v63 = vsel %vm865_vm2, %v1838_v5, %v1848_v8  ;;  %v4475_v61 = vld [vmem:[#allocation15_spill] sm:$0xff] }
 0x27b   : > { %1852 = vst.msk [vmem:[#allocation3 + $0x16] ss:$8 sm:$0x3] %vm3913_vm3, %v1849_v63  ;;  %v850_v34 = vadd.f32 %v849_v48, %v848_v35  ;;  %v857_v60 = vadd.f32 %v856_v0, %v855_v62  ;;  %v3996_v1 = vmul.f32 %v3909_v9, %v4475_v61  ;;  %v4477_v35 = vld [vmem:[#allocation17_spill] sm:$0xff] }
 0x27c   : > { %v1065_v4 = vrot.slane %v1064_v41, 2  ;;  %v1072_v49 = vrot.slane %v1071_v25, 2 }
 0x27d   : > { %v851_v42 = vrot.slane %v850_v34, 2  ;;  %v858_v19 = vrot.slane %v857_v60, 2 }
 0x27e   : > { %v1066_v36 = vadd.f32 %v1065_v4, %v1064_v41  ;;  %v1073_v29 = vadd.f32 %v1072_v49, %v1071_v25  ;;  %v916_v37 = vpop.permute.xlu1 %915  ;;  %v4476_v41 = vld [vmem:[#allocation13_spill] sm:$0xff] }
 0x27f   : > { %v1196_v18 = vpop.permute.xlu2 %1195  ;;  %v1268_v25 = vmul.f32 %v3942_v44, %v4476_v41  ;;  %v920_v62 = vmul.f32 %v916_v37, %v4477_v35  ;;  %v859_v26 = vadd.f32 %v858_v19, %v857_v60 }
 0x280   : > { %v1200_v38 = vmul.f32 %v1196_v18, %v3650_v3  ;;  %v1201_v10 = vmul.f32 %v1196_v18, %v4472_v40  ;;  %v3992_v3 = vmul.f32 %v3888_v33, %v4474_v57  ;;  %v1067_v6 = vrot.slane %v1066_v36, 1 }
 0x281   : > { %v1074_v30 = vrot.slane %v1073_v29, 1  ;;  %v852_v33 = vadd.f32 %v851_v42, %v850_v34  ;;  %v922_v48 = vadd.f32 %v920_v62, %v918_v58  ;;  %v4479_v34 = vld [vmem:[#allocation14_spill] sm:$0xff] }
 0x282   : > { %v1202_v51 = vadd.f32 %v1200_v38, %v1198_v13  ;;  %v1209_v28 = vadd.f32 %v1201_v10, %v1199_v16  ;;  %v4478_v13 = vld [vmem:[#allocation18_spill] sm:$0xff]  ;;  %v1068_v49 = vadd.f32 %v1067_v6, %v1066_v36  ;;  %v860_v38 = vrot.slane %v859_v26, 1 }
 0x283   : > { %v1075_v5 = vadd.f32 %v1074_v30, %v1073_v29  ;;  %v921_v4 = vmul.f32 %v916_v37, %v4478_v13  ;;  %v853_v0 = vrot.slane %v852_v33, 1  ;;  %v923_v53 = vrot.slane %v922_v48, 4 }
 0x284   : > { %v1203_v56 = vrot.slane %v1202_v51, 4  ;;  %v1210_v8 = vrot.slane %v1209_v28, 4  ;;  %v1269_v60 = vmul.f32 %v3942_v44, %v4479_v34  ;;  %v861_v36 = vadd.f32 %v860_v38, %v859_v26 }
 0x285   : > { %v1078_v18 = vrot.slane %v1075_v5, 7  ;;  %v929_v16 = vadd.f32 %v921_v4, %v919_v32  ;;  %v924_v30 = vadd.f32 %v923_v53, %v922_v48  ;;  %v854_v61 = vadd.f32 %v853_v0, %v852_v33 }
 0x286   : > { %v1204_v50 = vadd.f32 %v1203_v56, %v1202_v51  ;;  %v1211_v63 = vadd.f32 %v1210_v8, %v1209_v28  ;;  %v864_v42 = vrot.slane %v861_v36, 7  ;;  %v4480_v8 = vld [vmem:[#allocation19_spill] sm:$0xff] }
 0x287   : > { %v1079_v10 = vsel %vm865_vm2, %v1068_v49, %v1078_v18  ;;  %v930_v58 = vrot.slane %v929_v16, 4  ;;  %v1548_v35 = vmul.f32 %v3952_v55, %v4480_v8 }
 0x288   : > { %v1205_v2 = vrot.slane %v1204_v50, 2  ;;  %v1212_v29 = vrot.slane %v1211_v63, 2  ;;  %1082 = vst.msk [vmem:[#allocation3 + $0x3] ss:$8 sm:$0x3] %vm3913_vm3, %v1079_v10  ;;  %v866_v62 = vsel %vm865_vm2, %v854_v61, %v864_v42 }
 0x289   : > { %v1266_v40 = vpop.permute.xlu2 %1265  ;;  %v931_v56 = vadd.f32 %v930_v58, %v929_v16  ;;  %872 = vst.msk [vmem:[#allocation3] ss:$8 sm:$0x3] %vm3913_vm3, %v866_v62 }
 0x28a   : > { %v1270_v57 = vmul.f32 %v1266_v40, %v3677_v52  ;;  %v1206_v51 = vadd.f32 %v1205_v2, %v1204_v50  ;;  %v1213_v6 = vadd.f32 %v1212_v29, %v1211_v63  ;;  %v1271_v32 = vmul.f32 %v1266_v40, %v3679_v27  ;;  %v1126_v44 = vpop.permute.xlu1 %1125  ;;  %v4481_v50 = vld [vmem:[#allocation21_spill] sm:$0xff]  ;;  %v4482_v63 = vld [vmem:[#allocation22_spill] sm:$0xff] }
 0x28b   : > { %v925_v52 = vrot.slane %v924_v30, 2  ;;  %v932_v26 = vrot.slane %v931_v56, 2  ;;  %v1130_v13 = vmul.f32 %v1126_v44, %v4481_v50  ;;  %v1131_v48 = vmul.f32 %v1126_v44, %v4482_v63 }
 0x28c   : > { %v1272_v28 = vadd.f32 %v1270_v57, %v1268_v25  ;;  %v1207_v19 = vrot.slane %v1206_v51, 1  ;;  %v1214_v37 = vrot.slane %v1213_v6, 1  ;;  %v1279_v5 = vadd.f32 %v1271_v32, %v1269_v60  ;;  %v4483_v60 = vld [vmem:[#allocation20_spill] sm:$0xff] }
 0x28d   : > { %v926_v25 = vadd.f32 %v925_v52, %v924_v30  ;;  %v933_v18 = vadd.f32 %v932_v26, %v931_v56  ;;  %v1132_v0 = vadd.f32 %v1130_v13, %v3988_v43  ;;  %v1139_v57 = vadd.f32 %v1131_v48, %v3992_v3 }
 0x28e   : > { %v1273_v41 = vrot.slane %v1272_v28, 4  ;;  %v1215_v27 = vadd.f32 %v1214_v37, %v1213_v6  ;;  %v1280_v4 = vrot.slane %v1279_v5, 4  ;;  %v1208_v49 = vadd.f32 %v1207_v19, %v1206_v51 }
 0x28f   : > { %v927_v2 = vrot.slane %v926_v25, 1  ;;  %v934_v29 = vrot.slane %v933_v18, 1  ;;  %v1133_v53 = vrot.slane %v1132_v0, 4  ;;  %v1549_v36 = vmul.f32 %v3952_v55, %v4483_v60 }
 0x290   : > { %v1274_v33 = vadd.f32 %v1273_v41, %v1272_v28  ;;  %v1218_v38 = vrot.slane %v1215_v27, 7  ;;  %v1281_v40 = vadd.f32 %v1280_v4, %v1279_v5  ;;  %v1140_v32 = vrot.slane %v1139_v57, 4  ;;  %v4484_v27 = vld [vmem:[#allocation25_spill] sm:$0xff] }
 0x291   : > { %v935_v43 = vadd.f32 %v934_v29, %v933_v18  ;;  %v1134_v30 = vadd.f32 %v1133_v53, %v1132_v0  ;;  %v928_v61 = vadd.f32 %v927_v2, %v926_v25  ;;  %v1618_v41 = vmul.f32 %v3959_v7, %v3655_v31  ;;  %v4486_v2 = vld [vmem:[#allocation29_spill] sm:$0xff] }
 0x292   : > { %v1275_v16 = vrot.slane %v1274_v33, 2  ;;  %v1546_v10 = vpop.permute.xlu2 %1545  ;;  %v1219_v51 = vsel %vm865_vm2, %v1208_v49, %v1218_v38  ;;  %v1282_v6 = vrot.slane %v1281_v40, 2  ;;  %v1141_v37 = vadd.f32 %v1140_v32, %v1139_v57 }
 0x293   : > { %v1550_v34 = vmul.f32 %v1546_v10, %v3821_v17  ;;  %1222 = vst.msk [vmem:[#allocation3 + $0x5] ss:$8 sm:$0x3] %vm3913_vm3, %v1219_v51  ;;  %v1551_v28 = vmul.f32 %v1546_v10, %v3823_v46  ;;  %v938_v17 = vrot.slane %v935_v43, 7  ;;  %v1135_v56 = vrot.slane %v1134_v30, 2 }
 0x294   : > { %v1276_v58 = vadd.f32 %v1275_v16, %v1274_v33  ;;  %v1283_v3 = vadd.f32 %v1282_v6, %v1281_v40  ;;  %v1142_v46 = vrot.slane %v1141_v37, 2  ;;  %v4485_v33 = vld [vmem:[#allocation28_spill] sm:$0xff] }
 0x295   : > { %v1552_v19 = vadd.f32 %v1550_v34, %v1548_v35  ;;  %v1559_v55 = vadd.f32 %v1551_v28, %v1549_v36  ;;  %v939_v62 = vsel %vm865_vm2, %v928_v61, %v938_v17  ;;  %v1136_v26 = vadd.f32 %v1135_v56, %v1134_v30  ;;  %v4487_v40 = vld [vmem:[#allocation24_spill] sm:$0xff] }
 0x296   : > { %v1277_v42 = vrot.slane %v1276_v58, 1  ;;  %v1336_v52 = vpop.permute.xlu1 %1335  ;;  %v1284_v5 = vrot.slane %v1283_v3, 1  ;;  %942 = vst.msk [vmem:[#allocation3 + $0x1] ss:$8 sm:$0x3] %vm3913_vm3, %v939_v62  ;;  %v1143_v18 = vadd.f32 %v1142_v46, %v1141_v37  ;;  %v1619_v10 = vmul.f32 %v3959_v7, %v4487_v40  ;;  %v4488_v56 = vld [vmem:[#allocation16_spill] sm:$0xff] }
 0x297   : > { %v1553_v44 = vrot.slane %v1552_v19, 4  ;;  %v1340_v8 = vmul.f32 %v1336_v52, %v3704_v12  ;;  %v1560_v50 = vrot.slane %v1559_v55, 4  ;;  %v1341_v25 = vmul.f32 %v1336_v52, %v4484_v27 }
 0x298   : > { %v1285_v35 = vadd.f32 %v1284_v5, %v1283_v3  ;;  %v1278_v49 = vadd.f32 %v1277_v42, %v1276_v58  ;;  %v1137_v31 = vrot.slane %v1136_v26, 1  ;;  %v1144_v29 = vrot.slane %v1143_v18, 1  ;;  %v4489_v5 = vld [vmem:[#allocation26_spill] sm:$0xff] }
 0x299   : > { %v1554_v13 = vadd.f32 %v1553_v44, %v1552_v19  ;;  %v1342_v4 = vadd.f32 %v1340_v8, %v4485_v33  ;;  %v1561_v63 = vadd.f32 %v1560_v50, %v1559_v55  ;;  %v1349_v16 = vadd.f32 %v1341_v25, %v4486_v2  ;;  %v4490_v50 = vld [vmem:[#allocation27_spill] sm:$0xff] }
 0x29a   : > { %v1288_v12 = vrot.slane %v1285_v35, 7  ;;  %v1145_v58 = vadd.f32 %v1144_v29, %v1143_v18  ;;  %v1138_v32 = vadd.f32 %v1137_v31, %v1136_v26  ;;  %v1409_v37 = vmul.f32 %v3909_v9, %v4488_v56 }
 0x29b   : > { %v1616_v48 = vpop.permute.xlu2 %1615  ;;  %v1555_v0 = vrot.slane %v1554_v13, 2  ;;  %v1343_v38 = vrot.slane %v1342_v4, 4  ;;  %v1562_v53 = vrot.slane %v1561_v63, 2  ;;  %v1350_v51 = vrot.slane %v1349_v16, 4 }
 0x29c   : > { %v1620_v57 = vmul.f32 %v1616_v48, %v3857_v20  ;;  %v1289_v34 = vsel %vm865_vm2, %v1278_v49, %v1288_v12  ;;  %v1621_v43 = vmul.f32 %v1616_v48, %v3859_v54  ;;  %v1148_v3 = vrot.slane %v1145_v58, 7 }
 0x29d   : > { %v1556_v60 = vadd.f32 %v1555_v0, %v1554_v13  ;;  %v1344_v36 = vadd.f32 %v1343_v38, %v1342_v4  ;;  %1292 = vst.msk [vmem:[#allocation3 + $0x6] ss:$8 sm:$0x3] %vm3913_vm3, %v1289_v34  ;;  %v1563_v6 = vadd.f32 %v1562_v53, %v1561_v63  ;;  %v1351_v61 = vadd.f32 %v1350_v51, %v1349_v16 }
 0x29e   : > { %v1622_v30 = vadd.f32 %v1620_v57, %v1618_v41  ;;  %v1629_v17 = vadd.f32 %v1621_v43, %v1619_v10  ;;  %v1149_v8 = vsel %vm865_vm2, %v1138_v32, %v1148_v3  ;;  %v4060_v32 = vld [vmem:[%s2950_s15] sm:$0xff] }
 0x29f   : > { %v1557_v28 = vrot.slane %v1556_v60, 1  ;;  %v1345_v7 = vrot.slane %v1344_v36, 2  ;;  %v1406_v42 = vpop.permute.xlu1 %1405  ;;  %v1564_v20 = vrot.slane %v1563_v6, 1  ;;  %v1352_v52 = vrot.slane %v1351_v61, 2 }
 0x2a0   : > { %v1623_v19 = vrot.slane %v1622_v30, 4  ;;  %v1410_v44 = vmul.f32 %v1406_v42, %v4489_v5  ;;  %v1630_v62 = vrot.slane %v1629_v17, 4  ;;  %1152 = vst.msk [vmem:[#allocation3 + $0x4] ss:$8 sm:$0x3] %vm3913_vm3, %v1149_v8  ;;  %v1411_v35 = vmul.f32 %v1406_v42, %v4490_v50  ;;  %v2495_v5 = vld [vmem:[%s4265_s9 + $0x30] sm:$0xff] }
 0x2a1   : > { %v1346_v55 = vadd.f32 %v1345_v7, %v1344_v36  ;;  %v1565_v54 = vadd.f32 %v1564_v20, %v1563_v6  ;;  %v1558_v26 = vadd.f32 %v1557_v28, %v1556_v60  ;;  %v1353_v46 = vadd.f32 %v1352_v52, %v1351_v61  ;;  %v4063_v28 = vld [vmem:[%s2950_s15 + $0x8] sm:$0xff]  ;;  %v2504_v20 = vld [vmem:[%s4265_s9 + $0x78] sm:$0xff] }
 0x2a2   : > { %v1624_v41 = vadd.f32 %v1623_v19, %v1622_v30  ;;  %v1412_v13 = vadd.f32 %v1410_v44, %v3996_v1  ;;  %v1631_v33 = vadd.f32 %v1630_v62, %v1629_v17  ;;  %v1419_v31 = vadd.f32 %v1411_v35, %v1409_v37  ;;  %2174 = vmatpush.bf16.msrb.mxu1 %v2504_v20  ;;  %v2503_v44 = vld [vmem:[%s4265_s9 + $0x70] sm:$0xff] }
 0x2a3   : > { %v1568_v27 = vrot.slane %v1565_v54, 7  ;;  %v1347_v9 = vrot.slane %v1346_v55, 1  ;;  %v1354_v4 = vrot.slane %v1353_v46, 1 }
 0x2a4   : > { %v1625_v25 = vrot.slane %v1624_v41, 2  ;;  %v1413_v49 = vrot.slane %v1412_v13, 4  ;;  %v1632_v48 = vrot.slane %v1631_v33, 2  ;;  %v1420_v38 = vrot.slane %v1419_v31, 4 }
 0x2a5   : > { %v1569_v18 = vsel %vm865_vm2, %v1558_v26, %v1568_v27  ;;  %v1355_v12 = vadd.f32 %v1354_v4, %v1353_v46  ;;  %v1348_v2 = vadd.f32 %v1347_v9, %v1346_v55  ;;  %v2494_v4 = vld [vmem:[%s4265_s9 + $0x28] sm:$0xff] }
 0x2a6   : > { %v1626_v63 = vadd.f32 %v1625_v25, %v1624_v41  ;;  %1572 = vst.msk [vmem:[#allocation3 + $0x12] ss:$8 sm:$0x3] %vm3913_vm3, %v1569_v18  ;;  %v1414_v0 = vadd.f32 %v1413_v49, %v1412_v13  ;;  %v1633_v16 = vadd.f32 %v1632_v48, %v1631_v33  ;;  %v1421_v29 = vadd.f32 %v1420_v38, %v1419_v31 }
 0x2a7   : > { %v1358_v40 = vrot.slane %v1355_v12, 7  ;;  %2175 = vmatpush.bf16.msrb.mxu1 %v2503_v44  ;;  %v2499_v44 = vld [vmem:[%s4265_s9 + $0x50] sm:$0xff] }
 0x2a8   : > { %v1415_v10 = vrot.slane %v1414_v0, 2  ;;  %v1627_v57 = vrot.slane %v1626_v63, 1  ;;  %v1634_v34 = vrot.slane %v1633_v16, 1  ;;  %v1422_v58 = vrot.slane %v1421_v29, 2 }
 0x2a9   : > { %v1686_v1 = vpop.permute.xlu1 %1685  ;;  %v1359_v36 = vsel %vm865_vm2, %v1348_v2, %v1358_v40  ;;  %v2501_v40 = vld [vmem:[%s4265_s9 + $0x60] sm:$0xff] }
 0x2aa   : > { %v1690_v53 = vmul.f32 %v1686_v1, %v3883_v14  ;;  %v1691_v60 = vmul.f32 %v1686_v1, %v3885_v39  ;;  %v1416_v51 = vadd.f32 %v1415_v10, %v1414_v0  ;;  %1362 = vst.msk [vmem:[#allocation3 + $0x7] ss:$8 sm:$0x3] %vm3913_vm3, %v1359_v36  ;;  %v1635_v43 = vadd.f32 %v1634_v34, %v1633_v16  ;;  %v2493_v1 = vld [vmem:[%s4265_s9 + $0x20] sm:$0xff] }
 0x2ab   : > { %v1423_v14 = vadd.f32 %v1422_v58, %v1421_v29  ;;  %v1946_v39 = vsub.f32 0.0, %v4060_v32  ;;  %v1628_v61 = vadd.f32 %v1627_v57, %v1626_v63 }
 0x2ac   : > { %v1692_v6 = vadd.f32 %v1690_v53, %v3843_v15  ;;  %v1699_v30 = vadd.f32 %v1691_v60, %v3846_v47  ;;  %v1638_v42 = vrot.slane %v1635_v43, 7  ;;  %v2496_v15 = vld [vmem:[%s4265_s9 + $0x38] sm:$0xff]  ;;  %v1947_v47 = vsub.f32 0.0, %v4063_v28 }
 0x2ad   : > { %v1417_v19 = vrot.slane %v1416_v51, 1  ;;  %v1424_v17 = vrot.slane %v1423_v14, 1  ;;  %v1950_v37 = vmul.f32 1.442695, %v1946_v39  ;;  %2160 = vmatpush.bf16.msrb.mxu0 %v2496_v15 }
 0x2ae   : > { %v1693_v7 = vrot.slane %v1692_v6, 4  ;;  %v1700_v3 = vrot.slane %v1699_v30, 4  ;;  %v1639_v55 = vsel %vm865_vm2, %v1628_v61, %v1638_v42  ;;  %v1952_v8 = vmul.f32 1.442695, %v1947_v47  ;;  %v2492_v61 = vld [vmem:[%s4265_s9 + $0x18] sm:$0xff] }
 0x2af   : > { %1642 = vst.msk [vmem:[#allocation3 + $0x13] ss:$8 sm:$0x3] %vm3913_vm3, %v1639_v55  ;;  %v1425_v54 = vadd.f32 %v1424_v17, %v1423_v14  ;;  %2771 = vpow2.f32 %v1950_v37  ;;  %v1418_v35 = vadd.f32 %v1417_v19, %v1416_v51  ;;  %v2500_v42 = vld [vmem:[%s4265_s9 + $0x58] sm:$0xff] }
 0x2b0   : > { %v1694_v56 = vadd.f32 %v1693_v7, %v1692_v6  ;;  %v1701_v52 = vadd.f32 %v1700_v3, %v1699_v30  ;;  %2773 = vpow2.f32 %v1952_v8  ;;  %v4491_v6 = vld [vmem:[#allocation31_spill] sm:$0xff]  ;;  %v4492_v30 = vld [vmem:[#allocation30_spill] sm:$0xff] }
 0x2b1   : > { %v1428_v13 = vrot.slane %v1425_v54, 7  ;;  %2161 = vmatpush.bf16.msrb.mxu0 %v2495_v5  ;;  %v4122_v3 = vld [vmem:[%s2950_s15 + $0x18] sm:$0xff]  ;;  %v2491_v5 = vld [vmem:[%s4265_s9 + $0x10] sm:$0xff] }
 0x2b2   : > { %v1695_v41 = vrot.slane %v1694_v56, 2  ;;  %v1756_v62 = vpop.permute.xlu1 %1755  ;;  %v1702_v26 = vrot.slane %v1701_v52, 2  ;;  %v1949_v17 = vsub.f32 0.0, %v4122_v3 }
 0x2b3   : > { %v1760_v46 = vmul.f32 %v1756_v62, %v3907_v23  ;;  %v1761_v50 = vmul.f32 %v1756_v62, %v3905_v21  ;;  %v2502_v23 = vld [vmem:[%s4265_s9 + $0x68] sm:$0xff]  ;;  %v4093_v21 = vld [vmem:[%s2950_s15 + $0x10] sm:$0xff]  ;;  %v1429_v49 = vsel %vm865_vm2, %v1418_v35, %v1428_v13 }
 0x2b4   : > { %v1696_v27 = vadd.f32 %v1695_v41, %v1694_v56  ;;  %v1703_v9 = vadd.f32 %v1702_v26, %v1701_v52  ;;  %1432 = vst.msk [vmem:[#allocation3 + $0x10] ss:$8 sm:$0x3] %vm3913_vm3, %v1429_v49  ;;  %v1948_v12 = vsub.f32 0.0, %v4093_v21  ;;  %2176 = vmatpush.bf16.msrb.mxu1 %v2502_v23  ;;  %v1956_v8 = vmul.f32 1.442695, %v1949_v17 }
 0x2b5   : > { %v1762_v25 = vadd.f32 %v1760_v46, %v3947_v22  ;;  %v1769_v33 = vadd.f32 %v1761_v50, %v3950_v45  ;;  %v1896_v22 = vpop.permute.xlu2 %1895  ;;  %v2772_v48 = vpop.eup %2771  ;;  %2162 = vmatpush.bf16.msrb.mxu0 %v2494_v4  ;;  %v2498_v4 = vld [vmem:[%s4265_s9 + $0x48] sm:$0xff] }
 0x2b6   : > { %v1697_v31 = vrot.slane %v1696_v27, 1  ;;  %v1704_v45 = vrot.slane %v1703_v9, 1  ;;  %v2774_v0 = vpop.eup %2773  ;;  %v4105_v10 = vadd.f32 1.0, %v2772_v48  ;;  %v1900_v29 = vmul.f32 %v1896_v22, %v3938_v59  ;;  %v4162_v48 = vld [vmem:[%s4264_s8] sm:$0x3] }
 0x2b7   : > { %v1763_v18 = vrot.slane %v1762_v25, 4  ;;  %v1770_v63 = vrot.slane %v1769_v33, 4  ;;  %v1901_v53 = vmul.f32 %v1896_v22, %v3940_v24  ;;  %v1954_v34 = vmul.f32 1.442695, %v1948_v12 }
 0x2b8   : > { %v1705_v38 = vadd.f32 %v1704_v45, %v1703_v9  ;;  %v1698_v57 = vadd.f32 %v1697_v31, %v1696_v27  ;;  %2775 = vrcp.f32 %v4105_v10  ;;  %v4112_v7 = vadd.f32 1.0, %v2774_v0  ;;  %2177 = vmatpush.bf16.msrb.mxu1 %v2501_v40 }
 0x2b9   : > { %v1764_v2 = vadd.f32 %v1763_v18, %v1762_v25  ;;  %v1771_v16 = vadd.f32 %v1770_v63, %v1769_v33  ;;  %2777 = vpow2.f32 %v1954_v34  ;;  %2163 = vmatpush.bf16.msrb.mxu0 %v2493_v1  ;;  %v2490_v33 = vld [vmem:[%s4265_s9 + $0x8] sm:$0xff]  ;;  %vm1967_vm4 = vweird.f32 %v4105_v10 }
 0x2ba   : > { %v1708_v60 = vrot.slane %v1705_v38, 7  ;;  %2779 = vrcp.f32 %v4112_v7  ;;  %v1971_v45 = vand.u32 2147483647, %v4105_v10  ;;  %v1973_v18 = vand.u32 2147483648, %v4105_v10 }
 0x2bb   : > { %v1765_v36 = vrot.slane %v1764_v2, 2  ;;  %v1772_v51 = vrot.slane %v1771_v16, 2  ;;  %v1892_v58 = vpop.permute.xlu1 %1891  ;;  %2781 = vpow2.f32 %v1956_v8  ;;  %vm1982_vm10 = vweird.f32 %v4112_v7 }
 0x2bc   : > { %v1898_v43 = vmul.f32 %v1892_v58, %v4491_v6  ;;  %v1899_v14 = vmul.f32 %v1892_v58, %v4492_v30  ;;  %v1709_v59 = vsel %vm865_vm2, %v1698_v57, %v1708_v60  ;;  %2178 = vmatpush.bf16.msrb.mxu1 %v2500_v42  ;;  %v1934_v60 = vperm.slane %v4162_v48, 0 }
 0x2bd   : > { %v1766_v39 = vadd.f32 %v1765_v36, %v1764_v2  ;;  %v1773_v24 = vadd.f32 %v1772_v51, %v1771_v16  ;;  %1712 = vst.msk [vmem:[#allocation3 + $0x14] ss:$8 sm:$0x3] %vm3913_vm3, %v1709_v59  ;;  %2164 = vmatpush.bf16.msrb.mxu0 %v2492_v61  ;;  %v2489_v2 = vld [vmem:[%s4265_s9] sm:$0xff]  ;;  %vm4180_vm7 = vcmp.eq.f32.partialorder %v1971_v45, 8.507059e+37  ;;  %v1974_v51 = vor.u32 1.1754944e-38, %v1973_v18 }
 0x2be   : > { %v1902_v15 = vadd.f32 %v1900_v29, %v1898_v43  ;;  %v1909_v20 = vadd.f32 %v1901_v53, %v1899_v14  ;;  %v4128_v55 = vpop.eup %2775  ;;  %v2497_v16 = vld [vmem:[%s4265_s9 + $0x40] sm:$0xff]  ;;  %v1935_v8 = vperm.slane %v4162_v48, 1 }
 0x2bf   : > { %v1767_v47 = vrot.slane %v1766_v39, 1  ;;  %v1774_v19 = vrot.slane %v1773_v24, 1  ;;  %v2778_v54 = vpop.eup %2777  ;;  %v1963_v26 = vmul.f32 %v4128_v55, %v4105_v10  ;;  %vm1968_vm5 = vweird.f32 %v4128_v55  ;;  %v2788_v61 = vld [vmem:[%s2945_s19] sm:$0xff] }
 0x2c0   : > { %v1903_v56 = vrot.slane %v1902_v15, 4  ;;  %v1910_v37 = vrot.slane %v1909_v20, 4  ;;  %v4138_v35 = vadd.f32 1.0, %v2778_v54  ;;  %2179 = vmatpush.bf16.msrb.mxu1 %v2499_v44  ;;  %v4148_v23 = vpop.eup %2779  ;;  %vm4173_vm6 = vmor %vm1967_vm4, %vm1968_vm5  ;;  %v1938_v42 = vmul.f32 %v2788_v61, %v1934_v60 }
 0x2c1   : > { %v1775_v52 = vadd.f32 %v1774_v19, %v1773_v24  ;;  %v1768_v46 = vadd.f32 %v1767_v47, %v1766_v39  ;;  %v1964_v9 = vsub.f32 1.0, %v1963_v26  ;;  %2165 = vmatpush.bf16.msrb.mxu0 %v2491_v5  ;;  %v1978_v63 = vmul.f32 %v4148_v23, %v4112_v7  ;;  %v2782_v38 = vpop.eup %2781  ;;  %v2789_v5 = vld [vmem:[%s2945_s19 + $0x10] sm:$0xff] }
 0x2c2   : > { %v1904_v41 = vadd.f32 %v1903_v56, %v1902_v15  ;;  %v1911_v62 = vadd.f32 %v1910_v37, %v1909_v20  ;;  %2783 = vrcp.f32 %v4138_v35  ;;  %v4177_v53 = vadd.f32 1.0, %v2782_v38  ;;  %v1928_v20 = vld [vmem:[#allocation3] sm:$0xff] }
 0x2c3   : > { %v1778_v50 = vrot.slane %v1775_v52, 7  ;;  %v1965_v22 = vmul.f32 %v4128_v55, %v1964_v9  ;;  %v1979_v57 = vsub.f32 1.0, %v1978_v63  ;;  %vm1997_vm8 = vweird.f32 %v4138_v35 }
 0x2c4   : > { %v1905_v13 = vrot.slane %v1904_v41, 2  ;;  %v1912_v27 = vrot.slane %v1911_v62, 2  ;;  %2180 = vmatpush.bf16.msrb.mxu1 %v2498_v4  ;;  %v2001_v30 = vand.u32 2147483647, %v4138_v35  ;;  %v2003_v14 = vand.u32 2147483648, %v4138_v35 }
 0x2c5   : > { %v1779_v25 = vsel %vm865_vm2, %v1768_v46, %v1778_v50  ;;  %2166 = vmatpush.bf16.msrb.mxu0 %v2490_v33  ;;  %v1966_v1 = vadd.f32 %v4128_v55, %v1965_v22  ;;  %2785 = vrcp.f32 %v4177_v53  ;;  %v1980_v24 = vmul.f32 %v4148_v23, %v1979_v57  ;;  %v2791_v22 = vld [vmem:[%s2945_s19 + $0x18] sm:$0xff] }
 0x2c6   : > { %1782 = vst.msk [vmem:[#allocation3 + $0x15] ss:$8 sm:$0x3] %vm3913_vm3, %v1779_v25  ;;  %v1906_v49 = vadd.f32 %v1905_v13, %v1904_v41  ;;  %v1913_v31 = vadd.f32 %v1912_v27, %v1911_v62  ;;  %v1986_v15 = vand.u32 2147483647, %v4112_v7  ;;  %vm1983_vm11 = vweird.f32 %v4148_v23 }
 0x2c7   : > { %v1970_v43 = vsel %vm4173_vm6, %v4128_v55, %v1966_v1  ;;  %v1988_v19 = vand.u32 2147483648, %v4112_v7  ;;  %v2004_v11 = vor.u32 1.1754944e-38, %v2003_v14  ;;  %vm2002_vm13 = vcmp.eq.f32.partialorder %v2001_v30, 8.507059e+37  ;;  %vm4212_vm14 = vmor %vm1982_vm10, %vm1983_vm11 }
 0x2c8   : > { %v1907_v12 = vrot.slane %v1906_v49, 1  ;;  %v1914_v0 = vrot.slane %v1913_v31, 1  ;;  %v2784_v34 = vpop.eup %2783  ;;  %2181 = vmatpush.bf16.msrb.mxu1 %v2497_v16  ;;  %v1975_v17 = vsel %vm4180_vm7, %v1974_v51, %v1970_v43  ;;  %v1981_v55 = vadd.f32 %v4148_v23, %v1980_v24 }
 0x2c9   : > { %v1993_v10 = vmul.f32 %v2784_v34, %v4138_v35  ;;  %2167 = vmatpush.bf16.msrb.mxu0 %v2489_v2  ;;  %vm1998_vm9 = vweird.f32 %v2784_v34  ;;  %v1940_v44 = vmul.f32 %v2789_v5, %v1934_v60  ;;  %v1942_v7 = vadd.f32 %v1938_v42, %v1928_v20 }
 0x2ca   : > { %v1915_v40 = vadd.f32 %v1914_v0, %v1913_v31  ;;  %v1908_v58 = vadd.f32 %v1907_v12, %v1906_v49  ;;  %vm4205_vm12 = vmor %vm1997_vm8, %vm1998_vm9  ;;  %vm4216_vm15 = vcmp.eq.f32.partialorder %v1986_v15, 8.507059e+37  ;;  %v2022_v26 = vmul.f32 %v1975_v17, %v4060_v32  ;;  %v2790_v49 = vld [vmem:[%s2945_s19 + $0x8] sm:$0xff] }
 0x2cb   : > { %v1994_v39 = vsub.f32 1.0, %v1993_v10  ;;  %v2786_v52 = vpop.eup %2785  ;;  %v1989_v46 = vor.u32 1.1754944e-38, %v1988_v19  ;;  %vm2012_vm0 = vweird.f32 %v4177_v53  ;;  %v2016_v13 = vand.u32 2147483647, %v4177_v53  ;;  %v1929_v12 = vld [vmem:[#allocation3 + $0x8] sm:$0xff] }
 0x2cc   : > { %v1918_v6 = vrot.slane %v1915_v40, 7  ;;  %v2008_v50 = vmul.f32 %v2786_v52, %v4177_v53  ;;  %v2018_v27 = vand.u32 2147483648, %v4177_v53  ;;  %v1985_v33 = vsel %vm4212_vm14, %v4148_v23, %v1981_v55 }
 0x2cd   : > { %v1995_v47 = vmul.f32 %v2784_v34, %v1994_v39  ;;  %vm2013_vm1 = vweird.f32 %v2786_v52  ;;  %v1939_v31 = vmul.f32 %v2790_v49, %v1935_v8  ;;  %v1941_v45 = vmul.f32 %v2791_v22, %v1935_v8 }
 0x2ce   : > { %v1919_v59 = vsel %vm865_vm2, %v1908_v58, %v1918_v6  ;;  %v2009_v4 = vsub.f32 1.0, %v2008_v50  ;;  %v2026_v63 = vmul.f32 %v2022_v26, %v1942_v7  ;;  %v1990_v38 = vsel %vm4216_vm15, %v1989_v46, %v1985_v33  ;;  %vm2014_vm2 = vmor %vm2012_vm0, %vm2013_vm1 }
 0x2cf   : > { %1922 = vst.msk [vmem:[#allocation3 + $0x17] ss:$8 sm:$0x3] %vm3913_vm3, %v1919_v59  ;;  %v1996_v37 = vadd.f32 %v2784_v34, %v1995_v47  ;;  %vm2017_vm3 = vcmp.eq.f32.partialorder %v2016_v13, 8.507059e+37  ;;  %v1943_v16 = vadd.f32 %v1939_v31, %v1929_v12  ;;  %v2023_v29 = vmul.f32 %v1990_v38, %v4063_v28 }
 0x2d0   : > { %v2010_v18 = vmul.f32 %v2786_v52, %v2009_v4 }
 0x2d1   : > { %v2000_v62 = vsel %vm4205_vm12, %v2784_v34, %v1996_v37  ;;  %v2027_v60 = vmul.f32 %v2023_v29, %v1943_v16 }
 0x2d2   : > { %v2005_v35 = vsel %vm2002_vm13, %v2004_v11, %v2000_v62  ;;  %v2011_v23 = vadd.f32 %v2786_v52, %v2010_v18 }
 0x2d3   : > { %v2024_v25 = vmul.f32 %v2005_v35, %v4093_v21  ;;  %v2019_v21 = vor.u32 1.1754944e-38, %v2018_v27 }
 0x2d4   : > { %v2015_v40 = vsel %vm2014_vm2, %v2786_v52, %v2011_v23 }
 0x2d5   : > { %v2020_v57 = vsel %vm2017_vm3, %v2019_v21, %v2015_v40 }
 0x2d6   : > { %v1930_v9 = vld [vmem:[#allocation3 + $0x10] sm:$0xff]  ;;  %v1931_v0 = vld [vmem:[#allocation3 + $0x18] sm:$0xff]  ;;  %v2025_v34 = vmul.f32 %v2020_v57, %v4122_v3 }
 0x2d7   : > { %v1944_v32 = vadd.f32 %v1940_v44, %v1930_v9  ;;  %v1945_v1 = vadd.f32 %v1941_v45, %v1931_v0 }
 0x2d9   : > { %v2028_v48 = vmul.f32 %v2024_v25, %v1944_v32  ;;  %v2029_v36 = vmul.f32 %v2025_v34, %v1945_v1 }
 0x2db   : > { %v2030_v2 = vpack.c.bf16 %v2028_v48, %v2026_v63  ;;  %v2031_v51 = vpack.c.bf16 %v2029_v36, %v2027_v60 }
 0x2dd   : > { %2168 = vmatmul.bf16.vlgmr.msrb.gmra.mxu0 %v2030_v2  ;;  %2182 = vmatmul.bf16.vlgmr.msrb.gmra.mxu1 %v2031_v51 }
 0x35a   : > { %v2169_v53 = vpop.f32.mrf.mxu0  ;;  %v2183_v58 = vpop.f32.mrf.mxu1 }
 0x35b   : > { %v2184_v6 = vadd.f32 %v2183_v58, %v2169_v53 }
 0x35d   : > { %2188 = vst [vmem:[%s2940_s30] sm:$0xff] %v2184_v6 }
 0x362   : > { %v2171_v10 = vpop.f32.mrf.mxu0  ;;  %v2185_v43 = vpop.f32.mrf.mxu1 }
 0x363   : > { %v2186_v30 = vadd.f32 %v2185_v43, %v2171_v10 }
 0x365   : > { %2189 = vst [vmem:[%s2940_s30 + $0x8] sm:$0xff] %v2186_v30 }
 0x366 PF: > { %s20_s17 = sadd.s32 1, %s2830_s17   ;;  %s4503_s13 = sld [smem:[#allocation4_spill]] }
 0x367   : > { %p17_p8 = scmp.ge.s32.totalorder %s20_s17, 34   ;;  %s4504_s14 = sld [smem:[#allocation5_spill]] }
 0x368   : > { %s4505_s15 = sld [smem:[#allocation6_spill]] }
 0x369   : > { %s4506_s16 = sld [smem:[#allocation7_spill]]  ;;  %19 = sbr.rel (!%p17_p8) target bundleno = 3 (0x3), region = 112 }

</bundles_post_ra>
